<compile_context>
chip_gen: v6e
topology: v6e:2x2x1
jax: 0.10.0
libtpu: 0.0.40
codegen_flags: <defaults>
</compile_context>

<pallas_src>
import numpy as np
import jax
import jax.numpy as jnp
from jax.experimental import pallas as pl
from jax.experimental.pallas import tpu as pltpu

# ----------------------------- static geometry ------------------------------
_H0 = 28              # input spatial (MNIST-like, implied by the module)
_K = 5                # conv kernel size
_C1, _C2 = 10, 20     # conv output channels
_H1 = _H0 - _K + 1    # 24 : conv1 output spatial
_P1 = _H1 // 2        # 12 : pool1 output spatial
_H2 = _P1 - _K + 1    # 8  : conv2 output spatial
_P2 = _H2 // 2        # 4  : pool2 output spatial
_LANES = 128          # channel padding for lane-dense MXU / stores
_N1 = _P1 * _P1       # 144 rows per pool-slab after stage 1
_N2 = _P2 * _P2       # 16  rows per pool-slab after stage 2
_M2 = 4 * _N2         # 64  conv2 output rows (4 pool slabs x 16 positions)
_T = _K * _K          # 25 taps


def _build_s2():
    """Constant 0/1 gather matrix for the in-kernel conv2 patch gather.

    Row order: (tap=(kh,kw), pool-slab=(dh,dw), pos=(i,j)); each row selects
    pooled1 row (2i+dh+kh)*12 + (2j+dw+kw)."""
    s2 = np.zeros((_T * _M2, _N1), np.float32)
    r = 0
    for kh in range(_K):
        for kw in range(_K):
            for dh in (0, 1):
                for dw in (0, 1):
                    for i in range(_P2):
                        for j in range(_P2):
                            src = (2 * i + dh + kh) * _P1 + (2 * j + dw + kw)
                            s2[r, src] = 1.0
                            r += 1
    return s2


_S2_NP = _build_s2()   # [1600, 144]


# ------------------------------- Pallas kernel -------------------------------

def _celu(x):
    # CELU(alpha=1) as a single select; exp goes to the EUP (free slot).
    return jnp.where(x > 0, x, jnp.exp(x) - 1.0)


def _fused_lenet_kernel(a1_ref, s2_ref, w1_ref, b1_ref, w2_ref, b2_ref, o_ref):
    # ---- stage 1: conv1 (im2col rows @ weights) + bias + CELU --------------
    # a1 rows ordered (pool-slab, out_h, out_w); cols = 25 taps.
    y1 = jnp.dot(a1_ref[0], w1_ref[...], preferred_element_type=jnp.float32)
    y1 = _celu(y1 + b1_ref[...])                                  # [576, 128]

    # ---- pool1: max over the 4 pool-window slabs (aligned row slices) ------
    p1 = jnp.maximum(jnp.maximum(y1[0:_N1], y1[_N1:2 * _N1]),
                     jnp.maximum(y1[2 * _N1:3 * _N1], y1[3 * _N1:4 * _N1]))  # [144, 128]

    # ---- stage 2: gather conv2 patch rows with a 0/1 selection matmul ------
    g = jnp.dot(s2_ref[...], p1, preferred_element_type=jnp.float32)         # [1600, 128]

    # ---- conv2: accumulate the 25 taps on the MXU --------------------------
    acc = jnp.zeros((_M2, _LANES), jnp.float32)
    for t in range(_T):
        acc = acc + jnp.dot(g[t * _M2:(t + 1) * _M2], w2_ref[t],
                            preferred_element_type=jnp.float32)
    y2 = _celu(acc + b2_ref[...])                                 # [64, 128]

    # ---- pool2 --------------------------------------------------------------
    p2 = jnp.maximum(jnp.maximum(y2[0:_N2], y2[_N2:2 * _N2]),
                     jnp.maximum(y2[2 * _N2:3 * _N2], y2[3 * _N2:4 * _N2]))  # [16, 128]

    o_ref[0] = p2


# ------------------------------ JAX wrapper ----------------------------------

def _im2col_pool_slabs(x):
    """x: [B, 28, 28] -> A1: [B, 576, 25].

    Rows ordered (pool-slab (dh,dw), i, j) so the 2x2/stride-2 max-pool becomes a max over
    4 contiguous 144-row slabs inside the kernel; columns ordered (kh, kw)."""
    B = x.shape[0]
    span = 2 * _P1 - 1          # 23
    slabs = []
    for dh in (0, 1):
        for dw in (0, 1):
            cols = []
            for kh in range(_K):
                for kw in range(_K):
                    h0, w0 = dh + kh, dw + kw
                    patch = x[:, h0:h0 + span:2, w0:w0 + span:2]      # [B, 12, 12]
                    cols.append(patch.reshape(B, _N1))
            slabs.append(jnp.stack(cols, axis=-1))                    # [B, 144, 25]
    return jnp.concatenate(slabs, axis=1)                             # [B, 576, 25]


def _pack_params(params):
    """Zero-pad channel dims to 128 lanes; reorder conv weights to matmul layout."""
    w1, b1, w2, b2 = params["w1"], params["b1"], params["w2"], params["b2"]
    w1m = jnp.transpose(w1[:, 0], (1, 2, 0)).reshape(_T, _C1)            # [(kh,kw), co]
    w1p = jnp.zeros((_T, _LANES), jnp.float32).at[:, :_C1].set(w1m)
    b1p = jnp.zeros((1, _LANES), jnp.float32).at[0, :_C1].set(b1)
    w2m = jnp.transpose(w2, (2, 3, 1, 0)).reshape(_T, _C1, _C2)          # [tap, ci, co]
    w2p = jnp.zeros((_T, _LANES, _LANES), jnp.float32).at[:, :_C1, :_C2].set(w2m)
    b2p = jnp.zeros((1, _LANES), jnp.float32).at[0, :_C2].set(b2)
    return w1p, b1p, w2p, b2p


def encoder_lenet_forward(x_nchw, params):
    B = x_nchw.shape[0]
    a1 = _im2col_pool_slabs(x_nchw[:, 0])            # [B, 576, 25]  (tiny XLA prologue)
    s2 = jnp.asarray(_S2_NP)                         # [1600, 144]   constant gather matrix
    w1p, b1p, w2p, b2p = _pack_params(params)

    out = pl.pallas_call(
        _fused_lenet_kernel,
        out_shape=jax.ShapeDtypeStruct((B, _N2, _LANES), jnp.float32),
        grid=(B,),
        in_specs=[
            pl.BlockSpec((1, 4 * _N1, _T), lambda b: (b, 0, 0)),        # A1 per image
            pl.BlockSpec((_T * _M2, _N1), lambda b: (0, 0)),            # S2 (constant)
            pl.BlockSpec((_T, _LANES), lambda b: (0, 0)),               # W1 padded
            pl.BlockSpec((1, _LANES), lambda b: (0, 0)),                # b1 padded
            pl.BlockSpec((_T, _LANES, _LANES), lambda b: (0, 0, 0)),    # W2 padded
            pl.BlockSpec((1, _LANES), lambda b: (0, 0)),                # b2 padded
        ],
        out_specs=pl.BlockSpec((1, _N2, _LANES), lambda b: (b, 0, 0)),  # lane-dense output
        compiler_params=pltpu.CompilerParams(
            dimension_semantics=("parallel",),       # 2 TCs on v7x
            vmem_limit_bytes=32 * 1024 * 1024,       # sized for v7x's 64 MiB VMEM
        ),
    )(a1, s2, w1p, b1p, w2p, b2p)

    # PyTorch flattens the NCHW tensor: x2.view(B, -1) -> (c, h, w) order.
    feat = out[:, :, :_C2]                                      # [B, 16, 20]
    return jnp.transpose(feat, (0, 2, 1)).reshape(B, _C2 * _N2)  # [B, 320]


# --------------------------- params & reference -------------------------------

def init_params(key):
    """Deterministic params matching nn.Conv2d shapes (PyTorch-style uniform init)."""
    k1, k2, k3, k4 = jax.random.split(key, 4)

    def conv_init(kw_key, kb_key, c_out, c_in, k):
        fan_in = c_in * k * k
        bound = 1.0 / (fan_in ** 0.5)
        w = jax.random.uniform(kw_key, (c_out, c_in, k, k), jnp.float32, -bound, bound)
        b = jax.random.uniform(kb_key, (c_out,), jnp.float32, -bound, bound)
        return w, b

    w1, b1 = conv_init(k1, k2, _C1, 1, _K)
    w2, b2 = conv_init(k3, k4, _C2, _C1, _K)
    return {"w1": w1, "b1": b1, "w2": w2, "b2": b2}


def _reference_forward(x_nchw, params):
    """Pure-XLA reference of the same forward (for a sanity check)."""
    def celu(v):
        return jnp.where(v > 0, v, jnp.exp(v) - 1.0)

    def conv(v, w, b):
        y = jax.lax.conv_general_dilated(
            v, w, window_strides=(1, 1), padding="VALID",
            dimension_numbers=("NCHW", "OIHW", "NCHW"))
        return y + b[None, :, None, None]

    def pool(v):
        return jax.lax.reduce_window(v, -jnp.inf, jax.lax.max,
                                     (1, 1, 2, 2), (1, 1, 2, 2), "VALID")

    h = pool(celu(conv(x_nchw, params["w1"], params["b1"])))
    h = pool(celu(conv(h, params["w2"], params["b2"])))
    return h.reshape(h.shape[0], -1)


if __name__ == "__main__":
    key = jax.random.PRNGKey(0)
    pkey, xkey = jax.random.split(key)
    params = init_params(pkey)
    # MNIST-like input implied by the module: 1 channel, 28x28 spatial, batch 2.
    x = jax.random.normal(xkey, (2, 1, 28, 28), dtype=jnp.float32)

    fwd = jax.jit(encoder_lenet_forward)
    y = jax.block_until_ready(fwd(x, params))
    assert y.shape == (2, 320), y.shape

    # Sanity check vs. a pure-XLA reference (loose tol to cover matmul-precision paths).
    y_ref = jax.block_until_ready(jax.jit(_reference_forward)(x, params))
    assert float(jnp.max(jnp.abs(y - y_ref))) < 5e-2

    print("KERNEL_OK")
</pallas_src>

<mosaic_0001>
module attributes {stable_mosaic.version = 11 : i64} {
  func.func @_fused_lenet_kernel(%arg0: i32, %arg1: memref<1x576x25xf32, #tpu.memory_space<vmem>>, %arg2: memref<1600x144xf32, #tpu.memory_space<vmem>>, %arg3: memref<25x128xf32, #tpu.memory_space<vmem>>, %arg4: memref<1x128xf32, #tpu.memory_space<vmem>>, %arg5: memref<25x128x128xf32, #tpu.memory_space<vmem>>, %arg6: memref<1x128xf32, #tpu.memory_space<vmem>>, %arg7: memref<1x16x128xf32, #tpu.memory_space<vmem>>) attributes {dimension_semantics = [#tpu.dimension_semantics<parallel>], iteration_bounds = array<i64: 2>, scalar_prefetch = 0 : i64, scratch_operands = 0 : i64, tpu.core_type = #tpu.core_type<tc>, window_params = [{transform_indices = @transform_0, window_bounds = array<i64: 1, 576, 25>}, {pipeline_mode = #tpu.pipeline_mode<synchronous>, transform_indices = @transform_1, window_bounds = array<i64: 1600, 144>}, {pipeline_mode = #tpu.pipeline_mode<synchronous>, transform_indices = @transform_2, window_bounds = array<i64: 25, 128>}, {pipeline_mode = #tpu.pipeline_mode<synchronous>, transform_indices = @transform_3, window_bounds = array<i64: 1, 128>}, {pipeline_mode = #tpu.pipeline_mode<synchronous>, transform_indices = @transform_4, window_bounds = array<i64: 25, 128, 128>}, {pipeline_mode = #tpu.pipeline_mode<synchronous>, transform_indices = @transform_5, window_bounds = array<i64: 1, 128>}, {transform_indices = @transform_6, window_bounds = array<i64: 1, 16, 128>}]} {
    %c0 = arith.constant 0 : index
    %c0_0 = arith.constant 0 : index
    %c0_1 = arith.constant 0 : index
    %0 = vector.load %arg1[%c0, %c0_0, %c0_1] : memref<1x576x25xf32, #tpu.memory_space<vmem>>, vector<1x576x25xf32>
    %1 = vector.shape_cast %0 : vector<1x576x25xf32> to vector<576x25xf32>
    %c0_2 = arith.constant 0 : index
    %c0_3 = arith.constant 0 : index
    %2 = vector.load %arg3[%c0_2, %c0_3] : memref<25x128xf32, #tpu.memory_space<vmem>>, vector<25x128xf32>
    %cst = arith.constant dense<0.000000e+00> : vector<576x128xf32>
    %3 = tpu.matmul %1, %2, %cst {dimension_numbers = #tpu.dot_dimension_numbers<[1], [0], [0], [1], [0, 0, 1, 1], [], []>} : vector<576x25xf32>, vector<25x128xf32>, vector<576x128xf32> -> vector<576x128xf32>
    %c0_4 = arith.constant 0 : index
    %c0_5 = arith.constant 0 : index
    %4 = vector.load %arg4[%c0_4, %c0_5] : memref<1x128xf32, #tpu.memory_space<vmem>>, vector<1x128xf32>
    %5 = vector.broadcast %4 : vector<1x128xf32> to vector<576x128xf32>
    %6 = arith.addf %3, %5 : vector<576x128xf32>
    %cst_6 = arith.constant 0.000000e+00 : f32
    %7 = vector.broadcast %cst_6 : f32 to vector<576x128xf32>
    %8 = arith.cmpf ogt, %6, %7 : vector<576x128xf32>
    %9 = math.exp %6 : vector<576x128xf32>
    %cst_7 = arith.constant 1.000000e+00 : f32
    %10 = vector.broadcast %cst_7 : f32 to vector<576x128xf32>
    %11 = arith.subf %9, %10 : vector<576x128xf32>
    %12 = arith.select %8, %6, %11 : vector<576x128xi1>, vector<576x128xf32>
    %13 = vector.extract_strided_slice %12 {offsets = [0, 0], sizes = [144, 128], strides = [1, 1]} : vector<576x128xf32> to vector<144x128xf32>
    %14 = vector.extract_strided_slice %12 {offsets = [144, 0], sizes = [144, 128], strides = [1, 1]} : vector<576x128xf32> to vector<144x128xf32>
    %15 = arith.maximumf %13, %14 : vector<144x128xf32>
    %16 = vector.extract_strided_slice %12 {offsets = [288, 0], sizes = [144, 128], strides = [1, 1]} : vector<576x128xf32> to vector<144x128xf32>
    %17 = vector.extract_strided_slice %12 {offsets = [432, 0], sizes = [144, 128], strides = [1, 1]} : vector<576x128xf32> to vector<144x128xf32>
    %18 = arith.maximumf %16, %17 : vector<144x128xf32>
    %19 = arith.maximumf %15, %18 : vector<144x128xf32>
    %c0_8 = arith.constant 0 : index
    %c0_9 = arith.constant 0 : index
    %20 = vector.load %arg2[%c0_8, %c0_9] : memref<1600x144xf32, #tpu.memory_space<vmem>>, vector<1600x144xf32>
    %cst_10 = arith.constant dense<0.000000e+00> : vector<1600x128xf32>
    %21 = tpu.matmul %20, %19, %cst_10 {dimension_numbers = #tpu.dot_dimension_numbers<[1], [0], [0], [1], [0, 0, 1, 1], [], []>} : vector<1600x144xf32>, vector<144x128xf32>, vector<1600x128xf32> -> vector<1600x128xf32>
    %cst_11 = arith.constant 0.000000e+00 : f32
    %22 = vector.broadcast %cst_11 : f32 to vector<64x128xf32>
    %23 = vector.extract_strided_slice %21 {offsets = [0, 0], sizes = [64, 128], strides = [1, 1]} : vector<1600x128xf32> to vector<64x128xf32>
    %c0_12 = arith.constant 0 : index
    %c0_13 = arith.constant 0 : index
    %c0_14 = arith.constant 0 : index
    %24 = vector.load %arg5[%c0_12, %c0_13, %c0_14] : memref<25x128x128xf32, #tpu.memory_space<vmem>>, vector<1x128x128xf32>
    %25 = vector.shape_cast %24 : vector<1x128x128xf32> to vector<128x128xf32>
    %cst_15 = arith.constant dense<0.000000e+00> : vector<64x128xf32>
    %26 = tpu.matmul %23, %25, %cst_15 {dimension_numbers = #tpu.dot_dimension_numbers<[1], [0], [0], [1], [0, 0, 1, 1], [], []>} : vector<64x128xf32>, vector<128x128xf32>, vector<64x128xf32> -> vector<64x128xf32>
    %27 = arith.addf %22, %26 : vector<64x128xf32>
    %28 = vector.extract_strided_slice %21 {offsets = [64, 0], sizes = [64, 128], strides = [1, 1]} : vector<1600x128xf32> to vector<64x128xf32>
    %c1 = arith.constant 1 : index
    %c0_16 = arith.constant 0 : index
    %c0_17 = arith.constant 0 : index
    %29 = vector.load %arg5[%c1, %c0_16, %c0_17] : memref<25x128x128xf32, #tpu.memory_space<vmem>>, vector<1x128x128xf32>
    %30 = vector.shape_cast %29 : vector<1x128x128xf32> to vector<128x128xf32>
    %cst_18 = arith.constant dense<0.000000e+00> : vector<64x128xf32>
    %31 = tpu.matmul %28, %30, %cst_18 {dimension_numbers = #tpu.dot_dimension_numbers<[1], [0], [0], [1], [0, 0, 1, 1], [], []>} : vector<64x128xf32>, vector<128x128xf32>, vector<64x128xf32> -> vector<64x128xf32>
    %32 = arith.addf %27, %31 : vector<64x128xf32>
    %33 = vector.extract_strided_slice %21 {offsets = [128, 0], sizes = [64, 128], strides = [1, 1]} : vector<1600x128xf32> to vector<64x128xf32>
    %c2 = arith.constant 2 : index
    %c0_19 = arith.constant 0 : index
    %c0_20 = arith.constant 0 : index
    %34 = vector.load %arg5[%c2, %c0_19, %c0_20] : memref<25x128x128xf32, #tpu.memory_space<vmem>>, vector<1x128x128xf32>
    %35 = vector.shape_cast %34 : vector<1x128x128xf32> to vector<128x128xf32>
    %cst_21 = arith.constant dense<0.000000e+00> : vector<64x128xf32>
    %36 = tpu.matmul %33, %35, %cst_21 {dimension_numbers = #tpu.dot_dimension_numbers<[1], [0], [0], [1], [0, 0, 1, 1], [], []>} : vector<64x128xf32>, vector<128x128xf32>, vector<64x128xf32> -> vector<64x128xf32>
    %37 = arith.addf %32, %36 : vector<64x128xf32>
    %38 = vector.extract_strided_slice %21 {offsets = [192, 0], sizes = [64, 128], strides = [1, 1]} : vector<1600x128xf32> to vector<64x128xf32>
    %c3 = arith.constant 3 : index
    %c0_22 = arith.constant 0 : index
    %c0_23 = arith.constant 0 : index
    %39 = vector.load %arg5[%c3, %c0_22, %c0_23] : memref<25x128x128xf32, #tpu.memory_space<vmem>>, vector<1x128x128xf32>
    %40 = vector.shape_cast %39 : vector<1x128x128xf32> to vector<128x128xf32>
    %cst_24 = arith.constant dense<0.000000e+00> : vector<64x128xf32>
    %41 = tpu.matmul %38, %40, %cst_24 {dimension_numbers = #tpu.dot_dimension_numbers<[1], [0], [0], [1], [0, 0, 1, 1], [], []>} : vector<64x128xf32>, vector<128x128xf32>, vector<64x128xf32> -> vector<64x128xf32>
    %42 = arith.addf %37, %41 : vector<64x128xf32>
    %43 = vector.extract_strided_slice %21 {offsets = [256, 0], sizes = [64, 128], strides = [1, 1]} : vector<1600x128xf32> to vector<64x128xf32>
    %c4 = arith.constant 4 : index
    %c0_25 = arith.constant 0 : index
    %c0_26 = arith.constant 0 : index
    %44 = vector.load %arg5[%c4, %c0_25, %c0_26] : memref<25x128x128xf32, #tpu.memory_space<vmem>>, vector<1x128x128xf32>
    %45 = vector.shape_cast %44 : vector<1x128x128xf32> to vector<128x128xf32>
    %cst_27 = arith.constant dense<0.000000e+00> : vector<64x128xf32>
    %46 = tpu.matmul %43, %45, %cst_27 {dimension_numbers = #tpu.dot_dimension_numbers<[1], [0], [0], [1], [0, 0, 1, 1], [], []>} : vector<64x128xf32>, vector<128x128xf32>, vector<64x128xf32> -> vector<64x128xf32>
    %47 = arith.addf %42, %46 : vector<64x128xf32>
    %48 = vector.extract_strided_slice %21 {offsets = [320, 0], sizes = [64, 128], strides = [1, 1]} : vector<1600x128xf32> to vector<64x128xf32>
    %c5 = arith.constant 5 : index
    %c0_28 = arith.constant 0 : index
    %c0_29 = arith.constant 0 : index
    %49 = vector.load %arg5[%c5, %c0_28, %c0_29] : memref<25x128x128xf32, #tpu.memory_space<vmem>>, vector<1x128x128xf32>
    %50 = vector.shape_cast %49 : vector<1x128x128xf32> to vector<128x128xf32>
    %cst_30 = arith.constant dense<0.000000e+00> : vector<64x128xf32>
    %51 = tpu.matmul %48, %50, %cst_30 {dimension_numbers = #tpu.dot_dimension_numbers<[1], [0], [0], [1], [0, 0, 1, 1], [], []>} : vector<64x128xf32>, vector<128x128xf32>, vector<64x128xf32> -> vector<64x128xf32>
    %52 = arith.addf %47, %51 : vector<64x128xf32>
    %53 = vector.extract_strided_slice %21 {offsets = [384, 0], sizes = [64, 128], strides = [1, 1]} : vector<1600x128xf32> to vector<64x128xf32>
    %c6 = arith.constant 6 : index
    %c0_31 = arith.constant 0 : index
    %c0_32 = arith.constant 0 : index
    %54 = vector.load %arg5[%c6, %c0_31, %c0_32] : memref<25x128x128xf32, #tpu.memory_space<vmem>>, vector<1x128x128xf32>
    %55 = vector.shape_cast %54 : vector<1x128x128xf32> to vector<128x128xf32>
    %cst_33 = arith.constant dense<0.000000e+00> : vector<64x128xf32>
    %56 = tpu.matmul %53, %55, %cst_33 {dimension_numbers = #tpu.dot_dimension_numbers<[1], [0], [0], [1], [0, 0, 1, 1], [], []>} : vector<64x128xf32>, vector<128x128xf32>, vector<64x128xf32> -> vector<64x128xf32>
    %57 = arith.addf %52, %56 : vector<64x128xf32>
    %58 = vector.extract_strided_slice %21 {offsets = [448, 0], sizes = [64, 128], strides = [1, 1]} : vector<1600x128xf32> to vector<64x128xf32>
    %c7 = arith.constant 7 : index
    %c0_34 = arith.constant 0 : index
    %c0_35 = arith.constant 0 : index
    %59 = vector.load %arg5[%c7, %c0_34, %c0_35] : memref<25x128x128xf32, #tpu.memory_space<vmem>>, vector<1x128x128xf32>
    %60 = vector.shape_cast %59 : vector<1x128x128xf32> to vector<128x128xf32>
    %cst_36 = arith.constant dense<0.000000e+00> : vector<64x128xf32>
    %61 = tpu.matmul %58, %60, %cst_36 {dimension_numbers = #tpu.dot_dimension_numbers<[1], [0], [0], [1], [0, 0, 1, 1], [], []>} : vector<64x128xf32>, vector<128x128xf32>, vector<64x128xf32> -> vector<64x128xf32>
    %62 = arith.addf %57, %61 : vector<64x128xf32>
    %63 = vector.extract_strided_slice %21 {offsets = [512, 0], sizes = [64, 128], strides = [1, 1]} : vector<1600x128xf32> to vector<64x128xf32>
    %c8 = arith.constant 8 : index
    %c0_37 = arith.constant 0 : index
    %c0_38 = arith.constant 0 : index
    %64 = vector.load %arg5[%c8, %c0_37, %c0_38] : memref<25x128x128xf32, #tpu.memory_space<vmem>>, vector<1x128x128xf32>
    %65 = vector.shape_cast %64 : vector<1x128x128xf32> to vector<128x128xf32>
    %cst_39 = arith.constant dense<0.000000e+00> : vector<64x128xf32>
    %66 = tpu.matmul %63, %65, %cst_39 {dimension_numbers = #tpu.dot_dimension_numbers<[1], [0], [0], [1], [0, 0, 1, 1], [], []>} : vector<64x128xf32>, vector<128x128xf32>, vector<64x128xf32> -> vector<64x128xf32>
    %67 = arith.addf %62, %66 : vector<64x128xf32>
    %68 = vector.extract_strided_slice %21 {offsets = [576, 0], sizes = [64, 128], strides = [1, 1]} : vector<1600x128xf32> to vector<64x128xf32>
    %c9 = arith.constant 9 : index
    %c0_40 = arith.constant 0 : index
    %c0_41 = arith.constant 0 : index
    %69 = vector.load %arg5[%c9, %c0_40, %c0_41] : memref<25x128x128xf32, #tpu.memory_space<vmem>>, vector<1x128x128xf32>
    %70 = vector.shape_cast %69 : vector<1x128x128xf32> to vector<128x128xf32>
    %cst_42 = arith.constant dense<0.000000e+00> : vector<64x128xf32>
    %71 = tpu.matmul %68, %70, %cst_42 {dimension_numbers = #tpu.dot_dimension_numbers<[1], [0], [0], [1], [0, 0, 1, 1], [], []>} : vector<64x128xf32>, vector<128x128xf32>, vector<64x128xf32> -> vector<64x128xf32>
    %72 = arith.addf %67, %71 : vector<64x128xf32>
    %73 = vector.extract_strided_slice %21 {offsets = [640, 0], sizes = [64, 128], strides = [1, 1]} : vector<1600x128xf32> to vector<64x128xf32>
    %c10 = arith.constant 10 : index
    %c0_43 = arith.constant 0 : index
    %c0_44 = arith.constant 0 : index
    %74 = vector.load %arg5[%c10, %c0_43, %c0_44] : memref<25x128x128xf32, #tpu.memory_space<vmem>>, vector<1x128x128xf32>
    %75 = vector.shape_cast %74 : vector<1x128x128xf32> to vector<128x128xf32>
    %cst_45 = arith.constant dense<0.000000e+00> : vector<64x128xf32>
    %76 = tpu.matmul %73, %75, %cst_45 {dimension_numbers = #tpu.dot_dimension_numbers<[1], [0], [0], [1], [0, 0, 1, 1], [], []>} : vector<64x128xf32>, vector<128x128xf32>, vector<64x128xf32> -> vector<64x128xf32>
    %77 = arith.addf %72, %76 : vector<64x128xf32>
    %78 = vector.extract_strided_slice %21 {offsets = [704, 0], sizes = [64, 128], strides = [1, 1]} : vector<1600x128xf32> to vector<64x128xf32>
    %c11 = arith.constant 11 : index
    %c0_46 = arith.constant 0 : index
    %c0_47 = arith.constant 0 : index
    %79 = vector.load %arg5[%c11, %c0_46, %c0_47] : memref<25x128x128xf32, #tpu.memory_space<vmem>>, vector<1x128x128xf32>
    %80 = vector.shape_cast %79 : vector<1x128x128xf32> to vector<128x128xf32>
    %cst_48 = arith.constant dense<0.000000e+00> : vector<64x128xf32>
    %81 = tpu.matmul %78, %80, %cst_48 {dimension_numbers = #tpu.dot_dimension_numbers<[1], [0], [0], [1], [0, 0, 1, 1], [], []>} : vector<64x128xf32>, vector<128x128xf32>, vector<64x128xf32> -> vector<64x128xf32>
    %82 = arith.addf %77, %81 : vector<64x128xf32>
    %83 = vector.extract_strided_slice %21 {offsets = [768, 0], sizes = [64, 128], strides = [1, 1]} : vector<1600x128xf32> to vector<64x128xf32>
    %c12 = arith.constant 12 : index
    %c0_49 = arith.constant 0 : index
    %c0_50 = arith.constant 0 : index
    %84 = vector.load %arg5[%c12, %c0_49, %c0_50] : memref<25x128x128xf32, #tpu.memory_space<vmem>>, vector<1x128x128xf32>
    %85 = vector.shape_cast %84 : vector<1x128x128xf32> to vector<128x128xf32>
    %cst_51 = arith.constant dense<0.000000e+00> : vector<64x128xf32>
    %86 = tpu.matmul %83, %85, %cst_51 {dimension_numbers = #tpu.dot_dimension_numbers<[1], [0], [0], [1], [0, 0, 1, 1], [], []>} : vector<64x128xf32>, vector<128x128xf32>, vector<64x128xf32> -> vector<64x128xf32>
    %87 = arith.addf %82, %86 : vector<64x128xf32>
    %88 = vector.extract_strided_slice %21 {offsets = [832, 0], sizes = [64, 128], strides = [1, 1]} : vector<1600x128xf32> to vector<64x128xf32>
    %c13 = arith.constant 13 : index
    %c0_52 = arith.constant 0 : index
    %c0_53 = arith.constant 0 : index
    %89 = vector.load %arg5[%c13, %c0_52, %c0_53] : memref<25x128x128xf32, #tpu.memory_space<vmem>>, vector<1x128x128xf32>
    %90 = vector.shape_cast %89 : vector<1x128x128xf32> to vector<128x128xf32>
    %cst_54 = arith.constant dense<0.000000e+00> : vector<64x128xf32>
    %91 = tpu.matmul %88, %90, %cst_54 {dimension_numbers = #tpu.dot_dimension_numbers<[1], [0], [0], [1], [0, 0, 1, 1], [], []>} : vector<64x128xf32>, vector<128x128xf32>, vector<64x128xf32> -> vector<64x128xf32>
    %92 = arith.addf %87, %91 : vector<64x128xf32>
    %93 = vector.extract_strided_slice %21 {offsets = [896, 0], sizes = [64, 128], strides = [1, 1]} : vector<1600x128xf32> to vector<64x128xf32>
    %c14 = arith.constant 14 : index
    %c0_55 = arith.constant 0 : index
    %c0_56 = arith.constant 0 : index
    %94 = vector.load %arg5[%c14, %c0_55, %c0_56] : memref<25x128x128xf32, #tpu.memory_space<vmem>>, vector<1x128x128xf32>
    %95 = vector.shape_cast %94 : vector<1x128x128xf32> to vector<128x128xf32>
    %cst_57 = arith.constant dense<0.000000e+00> : vector<64x128xf32>
    %96 = tpu.matmul %93, %95, %cst_57 {dimension_numbers = #tpu.dot_dimension_numbers<[1], [0], [0], [1], [0, 0, 1, 1], [], []>} : vector<64x128xf32>, vector<128x128xf32>, vector<64x128xf32> -> vector<64x128xf32>
    %97 = arith.addf %92, %96 : vector<64x128xf32>
    %98 = vector.extract_strided_slice %21 {offsets = [960, 0], sizes = [64, 128], strides = [1, 1]} : vector<1600x128xf32> to vector<64x128xf32>
    %c15 = arith.constant 15 : index
    %c0_58 = arith.constant 0 : index
    %c0_59 = arith.constant 0 : index
    %99 = vector.load %arg5[%c15, %c0_58, %c0_59] : memref<25x128x128xf32, #tpu.memory_space<vmem>>, vector<1x128x128xf32>
    %100 = vector.shape_cast %99 : vector<1x128x128xf32> to vector<128x128xf32>
    %cst_60 = arith.constant dense<0.000000e+00> : vector<64x128xf32>
    %101 = tpu.matmul %98, %100, %cst_60 {dimension_numbers = #tpu.dot_dimension_numbers<[1], [0], [0], [1], [0, 0, 1, 1], [], []>} : vector<64x128xf32>, vector<128x128xf32>, vector<64x128xf32> -> vector<64x128xf32>
    %102 = arith.addf %97, %101 : vector<64x128xf32>
    %103 = vector.extract_strided_slice %21 {offsets = [1024, 0], sizes = [64, 128], strides = [1, 1]} : vector<1600x128xf32> to vector<64x128xf32>
    %c16 = arith.constant 16 : index
    %c0_61 = arith.constant 0 : index
    %c0_62 = arith.constant 0 : index
    %104 = vector.load %arg5[%c16, %c0_61, %c0_62] : memref<25x128x128xf32, #tpu.memory_space<vmem>>, vector<1x128x128xf32>
    %105 = vector.shape_cast %104 : vector<1x128x128xf32> to vector<128x128xf32>
    %cst_63 = arith.constant dense<0.000000e+00> : vector<64x128xf32>
    %106 = tpu.matmul %103, %105, %cst_63 {dimension_numbers = #tpu.dot_dimension_numbers<[1], [0], [0], [1], [0, 0, 1, 1], [], []>} : vector<64x128xf32>, vector<128x128xf32>, vector<64x128xf32> -> vector<64x128xf32>
    %107 = arith.addf %102, %106 : vector<64x128xf32>
    %108 = vector.extract_strided_slice %21 {offsets = [1088, 0], sizes = [64, 128], strides = [1, 1]} : vector<1600x128xf32> to vector<64x128xf32>
    %c17 = arith.constant 17 : index
    %c0_64 = arith.constant 0 : index
    %c0_65 = arith.constant 0 : index
    %109 = vector.load %arg5[%c17, %c0_64, %c0_65] : memref<25x128x128xf32, #tpu.memory_space<vmem>>, vector<1x128x128xf32>
    %110 = vector.shape_cast %109 : vector<1x128x128xf32> to vector<128x128xf32>
    %cst_66 = arith.constant dense<0.000000e+00> : vector<64x128xf32>
    %111 = tpu.matmul %108, %110, %cst_66 {dimension_numbers = #tpu.dot_dimension_numbers<[1], [0], [0], [1], [0, 0, 1, 1], [], []>} : vector<64x128xf32>, vector<128x128xf32>, vector<64x128xf32> -> vector<64x128xf32>
    %112 = arith.addf %107, %111 : vector<64x128xf32>
    %113 = vector.extract_strided_slice %21 {offsets = [1152, 0], sizes = [64, 128], strides = [1, 1]} : vector<1600x128xf32> to vector<64x128xf32>
    %c18 = arith.constant 18 : index
    %c0_67 = arith.constant 0 : index
    %c0_68 = arith.constant 0 : index
    %114 = vector.load %arg5[%c18, %c0_67, %c0_68] : memref<25x128x128xf32, #tpu.memory_space<vmem>>, vector<1x128x128xf32>
    %115 = vector.shape_cast %114 : vector<1x128x128xf32> to vector<128x128xf32>
    %cst_69 = arith.constant dense<0.000000e+00> : vector<64x128xf32>
    %116 = tpu.matmul %113, %115, %cst_69 {dimension_numbers = #tpu.dot_dimension_numbers<[1], [0], [0], [1], [0, 0, 1, 1], [], []>} : vector<64x128xf32>, vector<128x128xf32>, vector<64x128xf32> -> vector<64x128xf32>
    %117 = arith.addf %112, %116 : vector<64x128xf32>
    %118 = vector.extract_strided_slice %21 {offsets = [1216, 0], sizes = [64, 128], strides = [1, 1]} : vector<1600x128xf32> to vector<64x128xf32>
    %c19 = arith.constant 19 : index
    %c0_70 = arith.constant 0 : index
    %c0_71 = arith.constant 0 : index
    %119 = vector.load %arg5[%c19, %c0_70, %c0_71] : memref<25x128x128xf32, #tpu.memory_space<vmem>>, vector<1x128x128xf32>
    %120 = vector.shape_cast %119 : vector<1x128x128xf32> to vector<128x128xf32>
    %cst_72 = arith.constant dense<0.000000e+00> : vector<64x128xf32>
    %121 = tpu.matmul %118, %120, %cst_72 {dimension_numbers = #tpu.dot_dimension_numbers<[1], [0], [0], [1], [0, 0, 1, 1], [], []>} : vector<64x128xf32>, vector<128x128xf32>, vector<64x128xf32> -> vector<64x128xf32>
    %122 = arith.addf %117, %121 : vector<64x128xf32>
    %123 = vector.extract_strided_slice %21 {offsets = [1280, 0], sizes = [64, 128], strides = [1, 1]} : vector<1600x128xf32> to vector<64x128xf32>
    %c20 = arith.constant 20 : index
    %c0_73 = arith.constant 0 : index
    %c0_74 = arith.constant 0 : index
    %124 = vector.load %arg5[%c20, %c0_73, %c0_74] : memref<25x128x128xf32, #tpu.memory_space<vmem>>, vector<1x128x128xf32>
    %125 = vector.shape_cast %124 : vector<1x128x128xf32> to vector<128x128xf32>
    %cst_75 = arith.constant dense<0.000000e+00> : vector<64x128xf32>
    %126 = tpu.matmul %123, %125, %cst_75 {dimension_numbers = #tpu.dot_dimension_numbers<[1], [0], [0], [1], [0, 0, 1, 1], [], []>} : vector<64x128xf32>, vector<128x128xf32>, vector<64x128xf32> -> vector<64x128xf32>
    %127 = arith.addf %122, %126 : vector<64x128xf32>
    %128 = vector.extract_strided_slice %21 {offsets = [1344, 0], sizes = [64, 128], strides = [1, 1]} : vector<1600x128xf32> to vector<64x128xf32>
    %c21 = arith.constant 21 : index
    %c0_76 = arith.constant 0 : index
    %c0_77 = arith.constant 0 : index
    %129 = vector.load %arg5[%c21, %c0_76, %c0_77] : memref<25x128x128xf32, #tpu.memory_space<vmem>>, vector<1x128x128xf32>
    %130 = vector.shape_cast %129 : vector<1x128x128xf32> to vector<128x128xf32>
    %cst_78 = arith.constant dense<0.000000e+00> : vector<64x128xf32>
    %131 = tpu.matmul %128, %130, %cst_78 {dimension_numbers = #tpu.dot_dimension_numbers<[1], [0], [0], [1], [0, 0, 1, 1], [], []>} : vector<64x128xf32>, vector<128x128xf32>, vector<64x128xf32> -> vector<64x128xf32>
    %132 = arith.addf %127, %131 : vector<64x128xf32>
    %133 = vector.extract_strided_slice %21 {offsets = [1408, 0], sizes = [64, 128], strides = [1, 1]} : vector<1600x128xf32> to vector<64x128xf32>
    %c22 = arith.constant 22 : index
    %c0_79 = arith.constant 0 : index
    %c0_80 = arith.constant 0 : index
    %134 = vector.load %arg5[%c22, %c0_79, %c0_80] : memref<25x128x128xf32, #tpu.memory_space<vmem>>, vector<1x128x128xf32>
    %135 = vector.shape_cast %134 : vector<1x128x128xf32> to vector<128x128xf32>
    %cst_81 = arith.constant dense<0.000000e+00> : vector<64x128xf32>
    %136 = tpu.matmul %133, %135, %cst_81 {dimension_numbers = #tpu.dot_dimension_numbers<[1], [0], [0], [1], [0, 0, 1, 1], [], []>} : vector<64x128xf32>, vector<128x128xf32>, vector<64x128xf32> -> vector<64x128xf32>
    %137 = arith.addf %132, %136 : vector<64x128xf32>
    %138 = vector.extract_strided_slice %21 {offsets = [1472, 0], sizes = [64, 128], strides = [1, 1]} : vector<1600x128xf32> to vector<64x128xf32>
    %c23 = arith.constant 23 : index
    %c0_82 = arith.constant 0 : index
    %c0_83 = arith.constant 0 : index
    %139 = vector.load %arg5[%c23, %c0_82, %c0_83] : memref<25x128x128xf32, #tpu.memory_space<vmem>>, vector<1x128x128xf32>
    %140 = vector.shape_cast %139 : vector<1x128x128xf32> to vector<128x128xf32>
    %cst_84 = arith.constant dense<0.000000e+00> : vector<64x128xf32>
    %141 = tpu.matmul %138, %140, %cst_84 {dimension_numbers = #tpu.dot_dimension_numbers<[1], [0], [0], [1], [0, 0, 1, 1], [], []>} : vector<64x128xf32>, vector<128x128xf32>, vector<64x128xf32> -> vector<64x128xf32>
    %142 = arith.addf %137, %141 : vector<64x128xf32>
    %143 = vector.extract_strided_slice %21 {offsets = [1536, 0], sizes = [64, 128], strides = [1, 1]} : vector<1600x128xf32> to vector<64x128xf32>
    %c24 = arith.constant 24 : index
    %c0_85 = arith.constant 0 : index
    %c0_86 = arith.constant 0 : index
    %144 = vector.load %arg5[%c24, %c0_85, %c0_86] : memref<25x128x128xf32, #tpu.memory_space<vmem>>, vector<1x128x128xf32>
    %145 = vector.shape_cast %144 : vector<1x128x128xf32> to vector<128x128xf32>
    %cst_87 = arith.constant dense<0.000000e+00> : vector<64x128xf32>
    %146 = tpu.matmul %143, %145, %cst_87 {dimension_numbers = #tpu.dot_dimension_numbers<[1], [0], [0], [1], [0, 0, 1, 1], [], []>} : vector<64x128xf32>, vector<128x128xf32>, vector<64x128xf32> -> vector<64x128xf32>
    %147 = arith.addf %142, %146 : vector<64x128xf32>
    %c0_88 = arith.constant 0 : index
    %c0_89 = arith.constant 0 : index
    %148 = vector.load %arg6[%c0_88, %c0_89] : memref<1x128xf32, #tpu.memory_space<vmem>>, vector<1x128xf32>
    %149 = vector.broadcast %148 : vector<1x128xf32> to vector<64x128xf32>
    %150 = arith.addf %147, %149 : vector<64x128xf32>
    %cst_90 = arith.constant 0.000000e+00 : f32
    %151 = vector.broadcast %cst_90 : f32 to vector<64x128xf32>
    %152 = arith.cmpf ogt, %150, %151 : vector<64x128xf32>
    %153 = math.exp %150 : vector<64x128xf32>
    %cst_91 = arith.constant 1.000000e+00 : f32
    %154 = vector.broadcast %cst_91 : f32 to vector<64x128xf32>
    %155 = arith.subf %153, %154 : vector<64x128xf32>
    %156 = arith.select %152, %150, %155 : vector<64x128xi1>, vector<64x128xf32>
    %157 = vector.extract_strided_slice %156 {offsets = [0, 0], sizes = [16, 128], strides = [1, 1]} : vector<64x128xf32> to vector<16x128xf32>
    %158 = vector.extract_strided_slice %156 {offsets = [16, 0], sizes = [16, 128], strides = [1, 1]} : vector<64x128xf32> to vector<16x128xf32>
    %159 = arith.maximumf %157, %158 : vector<16x128xf32>
    %160 = vector.extract_strided_slice %156 {offsets = [32, 0], sizes = [16, 128], strides = [1, 1]} : vector<64x128xf32> to vector<16x128xf32>
    %161 = vector.extract_strided_slice %156 {offsets = [48, 0], sizes = [16, 128], strides = [1, 1]} : vector<64x128xf32> to vector<16x128xf32>
    %162 = arith.maximumf %160, %161 : vector<16x128xf32>
    %163 = arith.maximumf %159, %162 : vector<16x128xf32>
    %c0_92 = arith.constant 0 : index
    %c0_93 = arith.constant 0 : index
    %c0_94 = arith.constant 0 : index
    %164 = vector.load %arg7[%c0_92, %c0_93, %c0_94] : memref<1x16x128xf32, #tpu.memory_space<vmem>>, vector<1x16x128xf32>
    %165 = vector.shape_cast %164 : vector<1x16x128xf32> to vector<16x128xf32>
    %166 = vector.shape_cast %163 : vector<16x128xf32> to vector<1x16x128xf32>
    tpu.vector_store %arg7[%c0_92, %c0_93, %c0_94], %166 {strides = array<i32>} : memref<1x16x128xf32, #tpu.memory_space<vmem>>, vector<1x16x128xf32>,
    return
  }
  func.func @transform_0(%arg0: i32) -> (i32, i32, i32) {
    %c0_i32 = arith.constant 0 : i32
    %c0_i32_0 = arith.constant 0 : i32
    %c0_i32_1 = arith.constant 0 : i32
    return %arg0, %c0_i32, %c0_i32_0 : i32, i32, i32
  }
  func.func @transform_1(%arg0: i32) -> (i32, i32) {
    %c0_i32 = arith.constant 0 : i32
    %c0_i32_0 = arith.constant 0 : i32
    %c0_i32_1 = arith.constant 0 : i32
    return %c0_i32, %c0_i32_0 : i32, i32
  }
  func.func @transform_2(%arg0: i32) -> (i32, i32) {
    %c0_i32 = arith.constant 0 : i32
    %c0_i32_0 = arith.constant 0 : i32
    %c0_i32_1 = arith.constant 0 : i32
    return %c0_i32, %c0_i32_0 : i32, i32
  }
  func.func @transform_3(%arg0: i32) -> (i32, i32) {
    %c0_i32 = arith.constant 0 : i32
    %c0_i32_0 = arith.constant 0 : i32
    %c0_i32_1 = arith.constant 0 : i32
    return %c0_i32, %c0_i32_0 : i32, i32
  }
  func.func @transform_4(%arg0: i32) -> (i32, i32, i32) {
    %c0_i32 = arith.constant 0 : i32
    %c0_i32_0 = arith.constant 0 : i32
    %c0_i32_1 = arith.constant 0 : i32
    %c0_i32_2 = arith.constant 0 : i32
    return %c0_i32, %c0_i32_0, %c0_i32_1 : i32, i32, i32
  }
  func.func @transform_5(%arg0: i32) -> (i32, i32) {
    %c0_i32 = arith.constant 0 : i32
    %c0_i32_0 = arith.constant 0 : i32
    %c0_i32_1 = arith.constant 0 : i32
    return %c0_i32, %c0_i32_0 : i32, i32
  }
  func.func @transform_6(%arg0: i32) -> (i32, i32, i32) {
    %c0_i32 = arith.constant 0 : i32
    %c0_i32_0 = arith.constant 0 : i32
    %c0_i32_1 = arith.constant 0 : i32
    return %arg0, %c0_i32, %c0_i32_0 : i32, i32, i32
  }
}

</mosaic_0001>

<bundles_post_ra>
// kernel: encoder_lenet_forward.1
= control target key start
LH: loop header
LB: loop body
LE: loop exit
PB: predicated region body
PF: predicated region fallthrough
CT: control target
= control target key end

     0   :  { %s9668_s21 = smov 0   ;;  %s14167_s0 = inlined_call_operand.vmem [shape: f32[2,576,25], index: 0, kind: input, shape index: {}]   ;;  %s14168_s1 = inlined_call_operand.vmem [shape: f32[1600,144], index: 1, kind: input, shape index: {}]   ;;  %s14169_s2 = inlined_call_operand.vmem [shape: f32[25,128], index: 2, kind: input, shape index: {}]   ;;  %s14170_s3 = inlined_call_operand.vmem [shape: f32[1,128], index: 3, kind: input, shape index: {}]   ;;  %s14171_s4 = inlined_call_operand.vmem [shape: f32[25,128,128], index: 4, kind: input, shape index: {}]   ;;  %s14172_s5 = inlined_call_operand.vmem [shape: f32[1,128], index: 5, kind: input, shape index: {}]   ;;  %s14173_s6 = inlined_call_operand.vmem [shape: f32[2,16,128], index: 6, kind: output, shape index: {}]  }
   0x1 LB: > { %s6812_s22 = sadd.s32 4294967295, %s9630_s21   ;;  %p6816_p0 = scmp.ge.s32.totalorder %s9630_s21, 1  ;;  %s9630_s21 = sphi %s9668_s21, %s16_s21  }
   0x2   : > { %p212_p1 = scmp.lt.s32.totalorder %s9630_s21, 3 }
   0x4   : > { %p213_p2 = pnand %p6816_p0, %p212_p1 }
   0x6   : > { %216 = sbr.rel (%p213_p2) target bundleno = 1622 (0x656), region = 44 }
   0xb   : > { %v327_v0 = vld [vmem:[%s14169_s2 + $0x18] sm:$0x1]  ;;  %vm552_vm0 = vcmask 1040384   ;;  %v326_v1 = vld [vmem:[%s14169_s2 + $0x10] sm:$0xff]  ;;  %p242_p3 = scmp.lt.s32.totalorder %s6812_s22, 1  ;;  %v325_v2 = vld [vmem:[%s14169_s2 + $0x8] sm:$0xff] }
   0xc   : > { %8238 = vmatprep.subr.msk.mxu0 %vm552_vm0, %v327_v0  ;;  %v324_v3 = vld [vmem:[%s14169_s2] sm:$0xff]  ;;  %vm335_vm1 = vcmask 203776   ;;  %vm1795_vm10 = vcmask 130048  }
   0xd   : > { %8239 = vmatpush3.msk.msra.mxu0 %vm552_vm0, %v327_v0  ;;  %s14295_s22 = smov (!%p242_p3, %s6812_s22), 1 }
   0xe   : > { %8240 = vmatprep.subr.mxu0 %v326_v1  ;;  %s9454_s7 = smul.u32 576, %s14295_s22  ;;  %s7561_s9 = sshll.u32 %s14295_s22, 4 }
   0xf   : > { %8241 = vmatpush3.msra.mxu0 %v326_v1  ;;  %s251_s12 = scalar_lea.vmem %s14173_s6, %s7561_s9 }
  0x10   : > { %8242 = vmatprep.subr.mxu0 %v325_v2  ;;  %s9694_s10 = scalar_lea.vmem %s14167_s0, %s9454_s7 }
  0x11   : > { %8243 = vmatpush3.msra.mxu0 %v325_v2  ;;  %v252_v4 = vld [vmem:[%s9694_s10] sm:$0xff]  ;;  %v253_v5 = vld [vmem:[%s9694_s10 + $0x8] sm:$0xff]  ;;  %v254_v6 = vld [vmem:[%s9694_s10 + $0x10] sm:$0xff] }
  0x12   : > { %8244 = vmatprep.subr.mxu0 %v324_v3  ;;  %8246 = vmatprep.mubr.msk.f32.mxu0 %vm335_vm1, %v252_v4  ;;  %v255_v7 = vld [vmem:[%s9694_s10 + $0x18] sm:$0xff]  ;;  %v256_v8 = vld [vmem:[%s9694_s10 + $0x20] sm:$0xff]  ;;  %v257_v9 = vld [vmem:[%s9694_s10 + $0x28] sm:$0xff] }
  0x13   : > { %8245 = vmatpush3.msra.mxu0 %v324_v3  ;;  %v258_v10 = vld [vmem:[%s9694_s10 + $0x30] sm:$0xff]  ;;  %v259_v11 = vld [vmem:[%s9694_s10 + $0x38] sm:$0xff]  ;;  %v260_v12 = vld [vmem:[%s9694_s10 + $0x40] sm:$0xff] }
  0x14   : > { %8247 = vmatmul.mubr.msk.f32.vlgmr.msra.gmra.mxu0 %vm335_vm1, %v253_v5  ;;  %v261_v13 = vld [vmem:[%s9694_s10 + $0x48] sm:$0xff]  ;;  %v262_v14 = vld [vmem:[%s9694_s10 + $0x50] sm:$0xff]  ;;  %v263_v15 = vld [vmem:[%s9694_s10 + $0x58] sm:$0xff] }
  0x15   : > { %8249 = vmatprep.mubr.msk.f32.mxu0 %vm335_vm1, %v254_v6  ;;  %v264_v16 = vld [vmem:[%s9694_s10 + $0x60] sm:$0xff]  ;;  %v265_v17 = vld [vmem:[%s9694_s10 + $0x68] sm:$0xff]  ;;  %v266_v18 = vld [vmem:[%s9694_s10 + $0x70] sm:$0xff] }
  0x16   : > { %v267_v19 = vld [vmem:[%s9694_s10 + $0x78] sm:$0xff]  ;;  %v268_v20 = vld [vmem:[%s9694_s10 + $0x80] sm:$0xff]  ;;  %v269_v21 = vld [vmem:[%s9694_s10 + $0x88] sm:$0xff] }
  0x17   : > { %v270_v22 = vld [vmem:[%s9694_s10 + $0x90] sm:$0xff]  ;;  %v271_v23 = vld [vmem:[%s9694_s10 + $0x98] sm:$0xff]  ;;  %v272_v24 = vld [vmem:[%s9694_s10 + $0xa0] sm:$0xff] }
  0x18   : > { %8250 = vmatmul.mubr.msk.f32.gmra.mxu0 %vm335_vm1, %v255_v7  ;;  %v273_v25 = vld [vmem:[%s9694_s10 + $0xa8] sm:$0xff]  ;;  %v274_v26 = vld [vmem:[%s9694_s10 + $0xb0] sm:$0xff]  ;;  %v275_v27 = vld [vmem:[%s9694_s10 + $0xb8] sm:$0xff] }
  0x19   : > { %8252 = vmatprep.mubr.msk.f32.mxu0 %vm335_vm1, %v256_v8  ;;  %v276_v28 = vld [vmem:[%s9694_s10 + $0xc0] sm:$0xff]  ;;  %v277_v29 = vld [vmem:[%s9694_s10 + $0xc8] sm:$0xff]  ;;  %v278_v30 = vld [vmem:[%s9694_s10 + $0xd0] sm:$0xff] }
  0x1a   : > { %v279_v31 = vld [vmem:[%s9694_s10 + $0xd8] sm:$0xff]  ;;  %v280_v32 = vld [vmem:[%s9694_s10 + $0xe0] sm:$0xff]  ;;  %v281_v33 = vld [vmem:[%s9694_s10 + $0xe8] sm:$0xff] }
  0x1b   : > { %v282_v34 = vld [vmem:[%s9694_s10 + $0xf0] sm:$0xff]  ;;  %v283_v35 = vld [vmem:[%s9694_s10 + $0xf8] sm:$0xff]  ;;  %v284_v36 = vld [vmem:[%s9694_s10 + $0x100] sm:$0xff] }
  0x1c   : > { %8253 = vmatmul.mubr.msk.f32.gmra.mxu0 %vm335_vm1, %v257_v9  ;;  %v285_v37 = vld [vmem:[%s9694_s10 + $0x108] sm:$0xff]  ;;  %v286_v38 = vld [vmem:[%s9694_s10 + $0x110] sm:$0xff]  ;;  %v287_v39 = vld [vmem:[%s9694_s10 + $0x118] sm:$0xff] }
  0x1d   : > { %8255 = vmatprep.mubr.msk.f32.mxu0 %vm335_vm1, %v258_v10  ;;  %v288_v40 = vld [vmem:[%s9694_s10 + $0x120] sm:$0xff]  ;;  %v289_v41 = vld [vmem:[%s9694_s10 + $0x128] sm:$0xff]  ;;  %v290_v42 = vld [vmem:[%s9694_s10 + $0x130] sm:$0xff] }
  0x1e   : > { %v291_v43 = vld [vmem:[%s9694_s10 + $0x138] sm:$0xff]  ;;  %v292_v44 = vld [vmem:[%s9694_s10 + $0x140] sm:$0xff]  ;;  %v293_v45 = vld [vmem:[%s9694_s10 + $0x148] sm:$0xff] }
  0x1f   : > { %v294_v46 = vld [vmem:[%s9694_s10 + $0x150] sm:$0xff]  ;;  %v295_v47 = vld [vmem:[%s9694_s10 + $0x158] sm:$0xff]  ;;  %v296_v48 = vld [vmem:[%s9694_s10 + $0x160] sm:$0xff] }
  0x20   : > { %8256 = vmatmul.mubr.msk.f32.gmra.mxu0 %vm335_vm1, %v259_v11  ;;  %v297_v49 = vld [vmem:[%s9694_s10 + $0x168] sm:$0xff]  ;;  %v298_v50 = vld [vmem:[%s9694_s10 + $0x170] sm:$0xff]  ;;  %v299_v51 = vld [vmem:[%s9694_s10 + $0x178] sm:$0xff] }
  0x21   : > { %8258 = vmatprep.mubr.msk.f32.mxu0 %vm335_vm1, %v260_v12  ;;  %v300_v52 = vld [vmem:[%s9694_s10 + $0x180] sm:$0xff]  ;;  %v301_v53 = vld [vmem:[%s9694_s10 + $0x188] sm:$0xff]  ;;  %v302_v54 = vld [vmem:[%s9694_s10 + $0x190] sm:$0xff] }
  0x22   : > { %v303_v55 = vld [vmem:[%s9694_s10 + $0x198] sm:$0xff]  ;;  %v304_v56 = vld [vmem:[%s9694_s10 + $0x1a0] sm:$0xff]  ;;  %v305_v57 = vld [vmem:[%s9694_s10 + $0x1a8] sm:$0xff] }
  0x23   : > { %v306_v58 = vld [vmem:[%s9694_s10 + $0x1b0] sm:$0xff]  ;;  %v307_v59 = vld [vmem:[%s9694_s10 + $0x1b8] sm:$0xff]  ;;  %v308_v60 = vld [vmem:[%s9694_s10 + $0x1c0] sm:$0xff] }
  0x24   : > { %8259 = vmatmul.mubr.msk.f32.gmra.mxu0 %vm335_vm1, %v261_v13  ;;  %v309_v61 = vld [vmem:[%s9694_s10 + $0x1c8] sm:$0xff]  ;;  %v310_v62 = vld [vmem:[%s9694_s10 + $0x1d0] sm:$0xff]  ;;  %v311_v63 = vld [vmem:[%s9694_s10 + $0x1d8] sm:$0xff] }
  0x25   : > { %8261 = vmatprep.mubr.msk.f32.mxu0 %vm335_vm1, %v262_v14  ;;  %v312_v0 = vld [vmem:[%s9694_s10 + $0x1e0] sm:$0xff]  ;;  %v313_v1 = vld [vmem:[%s9694_s10 + $0x1e8] sm:$0xff]  ;;  %v314_v2 = vld [vmem:[%s9694_s10 + $0x1f0] sm:$0xff] }
  0x26   : > { %v315_v3 = vld [vmem:[%s9694_s10 + $0x1f8] sm:$0xff]  ;;  %v316_v4 = vld [vmem:[%s9694_s10 + $0x200] sm:$0xff]  ;;  %v317_v5 = vld [vmem:[%s9694_s10 + $0x208] sm:$0xff] }
  0x27   : > { %v318_v6 = vld [vmem:[%s9694_s10 + $0x210] sm:$0xff]  ;;  %v319_v7 = vld [vmem:[%s9694_s10 + $0x218] sm:$0xff]  ;;  %v320_v8 = vld [vmem:[%s9694_s10 + $0x220] sm:$0xff] }
  0x28   : > { %8262 = vmatmul.mubr.msk.f32.gmra.mxu0 %vm335_vm1, %v263_v15  ;;  %v321_v9 = vld [vmem:[%s9694_s10 + $0x228] sm:$0xff]  ;;  %v322_v10 = vld [vmem:[%s9694_s10 + $0x230] sm:$0xff]  ;;  %v323_v11 = vld [vmem:[%s9694_s10 + $0x238] sm:$0xff] }
  0x29   : > { %8264 = vmatprep.mubr.msk.f32.mxu0 %vm335_vm1, %v264_v16 }
  0x2c   : > { %8265 = vmatmul.mubr.msk.f32.gmra.mxu0 %vm335_vm1, %v265_v17 }
  0x2d   : > { %8267 = vmatprep.mubr.msk.f32.mxu0 %vm335_vm1, %v266_v18 }
  0x30   : > { %8268 = vmatmul.mubr.msk.f32.gmra.mxu0 %vm335_vm1, %v267_v19 }
  0x31   : > { %8270 = vmatprep.mubr.msk.f32.mxu0 %vm335_vm1, %v268_v20 }
  0x34   : > { %8271 = vmatmul.mubr.msk.f32.gmra.mxu0 %vm335_vm1, %v269_v21 }
  0x35   : > { %8273 = vmatprep.mubr.msk.f32.mxu0 %vm335_vm1, %v270_v22 }
  0x38   : > { %8274 = vmatmul.mubr.msk.f32.gmra.mxu0 %vm335_vm1, %v271_v23 }
  0x39   : > { %8276 = vmatprep.mubr.msk.f32.mxu0 %vm335_vm1, %v272_v24 }
  0x3c   : > { %8277 = vmatmul.mubr.msk.f32.gmra.mxu0 %vm335_vm1, %v273_v25  ;;  %v9855_v25 = vld [vmem:[%s14170_s3] ss:$0 sm:$0xff] }
  0x3d   : > { %8279 = vmatprep.mubr.msk.f32.mxu0 %vm335_vm1, %v274_v26 }
  0x40   : > { %8280 = vmatmul.mubr.msk.f32.gmra.mxu0 %vm335_vm1, %v275_v27 }
  0x41   : > { %8282 = vmatprep.mubr.msk.f32.mxu0 %vm335_vm1, %v276_v28 }
  0x44   : > { %8283 = vmatmul.mubr.msk.f32.gmra.mxu0 %vm335_vm1, %v277_v29 }
  0x45   : > { %8285 = vmatprep.mubr.msk.f32.mxu0 %vm335_vm1, %v278_v30 }
  0x48   : > { %8286 = vmatmul.mubr.msk.f32.gmra.mxu0 %vm335_vm1, %v279_v31 }
  0x49   : > { %8288 = vmatprep.mubr.msk.f32.mxu0 %vm335_vm1, %v280_v32 }
  0x4c   : > { %8289 = vmatmul.mubr.msk.f32.gmra.mxu0 %vm335_vm1, %v281_v33 }
  0x4d   : > { %8291 = vmatprep.mubr.msk.f32.mxu0 %vm335_vm1, %v282_v34  ;;  %v14174_v34 = vmov 0.0  }
  0x4e   : > { %2396 = vmatprep.subr.mxu1 %v14174_v34 }
  0x50   : > { %8292 = vmatmul.mubr.msk.f32.gmra.mxu0 %vm335_vm1, %v283_v35 }
  0x51   : > { %8294 = vmatprep.mubr.msk.f32.mxu0 %vm335_vm1, %v284_v36 }
  0x54   : > { %8295 = vmatmul.mubr.msk.f32.gmra.mxu0 %vm335_vm1, %v285_v37 }
  0x55   : > { %8297 = vmatprep.mubr.msk.f32.mxu0 %vm335_vm1, %v286_v38 }
  0x58   : > { %8298 = vmatmul.mubr.msk.f32.gmra.mxu0 %vm335_vm1, %v287_v39 }
  0x59   : > { %8300 = vmatprep.mubr.msk.f32.mxu0 %vm335_vm1, %v288_v40 }
  0x5c   : > { %8301 = vmatmul.mubr.msk.f32.gmra.mxu0 %vm335_vm1, %v289_v41 }
  0x5d   : > { %8303 = vmatprep.mubr.msk.f32.mxu0 %vm335_vm1, %v290_v42 }
  0x60   : > { %8304 = vmatmul.mubr.msk.f32.gmra.mxu0 %vm335_vm1, %v291_v43 }
  0x61   : > { %8306 = vmatprep.mubr.msk.f32.mxu0 %vm335_vm1, %v292_v44 }
  0x64   : > { %8307 = vmatmul.mubr.msk.f32.gmra.mxu0 %vm335_vm1, %v293_v45 }
  0x65   : > { %8309 = vmatprep.mubr.msk.f32.mxu0 %vm335_vm1, %v294_v46 }
  0x68   : > { %8310 = vmatmul.mubr.msk.f32.gmra.mxu0 %vm335_vm1, %v295_v47 }
  0x69   : > { %8312 = vmatprep.mubr.msk.f32.mxu0 %vm335_vm1, %v296_v48 }
  0x6c   : > { %8313 = vmatmul.mubr.msk.f32.gmra.mxu0 %vm335_vm1, %v297_v49 }
  0x6d   : > { %8315 = vmatprep.mubr.msk.f32.mxu0 %vm335_vm1, %v298_v50 }
  0x70   : > { %8316 = vmatmul.mubr.msk.f32.gmra.mxu0 %vm335_vm1, %v299_v51 }
  0x71   : > { %8318 = vmatprep.mubr.msk.f32.mxu0 %vm335_vm1, %v300_v52 }
  0x74   : > { %8319 = vmatmul.mubr.msk.f32.gmra.mxu0 %vm335_vm1, %v301_v53 }
  0x75   : > { %8321 = vmatprep.mubr.msk.f32.mxu0 %vm335_vm1, %v302_v54 }
  0x78   : > { %8322 = vmatmul.mubr.msk.f32.gmra.mxu0 %vm335_vm1, %v303_v55 }
  0x79   : > { %8324 = vmatprep.mubr.msk.f32.mxu0 %vm335_vm1, %v304_v56 }
  0x7c   : > { %8325 = vmatmul.mubr.msk.f32.gmra.mxu0 %vm335_vm1, %v305_v57 }
  0x7d   : > { %8327 = vmatprep.mubr.msk.f32.mxu0 %vm335_vm1, %v306_v58 }
  0x80   : > { %8328 = vmatmul.mubr.msk.f32.gmra.mxu0 %vm335_vm1, %v307_v59 }
  0x81   : > { %8330 = vmatprep.mubr.msk.f32.mxu0 %vm335_vm1, %v308_v60 }
  0x84   : > { %8331 = vmatmul.mubr.msk.f32.gmra.mxu0 %vm335_vm1, %v309_v61 }
  0x85   : > { %8333 = vmatprep.mubr.msk.f32.mxu0 %vm335_vm1, %v310_v62 }
  0x88   : > { %8334 = vmatmul.mubr.msk.f32.gmra.mxu0 %vm335_vm1, %v311_v63 }
  0x89   : > { %8336 = vmatprep.mubr.msk.f32.mxu0 %vm335_vm1, %v312_v0 }
  0x8c   : > { %8337 = vmatmul.mubr.msk.f32.gmra.mxu0 %vm335_vm1, %v313_v1 }
  0x8d   : > { %8339 = vmatprep.mubr.msk.f32.mxu0 %vm335_vm1, %v314_v2 }
  0x90   : > { %8340 = vmatmul.mubr.msk.f32.gmra.mxu0 %vm335_vm1, %v315_v3 }
  0x91   : > { %8342 = vmatprep.mubr.msk.f32.mxu0 %vm335_vm1, %v316_v4 }
  0x94   : > { %8343 = vmatmul.mubr.msk.f32.gmra.mxu0 %vm335_vm1, %v317_v5 }
  0x95   : > { %8345 = vmatprep.mubr.msk.f32.mxu0 %vm335_vm1, %v318_v6 }
  0x98   : > { %8346 = vmatmul.mubr.msk.f32.gmra.mxu0 %vm335_vm1, %v319_v7 }
  0x99   : > { %8348 = vmatprep.mubr.msk.f32.mxu0 %vm335_vm1, %v320_v8 }
  0x9c   : > { %8349 = vmatmul.mubr.msk.f32.gmra.mxu0 %vm335_vm1, %v321_v9 }
  0x9d   : > { %8351 = vmatprep.mubr.msk.f32.mxu0 %vm335_vm1, %v322_v10 }
  0xa0   : > { %8352 = vmatmul.mubr.msk.f32.gmra.mxu0 %vm335_vm1, %v323_v11 }
  0xd4   : > { %v8248_v12 = vpop.f32.mrf.mxu0 }
  0xd5   : > { %v628_v28 = vadd.f32 %v8248_v12, %v9855_v25 }
  0xd6   : > { %v9840_v13 = vpop.f32.mrf.mxu0 }
  0xd7   : > { %v1055_v31 = vmul.f32 1.442695, %v628_v28  ;;  %vm982_vm2 = vcmp.gt.f32.partialorder %v628_v28, 0.0 }
  0xd8   : > { %v8251_v14 = vpop.f32.mrf.mxu0 }
  0xd9   : > { %v9867_v32 = vadd.f32 %v8251_v14, %v9855_v25  ;;  %9464 = vpow2.f32 %v1055_v31 }
  0xda   : > { %v9842_v15 = vpop.f32.mrf.mxu0 }
  0xdb   : > { %v1059_v38 = vmul.f32 1.442695, %v9867_v32  ;;  %vm984_vm4 = vcmp.gt.f32.partialorder %v9867_v32, 0.0 }
  0xdc   : > { %v8254_v16 = vpop.f32.mrf.mxu0 }
  0xdd   : > { %v9873_v36 = vadd.f32 %v8254_v16, %v9855_v25 }
  0xde   : > { %v9844_v17 = vpop.f32.mrf.mxu0 }
  0xdf   : > { %v1063_v43 = vmul.f32 1.442695, %v9873_v36  ;;  %vm986_vm6 = vcmp.gt.f32.partialorder %v9873_v36, 0.0 }
  0xe0   : > { %v8257_v18 = vpop.f32.mrf.mxu0 }
  0xe1   : > { %v9880_v40 = vadd.f32 %v8257_v18, %v9855_v25 }
  0xe2   : > { %v9846_v19 = vpop.f32.mrf.mxu0 }
  0xe3   : > { %v1067_v46 = vmul.f32 1.442695, %v9880_v40  ;;  %vm988_vm8 = vcmp.gt.f32.partialorder %v9880_v40, 0.0 }
  0xe4   : > { %v8260_v20 = vpop.f32.mrf.mxu0 }
  0xe5   : > { %v9888_v47 = vadd.f32 %v8260_v20, %v9855_v25 }
  0xe6   : > { %v9848_v21 = vpop.f32.mrf.mxu0  ;;  %v9465_v56 = vpop.eup %9464 }
  0xe7   : > { %v1071_v53 = vmul.f32 1.442695, %v9888_v47  ;;  %v6895_v61 = vadd.f32 -1.0, %v9465_v56  ;;  %vm990_vm11 = vcmp.gt.f32.partialorder %v9888_v47, 0.0 }
  0xe8   : > { %v8263_v22 = vpop.f32.mrf.mxu0 }
  0xe9   : > { %v9903_v58 = vadd.f32 %v8263_v22, %v9855_v25  ;;  %v9916_v7 = vsel %vm982_vm2, %v628_v28, %v6895_v61 }
  0xea   : > { %v9850_v23 = vpop.f32.mrf.mxu0 }
  0xeb   : > { %v1075_v2 = vmul.f32 1.442695, %v9903_v58  ;;  %vm992_vm14 = vcmp.gt.f32.partialorder %v9903_v58, 0.0 }
  0xec   : > { %v8266_v24 = vpop.f32.mrf.mxu0 }
  0xed   : > { %v9913_v3 = vadd.f32 %v8266_v24, %v9855_v25 }
  0xee   : > { %v9857_v26 = vpop.f32.mrf.mxu0 }
  0xef   : > { %v1079_v18 = vmul.f32 1.442695, %v9913_v3  ;;  %vm994_vm0 = vcmp.gt.f32.partialorder %v9913_v3, 0.0 }
  0xf0   : > { %v9859_v27 = vpop.f32.mrf.mxu0 }
  0xf1   : > { %v9930_v20 = vadd.f32 %v9859_v27, %v9855_v25 }
  0xf2   : > { %v9862_v29 = vpop.f32.mrf.mxu0 }
  0xf3   : > { %vm996_vm2 = vcmp.gt.f32.partialorder %v9930_v20, 0.0 }
  0xf4   : > { %v9864_v30 = vpop.f32.mrf.mxu0 }
  0xf5   : > { %v9934_v24 = vadd.f32 %v9864_v30, %v9855_v25 }
  0xf6   : > { %v9869_v33 = vpop.f32.mrf.mxu0 }
  0xf8   : > { %v8275_v35 = vpop.f32.mrf.mxu0 }
  0xf9   : > { %v718_v37 = vadd.f32 %v8275_v35, %v9855_v25 }
  0xfa   : > { %v9877_v39 = vpop.f32.mrf.mxu0 }
  0xfb   : > { %v1091_v41 = vmul.f32 1.442695, %v718_v37  ;;  %vm1000_vm3 = vcmp.gt.f32.partialorder %v718_v37, 0.0  ;;  %v10101_v34 = vadd.f32 %v9855_v25, %v9877_v39 }
  0xfc   : > { %v8278_v42 = vpop.f32.mrf.mxu0 }
  0xfd   : > { %9466 = vpow2.f32 %v1091_v41  ;;  %v728_v44 = vadd.f32 %v8278_v42, %v9855_v25  ;;  %14226 = vst [vmem:[#allocation14_spill] sm:$0xff] %v10101_v34 }
  0xfe   : > { %9468 = vpow2.f32 %v1059_v38  ;;  %v9884_v45 = vpop.f32.mrf.mxu0 }
  0xff   : > { %v1095_v48 = vmul.f32 1.442695, %v728_v44  ;;  %9470 = vpow2.f32 %v1063_v43  ;;  %vm1002_vm5 = vcmp.gt.f32.partialorder %v728_v44, 0.0  ;;  %v10118_v39 = vadd.f32 %v9855_v25, %v9884_v45 }
 0x100   : > { %v8281_v49 = vpop.f32.mrf.mxu0 }
 0x101   : > { %v9891_v50 = vadd.f32 %v8281_v49, %v9855_v25  ;;  %9472 = vpow2.f32 %v1095_v48  ;;  %v1087_v49 = vmul.f32 1.442695, %v9934_v24  ;;  %14227 = vst [vmem:[#allocation15_spill] sm:$0xff] %v10118_v39 }
 0x102   : > { %v9893_v51 = vpop.f32.mrf.mxu0  ;;  %9474 = vpow2.f32 %v1067_v46  ;;  %v1083_v46 = vmul.f32 1.442695, %v9930_v20 }
 0x103   : > { %v1099_v52 = vmul.f32 1.442695, %v9891_v50  ;;  %vm1004_vm7 = vcmp.gt.f32.partialorder %v9891_v50, 0.0 }
 0x104   : > { %v8284_v54 = vpop.f32.mrf.mxu0 }
 0x105   : > { %9476 = vpow2.f32 %v1099_v52  ;;  %v9898_v55 = vadd.f32 %v8284_v54, %v9855_v25 }
 0x106   : > { %v9900_v57 = vpop.f32.mrf.mxu0  ;;  %9478 = vpow2.f32 %v1071_v53 }
 0x107   : > { %v1103_v59 = vmul.f32 1.442695, %v9898_v55  ;;  %vm1006_vm9 = vcmp.gt.f32.partialorder %v9898_v55, 0.0 }
 0x108   : > { %v8287_v60 = vpop.f32.mrf.mxu0 }
 0x109   : > { %9480 = vpow2.f32 %v1103_v59  ;;  %v9907_v62 = vadd.f32 %v8287_v60, %v9855_v25 }
 0x10a   : > { %v9467_v63 = vpop.eup %9466  ;;  %v9909_v0 = vpop.f32.mrf.mxu0 }
 0x10b   : > { %v9469_v1 = vpop.eup %9468  ;;  %v6913_v4 = vadd.f32 -1.0, %v9467_v63  ;;  %v1107_v5 = vmul.f32 1.442695, %v9907_v62  ;;  %vm1008_vm12 = vcmp.gt.f32.partialorder %v9907_v62, 0.0 }
 0x10c   : > { %v8290_v6 = vpop.f32.mrf.mxu0  ;;  %v9471_v9 = vpop.eup %9470  ;;  %v6897_v10 = vadd.f32 -1.0, %v9469_v1 }
 0x10d   : > { %v9918_v8 = vsel %vm1000_vm3, %v718_v37, %v6913_v4  ;;  %9482 = vpow2.f32 %v1107_v5  ;;  %v9921_v11 = vadd.f32 %v8290_v6, %v9855_v25  ;;  %v6899_v37 = vadd.f32 -1.0, %v9471_v9  ;;  %v1396_v9 = vld [vmem:[%s14168_s1 + $0x8] sm:$0xff] }
 0x10e   : > { %v9923_v12 = vpop.f32.mrf.mxu0  ;;  %v9473_v16 = vpop.eup %9472  ;;  %9484 = vpow2.f32 %v1075_v2  ;;  %v9942_v27 = vsel %vm984_vm4, %v9867_v32, %v6897_v10  ;;  %6966 = vmatprep.mubr.msk.f32.mxu1 %vm1795_vm10, %v1396_v9  ;;  %vm998_vm3 = vcmp.gt.f32.partialorder %v9934_v24, 0.0 }
 0x10f   : > { %v9475_v22 = vpop.eup %9474  ;;  %v6915_v28 = vadd.f32 -1.0, %v9473_v16  ;;  %v1111_v31 = vmul.f32 1.442695, %v9921_v11  ;;  %v9956_v54 = vsel %vm986_vm6, %v9873_v36, %v6899_v37  ;;  %vm1010_vm13 = vcmp.gt.f32.partialorder %v9921_v11, 0.0 }
 0x110   : > { %v8293_v35 = vpop.f32.mrf.mxu0  ;;  %v6901_v43 = vadd.f32 -1.0, %v9475_v22 }
 0x111   : > { %v9939_v38 = vadd.f32 %v8293_v35, %v9855_v25  ;;  %v9945_v42 = vsel %vm1002_vm5, %v728_v44, %v6915_v28  ;;  %9486 = vpow2.f32 %v1111_v31 }
 0x112   : > { %v9477_v41 = vpop.eup %9476  ;;  %v9947_v30 = vpop.f32.mrf.mxu0  ;;  %9488 = vpow2.f32 %v1079_v18  ;;  %v9971_v2 = vsel %vm988_vm8, %v9880_v40, %v6901_v43 }
 0x113   : > { %v6917_v48 = vadd.f32 -1.0, %v9477_v41  ;;  %v1115_v52 = vmul.f32 1.442695, %v9939_v38  ;;  %v9479_v44 = vpop.eup %9478  ;;  %vm1012_vm15 = vcmp.gt.f32.partialorder %v9939_v38, 0.0 }
 0x114   : > { %v8296_v32 = vpop.f32.mrf.mxu0 }
 0x115   : > { %v9959_v56 = vsel %vm1004_vm7, %v9891_v50, %v6917_v48  ;;  %v9962_v59 = vadd.f32 %v8296_v32, %v9855_v25  ;;  %9490 = vpow2.f32 %v1115_v52  ;;  %v6903_v50 = vadd.f32 -1.0, %v9479_v44 }
 0x116   : > { %v9481_v60 = vpop.eup %9480  ;;  %v9964_v61 = vpop.f32.mrf.mxu0  ;;  %9492 = vpow2.f32 %v1083_v46 }
 0x117   : > { %v6919_v1 = vadd.f32 -1.0, %v9481_v60  ;;  %v1119_v36 = vmul.f32 1.442695, %v9962_v59  ;;  %9494 = vpow2.f32 %v1087_v49  ;;  %v9991_v31 = vsel %vm990_vm11, %v9888_v47, %v6903_v50 }
 0x118   : > { %v8299_v4 = vpop.f32.mrf.mxu0  ;;  %14214 = vst [vmem:[#allocation2_spill] sm:$0xff] %v9991_v31  ;;  %vm1014_vm1 = vcmp.gt.f32.partialorder %v9962_v59, 0.0  ;;  %v10125_v53 = vadd.f32 %v9855_v25, %v9964_v61  ;;  %v1093_v61 = vmul.f32 1.442695, %v10118_v39 }
 0x119   : > { %v9975_v5 = vsel %vm1006_vm9, %v9898_v55, %v6919_v1  ;;  %9496 = vpow2.f32 %v1119_v36  ;;  %v798_v6 = vadd.f32 %v8299_v4, %v9855_v25 }
 0x11a   : > { %v9483_v10 = vpop.eup %9482  ;;  %v9981_v16 = vpop.f32.mrf.mxu0 }
 0x11b   : > { %v6921_v18 = vadd.f32 -1.0, %v9483_v10  ;;  %v1123_v22 = vmul.f32 1.442695, %v798_v6  ;;  %v9485_v55 = vpop.eup %9484  ;;  %vm1016_vm4 = vcmp.gt.f32.partialorder %v798_v6, 0.0 }
 0x11c   : > { %v9988_v28 = vpop.f32.mrf.mxu0  ;;  %v6905_v46 = vadd.f32 -1.0, %v9485_v55 }
 0x11d   : > { %v9994_v35 = vsel %vm1008_vm12, %v9907_v62, %v6921_v18  ;;  %9498 = vpow2.f32 %v1123_v22  ;;  %v10113_v63 = vadd.f32 %v9988_v28, %v9855_v25 }
 0x11e   : > { %14215 = vst [vmem:[#allocation3_spill] sm:$0xff] %v9994_v35  ;;  %v9996_v37 = vpop.f32.mrf.mxu0  ;;  %v9487_v43 = vpop.eup %9486  ;;  %v10010_v44 = vsel %vm992_vm14, %v9903_v58, %v6905_v46 }
 0x11f   : > { %v9489_v48 = vpop.eup %9488  ;;  %v6923_v49 = vadd.f32 -1.0, %v9487_v43  ;;  %14217 = vst [vmem:[#allocation5_spill] sm:$0xff] %v10010_v44  ;;  %v1127_v45 = vmul.f32 1.442695, %v10113_v63  ;;  %v10193_v35 = vadd.f32 %v9855_v25, %v9996_v37  ;;  %vm1018_vm8 = vcmp.gt.f32.partialorder %v10113_v63, 0.0 }
 0x120   : > { %v10000_v52 = vpop.f32.mrf.mxu0  ;;  %v6907_v60 = vadd.f32 -1.0, %v9489_v48 }
 0x121   : > { %v10005_v47 = vsel %vm1010_vm13, %v9921_v11, %v6923_v49  ;;  %14232 = vst [vmem:[#allocation20_spill] sm:$0xff] %v10193_v35 }
 0x122   : > { %14216 = vst [vmem:[#allocation4_spill] sm:$0xff] %v10005_v47  ;;  %v10007_v62 = vpop.f32.mrf.mxu0  ;;  %v9491_v32 = vpop.eup %9490  ;;  %v10024_v58 = vsel %vm994_vm0, %v9913_v3, %v6907_v60 }
 0x123   : > { %v9493_v1 = vpop.eup %9492  ;;  %v6925_v36 = vadd.f32 -1.0, %v9491_v32  ;;  %14219 = vst [vmem:[#allocation7_spill] sm:$0xff] %v10024_v58 }
 0x124   : > { %v10012_v50 = vpop.f32.mrf.mxu0  ;;  %v9495_v9 = vpop.eup %9494  ;;  %v6909_v22 = vadd.f32 -1.0, %v9493_v1 }
 0x125   : > { %v10019_v11 = vsel %vm1012_vm15, %v9939_v38, %v6925_v36  ;;  %v6911_v48 = vadd.f32 -1.0, %v9495_v9  ;;  %v10106_v36 = vadd.f32 %v9855_v25, %v9947_v30  ;;  %v1089_v30 = vmul.f32 1.442695, %v10101_v34 }
 0x126   : > { %v9497_v10 = vpop.eup %9496  ;;  %14218 = vst [vmem:[#allocation6_spill] sm:$0xff] %v10019_v11  ;;  %v10021_v18 = vpop.f32.mrf.mxu0  ;;  %v10038_v60 = vsel %vm996_vm2, %v9930_v20, %v6909_v22  ;;  %v10056_v20 = vadd.f32 %v9855_v25, %v9850_v23  ;;  %v10060_v22 = vadd.f32 %v9855_v25, %v9848_v21  ;;  %v10076_v23 = vadd.f32 %v9855_v25, %v9840_v13 }
 0x127   : > { %v6927_v55 = vadd.f32 -1.0, %v9497_v10  ;;  %v10046_v9 = vsel %vm998_vm3, %v9934_v24, %v6911_v48  ;;  %v10066_v24 = vadd.f32 %v9855_v25, %v9857_v26  ;;  %v10081_v21 = vadd.f32 %v9855_v25, %v9842_v15 }
 0x128   : > { %v10026_v43 = vpop.f32.mrf.mxu0  ;;  %14220 = vst [vmem:[#allocation8_spill] sm:$0xff] %v10046_v9  ;;  %14222 = vst [vmem:[#allocation10_spill] sm:$0xff] %v10076_v23  ;;  %v10093_v13 = vadd.f32 %v9855_v25, %v9846_v19  ;;  %v1053_v15 = vmul.f32 1.442695, %v10076_v23  ;;  %v1113_v28 = vmul.f32 1.442695, %v10106_v36 }
 0x129   : > { %v10035_v32 = vsel %vm1014_vm1, %v9962_v59, %v6927_v55  ;;  %14223 = vst [vmem:[#allocation11_spill] sm:$0xff] %v10081_v21  ;;  %v1077_v4 = vmul.f32 1.442695, %v10066_v24  ;;  %vm991_vm5 = vcmp.gt.f32.partialorder %v10056_v20, 0.0  ;;  %vm993_vm6 = vcmp.gt.f32.partialorder %v10066_v24, 0.0 }
 0x12a   : > { %v9499_v49 = vpop.eup %9498  ;;  %v10032_v38 = vpop.f32.mrf.mxu0  ;;  %14225 = vst [vmem:[#allocation13_spill] sm:$0xff] %v10093_v13  ;;  %vm1011_vm1 = vcmp.gt.f32.partialorder %v10106_v36, 0.0  ;;  %vm1013_vm2 = vcmp.gt.f32.partialorder %v10125_v53, 0.0 }
 0x12b   : > { %v6929_v3 = vadd.f32 -1.0, %v9499_v49  ;;  %v1073_v49 = vmul.f32 1.442695, %v10056_v20 }
 0x12c   : > { %v10041_v1 = vpop.f32.mrf.mxu0 }
 0x12d   : > { %v10048_v10 = vsel %vm1016_vm4, %v798_v6, %v6929_v3  ;;  %v10070_v6 = vadd.f32 %v9855_v25, %v9862_v29  ;;  %v1069_v3 = vmul.f32 1.442695, %v10060_v22  ;;  %v10088_v29 = vadd.f32 %v9855_v25, %v9844_v17 }
 0x12e   : > { %14221 = vst [vmem:[#allocation9_spill] sm:$0xff] %v10048_v10  ;;  %v10050_v41 = vpop.f32.mrf.mxu0  ;;  %9500 = vpow2.f32 %v1073_v49  ;;  %v1057_v17 = vmul.f32 1.442695, %v10081_v21  ;;  %v1065_v49 = vmul.f32 1.442695, %v10093_v13 }
 0x12f   : > { %14224 = vst [vmem:[#allocation12_spill] sm:$0xff] %v10088_v29  ;;  %v1081_v46 = vmul.f32 1.442695, %v10070_v6  ;;  %9502 = vpow2.f32 %v1069_v3  ;;  %v1061_v40 = vmul.f32 1.442695, %v10088_v29  ;;  %vm995_vm7 = vcmp.gt.f32.partialorder %v10070_v6, 0.0 }
 0x130   : > { %v10062_v55 = vpop.f32.mrf.mxu0  ;;  %9504 = vpow2.f32 %v1077_v4  ;;  %v10130_v4 = vadd.f32 %v10000_v52, %v9855_v25  ;;  %v1117_v52 = vmul.f32 1.442695, %v10125_v53 }
 0x131   : > { %9506 = vpow2.f32 %v1081_v46 }
 0x132   : > { %v10072_v48 = vpop.f32.mrf.mxu0  ;;  %9508 = vpow2.f32 %v1053_v15  ;;  %v10137_v15 = vadd.f32 %v10012_v50, %v9855_v25  ;;  %v1131_v50 = vmul.f32 1.442695, %v10130_v4  ;;  %vm1020_vm9 = vcmp.gt.f32.partialorder %v10130_v4, 0.0 }
 0x133   : > { %9510 = vpow2.f32 %v1057_v17  ;;  %v10144_v17 = vadd.f32 %v9855_v25, %v9893_v51 }
 0x134   : > { %v10084_v26 = vpop.f32.mrf.mxu0  ;;  %9512 = vpow2.f32 %v1061_v40  ;;  %v10149_v40 = vadd.f32 %v9855_v25, %v9900_v57  ;;  %vm1022_vm11 = vcmp.gt.f32.partialorder %v10137_v15, 0.0 }
 0x135   : > { %9514 = vpow2.f32 %v1065_v49  ;;  %14228 = vst [vmem:[#allocation16_spill] sm:$0xff] %v10144_v17  ;;  %v1135_v49 = vmul.f32 1.442695, %v10137_v15  ;;  %v1097_v57 = vmul.f32 1.442695, %v10144_v17 }
 0x136   : > { %v10096_v59 = vpop.f32.mrf.mxu0  ;;  %9516 = vpow2.f32 %v1089_v30  ;;  %14229 = vst [vmem:[#allocation17_spill] sm:$0xff] %v10149_v40  ;;  %v10155_v30 = vadd.f32 %v10026_v43, %v9855_v25  ;;  %v1101_v21 = vmul.f32 1.442695, %v10149_v40  ;;  %v10171_v43 = vadd.f32 %v9855_v25, %v9923_v12 }
 0x137   : > { %9518 = vpow2.f32 %v1113_v28  ;;  %v10166_v28 = vadd.f32 %v9855_v25, %v9909_v0  ;;  %v10182_v12 = vadd.f32 %v9855_v25, %v9869_v33 }
 0x138   : > { %v10108_v19 = vpop.f32.mrf.mxu0  ;;  %9520 = vpow2.f32 %v1127_v45  ;;  %v1139_v29 = vmul.f32 1.442695, %v10155_v30  ;;  %v1109_v33 = vmul.f32 1.442695, %v10171_v43  ;;  %vm1024_vm13 = vcmp.gt.f32.partialorder %v10155_v30, 0.0 }
 0x139   : > { %9522 = vpow2.f32 %v1093_v61  ;;  %14230 = vst [vmem:[#allocation18_spill] sm:$0xff] %v10182_v12  ;;  %vm1009_vm3 = vcmp.gt.f32.partialorder %v10171_v43, 0.0 }
 0x13a   : > { %v10120_v3 = vpop.f32.mrf.mxu0  ;;  %9524 = vpow2.f32 %v1117_v52 }
 0x13b   : > { %v9501_v45 = vpop.eup %9500  ;;  %9526 = vpow2.f32 %v1131_v50  ;;  %v10186_v50 = vadd.f32 %v9855_v25, %v9981_v16  ;;  %v10200_v16 = vadd.f32 %v9855_v25, %v10007_v62  ;;  %v10215_v62 = vadd.f32 %v9855_v25, %v10021_v18 }
 0x13c   : > { %v10132_v46 = vpop.f32.mrf.mxu0  ;;  %v9503_v39 = vpop.eup %9502  ;;  %9528 = vpow2.f32 %v1135_v49  ;;  %v6904_v13 = vadd.f32 -1.0, %v9501_v45 }
 0x13d   : > { %v9505_v52 = vpop.eup %9504  ;;  %14231 = vst [vmem:[#allocation19_spill] sm:$0xff] %v10186_v50  ;;  %14234 = vst [vmem:[#allocation22_spill] sm:$0xff] %v10200_v16  ;;  %v1121_v44 = vmul.f32 1.442695, %v10186_v50 }
 0x13e   : > { %v10140_v14 = vpop.f32.mrf.mxu0  ;;  %v9507_v49 = vpop.eup %9506  ;;  %v6906_v47 = vadd.f32 -1.0, %v9505_v52  ;;  %14238 = vst [vmem:[#allocation26_spill] sm:$0xff] %v10215_v62  ;;  %v10232_v18 = vsel %vm991_vm5, %v10056_v20, %v6904_v13 }
 0x13f   : > { %v10195_v31 = vpop.eup %9508  ;;  %14242 = vst [vmem:[#allocation30_spill] sm:$0xff] %v10232_v18 }
 0x140   : > { %v8329_v23 = vpop.f32.mrf.mxu0  ;;  %14233 = vst [vmem:[#allocation21_spill] sm:$0xff] %v10195_v31  ;;  %v10203_v45 = vpop.eup %9510 }
 0x141   : > { %v10158_v51 = vadd.f32 %v8329_v23, %v9855_v25  ;;  %14235 = vst [vmem:[#allocation23_spill] sm:$0xff] %v10203_v45  ;;  %v10210_v31 = vpop.eup %9512 }
 0x142   : > { %v10160_v34 = vpop.f32.mrf.mxu0  ;;  %14237 = vst [vmem:[#allocation25_spill] sm:$0xff] %v10210_v31  ;;  %v10219_v45 = vpop.eup %9514 }
 0x143   : > { %v1163_v23 = vmul.f32 1.442695, %v10158_v51  ;;  %14239 = vst [vmem:[#allocation27_spill] sm:$0xff] %v10219_v45  ;;  %v10227_v52 = vpop.eup %9516  ;;  %vm1036_vm12 = vcmp.gt.f32.partialorder %v10158_v51, 0.0 }
 0x144   : > { %v8332_v61 = vpop.f32.mrf.mxu0  ;;  %14241 = vst [vmem:[#allocation29_spill] sm:$0xff] %v10227_v52  ;;  %v9519_v50 = vpop.eup %9518 }
 0x145   : > { %v10177_v0 = vadd.f32 %v8332_v61, %v9855_v25  ;;  %9530 = vpow2.f32 %v1163_v23  ;;  %v1105_v61 = vmul.f32 1.442695, %v10166_v28  ;;  %v9521_v13 = vpop.eup %9520  ;;  %v10278_v52 = vadd.f32 -1.0, %v9519_v50 }
 0x146   : > { %v10188_v17 = vpop.f32.mrf.mxu0  ;;  %9532 = vpow2.f32 %v1097_v57  ;;  %v10205_v57 = vadd.f32 -1.0, %v9503_v39  ;;  %v10224_v39 = vadd.f32 %v10041_v1, %v9855_v25  ;;  %v10241_v1 = vsel %vm993_vm6, %v10066_v24, %v6906_v47 }
 0x147   : > { %9534 = vpow2.f32 %v1101_v21  ;;  %v1167_v23 = vmul.f32 1.442695, %v10177_v0  ;;  %v6908_v21 = vadd.f32 -1.0, %v9507_v49  ;;  %v10235_v49 = vmul.f32 1.442695, %v10182_v12 }
 0x148   : > { %v8335_v40 = vpop.f32.mrf.mxu0  ;;  %14236 = vst [vmem:[#allocation24_spill] sm:$0xff] %v10205_v57  ;;  %9536 = vpow2.f32 %v1139_v29  ;;  %v1125_v29 = vmul.f32 1.442695, %v10193_v35  ;;  %14240 = vst [vmem:[#allocation28_spill] sm:$0xff] %v10224_v39  ;;  %v10245_v35 = vadd.f32 %v10062_v55, %v9855_v25  ;;  %v1133_v12 = vmul.f32 1.442695, %v10215_v62  ;;  %v10262_v55 = vpop.eup %9522 }
 0x149   : > { %v10208_v37 = vadd.f32 %v8335_v40, %v9855_v25  ;;  %9538 = vpow2.f32 %v1167_v23  ;;  %14243 = vst [vmem:[#allocation31_spill] sm:$0xff] %v10235_v49  ;;  %v10258_v47 = vadd.f32 %v9855_v25, %v10072_v48  ;;  %14245 = vst [vmem:[#allocation33_spill] sm:$0xff] %v10262_v55  ;;  %v10274_v48 = vadd.f32 %v9855_v25, %v10096_v59 }
 0x14a   : > { %v10217_v11 = vpop.f32.mrf.mxu0  ;;  %9540 = vpow2.f32 %v1105_v61  ;;  %v1129_v61 = vmul.f32 1.442695, %v10200_v16  ;;  %v6931_v16 = vadd.f32 -1.0, %v9521_v13  ;;  %v10294_v13 = vadd.f32 %v9855_v25, %v10120_v3 }
 0x14b   : > { %v1171_v40 = vmul.f32 1.442695, %v10208_v37  ;;  %9542 = vpow2.f32 %v1109_v33  ;;  %v10253_v33 = vsel %vm995_vm7, %v10070_v6, %v6908_v21  ;;  %14244 = vst [vmem:[#allocation32_spill] sm:$0xff] %v10258_v47  ;;  %v1145_v62 = vmul.f32 1.442695, %v10258_v47 }
 0x14c   : > { %v8338_v23 = vpop.f32.mrf.mxu0  ;;  %v1149_v57 = vmul.f32 1.442695, %v10274_v48  ;;  %v10310_v3 = vadd.f32 %v9855_v25, %v10032_v38  ;;  %v10317_v47 = vadd.f32 %v9855_v25, %v10050_v41  ;;  %vm1038_vm14 = vcmp.gt.f32.partialorder %v10177_v0, 0.0 }
 0x14d   : > { %9544 = vpow2.f32 %v1171_v40  ;;  %v10248_v20 = vadd.f32 %v8338_v23, %v9855_v25  ;;  %v1143_v40 = vmul.f32 1.442695, %v10224_v39  ;;  %v10267_v23 = vadd.f32 %v10084_v26, %v9855_v25 }
 0x14e   : > { %9546 = vpow2.f32 %v1121_v44  ;;  %v10260_v24 = vpop.f32.mrf.mxu0  ;;  %v9525_v44 = vpop.eup %9524  ;;  %v1147_v26 = vmul.f32 1.442695, %v10245_v35  ;;  %vm1040_vm15 = vcmp.gt.f32.partialorder %v10208_v37, 0.0  ;;  %vm1028_vm4 = vcmp.gt.f32.partialorder %v10245_v35, 0.0 }
 0x14f   : > { %9548 = vpow2.f32 %v1125_v29  ;;  %v1175_v6 = vmul.f32 1.442695, %v10248_v20  ;;  %v9527_v29 = vpop.eup %9526  ;;  %v10289_v49 = vadd.f32 -1.0, %v9525_v44  ;;  %v1151_v50 = vmul.f32 1.442695, %v10267_v23 }
 0x150   : > { %9550 = vpow2.f32 %v1129_v61  ;;  %v10276_v21 = vpop.f32.mrf.mxu0  ;;  %v9529_v55 = vpop.eup %9528  ;;  %v10285_v61 = vadd.f32 %v10108_v19, %v9855_v25  ;;  %v10301_v19 = vadd.f32 %v10132_v46, %v9855_v25  ;;  %vm1042_vm0 = vcmp.gt.f32.partialorder %v10248_v20, 0.0 }
 0x151   : > { %9552 = vpow2.f32 %v1175_v6  ;;  %vm1030_vm5 = vcmp.gt.f32.partialorder %v10267_v23, 0.0  ;;  %vm1031_vm7 = vcmp.gt.f32.partialorder %v10294_v13, 0.0 }
 0x152   : > { %9554 = vpow2.f32 %v1133_v12  ;;  %v10287_v59 = vpop.f32.mrf.mxu0  ;;  %v9531_v31 = vpop.eup %9530  ;;  %v6933_v12 = vadd.f32 -1.0, %v9527_v29  ;;  %v1155_v46 = vmul.f32 1.442695, %v10285_v61  ;;  %vm1032_vm6 = vcmp.gt.f32.partialorder %v10285_v61, 0.0 }
 0x153   : > { %9556 = vpow2.f32 %v1143_v40  ;;  %v10296_v6 = vpop.eup %9532  ;;  %v6949_v45 = vadd.f32 -1.0, %v9531_v31  ;;  %v1306_v40 = vsel %vm1018_vm8, %v10113_v63, %v6931_v16  ;;  %v1153_v63 = vmul.f32 1.442695, %v10294_v13 }
 0x154   : > { %14246 = vst [vmem:[#allocation34_spill] sm:$0xff] %v10296_v6  ;;  %v8344_v18 = vpop.f32.mrf.mxu0  ;;  %v10303_v44 = vpop.eup %9534  ;;  %9558 = vpow2.f32 %v1147_v26  ;;  %v6935_v6 = vadd.f32 -1.0, %v9529_v55  ;;  %vm1029_vm8 = vcmp.gt.f32.partialorder %v10274_v48, 0.0 }
 0x155   : > { %v9537_v29 = vpop.eup %9536  ;;  %9560 = vpow2.f32 %v1145_v62  ;;  %v1324_v31 = vsel %vm1036_vm12, %v10158_v51, %v6949_v45  ;;  %v1308_v62 = vsel %vm1020_vm9, %v10130_v4, %v6933_v12  ;;  %v1159_v51 = vmul.f32 1.442695, %v10301_v19 }
 0x156   : > { %v942_v39 = vpop.f32.mrf.mxu0  ;;  %v9539_v58 = vpop.eup %9538  ;;  %9562 = vpow2.f32 %v1151_v50  ;;  %v1360_v38 = vmax.f32 %v1306_v40, %v1324_v31  ;;  %v10329_v41 = vadd.f32 %v8344_v18, %v9855_v25  ;;  %v14247_v40 = vmax.f32 %v9916_v7, %v9918_v8 }
 0x157   : > { %v10320_v16 = vpop.eup %9540  ;;  %9564 = vpow2.f32 %v1149_v57  ;;  %v6951_v45 = vadd.f32 -1.0, %v9539_v58  ;;  %v1310_v58 = vsel %vm1022_vm11, %v10137_v15, %v6935_v6  ;;  %v6937_v57 = vadd.f32 -1.0, %v9537_v29 }
 0x158   : > { %v8347_v55 = vpop.f32.mrf.mxu0  ;;  %v9543_v26 = vpop.eup %9542  ;;  %v10337_v4 = vmax.f32 %v14247_v40, %v1360_v38  ;;  %9566 = vpow2.f32 %v1155_v46  ;;  %v10346_v9 = vadd.f32 %v9855_v25, %v942_v39  ;;  %v10360_v39 = vadd.f32 %v10276_v21, %v9855_v25 }
 0x159   : > { %v10332_v50 = vadd.f32 %v8347_v55, %v9855_v25  ;;  %v1326_v31 = vsel %vm1038_vm14, %v10177_v0, %v6951_v45  ;;  %9568 = vpow2.f32 %v1153_v63  ;;  %v1183_v63 = vmul.f32 1.442695, %v10329_v41 }
 0x15a   : > { %14248 = vst [vmem:[#allocation35_spill] sm:$0xff] %v10337_v4  ;;  %v9545_v12 = vpop.eup %9544  ;;  %v952_v10 = vpop.f32.mrf.mxu0  ;;  %9570 = vpow2.f32 %v1159_v51  ;;  %v1362_v0 = vmax.f32 %v1308_v62, %v1326_v31  ;;  %v14249_v62 = vmax.f32 %v9942_v27, %v9945_v42  ;;  %v1181_v31 = vmul.f32 1.442695, %v10346_v9 }
 0x15b   : > { %v10343_v18 = vpop.eup %9546  ;;  %v6953_v55 = vadd.f32 -1.0, %v9545_v12  ;;  %v1187_v7 = vmul.f32 1.442695, %v10332_v50  ;;  %v10353_v15 = vadd.f32 %v9855_v25, %v952_v10  ;;  %v14250_v42 = vmax.f32 %v9956_v54, %v9959_v56 }
 0x15c   : > { %v10349_v8 = vpop.eup %9548  ;;  %v8350_v6 = vpop.f32.mrf.mxu0  ;;  %v10370_v12 = vmax.f32 %v14249_v62, %v1362_v0  ;;  %v6922_v56 = vadd.f32 -1.0, %v9543_v26  ;;  %v1141_v26 = vmul.f32 1.442695, %v10317_v47  ;;  %vm1034_vm9 = vcmp.gt.f32.partialorder %v10301_v19, 0.0 }
 0x15d   : > { %v10355_v29 = vpop.eup %9550  ;;  %v1328_v46 = vsel %vm1040_vm15, %v10208_v37, %v6953_v55  ;;  %v10364_v38 = vadd.f32 %v8350_v6, %v9855_v25  ;;  %9572 = vpow2.f32 %v1187_v7  ;;  %v1185_v10 = vmul.f32 1.442695, %v10353_v15 }
 0x15e   : > { %v9553_v51 = vpop.eup %9552  ;;  %v962_v45 = vpop.f32.mrf.mxu0  ;;  %v1364_v40 = vmax.f32 %v1310_v58, %v1328_v46  ;;  %v10379_v7 = vadd.f32 %v9855_v25, %v10287_v59  ;;  %v1312_v46 = vsel %vm1024_vm13, %v10155_v30, %v6937_v57  ;;  %vm1048_vm12 = vcmp.gt.f32.partialorder %v10332_v50, 0.0 }
 0x15f   : > { %v10372_v37 = vpop.eup %9554  ;;  %v6955_v21 = vadd.f32 -1.0, %v9553_v51  ;;  %v1191_v55 = vmul.f32 1.442695, %v10364_v38  ;;  %9574 = vpow2.f32 %v1185_v10  ;;  %v10382_v58 = vadd.f32 %v9855_v25, %v962_v45 }
 0x160   : > { %v9557_v6 = vpop.eup %9556  ;;  %v8353_v27 = vpop.f32.mrf.mxu0  ;;  %v10387_v0 = vmax.f32 %v14250_v42, %v1364_v40  ;;  %v1179_v45 = vmul.f32 1.442695, %v10360_v39  ;;  %v1137_v40 = vmul.f32 1.442695, %v10310_v3  ;;  %v10430_v42 = vadd.f32 %v9855_v25, %v10188_v17 }
 0x161   : > { %v1330_v51 = vsel %vm1042_vm0, %v10248_v20, %v6955_v21  ;;  %9576 = vpow2.f32 %v1191_v55  ;;  %v10394_v59 = vadd.f32 %v8353_v27, %v9855_v25  ;;  %v9559_v10 = vpop.eup %9558  ;;  %v1189_v62 = vmul.f32 1.442695, %v10382_v58 }
 0x162   : > { %9578 = vpow2.f32 %v1183_v63  ;;  %v1366_v4 = vmax.f32 %v1312_v46, %v1330_v51  ;;  %v9561_v54 = vpop.eup %9560  ;;  %v10402_v20 = vadd.f32 %v9855_v25, %v10260_v24  ;;  %v1177_v21 = vmul.f32 1.442695, %v10379_v7 }
 0x163   : > { %9580 = vpow2.f32 %v1181_v31  ;;  %v1195_v30 = vmul.f32 1.442695, %v10394_v59  ;;  %v9563_v57 = vpop.eup %9562  ;;  %v14251_v63 = vmax.f32 %v9971_v2, %v9975_v5  ;;  %v10416_v24 = vsel %vm1011_vm1, %v10106_v36, %v10278_v52 }
 0x164   : > { %9582 = vpow2.f32 %v1189_v62  ;;  %v9565_v27 = vpop.eup %9564  ;;  %v10420_v31 = vsel %vm1013_vm2, %v10125_v53, %v10289_v49  ;;  %v10423_v5 = vadd.f32 -1.0, %v10303_v44  ;;  %v10433_v36 = vsel %vm1009_vm3, %v10171_v43, %v6922_v56 }
 0x165   : > { %v10408_v55 = vmax.f32 %v14251_v63, %v1366_v4  ;;  %9584 = vpow2.f32 %v1195_v30  ;;  %v9567_v2 = vpop.eup %9566  ;;  %v10426_v4 = vadd.f32 -1.0, %v10320_v16  ;;  %v10437_v53 = vadd.f32 %v9855_v25, %v10217_v11 }
 0x166   : > { %9586 = vpow2.f32 %v1179_v45  ;;  %v9569_v46 = vpop.eup %9568  ;;  %v1173_v52 = vmul.f32 1.442695, %v10402_v20  ;;  %v6941_v16 = vadd.f32 -1.0, %v9559_v10  ;;  %v6943_v43 = vadd.f32 -1.0, %v9563_v57 }
 0x167   : > { %9588 = vpow2.f32 %v1137_v40  ;;  %v9571_v49 = vpop.eup %9570  ;;  %v10448_v11 = vadd.f32 %v9855_v25, %v10160_v34  ;;  %v1165_v45 = vmul.f32 1.442695, %v10430_v42  ;;  %v6945_v62 = vadd.f32 -1.0, %v9567_v2 }
 0x168   : > { %9590 = vpow2.f32 %v1177_v21  ;;  %v10453_v56 = vadd.f32 -1.0, %v9557_v6  ;;  %v6944_v40 = vadd.f32 -1.0, %v9569_v46  ;;  %v1169_v10 = vmul.f32 1.442695, %v10437_v53 }
 0x169   : > { %9592 = vpow2.f32 %v1141_v26  ;;  %v10456_v57 = vadd.f32 -1.0, %v9561_v54  ;;  %v6947_v34 = vadd.f32 -1.0, %v9571_v49  ;;  %v10462_v21 = vadd.f32 %v9855_v25, %v10140_v14 }
 0x16a   : > { %v9573_v51 = vpop.eup %9572  ;;  %9594 = vpow2.f32 %v1173_v52  ;;  %v10467_v6 = vsel %vm1028_vm4, %v10245_v35, %v6941_v16  ;;  %v1318_v54 = vsel %vm1030_vm5, %v10267_v23, %v6943_v43  ;;  %v1161_v26 = vmul.f32 1.442695, %v10448_v11  ;;  %v972_v23 = vpop.f32.mrf.mxu0 }
 0x16b   : > { %v6961_v2 = vadd.f32 -1.0, %v9573_v51  ;;  %v6942_v52 = vadd.f32 -1.0, %v9565_v27  ;;  %9596 = vpow2.f32 %v1165_v45  ;;  %v1320_v14 = vsel %vm1032_vm6, %v10285_v61, %v6945_v62 }
 0x16c   : > { %v9575_v30 = vpop.eup %9574  ;;  %v1319_v35 = vsel %vm1031_vm7, %v10294_v13, %v6944_v40  ;;  %9598 = vpow2.f32 %v1169_v10  ;;  %vm1050_vm11 = vcmp.gt.f32.partialorder %v10364_v38, 0.0  ;;  %v1322_v27 = vsel %vm1034_vm9, %v10301_v19, %v6947_v34 }
 0x16d   : > { %v6960_v16 = vadd.f32 -1.0, %v9575_v30  ;;  %vm1052_vm13 = vcmp.gt.f32.partialorder %v10394_v59, 0.0  ;;  %v1336_v13 = vsel %vm1048_vm12, %v10332_v50, %v6961_v2  ;;  %vm1047_vm14 = vcmp.gt.f32.partialorder %v10353_v15, 0.0 }
 0x16e   : > { %v9577_v63 = vpop.eup %9576  ;;  %vm1049_vm15 = vcmp.gt.f32.partialorder %v10382_v58, 0.0  ;;  %v10490_v19 = vadd.f32 %v9855_v25, %v972_v23  ;;  %v14252_v50 = vmax.f32 %v10038_v60, %v10035_v32  ;;  %vm1007_vm0 = vcmp.gt.f32.partialorder %v10166_v28, 0.0 }
 0x16f   : > { %v9579_v46 = vpop.eup %9578  ;;  %v6963_v49 = vadd.f32 -1.0, %v9577_v63  ;;  %v1335_v44 = vsel %vm1047_vm14, %v10353_v15, %v6960_v16  ;;  %vm1046_vm1 = vcmp.gt.f32.partialorder %v10329_v41, 0.0  ;;  %v1317_v15 = vsel %vm1029_vm8, %v10274_v48, %v6942_v52 }
 0x170   : > { %v9581_v17 = vpop.eup %9580  ;;  %v6959_v45 = vadd.f32 -1.0, %v9579_v46  ;;  %vm989_vm2 = vcmp.gt.f32.partialorder %v10060_v22, 0.0  ;;  %9600 = vpow2.f32 %v1161_v26  ;;  %vm1045_vm3 = vcmp.gt.f32.partialorder %v10346_v9, 0.0 }
 0x171   : > { %v9583_v43 = vpop.eup %9582  ;;  %v1338_v61 = vsel %vm1050_vm11, %v10364_v38, %v6963_v49  ;;  %v6958_v63 = vadd.f32 -1.0, %v9581_v17  ;;  %v14253_v16 = vmov 0.0   ;;  %v1193_v52 = vmul.f32 1.442695, %v10490_v19 }
 0x172   : > { %v9585_v51 = vpop.eup %9584  ;;  %v6962_v62 = vadd.f32 -1.0, %v9583_v43  ;;  %v1374_v40 = vmax.f32 %v1320_v14, %v1338_v61  ;;  %v1372_v14 = vmax.f32 %v1318_v54, %v1336_v13  ;;  %v1334_v32 = vsel %vm1046_vm1, %v10329_v41, %v6959_v45  ;;  %v14255_v41 = vld [vmem:[#allocation8_spill] sm:$0xff]  ;;  %v14256_v43 = vld [vmem:[#allocation9_spill] sm:$0xff]  ;;  %v14259_v45 = vld [vmem:[#allocation7_spill] sm:$0xff] }
 0x173   : > { %v9587_v10 = vpop.eup %9586  ;;  %v6965_v30 = vadd.f32 -1.0, %v9585_v51  ;;  %v1333_v48 = vsel %vm1045_vm3, %v10346_v9, %v6958_v63  ;;  %v14258_v51 = vld [vmem:[#allocation32_spill] sm:$0xff]  ;;  %vm1044_vm5 = vcmp.gt.f32.partialorder %v10360_v39, 0.0  ;;  %v1370_v13 = vmax.f32 %v10467_v6, %v1334_v32  ;;  %v14268_v32 = vld [vmem:[#allocation27_spill] sm:$0xff] }
 0x174   : > { %v9589_v34 = vpop.eup %9588  ;;  %v1337_v38 = vsel %vm1049_vm15, %v10382_v58, %v6962_v62  ;;  %v1392_v2 = vmax.f32 %v14252_v50, %v1374_v40  ;;  %v6957_v58 = vadd.f32 -1.0, %v9587_v10  ;;  %vm1027_vm4 = vcmp.gt.f32.partialorder %v14258_v51, 0.0 }
 0x175   : > { %v9591_v46 = vpop.eup %9590  ;;  %v1340_v25 = vsel %vm1052_vm13, %v10394_v59, %v6965_v30  ;;  %v1373_v49 = vmax.f32 %v1319_v35, %v1337_v38  ;;  %v14254_v59 = vmax.f32 %v10253_v33, %v10420_v31  ;;  %v1371_v35 = vmax.f32 %v1317_v15, %v1335_v44  ;;  %v14260_v33 = vld [vmem:[#allocation6_spill] sm:$0xff]  ;;  %v14262_v30 = vld [vmem:[#allocation28_spill] sm:$0xff] }
 0x176   : > { %v9593_v17 = vpop.eup %9592  ;;  %2397 = vmatpush1.msra.mxu1 %v1392_v2  ;;  %v1376_v60 = vmax.f32 %v1322_v27, %v1340_v25  ;;  %v6956_v23 = vadd.f32 -1.0, %v9591_v46  ;;  %v14257_v27 = vmax.f32 %v14255_v41, %v14256_v43  ;;  %v14261_v31 = vmax.f32 %v14259_v45, %v14260_v33  ;;  %v14264_v25 = vld [vmem:[#allocation5_spill] sm:$0xff] }
 0x177   : > { %2398 = vmatprep.subr.mxu1 %v14253_v16  ;;  %v1391_v54 = vmax.f32 %v14254_v59, %v1373_v49  ;;  %v9595_v26 = vpop.eup %9594  ;;  %v6938_v9 = vadd.f32 -1.0, %v9593_v17  ;;  %v1315_v62 = vsel %vm1027_vm4, %v14258_v51, %v10456_v57  ;;  %v1157_v40 = vmul.f32 1.442695, %v10462_v21  ;;  %v14265_v49 = vld [vmem:[#allocation4_spill] sm:$0xff]  ;;  %v14276_v45 = vld [vmem:[#allocation13_spill] sm:$0xff] }
 0x178   : > { %v10517_v61 = vmax.f32 %v14257_v27, %v1376_v60  ;;  %v1390_v44 = vmax.f32 %v14261_v31, %v1372_v14  ;;  %v1332_v10 = vsel %vm1044_vm5, %v10360_v39, %v6957_v58  ;;  %vm1026_vm6 = vcmp.gt.f32.partialorder %v14262_v30, 0.0  ;;  %v9597_v50 = vpop.eup %9596  ;;  %v14275_v27 = vld [vmem:[#allocation34_spill] sm:$0xff] }
 0x179   : > { %2399 = vmatpush1.msra.mxu1 %v1391_v54  ;;  %vm1043_vm7 = vcmp.gt.f32.partialorder %v10379_v7, 0.0  ;;  %v14263_v63 = vmax.f32 %v10241_v1, %v10416_v24  ;;  %v1369_v6 = vmax.f32 %v1315_v62, %v1333_v48  ;;  %v1314_v57 = vsel %vm1026_vm6, %v14262_v30, %v10453_v56  ;;  %v9599_v39 = vpop.eup %9598  ;;  %v14267_v24 = vld [vmem:[#allocation30_spill] sm:$0xff]  ;;  %v14273_v48 = vld [vmem:[#allocation3_spill] sm:$0xff]  ;;  %v14280_v30 = vld [vmem:[#allocation33_spill] sm:$0xff] }
 0x17a   : > { %2400 = vmatprep.subr.mxu1 %v14253_v16  ;;  %v6954_v2 = vadd.f32 -1.0, %v9595_v26  ;;  %v1331_v46 = vsel %vm1043_vm7, %v10379_v7, %v6956_v23  ;;  %9602 = vpow2.f32 %v1193_v52  ;;  %vm1025_vm8 = vcmp.gt.f32.partialorder %v10317_v47, 0.0  ;;  %v14270_v23 = vld [vmem:[#allocation31_spill] sm:$0xff] }
 0x17b   : > { %2401 = vmatpush1.msra.mxu1 %v1390_v44  ;;  %v1389_v38 = vmax.f32 %v14263_v63, %v1371_v35  ;;  %v14266_v14 = vmax.f32 %v14264_v25, %v14265_v49  ;;  %v1351_v17 = vmax.f32 %v14267_v24, %v10433_v36  ;;  %v1368_v15 = vmax.f32 %v1314_v57, %v1332_v10  ;;  %v14269_v36 = vld [vmem:[#allocation24_spill] sm:$0xff]  ;;  %v14284_v24 = vld [vmem:[#allocation22_spill] sm:$0xff] }
 0x17c   : > { %2402 = vmatprep.subr.mxu1 %v14253_v16  ;;  %v1295_v7 = vsel %vm1007_vm0, %v10166_v28, %v10426_v4  ;;  %v6936_v56 = vadd.f32 -1.0, %v9589_v34  ;;  %v1313_v58 = vsel %vm1025_vm8, %v10317_v47, %v6938_v9  ;;  %9604 = vpow2.f32 %v1157_v40  ;;  %v14271_v4 = vld [vmem:[#allocation17_spill] sm:$0xff]  ;;  %v14272_v34 = vld [vmem:[#allocation2_spill] sm:$0xff] }
 0x17d   : > { %2403 = vmatpush1.msra.mxu1 %v1389_v38  ;;  %v1388_v1 = vmax.f32 %v14266_v14, %v1370_v13  ;;  %v6900_v60 = vadd.f32 -1.0, %v14268_v32  ;;  %vm1041_vm9 = vcmp.gt.f32.partialorder %v10402_v20, 0.0  ;;  %v1387_v59 = vmax.f32 %v1351_v17, %v1369_v6  ;;  %v9601_v44 = vpop.eup %9600  ;;  %v14277_v13 = vld [vmem:[#allocation25_spill] sm:$0xff]  ;;  %v14286_v32 = vld [vmem:[#allocation11_spill] sm:$0xff] }
 0x17e   : > { %2404 = vmatprep.subr.mxu1 %v14253_v16  ;;  %v1367_v54 = vmax.f32 %v1313_v58, %v1331_v46  ;;  %v1277_v35 = vsel %vm989_vm2, %v10060_v22, %v14269_v36  ;;  %9606 = vpow2.f32 %v14270_v23  ;;  %v6952_v28 = vadd.f32 -1.0, %v9599_v39  ;;  %v14282_v46 = vld [vmem:[#allocation23_spill] sm:$0xff] }
 0x17f   : > { %2405 = vmatpush1.msra.mxu1 %v1388_v1  ;;  %v1329_v47 = vsel %vm1041_vm9, %v10402_v20, %v6954_v2  ;;  %vm1005_vm11 = vcmp.gt.f32.partialorder %v14271_v4, 0.0  ;;  %vm1023_vm12 = vcmp.gt.f32.partialorder %v10310_v3, 0.0  ;;  %v14274_v52 = vmax.f32 %v14272_v34, %v14273_v48  ;;  %v14283_v1 = vld [vmem:[#allocation15_spill] sm:$0xff] }
 0x180   : > { %2406 = vmatprep.subr.mxu1 %v14253_v16  ;;  %v1349_v43 = vmax.f32 %v1277_v35, %v1295_v7  ;;  %v6916_v26 = vadd.f32 -1.0, %v14275_v27  ;;  %v1293_v22 = vsel %vm1005_vm11, %v14271_v4, %v10423_v5  ;;  %v6934_v51 = vadd.f32 -1.0, %v10372_v37  ;;  %v14279_v37 = vld [vmem:[#allocation26_spill] sm:$0xff]  ;;  %v14289_v4 = vld [vmem:[#allocation20_spill] sm:$0xff] }
 0x181   : > { %2407 = vmatpush1.msra.mxu1 %v1387_v59  ;;  %v1386_v41 = vmax.f32 %v14274_v52, %v1368_v15  ;;  %v1311_v20 = vsel %vm1023_vm12, %v10310_v3, %v6936_v56  ;;  %vm987_vm13 = vcmp.gt.f32.partialorder %v14276_v45, 0.0  ;;  %vm1039_vm14 = vcmp.gt.f32.partialorder %v10437_v53, 0.0  ;;  %v14278_v3 = vld [vmem:[#allocation16_spill] sm:$0xff]  ;;  %v14285_v15 = vld [vmem:[#allocation29_spill] sm:$0xff] }
 0x182   : > { %2408 = vmatprep.subr.mxu1 %v14253_v16  ;;  %v1385_v33 = vmax.f32 %v1349_v43, %v1367_v54  ;;  %v1365_v31 = vmax.f32 %v1311_v20, %v1329_v47  ;;  %v6898_v9 = vadd.f32 -1.0, %v14277_v13  ;;  %v1275_v62 = vsel %vm987_vm13, %v14276_v45, %v6900_v60  ;;  %v14287_v54 = vld [vmem:[#allocation21_spill] sm:$0xff]  ;;  %v14288_v47 = vld [vmem:[#allocation14_spill] sm:$0xff]  ;;  %v14291_v20 = vld [vmem:[#allocation19_spill] sm:$0xff] }
 0x183   : > { %2409 = vmatpush1.msra.mxu1 %v1386_v41  ;;  %v6950_v40 = vadd.f32 -1.0, %v9597_v50  ;;  %v1327_v5 = vsel %vm1039_vm14, %v10437_v53, %v6952_v28  ;;  %vm1003_vm15 = vcmp.gt.f32.partialorder %v14278_v3, 0.0  ;;  %vm1021_vm0 = vcmp.gt.f32.partialorder %v14279_v37, 0.0  ;;  %v14281_v50 = vld [vmem:[#allocation12_spill] sm:$0xff] }
 0x184   : > { %2410 = vmatprep.subr.mxu1 %v14253_v16  ;;  %v1347_v10 = vmax.f32 %v1275_v62, %v1293_v22  ;;  %v6914_v63 = vadd.f32 -1.0, %v14280_v30  ;;  %v1291_v38 = vsel %vm1003_vm15, %v14278_v3, %v6916_v26  ;;  %v6932_v6 = vadd.f32 -1.0, %v10355_v29  ;;  %v1400_v3 = vld [vmem:[%s14168_s1 + $0x28] sm:$0xff]  ;;  %v1401_v30 = vld [vmem:[%s14168_s1 + $0x30] sm:$0xff] }
 0x185   : > { %2411 = vmatpush1.msra.mxu1 %v1385_v33  ;;  %v1309_v57 = vsel %vm1021_vm0, %v14279_v37, %v6934_v51  ;;  %vm985_vm1 = vcmp.gt.f32.partialorder %v14281_v50, 0.0  ;;  %vm1037_vm2 = vcmp.gt.f32.partialorder %v10430_v42, 0.0  ;;  %v6896_v39 = vadd.f32 -1.0, %v14282_v46  ;;  %v1402_v37 = vld [vmem:[%s14168_s1 + $0x38] sm:$0xff]  ;;  %v1407_v46 = vld [vmem:[%s14168_s1 + $0x60] sm:$0xff] }
 0x186   : > { %2412 = vmatprep.subr.mxu1 %v14253_v16  ;;  %v1383_v53 = vmax.f32 %v1347_v10, %v1365_v31  ;;  %v1363_v2 = vmax.f32 %v1309_v57, %v1327_v5  ;;  %v1273_v25 = vsel %vm985_vm1, %v14281_v50, %v6898_v9  ;;  %v6948_v49 = vadd.f32 -1.0, %v9601_v44  ;;  %v14293_v31 = vld [vmem:[#allocation35_spill] sm:$0xff]  ;;  %v1398_v5 = vld [vmem:[%s14168_s1 + $0x18] sm:$0xff]  ;;  %v7180_v10 = vld [vmem:[%s14171_s4 + $0xf0] sm:$0xff] }
 0x187   : > { %2413 = vmatpush1.msra.mxu1 %v10408_v55  ;;  %v1325_v14 = vsel %vm1037_vm2, %v10430_v42, %v6950_v40  ;;  %v9603_v29 = vpop.eup %9602  ;;  %vm1001_vm3 = vcmp.gt.f32.partialorder %v14283_v1, 0.0  ;;  %vm1019_vm4 = vcmp.gt.f32.partialorder %v14284_v24, 0.0  ;;  %v1345_v17 = vmax.f32 %v1273_v25, %v1291_v38  ;;  %v7181_v40 = vld [vmem:[%s14171_s4 + $0xf8] sm:$0xff]  ;;  %v1403_v38 = vld [vmem:[%s14168_s1 + $0x40] sm:$0xff]  ;;  %v7179_v57 = vld [vmem:[%s14171_s4 + $0xe8] sm:$0xff] }
 0x188   : > { %2414 = vmatprep.subr.mxu1 %v14253_v16  ;;  %v6912_v55 = vadd.f32 -1.0, %v14285_v15  ;;  %v1289_v7 = vsel %vm1001_vm3, %v14283_v1, %v6914_v63  ;;  %v6930_v56 = vadd.f32 -1.0, %v10349_v8  ;;  %v1307_v58 = vsel %vm1019_vm4, %v14284_v24, %v6932_v6  ;;  %8354 = vmatprep.subr.mxu0 %v7181_v40  ;;  %v1404_v63 = vld [vmem:[%s14168_s1 + $0x48] sm:$0xff]  ;;  %v1406_v6 = vld [vmem:[%s14168_s1 + $0x58] sm:$0xff]  ;;  %v7178_v25 = vld [vmem:[%s14171_s4 + $0xe0] sm:$0xff] }
 0x189   : > { %2415 = vmatpush1.msra.mxu1 %v1383_v53  ;;  %v9605_v42 = vpop.eup %9604  ;;  %vm983_vm5 = vcmp.gt.f32.partialorder %v14286_v32, 0.0  ;;  %vm1035_vm6 = vcmp.gt.f32.partialorder %v10448_v11, 0.0  ;;  %v1381_v60 = vmax.f32 %v1345_v17, %v1363_v2  ;;  %v1361_v59 = vmax.f32 %v1307_v58, %v1325_v14  ;;  %8355 = vmatpush3.msra.mxu0 %v7181_v40  ;;  %v7517_v50 = vld [vmem:[%s14171_s4 + $0xb78] sm:$0xff]  ;;  %v1405_v53 = vld [vmem:[%s14168_s1 + $0x50] sm:$0xff]  ;;  %v1408_v2 = vld [vmem:[%s14168_s1 + $0x68] sm:$0xff] }
 0x18a   : > { %2416 = vmatprep.subr.mxu1 %v14253_v16  ;;  %v6894_v36 = vadd.f32 -1.0, %v14287_v54  ;;  %v1271_v35 = vsel %vm983_vm5, %v14286_v32, %v6896_v39  ;;  %v1323_v23 = vsel %vm1035_vm6, %v10448_v11, %v6948_v49  ;;  %v6964_v8 = vadd.f32 -1.0, %v9603_v29  ;;  %v14290_v11 = vld [vmem:[#allocation10_spill] sm:$0xff]  ;;  %8356 = vmatprep.subr.mxu0 %v7180_v10  ;;  %v1410_v39 = vld [vmem:[%s14168_s1 + $0x78] sm:$0xff]  ;;  %v1409_v49 = vld [vmem:[%s14168_s1 + $0x70] sm:$0xff] }
 0x18b   : > { %2417 = vmatpush1.msra.mxu1 %v10387_v0  ;;  %v9607_v28 = vpop.eup %9606  ;;  %vm999_vm7 = vcmp.gt.f32.partialorder %v14288_v47, 0.0  ;;  %vm1017_vm8 = vcmp.gt.f32.partialorder %v14289_v4, 0.0  ;;  %vm1051_vm9 = vcmp.gt.f32.partialorder %v10490_v19, 0.0  ;;  %v1343_v0 = vmax.f32 %v1271_v35, %v1289_v7  ;;  %8357 = vmatpush3.msra.mxu0 %v7180_v10  ;;  %v1412_v14 = vld [vmem:[%s14168_s1 + $0x88] sm:$0xff]  ;;  %v1411_v29 = vld [vmem:[%s14168_s1 + $0x80] sm:$0xff]  ;;  %v1414_v1 = vld [vmem:[%s14168_s1 + $0x98] sm:$0xff] }
 0x18c   : > { %2418 = vmatprep.subr.mxu1 %v14253_v16  ;;  %v1287_v34 = vsel %vm999_vm7, %v14288_v47, %v6912_v55  ;;  %v6928_v48 = vadd.f32 -1.0, %v10343_v18  ;;  %v1305_v52 = vsel %vm1017_vm8, %v14289_v4, %v6930_v56  ;;  %v6946_v41 = vadd.f32 -1.0, %v9605_v42  ;;  %8358 = vmatprep.subr.mxu0 %v7179_v57  ;;  %v1413_v24 = vld [vmem:[%s14168_s1 + $0x90] sm:$0xff]  ;;  %v7177_v17 = vld [vmem:[%s14171_s4 + $0xd8] sm:$0xff]  ;;  %v1416_v15 = vld [vmem:[%s14168_s1 + $0xa8] sm:$0xff] }
 0x18d   : > { %2419 = vmatpush1.msra.mxu1 %v1381_v60  ;;  %vm981_vm11 = vcmp.gt.f32.partialorder %v14290_v11, 0.0  ;;  %v1379_v43 = vmax.f32 %v1343_v0, %v1361_v59  ;;  %v1359_v27 = vmax.f32 %v1305_v52, %v1323_v23  ;;  %v6910_v22 = vadd.f32 -1.0, %v9607_v28  ;;  %8359 = vmatpush3.msra.mxu0 %v7179_v57  ;;  %v1415_v55 = vld [vmem:[%s14168_s1 + $0xa0] sm:$0xff]  ;;  %v1418_v7 = vld [vmem:[%s14168_s1 + $0xb8] sm:$0xff]  ;;  %v1417_v56 = vld [vmem:[%s14168_s1 + $0xb0] sm:$0xff] }
 0x18e   : > { %2420 = vmatprep.subr.mxu1 %v14253_v16  ;;  %v1269_v26 = vsel %vm981_vm11, %v14290_v11, %v6894_v36  ;;  %v1339_v51 = vsel %vm1051_vm9, %v10490_v19, %v6964_v8  ;;  %vm1015_vm12 = vcmp.gt.f32.partialorder %v14291_v20, 0.0  ;;  %vm1033_vm13 = vcmp.gt.f32.partialorder %v10462_v21, 0.0  ;;  %8360 = vmatprep.subr.mxu0 %v7178_v25  ;;  %v1420_v58 = vld [vmem:[%s14168_s1 + $0xc8] sm:$0xff]  ;;  %v7176_v42 = vld [vmem:[%s14171_s4 + $0xd0] sm:$0xff]  ;;  %v1419_v32 = vld [vmem:[%s14168_s1 + $0xc0] sm:$0xff] }
 0x18f   : > { %2421 = vmatpush1.msra.mxu1 %v10370_v12  ;;  %v1341_v18 = vmax.f32 %v1269_v26, %v1287_v34  ;;  %v1303_v45 = vsel %vm1015_vm12, %v14291_v20, %v6928_v48  ;;  %v1321_v33 = vsel %vm1033_vm13, %v10462_v21, %v6946_v41  ;;  %v14292_v12 = vld [vmem:[#allocation18_spill] sm:$0xff]  ;;  %8361 = vmatpush3.msra.mxu0 %v7178_v25  ;;  %v1422_v60 = vld [vmem:[%s14168_s1 + $0xd8] sm:$0xff]  ;;  %v1421_v59 = vld [vmem:[%s14168_s1 + $0xd0] sm:$0xff] }
 0x190   : > { %2422 = vmatprep.subr.mxu1 %v14253_v16  ;;  %vm997_vm14 = vcmp.gt.f32.partialorder %v14292_v12, 0.0  ;;  %v1375_v19 = vmax.f32 %v1321_v33, %v1339_v51  ;;  %v1395_v21 = vld [vmem:[%s14168_s1] sm:$0xff]  ;;  %8362 = vmatprep.subr.mxu0 %v7177_v17  ;;  %v1424_v54 = vld [vmem:[%s14168_s1 + $0xe8] sm:$0xff]  ;;  %v1426_v23 = vld [vmem:[%s14168_s1 + $0xf8] sm:$0xff] }
 0x191   : > { %2423 = vmatpush1.msra.mxu1 %v1379_v43  ;;  %v1377_v44 = vmax.f32 %v1341_v18, %v1359_v27  ;;  %v1285_v13 = vsel %vm997_vm14, %v14292_v12, %v6910_v22  ;;  %8363 = vmatpush3.msra.mxu0 %v7177_v17  ;;  %v7175_v36 = vld [vmem:[%s14171_s4 + $0xc8] sm:$0xff]  ;;  %v1423_v35 = vld [vmem:[%s14168_s1 + $0xe0] sm:$0xff]  ;;  %v1425_v8 = vld [vmem:[%s14168_s1 + $0xf0] sm:$0xff] }
 0x192   : > { %2424 = vmatprep.subr.mxu1 %v14253_v16  ;;  %v1357_v9 = vmax.f32 %v1285_v13, %v1303_v45  ;;  %8364 = vmatprep.subr.mxu0 %v7176_v42  ;;  %v1428_v28 = vld [vmem:[%s14168_s1 + $0x108] sm:$0xff]  ;;  %v7174_v47 = vld [vmem:[%s14171_s4 + $0xc0] sm:$0xff]  ;;  %v1430_v0 = vld [vmem:[%s14168_s1 + $0x118] sm:$0xff] }
 0x193   : > { %2425 = vmatpush1.msra.mxu1 %v14293_v31  ;;  %8365 = vmatpush3.msra.mxu0 %v7176_v42  ;;  %v1427_v4 = vld [vmem:[%s14168_s1 + $0x100] sm:$0xff]  ;;  %v1429_v34 = vld [vmem:[%s14168_s1 + $0x110] sm:$0xff]  ;;  %v1432_v48 = vld [vmem:[%s14168_s1 + $0x128] sm:$0xff] }
 0x194   : > { %2426 = vmatprep.subr.mxu1 %v14253_v16  ;;  %v1393_v62 = vmax.f32 %v1357_v9, %v1375_v19  ;;  %8366 = vmatprep.subr.mxu0 %v7175_v36  ;;  %v7516_v52 = vld [vmem:[%s14171_s4 + $0xb70] sm:$0xff]  ;;  %v1431_v41 = vld [vmem:[%s14168_s1 + $0x120] sm:$0xff]  ;;  %v1434_v11 = vld [vmem:[%s14168_s1 + $0x138] sm:$0xff] }
 0x195   : > { %2427 = vmatpush1.msra.mxu1 %v1377_v44  ;;  %8367 = vmatpush3.msra.mxu0 %v7175_v36  ;;  %v7173_v43 = vld [vmem:[%s14171_s4 + $0xb8] sm:$0xff]  ;;  %v1433_v27 = vld [vmem:[%s14168_s1 + $0x130] sm:$0xff]  ;;  %v1436_v26 = vld [vmem:[%s14168_s1 + $0x148] sm:$0xff] }
 0x196   : > { %2456 = vmatprep.subr.mxu1 %v14253_v16  ;;  %8368 = vmatprep.subr.mxu0 %v7174_v47  ;;  %v1435_v22 = vld [vmem:[%s14168_s1 + $0x140] sm:$0xff]  ;;  %v1438_v51 = vld [vmem:[%s14168_s1 + $0x158] sm:$0xff]  ;;  %v7172_v20 = vld [vmem:[%s14171_s4 + $0xb0] sm:$0xff] }
 0x197   : > { %2457 = vmatpush2.msra.mxu1 %v10517_v61  ;;  %v1397_v61 = vld [vmem:[%s14168_s1 + $0x10] sm:$0xff]  ;;  %8369 = vmatpush3.msra.mxu0 %v7174_v47  ;;  %v1440_v45 = vld [vmem:[%s14168_s1 + $0x168] sm:$0xff]  ;;  %v1439_v33 = vld [vmem:[%s14168_s1 + $0x160] sm:$0xff] }
 0x198   : > { %2458 = vmatprep.subr.mxu1 %v14253_v16  ;;  %v1399_v16 = vld [vmem:[%s14168_s1 + $0x20] sm:$0xff]  ;;  %8370 = vmatprep.subr.mxu0 %v7173_v43  ;;  %v1437_v18 = vld [vmem:[%s14168_s1 + $0x150] sm:$0xff]  ;;  %v1442_v12 = vld [vmem:[%s14168_s1 + $0x178] sm:$0xff] }
 0x199   : > { %2459 = vmatpush2.msra.mxu1 %v1393_v62  ;;  %8371 = vmatpush3.msra.mxu0 %v7173_v43  ;;  %v7171_v31 = vld [vmem:[%s14171_s4 + $0xa8] sm:$0xff]  ;;  %v1441_v44 = vld [vmem:[%s14168_s1 + $0x170] sm:$0xff]  ;;  %v7170_v13 = vld [vmem:[%s14171_s4 + $0xa0] sm:$0xff] }
 0x19a   : > { %2461 = vmatmul.mubr.f32.vlgmr.msra.gmra.mxu1 %v1395_v21  ;;  %9322 = vmatprep.subr.mxu1 %v7517_v50  ;;  %v1444_v19 = vld [vmem:[%s14168_s1 + $0x188] sm:$0xff]  ;;  %v7169_v9 = vld [vmem:[%s14171_s4 + $0x98] sm:$0xff]  ;;  %v1443_v62 = vld [vmem:[%s14168_s1 + $0x180] sm:$0xff] }
 0x19b   : > { %6967 = vmatprep.mubr.msk.f32.mxu1 %vm1795_vm10, %v1398_v5  ;;  %9323 = vmatpush3.msra.mxu1 %v7517_v50  ;;  %v1446_v21 = vld [vmem:[%s14168_s1 + $0x198] sm:$0xff]  ;;  %v7168_v40 = vld [vmem:[%s14171_s4 + $0x90] sm:$0xff]  ;;  %v7167_v5 = vld [vmem:[%s14171_s4 + $0x88] sm:$0xff] }
 0x19c   : > { %9324 = vmatprep.subr.mxu1 %v7516_v52  ;;  %8372 = vmatprep.subr.mxu0 %v7172_v20  ;;  %v1447_v10 = vld [vmem:[%s14168_s1 + $0x1a0] sm:$0xff]  ;;  %v1454_v57 = vld [vmem:[%s14168_s1 + $0x1d8] sm:$0xff]  ;;  %v1453_v50 = vld [vmem:[%s14168_s1 + $0x1d0] sm:$0xff] }
 0x19d   : > { %9325 = vmatpush3.msra.mxu1 %v7516_v52  ;;  %8373 = vmatpush3.msra.mxu0 %v7172_v20  ;;  %v1457_v25 = vld [vmem:[%s14168_s1 + $0x1f0] sm:$0xff]  ;;  %v1463_v17 = vld [vmem:[%s14168_s1 + $0x220] sm:$0xff]  ;;  %v1476_v36 = vld [vmem:[%s14168_s1 + $0x288] sm:$0xff] }
 0x19e   : > { %2466 = vmatmul.mubr.f32.gmra.mxu1 %v1397_v61  ;;  %8374 = vmatprep.subr.mxu0 %v7171_v31  ;;  %v1445_v61 = vld [vmem:[%s14168_s1 + $0x190] sm:$0xff]  ;;  %v1479_v47 = vld [vmem:[%s14168_s1 + $0x2a0] sm:$0xff]  ;;  %v1488_v43 = vld [vmem:[%s14168_s1 + $0x2e8] sm:$0xff] }
 0x19f   : > { %6968 = vmatprep.mubr.msk.f32.mxu1 %vm1795_vm10, %v1400_v3  ;;  %8375 = vmatpush3.msra.mxu0 %v7171_v31  ;;  %v1448_v3 = vld [vmem:[%s14168_s1 + $0x1a8] sm:$0xff]  ;;  %v1469_v42 = vld [vmem:[%s14168_s1 + $0x250] sm:$0xff]  ;;  %v1483_v52 = vld [vmem:[%s14168_s1 + $0x2c0] sm:$0xff] }
 0x1a0   : > { %8376 = vmatprep.subr.mxu0 %v7170_v13  ;;  %v1491_v20 = vld [vmem:[%s14168_s1 + $0x300] sm:$0xff]  ;;  %v1496_v31 = vld [vmem:[%s14168_s1 + $0x328] sm:$0xff] }
 0x1a1   : > { %8377 = vmatpush3.msra.mxu0 %v7170_v13 }
 0x1a2   : > { %2471 = vmatmul.mubr.f32.gmra.mxu1 %v1399_v16  ;;  %8378 = vmatprep.subr.mxu0 %v7169_v9  ;;  %v7166_v16 = vld [vmem:[%s14171_s4 + $0x80] sm:$0xff] }
 0x1a3   : > { %6969 = vmatprep.mubr.msk.f32.mxu1 %vm1795_vm10, %v1402_v37  ;;  %8379 = vmatpush3.msra.mxu0 %v7169_v9  ;;  %v10867_v37 = vld [vmem:[%s14171_s4 + $0x78] sm:$0xff] }
 0x1a4   : > { %8380 = vmatprep.subr.mxu0 %v7168_v40  ;;  %v1498_v9 = vld [vmem:[%s14168_s1 + $0x338] sm:$0xff] }
 0x1a5   : > { %8381 = vmatpush3.msra.mxu0 %v7168_v40 }
 0x1a6   : > { %2476 = vmatmul.mubr.f32.gmra.mxu1 %v1401_v30  ;;  %8382 = vmatprep.subr.mxu0 %v7167_v5  ;;  %v1450_v30 = vld [vmem:[%s14168_s1 + $0x1b8] sm:$0xff] }
 0x1a7   : > { %6970 = vmatprep.mubr.msk.f32.mxu1 %vm1795_vm10, %v1404_v63  ;;  %8383 = vmatpush3.msra.mxu0 %v7167_v5  ;;  %v1449_v63 = vld [vmem:[%s14168_s1 + $0x1b0] sm:$0xff]  ;;  %v1500_v5 = vld [vmem:[%s14168_s1 + $0x348] sm:$0xff] }
 0x1a8   : > { %8384 = vmatprep.subr.mxu0 %v7166_v16 }
 0x1a9   : > { %8385 = vmatpush3.msra.mxu0 %v7166_v16 }
 0x1aa   : > { %2481 = vmatmul.mubr.f32.gmra.mxu1 %v1403_v38  ;;  %8398 = vmatprep.subr.mxu0 %v10867_v37  ;;  %v1452_v38 = vld [vmem:[%s14168_s1 + $0x1c8] sm:$0xff] }
 0x1ab   : > { %6971 = vmatprep.mubr.msk.f32.mxu1 %vm1795_vm10, %v1406_v6  ;;  %v1451_v6 = vld [vmem:[%s14168_s1 + $0x1c0] sm:$0xff] }
 0x1ae   : > { %2486 = vmatmul.mubr.f32.gmra.mxu1 %v1405_v53  ;;  %v1456_v53 = vld [vmem:[%s14168_s1 + $0x1e8] sm:$0xff] }
 0x1af   : > { %6972 = vmatprep.mubr.msk.f32.mxu1 %vm1795_vm10, %v1408_v2  ;;  %v1455_v2 = vld [vmem:[%s14168_s1 + $0x1e0] sm:$0xff] }
 0x1b2   : > { %2491 = vmatmul.mubr.f32.gmra.mxu1 %v1407_v46  ;;  %v1458_v46 = vld [vmem:[%s14168_s1 + $0x1f8] sm:$0xff] }
 0x1b3   : > { %6973 = vmatprep.mubr.msk.f32.mxu1 %vm1795_vm10, %v1410_v39  ;;  %v7515_v39 = vld [vmem:[%s14171_s4 + $0xb68] sm:$0xff] }
 0x1b4   : > { %9326 = vmatprep.subr.mxu1 %v7515_v39 }
 0x1b5   : > { %9327 = vmatpush3.msra.mxu1 %v7515_v39  ;;  %v1505_v39 = vld [vmem:[%s14168_s1 + $0x370] sm:$0xff] }
 0x1b6   : > { %2496 = vmatmul.mubr.f32.gmra.mxu1 %v1409_v49  ;;  %v1460_v49 = vld [vmem:[%s14168_s1 + $0x208] sm:$0xff] }
 0x1b7   : > { %6974 = vmatprep.mubr.msk.f32.mxu1 %vm1795_vm10, %v1412_v14  ;;  %v1459_v14 = vld [vmem:[%s14168_s1 + $0x200] sm:$0xff] }
 0x1ba   : > { %2501 = vmatmul.mubr.f32.gmra.mxu1 %v1411_v29  ;;  %v1462_v29 = vld [vmem:[%s14168_s1 + $0x218] sm:$0xff] }
 0x1bb   : > { %6975 = vmatprep.mubr.msk.f32.mxu1 %vm1795_vm10, %v1414_v1  ;;  %v1461_v1 = vld [vmem:[%s14168_s1 + $0x210] sm:$0xff] }
 0x1be   : > { %2506 = vmatmul.mubr.f32.gmra.mxu1 %v1413_v24  ;;  %v1464_v24 = vld [vmem:[%s14168_s1 + $0x228] sm:$0xff] }
 0x1bf   : > { %6976 = vmatprep.mubr.msk.f32.mxu1 %vm1795_vm10, %v1416_v15  ;;  %v1466_v15 = vld [vmem:[%s14168_s1 + $0x238] sm:$0xff] }
 0x1c2   : > { %2511 = vmatmul.mubr.f32.gmra.mxu1 %v1415_v55  ;;  %v1465_v55 = vld [vmem:[%s14168_s1 + $0x230] sm:$0xff] }
 0x1c3   : > { %6977 = vmatprep.mubr.msk.f32.mxu1 %vm1795_vm10, %v1418_v7  ;;  %v1468_v7 = vld [vmem:[%s14168_s1 + $0x248] sm:$0xff] }
 0x1c6   : > { %2516 = vmatmul.mubr.f32.gmra.mxu1 %v1417_v56  ;;  %v1467_v56 = vld [vmem:[%s14168_s1 + $0x240] sm:$0xff] }
 0x1c7   : > { %6978 = vmatprep.mubr.msk.f32.mxu1 %vm1795_vm10, %v1420_v58  ;;  %v1470_v58 = vld [vmem:[%s14168_s1 + $0x258] sm:$0xff] }
 0x1ca   : > { %2521 = vmatmul.mubr.f32.gmra.mxu1 %v1419_v32  ;;  %v1472_v32 = vld [vmem:[%s14168_s1 + $0x268] sm:$0xff] }
 0x1cb   : > { %6979 = vmatprep.mubr.msk.f32.mxu1 %vm1795_vm10, %v1422_v60  ;;  %v1471_v60 = vld [vmem:[%s14168_s1 + $0x260] sm:$0xff] }
 0x1ce   : > { %2526 = vmatmul.mubr.f32.gmra.mxu1 %v1421_v59  ;;  %v1474_v59 = vld [vmem:[%s14168_s1 + $0x278] sm:$0xff] }
 0x1cf   : > { %6980 = vmatprep.mubr.msk.f32.mxu1 %vm1795_vm10, %v1424_v54  ;;  %v1473_v54 = vld [vmem:[%s14168_s1 + $0x270] sm:$0xff] }
 0x1d2   : > { %2531 = vmatmul.mubr.f32.gmra.mxu1 %v1423_v35  ;;  %v1475_v35 = vld [vmem:[%s14168_s1 + $0x280] sm:$0xff] }
 0x1d3   : > { %6981 = vmatprep.mubr.msk.f32.mxu1 %vm1795_vm10, %v1426_v23  ;;  %v1478_v23 = vld [vmem:[%s14168_s1 + $0x298] sm:$0xff] }
 0x1d6   : > { %2536 = vmatmul.mubr.f32.gmra.mxu1 %v1425_v8  ;;  %v1477_v8 = vld [vmem:[%s14168_s1 + $0x290] sm:$0xff] }
 0x1d7   : > { %6982 = vmatprep.mubr.msk.f32.mxu1 %vm1795_vm10, %v1428_v28  ;;  %v1480_v28 = vld [vmem:[%s14168_s1 + $0x2a8] sm:$0xff] }
 0x1da   : > { %2541 = vmatmul.mubr.f32.gmra.mxu1 %v1427_v4  ;;  %v1482_v4 = vld [vmem:[%s14168_s1 + $0x2b8] sm:$0xff] }
 0x1db   : > { %6983 = vmatprep.mubr.msk.f32.mxu1 %vm1795_vm10, %v1430_v0  ;;  %v7514_v0 = vld [vmem:[%s14171_s4 + $0xb60] sm:$0xff] }
 0x1dc   : > { %9328 = vmatprep.subr.mxu1 %v7514_v0 }
 0x1dd   : > { %9329 = vmatpush3.msra.mxu1 %v7514_v0  ;;  %v1515_v0 = vld [vmem:[%s14168_s1 + $0x3c0] sm:$0xff] }
 0x1de   : > { %2546 = vmatmul.mubr.f32.gmra.mxu1 %v1429_v34  ;;  %v1481_v34 = vld [vmem:[%s14168_s1 + $0x2b0] sm:$0xff] }
 0x1df   : > { %6984 = vmatprep.mubr.msk.f32.mxu1 %vm1795_vm10, %v1432_v48  ;;  %v1484_v48 = vld [vmem:[%s14168_s1 + $0x2c8] sm:$0xff] }
 0x1e2   : > { %2551 = vmatmul.mubr.f32.gmra.mxu1 %v1431_v41  ;;  %v1486_v41 = vld [vmem:[%s14168_s1 + $0x2d8] sm:$0xff] }
 0x1e3   : > { %6985 = vmatprep.mubr.msk.f32.mxu1 %vm1795_vm10, %v1434_v11  ;;  %v1485_v11 = vld [vmem:[%s14168_s1 + $0x2d0] sm:$0xff] }
 0x1e6   : > { %2556 = vmatmul.mubr.f32.gmra.mxu1 %v1433_v27  ;;  %v1487_v27 = vld [vmem:[%s14168_s1 + $0x2e0] sm:$0xff] }
 0x1e7   : > { %6986 = vmatprep.mubr.msk.f32.mxu1 %vm1795_vm10, %v1436_v26  ;;  %v1490_v26 = vld [vmem:[%s14168_s1 + $0x2f8] sm:$0xff] }
 0x1ea   : > { %2561 = vmatmul.mubr.f32.gmra.mxu1 %v1435_v22  ;;  %v1489_v22 = vld [vmem:[%s14168_s1 + $0x2f0] sm:$0xff] }
 0x1eb   : > { %6987 = vmatprep.mubr.msk.f32.mxu1 %vm1795_vm10, %v1438_v51  ;;  %v1492_v51 = vld [vmem:[%s14168_s1 + $0x308] sm:$0xff] }
 0x1ee   : > { %2566 = vmatmul.mubr.f32.gmra.mxu1 %v1437_v18  ;;  %v1494_v18 = vld [vmem:[%s14168_s1 + $0x318] sm:$0xff] }
 0x1ef   : > { %6988 = vmatprep.mubr.msk.f32.mxu1 %vm1795_vm10, %v1440_v45 }
 0x1f2   : > { %2571 = vmatmul.mubr.f32.gmra.mxu1 %v1439_v33  ;;  %v1493_v33 = vld [vmem:[%s14168_s1 + $0x310] sm:$0xff] }
 0x1f3   : > { %6989 = vmatprep.mubr.msk.f32.mxu1 %vm1795_vm10, %v1442_v12 }
 0x1f6   : > { %2576 = vmatmul.mubr.f32.gmra.mxu1 %v1441_v44 }
 0x1f7   : > { %6990 = vmatprep.mubr.msk.f32.mxu1 %vm1795_vm10, %v1444_v19  ;;  %v1495_v19 = vld [vmem:[%s14168_s1 + $0x320] sm:$0xff] }
 0x1fa   : > { %2581 = vmatmul.mubr.f32.gmra.mxu1 %v1443_v62 }
 0x1fb   : > { %6991 = vmatprep.mubr.msk.f32.mxu1 %vm1795_vm10, %v1446_v21  ;;  %v1497_v21 = vld [vmem:[%s14168_s1 + $0x330] sm:$0xff] }
 0x1fe   : > { %2586 = vmatmul.mubr.f32.gmra.mxu1 %v1445_v61 }
 0x1ff   : > { %6992 = vmatprep.mubr.msk.f32.mxu1 %vm1795_vm10, %v1448_v3  ;;  %v1499_v3 = vld [vmem:[%s14168_s1 + $0x340] sm:$0xff] }
 0x202   : > { %2591 = vmatmul.mubr.f32.gmra.mxu1 %v1447_v10  ;;  %v1502_v10 = vld [vmem:[%s14168_s1 + $0x358] sm:$0xff] }
 0x203   : > { %6993 = vmatprep.mubr.msk.f32.mxu1 %vm1795_vm10, %v1450_v30 }
 0x206   : > { %2596 = vmatmul.mubr.f32.gmra.mxu1 %v1449_v63  ;;  %v1501_v63 = vld [vmem:[%s14168_s1 + $0x350] sm:$0xff] }
 0x207   : > { %6994 = vmatprep.mubr.msk.f32.mxu1 %vm1795_vm10, %v1452_v38 }
 0x20a   : > { %2601 = vmatmul.mubr.f32.gmra.mxu1 %v1451_v6  ;;  %v1504_v6 = vld [vmem:[%s14168_s1 + $0x368] sm:$0xff] }
 0x20b   : > { %6995 = vmatprep.mubr.msk.f32.mxu1 %vm1795_vm10, %v1454_v57 }
 0x20e   : > { %2606 = vmatmul.mubr.f32.gmra.mxu1 %v1453_v50  ;;  %v1503_v50 = vld [vmem:[%s14168_s1 + $0x360] sm:$0xff] }
 0x20f   : > { %6996 = vmatprep.mubr.msk.f32.mxu1 %vm1795_vm10, %v1456_v53 }
 0x212   : > { %2611 = vmatmul.mubr.f32.gmra.mxu1 %v1455_v2  ;;  %v1506_v2 = vld [vmem:[%s14168_s1 + $0x378] sm:$0xff] }
 0x213   : > { %6997 = vmatprep.mubr.msk.f32.mxu1 %vm1795_vm10, %v1458_v46 }
 0x216   : > { %2616 = vmatmul.mubr.f32.gmra.mxu1 %v1457_v25 }
 0x217   : > { %6998 = vmatprep.mubr.msk.f32.mxu1 %vm1795_vm10, %v1460_v49  ;;  %v1508_v49 = vld [vmem:[%s14168_s1 + $0x388] sm:$0xff] }
 0x21a   : > { %2621 = vmatmul.mubr.f32.gmra.mxu1 %v1459_v14  ;;  %v7513_v14 = vld [vmem:[%s14171_s4 + $0xb58] sm:$0xff] }
 0x21b   : > { %6999 = vmatprep.mubr.msk.f32.mxu1 %vm1795_vm10, %v1462_v29  ;;  %9330 = vmatprep.subr.mxu1 %v7513_v14 }
 0x21c   : > { %9331 = vmatpush3.msra.mxu1 %v7513_v14  ;;  %v1528_v14 = vld [vmem:[%s14168_s1 + $0x428] sm:$0xff] }
 0x21e   : > { %2626 = vmatmul.mubr.f32.gmra.mxu1 %v1461_v1  ;;  %v1507_v1 = vld [vmem:[%s14168_s1 + $0x380] sm:$0xff] }
 0x21f   : > { %7000 = vmatprep.mubr.msk.f32.mxu1 %vm1795_vm10, %v1464_v24 }
 0x222   : > { %2631 = vmatmul.mubr.f32.gmra.mxu1 %v1463_v17  ;;  %v1510_v17 = vld [vmem:[%s14168_s1 + $0x398] sm:$0xff] }
 0x223   : > { %7001 = vmatprep.mubr.msk.f32.mxu1 %vm1795_vm10, %v1466_v15 }
 0x226   : > { %2636 = vmatmul.mubr.f32.gmra.mxu1 %v1465_v55  ;;  %v1509_v55 = vld [vmem:[%s14168_s1 + $0x390] sm:$0xff] }
 0x227   : > { %7002 = vmatprep.mubr.msk.f32.mxu1 %vm1795_vm10, %v1468_v7 }
 0x22a   : > { %2641 = vmatmul.mubr.f32.gmra.mxu1 %v1467_v56  ;;  %v1512_v56 = vld [vmem:[%s14168_s1 + $0x3a8] sm:$0xff] }
 0x22b   : > { %7003 = vmatprep.mubr.msk.f32.mxu1 %vm1795_vm10, %v1470_v58 }
 0x22e   : > { %2646 = vmatmul.mubr.f32.gmra.mxu1 %v1469_v42  ;;  %v3475_v42 = vld [vmem:[%s14171_s4 + $0x70] sm:$0xff] }
 0x22f   : > { %7004 = vmatprep.mubr.msk.f32.mxu1 %vm1795_vm10, %v1472_v32  ;;  %v1511_v32 = vld [vmem:[%s14168_s1 + $0x3a0] sm:$0xff] }
 0x232   : > { %2651 = vmatmul.mubr.f32.gmra.mxu1 %v1471_v60 }
 0x233   : > { %7005 = vmatprep.mubr.msk.f32.mxu1 %vm1795_vm10, %v1474_v59  ;;  %v3474_v59 = vld [vmem:[%s14171_s4 + $0x68] sm:$0xff] }
 0x236   : > { %2656 = vmatmul.mubr.f32.gmra.mxu1 %v1473_v54  ;;  %v1514_v54 = vld [vmem:[%s14168_s1 + $0x3b8] sm:$0xff] }
 0x237   : > { %7006 = vmatprep.mubr.msk.f32.mxu1 %vm1795_vm10, %v1476_v36 }
 0x23a   : > { %2661 = vmatmul.mubr.f32.gmra.mxu1 %v1475_v35  ;;  %v3473_v35 = vld [vmem:[%s14171_s4 + $0x60] sm:$0xff] }
 0x23b   : > { %7007 = vmatprep.mubr.msk.f32.mxu1 %vm1795_vm10, %v1478_v23 }
 0x23e   : > { %2666 = vmatmul.mubr.f32.gmra.mxu1 %v1477_v8  ;;  %v3472_v8 = vld [vmem:[%s14171_s4 + $0x58] sm:$0xff] }
 0x23f   : > { %7008 = vmatprep.mubr.msk.f32.mxu1 %vm1795_vm10, %v1480_v28  ;;  %v1516_v28 = vld [vmem:[%s14168_s1 + $0x3c8] sm:$0xff] }
 0x242   : > { %2671 = vmatmul.mubr.f32.gmra.mxu1 %v1479_v47 }
 0x243   : > { %7009 = vmatprep.mubr.msk.f32.mxu1 %vm1795_vm10, %v1482_v4  ;;  %v3471_v4 = vld [vmem:[%s14171_s4 + $0x50] sm:$0xff] }
 0x246   : > { %2676 = vmatmul.mubr.f32.gmra.mxu1 %v1481_v34 }
 0x247   : > { %7010 = vmatprep.mubr.msk.f32.mxu1 %vm1795_vm10, %v1484_v48  ;;  %v3470_v48 = vld [vmem:[%s14171_s4 + $0x48] sm:$0xff] }
 0x24a   : > { %2681 = vmatmul.mubr.f32.gmra.mxu1 %v1483_v52  ;;  %v1518_v52 = vld [vmem:[%s14168_s1 + $0x3d8] sm:$0xff] }
 0x24b   : > { %7011 = vmatprep.mubr.msk.f32.mxu1 %vm1795_vm10, %v1486_v41 }
 0x24e   : > { %2686 = vmatmul.mubr.f32.gmra.mxu1 %v1485_v11  ;;  %v3469_v11 = vld [vmem:[%s14171_s4 + $0x40] sm:$0xff] }
 0x24f   : > { %7012 = vmatprep.mubr.msk.f32.mxu1 %vm1795_vm10, %v1488_v43  ;;  %v1517_v43 = vld [vmem:[%s14168_s1 + $0x3d0] sm:$0xff] }
 0x252   : > { %2691 = vmatmul.mubr.f32.gmra.mxu1 %v1487_v27 }
 0x253   : > { %7013 = vmatprep.mubr.msk.f32.mxu1 %vm1795_vm10, %v1490_v26  ;;  %v3468_v26 = vld [vmem:[%s14171_s4 + $0x38] sm:$0xff] }
 0x256   : > { %2696 = vmatmul.mubr.f32.gmra.mxu1 %v1489_v22  ;;  %v1520_v22 = vld [vmem:[%s14168_s1 + $0x3e8] sm:$0xff] }
 0x257   : > { %7014 = vmatprep.mubr.msk.f32.mxu1 %vm1795_vm10, %v1492_v51 }
 0x25a   : > { %v11037_v45 = vpop.f32.mrf.mxu1  ;;  %2701 = vmatmul.mubr.f32.gmra.mxu1 %v1491_v20  ;;  %v3467_v20 = vld [vmem:[%s14171_s4 + $0x30] sm:$0xff] }
 0x25b   : > { %7015 = vmatprep.mubr.msk.f32.mxu1 %vm1795_vm10, %v1494_v18  ;;  %v1519_v18 = vld [vmem:[%s14168_s1 + $0x3e0] sm:$0xff] }
 0x25c   : > { %v2464_v12 = vpop.f32.mrf.mxu1 }
 0x25d   : > { %v3466_v12 = vld [vmem:[%s14171_s4 + $0x28] sm:$0xff] }
 0x25e   : > { %v11046_v44 = vpop.f32.mrf.mxu1  ;;  %2706 = vmatmul.mubr.f32.gmra.mxu1 %v1493_v33 }
 0x25f   : > { %7016 = vmatprep.mubr.msk.f32.mxu1 %vm1795_vm10, %v1496_v31  ;;  %v1522_v31 = vld [vmem:[%s14168_s1 + $0x3f8] sm:$0xff] }
 0x260   : > { %v2469_v13 = vpop.f32.mrf.mxu1 }
 0x261   : > { %v3465_v13 = vld [vmem:[%s14171_s4 + $0x20] sm:$0xff] }
 0x262   : > { %v11055_v62 = vpop.f32.mrf.mxu1  ;;  %2711 = vmatmul.mubr.f32.gmra.mxu1 %v1495_v19 }
 0x263   : > { %7017 = vmatprep.mubr.msk.f32.mxu1 %vm1795_vm10, %v1498_v9  ;;  %v1521_v9 = vld [vmem:[%s14168_s1 + $0x3f0] sm:$0xff] }
 0x264   : > { %v2474_v40 = vpop.f32.mrf.mxu1 }
 0x265   : > { %v3464_v40 = vld [vmem:[%s14171_s4 + $0x18] sm:$0xff] }
 0x266   : > { %v11064_v61 = vpop.f32.mrf.mxu1  ;;  %2716 = vmatmul.mubr.f32.gmra.mxu1 %v1497_v21 }
 0x267   : > { %7018 = vmatprep.mubr.msk.f32.mxu1 %vm1795_vm10, %v1500_v5 }
 0x268   : > { %v2479_v16 = vpop.f32.mrf.mxu1 }
 0x269   : > { %v1524_v16 = vld [vmem:[%s14168_s1 + $0x408] sm:$0xff] }
 0x26a   : > { %v11073_v30 = vpop.f32.mrf.mxu1  ;;  %2721 = vmatmul.mubr.f32.gmra.mxu1 %v1499_v3  ;;  %v3463_v3 = vld [vmem:[%s14171_s4 + $0x10] sm:$0xff] }
 0x26b   : > { %7019 = vmatprep.mubr.msk.f32.mxu1 %vm1795_vm10, %v1502_v10  ;;  %v1523_v10 = vld [vmem:[%s14168_s1 + $0x400] sm:$0xff] }
 0x26c   : > { %v2484_v38 = vpop.f32.mrf.mxu1 }
 0x26d   : > { %v3462_v38 = vld [vmem:[%s14171_s4 + $0x8] sm:$0xff] }
 0x26e   : > { %v11082_v57 = vpop.f32.mrf.mxu1  ;;  %2726 = vmatmul.mubr.f32.gmra.mxu1 %v1501_v63 }
 0x26f   : > { %7020 = vmatprep.mubr.msk.f32.mxu1 %vm1795_vm10, %v1504_v6  ;;  %v1526_v6 = vld [vmem:[%s14168_s1 + $0x418] sm:$0xff] }
 0x270   : > { %v2489_v53 = vpop.f32.mrf.mxu1 }
 0x271   : > { %v3461_v53 = vld [vmem:[%s14171_s4] sm:$0xff] }
 0x272   : > { %v11091_v46 = vpop.f32.mrf.mxu1  ;;  %2731 = vmatmul.mubr.f32.gmra.mxu1 %v1503_v50 }
 0x273   : > { %7021 = vmatprep.mubr.msk.f32.mxu1 %vm1795_vm10, %v1506_v2 }
 0x274   : > { %v2494_v25 = vpop.f32.mrf.mxu1 }
 0x276   : > { %v11103_v29 = vpop.f32.mrf.mxu1  ;;  %2736 = vmatmul.mubr.f32.gmra.mxu1 %v1505_v39  ;;  %v7197_v39 = vld [vmem:[%s14171_s4 + $0x178] sm:$0xff] }
 0x277   : > { %7022 = vmatprep.mubr.msk.f32.mxu1 %vm1795_vm10, %v1508_v49  ;;  %v7196_v49 = vld [vmem:[%s14171_s4 + $0x170] sm:$0xff] }
 0x278   : > { %v2499_v24 = vpop.f32.mrf.mxu1 }
 0x27a   : > { %v2502_v15 = vpop.f32.mrf.mxu1  ;;  %2741 = vmatmul.mubr.f32.gmra.mxu1 %v1507_v1  ;;  %v1527_v1 = vld [vmem:[%s14168_s1 + $0x420] sm:$0xff] }
 0x27b   : > { %8386 = vmatprep.mubr.f32.mxu0 %v2502_v15  ;;  %7023 = vmatprep.mubr.msk.f32.mxu1 %vm1795_vm10, %v1510_v17  ;;  %v7195_v17 = vld [vmem:[%s14171_s4 + $0x168] sm:$0xff] }
 0x27c   : > { %v2504_v7 = vpop.f32.mrf.mxu1 }
 0x27e   : > { %v2507_v58 = vpop.f32.mrf.mxu1  ;;  %2746 = vmatmul.mubr.f32.gmra.mxu1 %v1509_v55  ;;  %v1529_v55 = vld [vmem:[%s14168_s1 + $0x430] sm:$0xff] }
 0x27f   : > { %8387 = vmatmul.mubr.f32.vlgmr.msra.gmra.mxu0 %v2507_v58  ;;  %7024 = vmatprep.mubr.msk.f32.mxu1 %vm1795_vm10, %v1512_v56  ;;  %v7193_v56 = vld [vmem:[%s14171_s4 + $0x158] sm:$0xff] }
 0x280   : > { %8399 = vmatpush3.msra.mxu0 %v10867_v37  ;;  %v2509_v60 = vpop.f32.mrf.mxu1  ;;  %v1513_v37 = vld [vmem:[%s14168_s1 + $0x3b0] sm:$0xff] }
 0x281   : > { %8400 = vmatprep.subr.mxu0 %v3475_v42  ;;  %v7191_v60 = vld [vmem:[%s14171_s4 + $0x148] sm:$0xff] }
 0x282   : > { %8401 = vmatpush3.msra.mxu0 %v3475_v42  ;;  %v2512_v36 = vpop.f32.mrf.mxu1  ;;  %2751 = vmatmul.mubr.f32.gmra.mxu1 %v1511_v32  ;;  %v1531_v42 = vld [vmem:[%s14168_s1 + $0x440] sm:$0xff] }
 0x283   : > { %8402 = vmatprep.subr.mxu0 %v3474_v59  ;;  %8389 = vmatprep.mubr.f32.mxu0 %v2512_v36 }
 0x284   : > { %8403 = vmatpush3.msra.mxu0 %v3474_v59  ;;  %v2514_v23 = vpop.f32.mrf.mxu1  ;;  %7025 = vmatprep.mubr.msk.f32.mxu1 %vm1795_vm10, %v1514_v54  ;;  %v1533_v54 = vld [vmem:[%s14168_s1 + $0x450] sm:$0xff] }
 0x285   : > { %8404 = vmatprep.subr.mxu0 %v3473_v35 }
 0x286   : > { %8405 = vmatpush3.msra.mxu0 %v3473_v35  ;;  %v2517_v47 = vpop.f32.mrf.mxu1  ;;  %2756 = vmatmul.mubr.f32.gmra.mxu1 %v1513_v37  ;;  %v7189_v35 = vld [vmem:[%s14171_s4 + $0x138] sm:$0xff]  ;;  %v1536_v37 = vld [vmem:[%s14168_s1 + $0x468] sm:$0xff] }
 0x287   : > { %8406 = vmatprep.subr.mxu0 %v3472_v8  ;;  %8390 = vmatmul.mubr.f32.gmra.mxu0 %v2517_v47 }
 0x288   : > { %8407 = vmatpush3.msra.mxu0 %v3472_v8  ;;  %v2519_v34 = vpop.f32.mrf.mxu1  ;;  %7026 = vmatprep.mubr.msk.f32.mxu1 %vm1795_vm10, %v1516_v28  ;;  %v7188_v8 = vld [vmem:[%s14171_s4 + $0x130] sm:$0xff]  ;;  %v1535_v28 = vld [vmem:[%s14168_s1 + $0x460] sm:$0xff] }
 0x289   : > { %8408 = vmatprep.subr.mxu0 %v3471_v4 }
 0x28a   : > { %8409 = vmatpush3.msra.mxu0 %v3471_v4  ;;  %v2522_v41 = vpop.f32.mrf.mxu1  ;;  %2761 = vmatmul.mubr.f32.gmra.mxu1 %v1515_v0  ;;  %v7187_v4 = vld [vmem:[%s14171_s4 + $0x128] sm:$0xff]  ;;  %v1538_v0 = vld [vmem:[%s14168_s1 + $0x478] sm:$0xff] }
 0x28b   : > { %8410 = vmatprep.subr.mxu0 %v3470_v48  ;;  %8392 = vmatprep.mubr.f32.mxu0 %v2522_v41 }
 0x28c   : > { %8411 = vmatpush3.msra.mxu0 %v3470_v48  ;;  %v2524_v27 = vpop.f32.mrf.mxu1  ;;  %7027 = vmatprep.mubr.msk.f32.mxu1 %vm1795_vm10, %v1518_v52  ;;  %v7186_v48 = vld [vmem:[%s14171_s4 + $0x120] sm:$0xff]  ;;  %v1537_v52 = vld [vmem:[%s14168_s1 + $0x470] sm:$0xff] }
 0x28d   : > { %8412 = vmatprep.subr.mxu0 %v3469_v11 }
 0x28e   : > { %8413 = vmatpush3.msra.mxu0 %v3469_v11  ;;  %v2527_v51 = vpop.f32.mrf.mxu1  ;;  %2766 = vmatmul.mubr.f32.gmra.mxu1 %v1517_v43  ;;  %v7185_v11 = vld [vmem:[%s14171_s4 + $0x118] sm:$0xff]  ;;  %v1540_v43 = vld [vmem:[%s14168_s1 + $0x488] sm:$0xff] }
 0x28f   : > { %8414 = vmatprep.subr.mxu0 %v3468_v26  ;;  %8393 = vmatmul.mubr.f32.gmra.mxu0 %v2527_v51 }
 0x290   : > { %8415 = vmatpush3.msra.mxu0 %v3468_v26  ;;  %v2529_v33 = vpop.f32.mrf.mxu1  ;;  %7028 = vmatprep.mubr.msk.f32.mxu1 %vm1795_vm10, %v1520_v22  ;;  %v7184_v26 = vld [vmem:[%s14171_s4 + $0x110] sm:$0xff]  ;;  %v1539_v22 = vld [vmem:[%s14168_s1 + $0x480] sm:$0xff] }
 0x291   : > { %8416 = vmatprep.subr.mxu0 %v3467_v20 }
 0x292   : > { %8417 = vmatpush3.msra.mxu0 %v3467_v20  ;;  %v2532_v19 = vpop.f32.mrf.mxu1  ;;  %2771 = vmatmul.mubr.f32.gmra.mxu1 %v1519_v18  ;;  %v7183_v20 = vld [vmem:[%s14171_s4 + $0x108] sm:$0xff]  ;;  %v1542_v18 = vld [vmem:[%s14168_s1 + $0x498] sm:$0xff] }
 0x293   : > { %8418 = vmatprep.subr.mxu0 %v3466_v12  ;;  %8395 = vmatprep.mubr.f32.mxu0 %v2532_v19 }
 0x294   : > { %8419 = vmatpush3.msra.mxu0 %v3466_v12  ;;  %v2534_v21 = vpop.f32.mrf.mxu1  ;;  %7029 = vmatprep.mubr.msk.f32.mxu1 %vm1795_vm10, %v1522_v31  ;;  %v7182_v12 = vld [vmem:[%s14171_s4 + $0x100] sm:$0xff]  ;;  %v1541_v31 = vld [vmem:[%s14168_s1 + $0x490] sm:$0xff] }
 0x295   : > { %8420 = vmatprep.subr.mxu0 %v3465_v13  ;;  %v7212_v21 = vld [vmem:[%s14171_s4 + $0x1f0] sm:$0xff] }
 0x296   : > { %8421 = vmatpush3.msra.mxu0 %v3465_v13  ;;  %v2537_v5 = vpop.f32.mrf.mxu1  ;;  %2776 = vmatmul.mubr.f32.gmra.mxu1 %v1521_v9  ;;  %v7213_v13 = vld [vmem:[%s14171_s4 + $0x1f8] sm:$0xff] }
 0x297   : > { %8422 = vmatprep.subr.mxu0 %v3464_v40  ;;  %8396 = vmatmul.mubr.f32.gmra.mxu0 %v2537_v5  ;;  %v1543_v5 = vld [vmem:[%s14168_s1 + $0x4a0] sm:$0xff] }
 0x298   : > { %8423 = vmatpush3.msra.mxu0 %v3464_v40  ;;  %v2539_v63 = vpop.f32.mrf.mxu1  ;;  %8430 = vmatprep.mubr.f32.mxu0 %v11037_v45  ;;  %v1525_v45 = vld [vmem:[%s14168_s1 + $0x410] sm:$0xff]  ;;  %v1544_v40 = vld [vmem:[%s14168_s1 + $0x4a8] sm:$0xff] }
 0x299   : > { %8424 = vmatprep.subr.mxu0 %v3463_v3  ;;  %7030 = vmatprep.mubr.msk.f32.mxu1 %vm1795_vm10, %v1524_v16  ;;  %v7211_v16 = vld [vmem:[%s14171_s4 + $0x1e8] sm:$0xff]  ;;  %v7210_v63 = vld [vmem:[%s14171_s4 + $0x1e0] sm:$0xff] }
 0x29a   : > { %8425 = vmatpush3.msra.mxu0 %v3463_v3  ;;  %v2542_v50 = vpop.f32.mrf.mxu1  ;;  %2781 = vmatmul.mubr.f32.gmra.mxu1 %v1523_v10 }
 0x29b   : > { %8426 = vmatprep.subr.mxu0 %v3462_v38  ;;  %7031 = vmatprep.mubr.msk.f32.mxu1 %vm1795_vm10, %v1526_v6  ;;  %v1545_v6 = vld [vmem:[%s14168_s1 + $0x4b0] sm:$0xff] }
 0x29c   : > { %8427 = vmatpush3.msra.mxu0 %v3462_v38  ;;  %v2544_v2 = vpop.f32.mrf.mxu1  ;;  %v1546_v38 = vld [vmem:[%s14168_s1 + $0x4b8] sm:$0xff] }
 0x29d   : > { %8428 = vmatprep.subr.mxu0 %v3461_v53  ;;  %v7208_v2 = vld [vmem:[%s14171_s4 + $0x1d0] sm:$0xff] }
 0x29e   : > { %8429 = vmatpush3.msra.mxu0 %v3461_v53  ;;  %v11222_v25 = vpop.f32.mrf.mxu1  ;;  %2786 = vmatmul.mubr.f32.gmra.mxu1 %v1525_v45  ;;  %v7209_v53 = vld [vmem:[%s14171_s4 + $0x1d8] sm:$0xff] }
 0x29f   : > { %8431 = vmatmul.mubr.f32.vlgmr.msra.gmra.mxu0 %v11046_v44  ;;  %8442 = vmatprep.subr.mxu0 %v7197_v39  ;;  %v7194_v44 = vld [vmem:[%s14171_s4 + $0x160] sm:$0xff] }
 0x2a0   : > { %8433 = vmatprep.mubr.f32.mxu0 %v11055_v62  ;;  %8443 = vmatpush3.msra.mxu0 %v7197_v39  ;;  %v2549_v24 = vpop.f32.mrf.mxu1  ;;  %v1530_v62 = vld [vmem:[%s14168_s1 + $0x438] sm:$0xff]  ;;  %v1548_v39 = vld [vmem:[%s14168_s1 + $0x4c8] sm:$0xff] }
 0x2a1   : > { %8444 = vmatprep.subr.mxu0 %v7196_v49  ;;  %7032 = vmatprep.mubr.msk.f32.mxu1 %vm1795_vm10, %v1528_v14  ;;  %v7207_v14 = vld [vmem:[%s14171_s4 + $0x1c8] sm:$0xff]  ;;  %v7206_v24 = vld [vmem:[%s14171_s4 + $0x1c0] sm:$0xff] }
 0x2a2   : > { %8445 = vmatpush3.msra.mxu0 %v7196_v49  ;;  %v11239_v15 = vpop.f32.mrf.mxu1  ;;  %2791 = vmatmul.mubr.f32.gmra.mxu1 %v1527_v1 }
 0x2a3   : > { %8434 = vmatmul.mubr.f32.gmra.mxu0 %v11064_v61  ;;  %8446 = vmatprep.subr.mxu0 %v7195_v17  ;;  %v7192_v61 = vld [vmem:[%s14171_s4 + $0x150] sm:$0xff] }
 0x2a4   : > { %8436 = vmatprep.mubr.f32.mxu0 %v11073_v30  ;;  %8447 = vmatpush3.msra.mxu0 %v7195_v17  ;;  %v2554_v7 = vpop.f32.mrf.mxu1  ;;  %v1532_v30 = vld [vmem:[%s14168_s1 + $0x448] sm:$0xff]  ;;  %v1550_v17 = vld [vmem:[%s14168_s1 + $0x4d8] sm:$0xff] }
 0x2a5   : > { %8448 = vmatprep.subr.mxu0 %v7194_v44  ;;  %7033 = vmatprep.mubr.msk.f32.mxu1 %vm1795_vm10, %v1530_v62  ;;  %v7205_v62 = vld [vmem:[%s14171_s4 + $0x1b8] sm:$0xff] }
 0x2a6   : > { %8449 = vmatpush3.msra.mxu0 %v7194_v44  ;;  %v11256_v58 = vpop.f32.mrf.mxu1  ;;  %2796 = vmatmul.mubr.f32.gmra.mxu1 %v1529_v55  ;;  %v1552_v55 = vld [vmem:[%s14168_s1 + $0x4e8] sm:$0xff] }
 0x2a7   : > { %8437 = vmatmul.mubr.f32.gmra.mxu0 %v11082_v57  ;;  %8450 = vmatprep.subr.mxu0 %v7193_v56  ;;  %v7190_v57 = vld [vmem:[%s14171_s4 + $0x140] sm:$0xff] }
 0x2a8   : > { %8439 = vmatprep.mubr.f32.mxu0 %v11091_v46  ;;  %8451 = vmatpush3.msra.mxu0 %v7193_v56  ;;  %v2559_v32 = vpop.f32.mrf.mxu1  ;;  %v1534_v46 = vld [vmem:[%s14168_s1 + $0x458] sm:$0xff]  ;;  %v7204_v56 = vld [vmem:[%s14171_s4 + $0x1b0] sm:$0xff] }
 0x2a9   : > { %8452 = vmatprep.subr.mxu0 %v7192_v61  ;;  %7034 = vmatprep.mubr.msk.f32.mxu1 %vm1795_vm10, %v1532_v30  ;;  %v7203_v30 = vld [vmem:[%s14171_s4 + $0x1a8] sm:$0xff] }
 0x2aa   : > { %8453 = vmatpush3.msra.mxu0 %v7192_v61  ;;  %v11273_v59 = vpop.f32.mrf.mxu1  ;;  %2801 = vmatmul.mubr.f32.gmra.mxu1 %v1531_v42  ;;  %v1554_v42 = vld [vmem:[%s14168_s1 + $0x4f8] sm:$0xff] }
 0x2ab   : > { %8440 = vmatmul.mubr.f32.gmra.mxu0 %v11103_v29  ;;  %8454 = vmatprep.subr.mxu0 %v7191_v60  ;;  %v7512_v29 = vld [vmem:[%s14171_s4 + $0xb50] sm:$0xff] }
 0x2ac   : > { %8455 = vmatpush3.msra.mxu0 %v7191_v60  ;;  %8474 = vmatprep.mubr.f32.mxu0 %v2542_v50  ;;  %v2564_v36 = vpop.f32.mrf.mxu1  ;;  %v7202_v60 = vld [vmem:[%s14171_s4 + $0x1a0] sm:$0xff] }
 0x2ad   : > { %8456 = vmatprep.subr.mxu0 %v7190_v57  ;;  %7035 = vmatprep.mubr.msk.f32.mxu1 %vm1795_vm10, %v1534_v46  ;;  %v7201_v46 = vld [vmem:[%s14171_s4 + $0x198] sm:$0xff] }
 0x2ae   : > { %8457 = vmatpush3.msra.mxu0 %v7190_v57  ;;  %v11295_v23 = vpop.f32.mrf.mxu1  ;;  %2806 = vmatmul.mubr.f32.gmra.mxu1 %v1533_v54  ;;  %v1556_v54 = vld [vmem:[%s14168_s1 + $0x508] sm:$0xff] }
 0x2af   : > { %8458 = vmatprep.subr.mxu0 %v7189_v35  ;;  %7036 = vmatprep.mubr.msk.f32.mxu1 %vm1795_vm10, %v1536_v37  ;;  %v1555_v37 = vld [vmem:[%s14168_s1 + $0x500] sm:$0xff] }
 0x2b0   : > { %8459 = vmatpush3.msra.mxu0 %v7189_v35  ;;  %v2569_v47 = vpop.f32.mrf.mxu1  ;;  %9332 = vmatprep.subr.mxu1 %v7512_v29  ;;  %v7200_v35 = vld [vmem:[%s14171_s4 + $0x190] sm:$0xff] }
 0x2b1   : > { %8460 = vmatprep.subr.mxu0 %v7188_v8  ;;  %9333 = vmatpush3.msra.mxu1 %v7512_v29 }
 0x2b2   : > { %8461 = vmatpush3.msra.mxu0 %v7188_v8  ;;  %v11310_v34 = vpop.f32.mrf.mxu1  ;;  %2811 = vmatmul.mubr.f32.gmra.mxu1 %v1535_v28  ;;  %v1558_v8 = vld [vmem:[%s14168_s1 + $0x518] sm:$0xff]  ;;  %v7511_v28 = vld [vmem:[%s14171_s4 + $0xb48] sm:$0xff] }
 0x2b3   : > { %8462 = vmatprep.subr.mxu0 %v7187_v4  ;;  %7037 = vmatprep.mubr.msk.f32.mxu1 %vm1795_vm10, %v1538_v0  ;;  %v1557_v0 = vld [vmem:[%s14168_s1 + $0x510] sm:$0xff] }
 0x2b4   : > { %8463 = vmatpush3.msra.mxu0 %v7187_v4  ;;  %v2574_v41 = vpop.f32.mrf.mxu1  ;;  %9334 = vmatprep.subr.mxu1 %v7511_v28  ;;  %v7198_v4 = vld [vmem:[%s14171_s4 + $0x180] sm:$0xff] }
 0x2b5   : > { %8464 = vmatprep.subr.mxu0 %v7186_v48  ;;  %9335 = vmatpush3.msra.mxu1 %v7511_v28  ;;  %v7228_v41 = vld [vmem:[%s14171_s4 + $0x270] sm:$0xff] }
 0x2b6   : > { %8465 = vmatpush3.msra.mxu0 %v7186_v48  ;;  %v11325_v27 = vpop.f32.mrf.mxu1  ;;  %2816 = vmatmul.mubr.f32.gmra.mxu1 %v1537_v52  ;;  %v7229_v48 = vld [vmem:[%s14171_s4 + $0x278] sm:$0xff] }
 0x2b7   : > { %8466 = vmatprep.subr.mxu0 %v7185_v11  ;;  %7038 = vmatprep.mubr.msk.f32.mxu1 %vm1795_vm10, %v1540_v43  ;;  %v1559_v43 = vld [vmem:[%s14168_s1 + $0x520] sm:$0xff] }
 0x2b8   : > { %8467 = vmatpush3.msra.mxu0 %v7185_v11  ;;  %v2579_v51 = vpop.f32.mrf.mxu1  ;;  %v1560_v11 = vld [vmem:[%s14168_s1 + $0x528] sm:$0xff] }
 0x2b9   : > { %8468 = vmatprep.subr.mxu0 %v7184_v26  ;;  %v7226_v51 = vld [vmem:[%s14171_s4 + $0x260] sm:$0xff] }
 0x2ba   : > { %8469 = vmatpush3.msra.mxu0 %v7184_v26  ;;  %v2582_v33 = vpop.f32.mrf.mxu1  ;;  %2821 = vmatmul.mubr.f32.gmra.mxu1 %v1539_v22  ;;  %v7227_v26 = vld [vmem:[%s14171_s4 + $0x268] sm:$0xff] }
 0x2bb   : > { %8470 = vmatprep.subr.mxu0 %v7183_v20  ;;  %7039 = vmatprep.mubr.msk.f32.mxu1 %vm1795_vm10, %v1542_v18  ;;  %v1561_v18 = vld [vmem:[%s14168_s1 + $0x530] sm:$0xff] }
 0x2bc   : > { %8471 = vmatpush3.msra.mxu0 %v7183_v20  ;;  %v2584_v19 = vpop.f32.mrf.mxu1  ;;  %v1562_v20 = vld [vmem:[%s14168_s1 + $0x538] sm:$0xff] }
 0x2bd   : > { %8472 = vmatprep.subr.mxu0 %v7182_v12  ;;  %v7224_v19 = vld [vmem:[%s14171_s4 + $0x250] sm:$0xff] }
 0x2be   : > { %8473 = vmatpush3.msra.mxu0 %v7182_v12  ;;  %v11350_v9 = vpop.f32.mrf.mxu1  ;;  %2826 = vmatmul.mubr.f32.gmra.mxu1 %v1541_v31  ;;  %v7225_v12 = vld [vmem:[%s14171_s4 + $0x258] sm:$0xff] }
 0x2bf   : > { %8475 = vmatmul.mubr.f32.vlgmr.msra.gmra.mxu0 %v11222_v25  ;;  %8486 = vmatprep.subr.mxu0 %v7213_v13  ;;  %v1547_v25 = vld [vmem:[%s14168_s1 + $0x4c0] sm:$0xff] }
 0x2c0   : > { %8477 = vmatprep.mubr.f32.mxu0 %v11239_v15  ;;  %8487 = vmatpush3.msra.mxu0 %v7213_v13  ;;  %v2589_v3 = vpop.f32.mrf.mxu1  ;;  %v1549_v15 = vld [vmem:[%s14168_s1 + $0x4d0] sm:$0xff]  ;;  %v1564_v13 = vld [vmem:[%s14168_s1 + $0x548] sm:$0xff] }
 0x2c1   : > { %8488 = vmatprep.subr.mxu0 %v7212_v21  ;;  %7040 = vmatprep.mubr.msk.f32.mxu1 %vm1795_vm10, %v1544_v40  ;;  %v7223_v40 = vld [vmem:[%s14171_s4 + $0x248] sm:$0xff]  ;;  %v7222_v3 = vld [vmem:[%s14171_s4 + $0x240] sm:$0xff] }
 0x2c2   : > { %8489 = vmatpush3.msra.mxu0 %v7212_v21  ;;  %v11367_v10 = vpop.f32.mrf.mxu1  ;;  %2831 = vmatmul.mubr.f32.gmra.mxu1 %v1543_v5 }
 0x2c3   : > { %8478 = vmatmul.mubr.f32.gmra.mxu0 %v11256_v58  ;;  %8490 = vmatprep.subr.mxu0 %v7211_v16  ;;  %v1551_v58 = vld [vmem:[%s14168_s1 + $0x4e0] sm:$0xff] }
 0x2c4   : > { %8480 = vmatprep.mubr.f32.mxu0 %v11273_v59  ;;  %8491 = vmatpush3.msra.mxu0 %v7211_v16  ;;  %v2594_v50 = vpop.f32.mrf.mxu1  ;;  %v1553_v59 = vld [vmem:[%s14168_s1 + $0x4f0] sm:$0xff]  ;;  %v1566_v16 = vld [vmem:[%s14168_s1 + $0x558] sm:$0xff] }
 0x2c5   : > { %8492 = vmatprep.subr.mxu0 %v7210_v63  ;;  %7041 = vmatprep.mubr.msk.f32.mxu1 %vm1795_vm10, %v1546_v38  ;;  %v7221_v38 = vld [vmem:[%s14171_s4 + $0x238] sm:$0xff] }
 0x2c6   : > { %8493 = vmatpush3.msra.mxu0 %v7210_v63  ;;  %v11384_v45 = vpop.f32.mrf.mxu1  ;;  %2836 = vmatmul.mubr.f32.gmra.mxu1 %v1545_v6  ;;  %v1568_v6 = vld [vmem:[%s14168_s1 + $0x568] sm:$0xff] }
 0x2c7   : > { %8481 = vmatmul.mubr.f32.gmra.mxu0 %v11295_v23  ;;  %8494 = vmatprep.subr.mxu0 %v7209_v53  ;;  %v7199_v23 = vld [vmem:[%s14171_s4 + $0x188] sm:$0xff] }
 0x2c8   : > { %8483 = vmatprep.mubr.f32.mxu0 %v11310_v34  ;;  %8495 = vmatpush3.msra.mxu0 %v7209_v53  ;;  %v2599_v49 = vpop.f32.mrf.mxu1  ;;  %v7220_v53 = vld [vmem:[%s14171_s4 + $0x230] sm:$0xff] }
 0x2c9   : > { %8496 = vmatprep.subr.mxu0 %v7208_v2  ;;  %7042 = vmatprep.mubr.msk.f32.mxu1 %vm1795_vm10, %v1548_v39  ;;  %v7219_v39 = vld [vmem:[%s14171_s4 + $0x228] sm:$0xff] }
 0x2ca   : > { %8497 = vmatpush3.msra.mxu0 %v7208_v2  ;;  %v11401_v1 = vpop.f32.mrf.mxu1  ;;  %2841 = vmatmul.mubr.f32.gmra.mxu1 %v1547_v25  ;;  %v1570_v25 = vld [vmem:[%s14168_s1 + $0x578] sm:$0xff] }
 0x2cb   : > { %8484 = vmatmul.mubr.f32.gmra.mxu0 %v11325_v27  ;;  %8498 = vmatprep.subr.mxu0 %v7207_v14 }
 0x2cc   : > { %8499 = vmatpush3.msra.mxu0 %v7207_v14  ;;  %8518 = vmatprep.mubr.f32.mxu0 %v2582_v33  ;;  %v2604_v44 = vpop.f32.mrf.mxu1  ;;  %v7218_v14 = vld [vmem:[%s14171_s4 + $0x220] sm:$0xff] }
 0x2cd   : > { %8500 = vmatprep.subr.mxu0 %v7206_v24  ;;  %7043 = vmatprep.mubr.msk.f32.mxu1 %vm1795_vm10, %v1550_v17  ;;  %v7217_v17 = vld [vmem:[%s14171_s4 + $0x218] sm:$0xff] }
 0x2ce   : > { %8501 = vmatpush3.msra.mxu0 %v7206_v24  ;;  %v11420_v7 = vpop.f32.mrf.mxu1  ;;  %2846 = vmatmul.mubr.f32.gmra.mxu1 %v1549_v15  ;;  %v1572_v15 = vld [vmem:[%s14168_s1 + $0x588] sm:$0xff] }
 0x2cf   : > { %8502 = vmatprep.subr.mxu0 %v7205_v62  ;;  %7044 = vmatprep.mubr.msk.f32.mxu1 %vm1795_vm10, %v1552_v55  ;;  %v1571_v55 = vld [vmem:[%s14168_s1 + $0x580] sm:$0xff] }
 0x2d0   : > { %8503 = vmatpush3.msra.mxu0 %v7205_v62  ;;  %v2609_v61 = vpop.f32.mrf.mxu1  ;;  %v7216_v62 = vld [vmem:[%s14171_s4 + $0x210] sm:$0xff] }
 0x2d1   : > { %8504 = vmatprep.subr.mxu0 %v7204_v56 }
 0x2d2   : > { %8505 = vmatpush3.msra.mxu0 %v7204_v56  ;;  %v11435_v32 = vpop.f32.mrf.mxu1  ;;  %2851 = vmatmul.mubr.f32.gmra.mxu1 %v1551_v58  ;;  %v7215_v56 = vld [vmem:[%s14171_s4 + $0x208] sm:$0xff]  ;;  %v1574_v58 = vld [vmem:[%s14168_s1 + $0x598] sm:$0xff] }
 0x2d3   : > { %8506 = vmatprep.subr.mxu0 %v7203_v30  ;;  %7045 = vmatprep.mubr.msk.f32.mxu1 %vm1795_vm10, %v1554_v42  ;;  %v1573_v42 = vld [vmem:[%s14168_s1 + $0x590] sm:$0xff] }
 0x2d4   : > { %8507 = vmatpush3.msra.mxu0 %v7203_v30  ;;  %v2614_v57 = vpop.f32.mrf.mxu1  ;;  %v7214_v30 = vld [vmem:[%s14171_s4 + $0x200] sm:$0xff] }
 0x2d5   : > { %8508 = vmatprep.subr.mxu0 %v7202_v60  ;;  %v7244_v57 = vld [vmem:[%s14171_s4 + $0x2f0] sm:$0xff] }
 0x2d6   : > { %8509 = vmatpush3.msra.mxu0 %v7202_v60  ;;  %v11450_v36 = vpop.f32.mrf.mxu1  ;;  %2856 = vmatmul.mubr.f32.gmra.mxu1 %v1553_v59  ;;  %v7245_v60 = vld [vmem:[%s14171_s4 + $0x2f8] sm:$0xff] }
 0x2d7   : > { %8510 = vmatprep.subr.mxu0 %v7201_v46  ;;  %7046 = vmatprep.mubr.msk.f32.mxu1 %vm1795_vm10, %v1556_v54  ;;  %v1575_v54 = vld [vmem:[%s14168_s1 + $0x5a0] sm:$0xff] }
 0x2d8   : > { %8511 = vmatpush3.msra.mxu0 %v7201_v46  ;;  %v2619_v29 = vpop.f32.mrf.mxu1  ;;  %v1576_v46 = vld [vmem:[%s14168_s1 + $0x5a8] sm:$0xff] }
 0x2d9   : > { %8512 = vmatprep.subr.mxu0 %v7200_v35  ;;  %v7242_v29 = vld [vmem:[%s14171_s4 + $0x2e0] sm:$0xff] }
 0x2da   : > { %8513 = vmatpush3.msra.mxu0 %v7200_v35  ;;  %v2622_v47 = vpop.f32.mrf.mxu1  ;;  %2861 = vmatmul.mubr.f32.gmra.mxu1 %v1555_v37  ;;  %v7243_v35 = vld [vmem:[%s14171_s4 + $0x2e8] sm:$0xff] }
 0x2db   : > { %8514 = vmatprep.subr.mxu0 %v7199_v23  ;;  %7047 = vmatprep.mubr.msk.f32.mxu1 %vm1795_vm10, %v1558_v8  ;;  %v1577_v8 = vld [vmem:[%s14168_s1 + $0x5b0] sm:$0xff] }
 0x2dc   : > { %8515 = vmatpush3.msra.mxu0 %v7199_v23  ;;  %v2624_v34 = vpop.f32.mrf.mxu1  ;;  %v1578_v23 = vld [vmem:[%s14168_s1 + $0x5b8] sm:$0xff] }
 0x2dd   : > { %8516 = vmatprep.subr.mxu0 %v7198_v4  ;;  %v1580_v34 = vld [vmem:[%s14168_s1 + $0x5c8] sm:$0xff] }
 0x2de   : > { %8517 = vmatpush3.msra.mxu0 %v7198_v4  ;;  %v11478_v52 = vpop.f32.mrf.mxu1  ;;  %2866 = vmatmul.mubr.f32.gmra.mxu1 %v1557_v0  ;;  %v7240_v0 = vld [vmem:[%s14171_s4 + $0x2d0] sm:$0xff] }
 0x2df   : > { %8519 = vmatmul.mubr.f32.vlgmr.msra.gmra.mxu0 %v11350_v9  ;;  %8530 = vmatprep.subr.mxu0 %v7229_v48  ;;  %v1563_v9 = vld [vmem:[%s14168_s1 + $0x540] sm:$0xff] }
 0x2e0   : > { %8521 = vmatprep.mubr.f32.mxu0 %v11367_v10  ;;  %8531 = vmatpush3.msra.mxu0 %v7229_v48  ;;  %v2629_v27 = vpop.f32.mrf.mxu1  ;;  %v1565_v10 = vld [vmem:[%s14168_s1 + $0x550] sm:$0xff]  ;;  %v1579_v48 = vld [vmem:[%s14168_s1 + $0x5c0] sm:$0xff] }
 0x2e1   : > { %8532 = vmatprep.subr.mxu0 %v7228_v41  ;;  %7048 = vmatprep.mubr.msk.f32.mxu1 %vm1795_vm10, %v1560_v11  ;;  %v1582_v27 = vld [vmem:[%s14168_s1 + $0x5d8] sm:$0xff] }
 0x2e2   : > { %8533 = vmatpush3.msra.mxu0 %v7228_v41  ;;  %v11495_v22 = vpop.f32.mrf.mxu1  ;;  %2871 = vmatmul.mubr.f32.gmra.mxu1 %v1559_v43  ;;  %v7239_v41 = vld [vmem:[%s14171_s4 + $0x2c8] sm:$0xff]  ;;  %v7238_v43 = vld [vmem:[%s14171_s4 + $0x2c0] sm:$0xff] }
 0x2e3   : > { %8522 = vmatmul.mubr.f32.gmra.mxu0 %v11384_v45  ;;  %8534 = vmatprep.subr.mxu0 %v7227_v26  ;;  %v1567_v45 = vld [vmem:[%s14168_s1 + $0x560] sm:$0xff] }
 0x2e4   : > { %8524 = vmatprep.mubr.f32.mxu0 %v11401_v1  ;;  %8535 = vmatpush3.msra.mxu0 %v7227_v26  ;;  %v2634_v33 = vpop.f32.mrf.mxu1  ;;  %v1569_v1 = vld [vmem:[%s14168_s1 + $0x570] sm:$0xff] }
 0x2e5   : > { %8536 = vmatprep.subr.mxu0 %v7226_v51  ;;  %7049 = vmatprep.mubr.msk.f32.mxu1 %vm1795_vm10, %v1562_v20  ;;  %v1581_v26 = vld [vmem:[%s14168_s1 + $0x5d0] sm:$0xff]  ;;  %v1584_v20 = vld [vmem:[%s14168_s1 + $0x5e8] sm:$0xff] }
 0x2e6   : > { %8537 = vmatpush3.msra.mxu0 %v7226_v51  ;;  %v11512_v31 = vpop.f32.mrf.mxu1  ;;  %2876 = vmatmul.mubr.f32.gmra.mxu1 %v1561_v18  ;;  %v7237_v51 = vld [vmem:[%s14171_s4 + $0x2b8] sm:$0xff]  ;;  %v7510_v18 = vld [vmem:[%s14171_s4 + $0xb40] sm:$0xff] }
 0x2e7   : > { %8525 = vmatmul.mubr.f32.gmra.mxu0 %v11420_v7  ;;  %8538 = vmatprep.subr.mxu0 %v7225_v12 }
 0x2e8   : > { %8527 = vmatprep.mubr.f32.mxu0 %v11435_v32  ;;  %8539 = vmatpush3.msra.mxu0 %v7225_v12  ;;  %v2639_v21 = vpop.f32.mrf.mxu1  ;;  %v7236_v12 = vld [vmem:[%s14171_s4 + $0x2b0] sm:$0xff] }
 0x2e9   : > { %8540 = vmatprep.subr.mxu0 %v7224_v19  ;;  %7050 = vmatprep.mubr.msk.f32.mxu1 %vm1795_vm10, %v1564_v13  ;;  %v7235_v13 = vld [vmem:[%s14171_s4 + $0x2a8] sm:$0xff] }
 0x2ea   : > { %8541 = vmatpush3.msra.mxu0 %v7224_v19  ;;  %v11529_v5 = vpop.f32.mrf.mxu1  ;;  %2881 = vmatmul.mubr.f32.gmra.mxu1 %v1563_v9  ;;  %v1586_v9 = vld [vmem:[%s14168_s1 + $0x5f8] sm:$0xff] }
 0x2eb   : > { %8528 = vmatmul.mubr.f32.gmra.mxu0 %v11450_v36  ;;  %8542 = vmatprep.subr.mxu0 %v7223_v40 }
 0x2ec   : > { %8543 = vmatpush3.msra.mxu0 %v7223_v40  ;;  %8562 = vmatprep.mubr.f32.mxu0 %v2622_v47  ;;  %v2644_v63 = vpop.f32.mrf.mxu1  ;;  %v7241_v47 = vld [vmem:[%s14171_s4 + $0x2d8] sm:$0xff]  ;;  %v7234_v40 = vld [vmem:[%s14171_s4 + $0x2a0] sm:$0xff] }
 0x2ed   : > { %8544 = vmatprep.subr.mxu0 %v7222_v3  ;;  %7051 = vmatprep.mubr.msk.f32.mxu1 %vm1795_vm10, %v1566_v16  ;;  %v7233_v16 = vld [vmem:[%s14171_s4 + $0x298] sm:$0xff] }
 0x2ee   : > { %8545 = vmatpush3.msra.mxu0 %v7222_v3  ;;  %v11548_v50 = vpop.f32.mrf.mxu1  ;;  %2886 = vmatmul.mubr.f32.gmra.mxu1 %v1565_v10  ;;  %v1588_v10 = vld [vmem:[%s14168_s1 + $0x608] sm:$0xff] }
 0x2ef   : > { %8546 = vmatprep.subr.mxu0 %v7221_v38  ;;  %7052 = vmatprep.mubr.msk.f32.mxu1 %vm1795_vm10, %v1568_v6  ;;  %v1587_v6 = vld [vmem:[%s14168_s1 + $0x600] sm:$0xff] }
 0x2f0   : > { %8547 = vmatpush3.msra.mxu0 %v7221_v38  ;;  %v2649_v2 = vpop.f32.mrf.mxu1  ;;  %9336 = vmatprep.subr.mxu1 %v7510_v18  ;;  %v7232_v38 = vld [vmem:[%s14171_s4 + $0x290] sm:$0xff] }
 0x2f1   : > { %8548 = vmatprep.subr.mxu0 %v7220_v53  ;;  %9337 = vmatpush3.msra.mxu1 %v7510_v18 }
 0x2f2   : > { %8549 = vmatpush3.msra.mxu0 %v7220_v53  ;;  %v11563_v49 = vpop.f32.mrf.mxu1  ;;  %2891 = vmatmul.mubr.f32.gmra.mxu1 %v1567_v45  ;;  %v7231_v53 = vld [vmem:[%s14171_s4 + $0x288] sm:$0xff]  ;;  %v1590_v45 = vld [vmem:[%s14168_s1 + $0x618] sm:$0xff] }
 0x2f3   : > { %8550 = vmatprep.subr.mxu0 %v7219_v39  ;;  %7053 = vmatprep.mubr.msk.f32.mxu1 %vm1795_vm10, %v1570_v25  ;;  %v1589_v25 = vld [vmem:[%s14168_s1 + $0x610] sm:$0xff] }
 0x2f4   : > { %8551 = vmatpush3.msra.mxu0 %v7219_v39  ;;  %v2654_v24 = vpop.f32.mrf.mxu1  ;;  %v7230_v39 = vld [vmem:[%s14171_s4 + $0x280] sm:$0xff] }
 0x2f5   : > { %8552 = vmatprep.subr.mxu0 %v7218_v14  ;;  %v7260_v24 = vld [vmem:[%s14171_s4 + $0x370] sm:$0xff] }
 0x2f6   : > { %8553 = vmatpush3.msra.mxu0 %v7218_v14  ;;  %v11578_v44 = vpop.f32.mrf.mxu1  ;;  %2896 = vmatmul.mubr.f32.gmra.mxu1 %v1569_v1  ;;  %v7261_v14 = vld [vmem:[%s14171_s4 + $0x378] sm:$0xff] }
 0x2f7   : > { %8554 = vmatprep.subr.mxu0 %v7217_v17  ;;  %7054 = vmatprep.mubr.msk.f32.mxu1 %vm1795_vm10, %v1572_v15  ;;  %v1591_v15 = vld [vmem:[%s14168_s1 + $0x620] sm:$0xff] }
 0x2f8   : > { %8555 = vmatpush3.msra.mxu0 %v7217_v17  ;;  %v2659_v7 = vpop.f32.mrf.mxu1  ;;  %v1592_v17 = vld [vmem:[%s14168_s1 + $0x628] sm:$0xff] }
 0x2f9   : > { %8556 = vmatprep.subr.mxu0 %v7216_v62  ;;  %v7258_v7 = vld [vmem:[%s14171_s4 + $0x360] sm:$0xff] }
 0x2fa   : > { %8557 = vmatpush3.msra.mxu0 %v7216_v62  ;;  %v2662_v61 = vpop.f32.mrf.mxu1  ;;  %2901 = vmatmul.mubr.f32.gmra.mxu1 %v1571_v55  ;;  %v7259_v62 = vld [vmem:[%s14171_s4 + $0x368] sm:$0xff] }
 0x2fb   : > { %8558 = vmatprep.subr.mxu0 %v7215_v56  ;;  %7055 = vmatprep.mubr.msk.f32.mxu1 %vm1795_vm10, %v1574_v58  ;;  %v1593_v58 = vld [vmem:[%s14168_s1 + $0x630] sm:$0xff] }
 0x2fc   : > { %8559 = vmatpush3.msra.mxu0 %v7215_v56  ;;  %v2664_v32 = vpop.f32.mrf.mxu1  ;;  %v1594_v56 = vld [vmem:[%s14168_s1 + $0x638] sm:$0xff] }
 0x2fd   : > { %8560 = vmatprep.subr.mxu0 %v7214_v30  ;;  %v7256_v32 = vld [vmem:[%s14171_s4 + $0x350] sm:$0xff] }
 0x2fe   : > { %8561 = vmatpush3.msra.mxu0 %v7214_v30  ;;  %v11603_v59 = vpop.f32.mrf.mxu1  ;;  %2906 = vmatmul.mubr.f32.gmra.mxu1 %v1573_v42  ;;  %v7257_v30 = vld [vmem:[%s14171_s4 + $0x358] sm:$0xff] }
 0x2ff   : > { %8563 = vmatmul.mubr.f32.vlgmr.msra.gmra.mxu0 %v11478_v52  ;;  %8574 = vmatprep.subr.mxu0 %v7245_v60 }
 0x300   : > { %8565 = vmatprep.mubr.f32.mxu0 %v11495_v22  ;;  %8575 = vmatpush3.msra.mxu0 %v7245_v60  ;;  %v2669_v36 = vpop.f32.mrf.mxu1  ;;  %v1596_v60 = vld [vmem:[%s14168_s1 + $0x648] sm:$0xff] }
 0x301   : > { %8576 = vmatprep.subr.mxu0 %v7244_v57  ;;  %7056 = vmatprep.mubr.msk.f32.mxu1 %vm1795_vm10, %v1576_v46  ;;  %v7255_v46 = vld [vmem:[%s14171_s4 + $0x348] sm:$0xff]  ;;  %v7254_v36 = vld [vmem:[%s14171_s4 + $0x340] sm:$0xff] }
 0x302   : > { %8577 = vmatpush3.msra.mxu0 %v7244_v57  ;;  %v11620_v37 = vpop.f32.mrf.mxu1  ;;  %2911 = vmatmul.mubr.f32.gmra.mxu1 %v1575_v54 }
 0x303   : > { %8566 = vmatmul.mubr.f32.gmra.mxu0 %v11512_v31  ;;  %8578 = vmatprep.subr.mxu0 %v7243_v35  ;;  %v1583_v31 = vld [vmem:[%s14168_s1 + $0x5e0] sm:$0xff] }
 0x304   : > { %8568 = vmatprep.mubr.f32.mxu0 %v11529_v5  ;;  %8579 = vmatpush3.msra.mxu0 %v7243_v35  ;;  %v2674_v28 = vpop.f32.mrf.mxu1  ;;  %v1585_v5 = vld [vmem:[%s14168_s1 + $0x5f0] sm:$0xff]  ;;  %v1598_v35 = vld [vmem:[%s14168_s1 + $0x658] sm:$0xff] }
 0x305   : > { %8580 = vmatprep.subr.mxu0 %v7242_v29  ;;  %7057 = vmatprep.mubr.msk.f32.mxu1 %vm1795_vm10, %v1578_v23  ;;  %v7253_v23 = vld [vmem:[%s14171_s4 + $0x338] sm:$0xff] }
 0x306   : > { %8581 = vmatpush3.msra.mxu0 %v7242_v29  ;;  %v11637_v4 = vpop.f32.mrf.mxu1  ;;  %2916 = vmatmul.mubr.f32.gmra.mxu1 %v1577_v8  ;;  %v1600_v8 = vld [vmem:[%s14168_s1 + $0x668] sm:$0xff] }
 0x307   : > { %8569 = vmatmul.mubr.f32.gmra.mxu0 %v11548_v50  ;;  %8582 = vmatprep.subr.mxu0 %v7241_v47 }
 0x308   : > { %8571 = vmatprep.mubr.f32.mxu0 %v11563_v49  ;;  %8583 = vmatpush3.msra.mxu0 %v7241_v47  ;;  %v2679_v52 = vpop.f32.mrf.mxu1  ;;  %v7252_v47 = vld [vmem:[%s14171_s4 + $0x330] sm:$0xff] }
 0x309   : > { %8584 = vmatprep.subr.mxu0 %v7240_v0  ;;  %7058 = vmatprep.mubr.msk.f32.mxu1 %vm1795_vm10, %v1580_v34  ;;  %v7251_v34 = vld [vmem:[%s14171_s4 + $0x328] sm:$0xff] }
 0x30a   : > { %8585 = vmatpush3.msra.mxu0 %v7240_v0  ;;  %v11654_v11 = vpop.f32.mrf.mxu1  ;;  %2921 = vmatmul.mubr.f32.gmra.mxu1 %v1579_v48  ;;  %v1602_v48 = vld [vmem:[%s14168_s1 + $0x678] sm:$0xff] }
 0x30b   : > { %8572 = vmatmul.mubr.f32.gmra.mxu0 %v11578_v44  ;;  %8586 = vmatprep.subr.mxu0 %v7239_v41 }
 0x30c   : > { %8587 = vmatpush3.msra.mxu0 %v7239_v41  ;;  %8606 = vmatprep.mubr.f32.mxu0 %v2662_v61  ;;  %v2684_v22 = vpop.f32.mrf.mxu1  ;;  %v7250_v41 = vld [vmem:[%s14171_s4 + $0x320] sm:$0xff] }
 0x30d   : > { %8588 = vmatprep.subr.mxu0 %v7238_v43  ;;  %7059 = vmatprep.mubr.msk.f32.mxu1 %vm1795_vm10, %v1582_v27  ;;  %v7249_v27 = vld [vmem:[%s14171_s4 + $0x318] sm:$0xff] }
 0x30e   : > { %8589 = vmatpush3.msra.mxu0 %v7238_v43  ;;  %v11676_v33 = vpop.f32.mrf.mxu1  ;;  %2926 = vmatmul.mubr.f32.gmra.mxu1 %v1581_v26  ;;  %v1604_v26 = vld [vmem:[%s14168_s1 + $0x688] sm:$0xff] }
 0x30f   : > { %8590 = vmatprep.subr.mxu0 %v7237_v51  ;;  %7060 = vmatprep.mubr.msk.f32.mxu1 %vm1795_vm10, %v1584_v20  ;;  %v1603_v20 = vld [vmem:[%s14168_s1 + $0x680] sm:$0xff] }
 0x310   : > { %8591 = vmatpush3.msra.mxu0 %v7237_v51  ;;  %v2689_v19 = vpop.f32.mrf.mxu1  ;;  %v7248_v51 = vld [vmem:[%s14171_s4 + $0x310] sm:$0xff] }
 0x311   : > { %8592 = vmatprep.subr.mxu0 %v7236_v12  ;;  %v7246_v19 = vld [vmem:[%s14171_s4 + $0x300] sm:$0xff] }
 0x312   : > { %8593 = vmatpush3.msra.mxu0 %v7236_v12  ;;  %v11691_v21 = vpop.f32.mrf.mxu1  ;;  %2931 = vmatmul.mubr.f32.gmra.mxu1 %v1583_v31  ;;  %v1606_v12 = vld [vmem:[%s14168_s1 + $0x698] sm:$0xff] }
 0x313   : > { %8594 = vmatprep.subr.mxu0 %v7235_v13  ;;  %7061 = vmatprep.mubr.msk.f32.mxu1 %vm1795_vm10, %v1586_v9 }
 0x314   : > { %8595 = vmatpush3.msra.mxu0 %v7235_v13  ;;  %v2694_v3 = vpop.f32.mrf.mxu1  ;;  %v1605_v13 = vld [vmem:[%s14168_s1 + $0x690] sm:$0xff] }
 0x315   : > { %8596 = vmatprep.subr.mxu0 %v7234_v40  ;;  %v7276_v3 = vld [vmem:[%s14171_s4 + $0x3f0] sm:$0xff] }
 0x316   : > { %8597 = vmatpush3.msra.mxu0 %v7234_v40  ;;  %v11706_v63 = vpop.f32.mrf.mxu1  ;;  %2936 = vmatmul.mubr.f32.gmra.mxu1 %v1585_v5  ;;  %v11861_v40 = vld [vmem:[%s14171_s4 + $0xb38] sm:$0xff] }
 0x317   : > { %8598 = vmatprep.subr.mxu0 %v7233_v16  ;;  %7062 = vmatprep.mubr.msk.f32.mxu1 %vm1795_vm10, %v1588_v10  ;;  %v1607_v10 = vld [vmem:[%s14168_s1 + $0x6a0] sm:$0xff] }
 0x318   : > { %8599 = vmatpush3.msra.mxu0 %v7233_v16  ;;  %v2699_v50 = vpop.f32.mrf.mxu1  ;;  %9338 = vmatprep.subr.mxu1 %v11861_v40  ;;  %v1608_v16 = vld [vmem:[%s14168_s1 + $0x6a8] sm:$0xff] }
 0x319   : > { %8600 = vmatprep.subr.mxu0 %v7232_v38  ;;  %v7274_v50 = vld [vmem:[%s14171_s4 + $0x3e0] sm:$0xff]  ;;  %9339 = vmatpush3.msra.mxu1 %v11861_v40  ;;  %v7291_v40 = vld [vmem:[%s14171_s4 + $0x468] sm:$0xff] }
 0x31a   : > { %8601 = vmatpush3.msra.mxu0 %v7232_v38  ;;  %v2702_v2 = vpop.f32.mrf.mxu1  ;;  %2941 = vmatmul.mubr.f32.gmra.mxu1 %v1587_v6  ;;  %v7275_v38 = vld [vmem:[%s14171_s4 + $0x3e8] sm:$0xff] }
 0x31b   : > { %8602 = vmatprep.subr.mxu0 %v7231_v53  ;;  %7063 = vmatprep.mubr.msk.f32.mxu1 %vm1795_vm10, %v1590_v45  ;;  %v1609_v45 = vld [vmem:[%s14168_s1 + $0x6b0] sm:$0xff] }
 0x31c   : > { %8603 = vmatpush3.msra.mxu0 %v7231_v53  ;;  %v2704_v49 = vpop.f32.mrf.mxu1  ;;  %v1610_v53 = vld [vmem:[%s14168_s1 + $0x6b8] sm:$0xff] }
 0x31d   : > { %8604 = vmatprep.subr.mxu0 %v7230_v39  ;;  %v7272_v49 = vld [vmem:[%s14171_s4 + $0x3d0] sm:$0xff] }
 0x31e   : > { %8605 = vmatpush3.msra.mxu0 %v7230_v39  ;;  %v11731_v1 = vpop.f32.mrf.mxu1  ;;  %2946 = vmatmul.mubr.f32.gmra.mxu1 %v1589_v25  ;;  %v7273_v39 = vld [vmem:[%s14171_s4 + $0x3d8] sm:$0xff] }
 0x31f   : > { %8607 = vmatmul.mubr.f32.vlgmr.msra.gmra.mxu0 %v11603_v59  ;;  %8618 = vmatprep.subr.mxu0 %v7261_v14  ;;  %v1595_v59 = vld [vmem:[%s14168_s1 + $0x640] sm:$0xff] }
 0x320   : > { %8609 = vmatprep.mubr.f32.mxu0 %v11620_v37  ;;  %8619 = vmatpush3.msra.mxu0 %v7261_v14  ;;  %v2709_v44 = vpop.f32.mrf.mxu1  ;;  %v1597_v37 = vld [vmem:[%s14168_s1 + $0x650] sm:$0xff]  ;;  %v1612_v14 = vld [vmem:[%s14168_s1 + $0x6c8] sm:$0xff] }
 0x321   : > { %8620 = vmatprep.subr.mxu0 %v7260_v24  ;;  %7064 = vmatprep.mubr.msk.f32.mxu1 %vm1795_vm10, %v1592_v17 }
 0x322   : > { %8621 = vmatpush3.msra.mxu0 %v7260_v24  ;;  %v11748_v55 = vpop.f32.mrf.mxu1  ;;  %2951 = vmatmul.mubr.f32.gmra.mxu1 %v1591_v15  ;;  %v1611_v24 = vld [vmem:[%s14168_s1 + $0x6c0] sm:$0xff]  ;;  %v7271_v15 = vld [vmem:[%s14171_s4 + $0x3c8] sm:$0xff] }
 0x323   : > { %8610 = vmatmul.mubr.f32.gmra.mxu0 %v11637_v4  ;;  %8622 = vmatprep.subr.mxu0 %v7259_v62  ;;  %v1599_v4 = vld [vmem:[%s14168_s1 + $0x660] sm:$0xff] }
 0x324   : > { %8612 = vmatprep.mubr.f32.mxu0 %v11654_v11  ;;  %8623 = vmatpush3.msra.mxu0 %v7259_v62  ;;  %v2714_v61 = vpop.f32.mrf.mxu1  ;;  %v1601_v11 = vld [vmem:[%s14168_s1 + $0x670] sm:$0xff]  ;;  %v7270_v62 = vld [vmem:[%s14171_s4 + $0x3c0] sm:$0xff] }
 0x325   : > { %8624 = vmatprep.subr.mxu0 %v7258_v7  ;;  %7065 = vmatprep.mubr.msk.f32.mxu1 %vm1795_vm10, %v1594_v56  ;;  %v1613_v56 = vld [vmem:[%s14168_s1 + $0x6d0] sm:$0xff]  ;;  %v7269_v61 = vld [vmem:[%s14171_s4 + $0x3b8] sm:$0xff] }
 0x326   : > { %8625 = vmatpush3.msra.mxu0 %v7258_v7  ;;  %v11765_v42 = vpop.f32.mrf.mxu1  ;;  %2956 = vmatmul.mubr.f32.gmra.mxu1 %v1593_v58 }
 0x327   : > { %8613 = vmatmul.mubr.f32.gmra.mxu0 %v11676_v33  ;;  %8626 = vmatprep.subr.mxu0 %v7257_v30  ;;  %v7247_v33 = vld [vmem:[%s14171_s4 + $0x308] sm:$0xff] }
 0x328   : > { %8615 = vmatprep.mubr.f32.mxu0 %v11691_v21  ;;  %8627 = vmatpush3.msra.mxu0 %v7257_v30  ;;  %v2719_v57 = vpop.f32.mrf.mxu1  ;;  %v7277_v21 = vld [vmem:[%s14171_s4 + $0x3f8] sm:$0xff]  ;;  %v1616_v30 = vld [vmem:[%s14168_s1 + $0x6e8] sm:$0xff] }
 0x329   : > { %8628 = vmatprep.subr.mxu0 %v7256_v32  ;;  %7066 = vmatprep.mubr.msk.f32.mxu1 %vm1795_vm10, %v1596_v60  ;;  %v7268_v60 = vld [vmem:[%s14171_s4 + $0x3b0] sm:$0xff] }
 0x32a   : > { %8629 = vmatpush3.msra.mxu0 %v7256_v32  ;;  %v11782_v54 = vpop.f32.mrf.mxu1  ;;  %2961 = vmatmul.mubr.f32.gmra.mxu1 %v1595_v59  ;;  %v1615_v59 = vld [vmem:[%s14168_s1 + $0x6e0] sm:$0xff] }
 0x32b   : > { %8616 = vmatmul.mubr.f32.gmra.mxu0 %v11706_v63  ;;  %8630 = vmatprep.subr.mxu0 %v7255_v46 }
 0x32c   : > { %8631 = vmatpush3.msra.mxu0 %v7255_v46  ;;  %8650 = vmatprep.mubr.f32.mxu0 %v2702_v2  ;;  %v2724_v29 = vpop.f32.mrf.mxu1  ;;  %v7267_v46 = vld [vmem:[%s14171_s4 + $0x3a8] sm:$0xff] }
 0x32d   : > { %8632 = vmatprep.subr.mxu0 %v7254_v36  ;;  %7067 = vmatprep.mubr.msk.f32.mxu1 %vm1795_vm10, %v1598_v35 }
 0x32e   : > { %8633 = vmatpush3.msra.mxu0 %v7254_v36  ;;  %v11801_v28 = vpop.f32.mrf.mxu1  ;;  %2966 = vmatmul.mubr.f32.gmra.mxu1 %v1597_v37  ;;  %v7266_v37 = vld [vmem:[%s14171_s4 + $0x3a0] sm:$0xff] }
 0x32f   : > { %8634 = vmatprep.subr.mxu0 %v7253_v23  ;;  %7068 = vmatprep.mubr.msk.f32.mxu1 %vm1795_vm10, %v1600_v8 }
 0x330   : > { %8635 = vmatpush3.msra.mxu0 %v7253_v23  ;;  %v2729_v0 = vpop.f32.mrf.mxu1  ;;  %v1617_v23 = vld [vmem:[%s14168_s1 + $0x6f0] sm:$0xff] }
 0x331   : > { %8636 = vmatprep.subr.mxu0 %v7252_v47  ;;  %v7264_v0 = vld [vmem:[%s14171_s4 + $0x390] sm:$0xff] }
 0x332   : > { %8637 = vmatpush3.msra.mxu0 %v7252_v47  ;;  %v11816_v52 = vpop.f32.mrf.mxu1  ;;  %2971 = vmatmul.mubr.f32.gmra.mxu1 %v1599_v4  ;;  %v1620_v47 = vld [vmem:[%s14168_s1 + $0x708] sm:$0xff] }
 0x333   : > { %8638 = vmatprep.subr.mxu0 %v7251_v34  ;;  %7069 = vmatprep.mubr.msk.f32.mxu1 %vm1795_vm10, %v1602_v48  ;;  %v1619_v48 = vld [vmem:[%s14168_s1 + $0x700] sm:$0xff] }
 0x334   : > { %8639 = vmatpush3.msra.mxu0 %v7251_v34  ;;  %v2734_v43 = vpop.f32.mrf.mxu1 }
 0x335   : > { %8640 = vmatprep.subr.mxu0 %v7250_v41 }
 0x336   : > { %8641 = vmatpush3.msra.mxu0 %v7250_v41  ;;  %v11831_v22 = vpop.f32.mrf.mxu1  ;;  %2976 = vmatmul.mubr.f32.gmra.mxu1 %v1601_v11  ;;  %v7263_v41 = vld [vmem:[%s14171_s4 + $0x388] sm:$0xff]  ;;  %v1622_v11 = vld [vmem:[%s14168_s1 + $0x718] sm:$0xff] }
 0x337   : > { %8642 = vmatprep.subr.mxu0 %v7249_v27  ;;  %7070 = vmatprep.mubr.msk.f32.mxu1 %vm1795_vm10, %v1604_v26  ;;  %v7262_v26 = vld [vmem:[%s14171_s4 + $0x380] sm:$0xff] }
 0x338   : > { %8643 = vmatpush3.msra.mxu0 %v7249_v27  ;;  %v2739_v18 = vpop.f32.mrf.mxu1 }
 0x339   : > { %8644 = vmatprep.subr.mxu0 %v7248_v51 }
 0x33a   : > { %8645 = vmatpush3.msra.mxu0 %v7248_v51  ;;  %v11846_v31 = vpop.f32.mrf.mxu1  ;;  %2981 = vmatmul.mubr.f32.gmra.mxu1 %v1603_v20  ;;  %v7293_v20 = vld [vmem:[%s14171_s4 + $0x478] sm:$0xff] }
 0x33b   : > { %8646 = vmatprep.subr.mxu0 %v7247_v33  ;;  %7071 = vmatprep.mubr.msk.f32.mxu1 %vm1795_vm10, %v1606_v12  ;;  %v7292_v12 = vld [vmem:[%s14171_s4 + $0x470] sm:$0xff] }
 0x33c   : > { %8647 = vmatpush3.msra.mxu0 %v7247_v33  ;;  %v2744_v9 = vpop.f32.mrf.mxu1 }
 0x33d   : > { %8648 = vmatprep.subr.mxu0 %v7246_v19 }
 0x33e   : > { %8649 = vmatpush3.msra.mxu0 %v7246_v19  ;;  %v11864_v5 = vpop.f32.mrf.mxu1  ;;  %2986 = vmatmul.mubr.f32.gmra.mxu1 %v1605_v13  ;;  %v1623_v13 = vld [vmem:[%s14168_s1 + $0x720] sm:$0xff] }
 0x33f   : > { %8651 = vmatmul.mubr.f32.vlgmr.msra.gmra.mxu0 %v11731_v1  ;;  %8662 = vmatprep.subr.mxu0 %v7277_v21  ;;  %v11906_v1 = vpop.f32.mrf.mxu0 }
 0x340   : > { %8653 = vmatprep.mubr.f32.mxu0 %v11748_v55  ;;  %8663 = vmatpush3.msra.mxu0 %v7277_v21  ;;  %v2749_v63 = vpop.f32.mrf.mxu1  ;;  %v1614_v55 = vld [vmem:[%s14168_s1 + $0x6d8] sm:$0xff] }
 0x341   : > { %8664 = vmatprep.subr.mxu0 %v7276_v3  ;;  %7072 = vmatprep.mubr.msk.f32.mxu1 %vm1795_vm10, %v1608_v16  ;;  %v11925_v7 = vpop.f32.mrf.mxu0  ;;  %v7290_v16 = vld [vmem:[%s14171_s4 + $0x460] sm:$0xff] }
 0x342   : > { %8665 = vmatpush3.msra.mxu0 %v7276_v3  ;;  %v11881_v6 = vpop.f32.mrf.mxu1  ;;  %2991 = vmatmul.mubr.f32.gmra.mxu1 %v1607_v10  ;;  %v1626_v10 = vld [vmem:[%s14168_s1 + $0x738] sm:$0xff] }
 0x343   : > { %8654 = vmatmul.mubr.f32.gmra.mxu0 %v11765_v42  ;;  %8666 = vmatprep.subr.mxu0 %v7275_v38 }
 0x344   : > { %8656 = vmatprep.mubr.f32.mxu0 %v11782_v54  ;;  %8667 = vmatpush3.msra.mxu0 %v7275_v38  ;;  %v2754_v2 = vpop.f32.mrf.mxu1  ;;  %v1618_v54 = vld [vmem:[%s14168_s1 + $0x6f8] sm:$0xff]  ;;  %v1625_v38 = vld [vmem:[%s14168_s1 + $0x730] sm:$0xff] }
 0x345   : > { %8668 = vmatprep.subr.mxu0 %v7274_v50  ;;  %7073 = vmatprep.mubr.msk.f32.mxu1 %vm1795_vm10, %v1610_v53  ;;  %v7289_v53 = vld [vmem:[%s14171_s4 + $0x458] sm:$0xff] }
 0x346   : > { %8669 = vmatpush3.msra.mxu0 %v7274_v50  ;;  %v11898_v25 = vpop.f32.mrf.mxu1  ;;  %2996 = vmatmul.mubr.f32.gmra.mxu1 %v1609_v45 }
 0x347   : > { %8657 = vmatmul.mubr.f32.gmra.mxu0 %v11801_v28  ;;  %8670 = vmatprep.subr.mxu0 %v7273_v39  ;;  %v11938_v42 = vpop.f32.mrf.mxu0  ;;  %v7265_v28 = vld [vmem:[%s14171_s4 + $0x398] sm:$0xff] }
 0x348   : > { %8659 = vmatprep.mubr.f32.mxu0 %v11816_v52  ;;  %8671 = vmatpush3.msra.mxu0 %v7273_v39  ;;  %v2759_v17 = vpop.f32.mrf.mxu1  ;;  %v7288_v39 = vld [vmem:[%s14171_s4 + $0x450] sm:$0xff] }
 0x349   : > { %8672 = vmatprep.subr.mxu0 %v7272_v49  ;;  %7074 = vmatprep.mubr.msk.f32.mxu1 %vm1795_vm10, %v1612_v14  ;;  %v11957_v36 = vpop.f32.mrf.mxu0  ;;  %v1627_v14 = vld [vmem:[%s14168_s1 + $0x740] sm:$0xff]  ;;  %v7287_v17 = vld [vmem:[%s14171_s4 + $0x448] sm:$0xff] }
 0x34a   : > { %8673 = vmatpush3.msra.mxu0 %v7272_v49  ;;  %v11917_v44 = vpop.f32.mrf.mxu1  ;;  %3001 = vmatmul.mubr.f32.gmra.mxu1 %v1611_v24 }
 0x34b   : > { %8660 = vmatmul.mubr.f32.gmra.mxu0 %v11831_v22  ;;  %8674 = vmatprep.subr.mxu0 %v7271_v15  ;;  %v1621_v22 = vld [vmem:[%s14168_s1 + $0x710] sm:$0xff] }
 0x34c   : > { %8675 = vmatpush3.msra.mxu0 %v7271_v15  ;;  %8694 = vmatprep.mubr.f32.mxu0 %v11846_v31  ;;  %v2764_v58 = vpop.f32.mrf.mxu1  ;;  %v1624_v31 = vld [vmem:[%s14168_s1 + $0x728] sm:$0xff] }
 0x34d   : > { %8676 = vmatprep.subr.mxu0 %v7270_v62  ;;  %7075 = vmatprep.mubr.msk.f32.mxu1 %vm1795_vm10, %v1614_v55  ;;  %v1630_v55 = vld [vmem:[%s14168_s1 + $0x758] sm:$0xff]  ;;  %v1629_v58 = vld [vmem:[%s14168_s1 + $0x750] sm:$0xff] }
 0x34e   : > { %8677 = vmatpush3.msra.mxu0 %v7270_v62  ;;  %v11941_v32 = vpop.f32.mrf.mxu1  ;;  %3006 = vmatmul.mubr.f32.gmra.mxu1 %v1613_v56  ;;  %v7286_v62 = vld [vmem:[%s14171_s4 + $0x440] sm:$0xff] }
 0x34f   : > { %8678 = vmatprep.subr.mxu0 %v7269_v61  ;;  %7076 = vmatprep.mubr.msk.f32.mxu1 %vm1795_vm10, %v1616_v30  ;;  %v11964_v29 = vpop.f32.mrf.mxu0 }
 0x350   : > { %8679 = vmatpush3.msra.mxu0 %v7269_v61  ;;  %v2769_v57 = vpop.f32.mrf.mxu1 }
 0x351   : > { %8680 = vmatprep.subr.mxu0 %v7268_v60  ;;  %v11981_v34 = vpop.f32.mrf.mxu0  ;;  %v7508_v57 = vld [vmem:[%s14171_s4 + $0xb30] sm:$0xff] }
 0x352   : > { %8681 = vmatpush3.msra.mxu0 %v7268_v60  ;;  %v11959_v35 = vpop.f32.mrf.mxu1  ;;  %3011 = vmatmul.mubr.f32.gmra.mxu1 %v1615_v59  ;;  %v7284_v59 = vld [vmem:[%s14171_s4 + $0x430] sm:$0xff] }
 0x353   : > { %8682 = vmatprep.subr.mxu0 %v7267_v46  ;;  %7077 = vmatprep.mubr.msk.f32.mxu1 %vm1795_vm10, %v1618_v54 }
 0x354   : > { %8683 = vmatpush3.msra.mxu0 %v7267_v46  ;;  %v2774_v8 = vpop.f32.mrf.mxu1  ;;  %v1631_v46 = vld [vmem:[%s14168_s1 + $0x760] sm:$0xff]  ;;  %9340 = vmatprep.subr.mxu1 %v7508_v57 }
 0x355   : > { %8684 = vmatprep.subr.mxu0 %v7266_v37  ;;  %9341 = vmatpush3.msra.mxu1 %v7508_v57  ;;  %v1633_v8 = vld [vmem:[%s14168_s1 + $0x770] sm:$0xff] }
 0x356   : > { %8685 = vmatpush3.msra.mxu0 %v7266_v37  ;;  %v11976_v4 = vpop.f32.mrf.mxu1  ;;  %3016 = vmatmul.mubr.f32.gmra.mxu1 %v1617_v23  ;;  %v1634_v37 = vld [vmem:[%s14168_s1 + $0x778] sm:$0xff]  ;;  %v7282_v23 = vld [vmem:[%s14171_s4 + $0x420] sm:$0xff] }
 0x357   : > { %8686 = vmatprep.subr.mxu0 %v7265_v28  ;;  %7078 = vmatprep.mubr.msk.f32.mxu1 %vm1795_vm10, %v1620_v47  ;;  %v11993_v43 = vpop.f32.mrf.mxu0  ;;  %v7281_v47 = vld [vmem:[%s14171_s4 + $0x418] sm:$0xff] }
 0x358   : > { %8687 = vmatpush3.msra.mxu0 %v7265_v28  ;;  %v2779_v52 = vpop.f32.mrf.mxu1 }
 0x359   : > { %8688 = vmatprep.subr.mxu0 %v7264_v0  ;;  %v12007_v18 = vpop.f32.mrf.mxu0  ;;  %v1635_v52 = vld [vmem:[%s14168_s1 + $0x780] sm:$0xff] }
 0x35a   : > { %8689 = vmatpush3.msra.mxu0 %v7264_v0  ;;  %v11995_v27 = vpop.f32.mrf.mxu1  ;;  %3021 = vmatmul.mubr.f32.gmra.mxu1 %v1619_v48  ;;  %v7280_v48 = vld [vmem:[%s14171_s4 + $0x410] sm:$0xff] }
 0x35b   : > { %8690 = vmatprep.subr.mxu0 %v7263_v41  ;;  %7079 = vmatprep.mubr.msk.f32.mxu1 %vm1795_vm10, %v1622_v11  ;;  %v7279_v11 = vld [vmem:[%s14171_s4 + $0x408] sm:$0xff] }
 0x35c   : > { %8691 = vmatpush3.msra.mxu0 %v7263_v41  ;;  %v2784_v51 = vpop.f32.mrf.mxu1 }
 0x35d   : > { %8692 = vmatprep.subr.mxu0 %v7262_v26 }
 0x35e   : > { %8693 = vmatpush3.msra.mxu0 %v7262_v26  ;;  %v12009_v33 = vpop.f32.mrf.mxu1  ;;  %3026 = vmatmul.mubr.f32.gmra.mxu1 %v1621_v22  ;;  %v7278_v26 = vld [vmem:[%s14171_s4 + $0x400] sm:$0xff]  ;;  %v1637_v22 = vld [vmem:[%s14168_s1 + $0x790] sm:$0xff] }
 0x35f   : > { %v8432_v19 = vpop.f32.mrf.mxu0  ;;  %8695 = vmatmul.mubr.f32.vlgmr.msra.gmra.mxu0 %v11864_v5  ;;  %8706 = vmatprep.subr.mxu0 %v7293_v20 }
 0x360   : > { %v12022_v9 = vadd.f32 %v8432_v19, %v11906_v1  ;;  %8697 = vmatprep.mubr.f32.mxu0 %v11881_v6  ;;  %8707 = vmatpush3.msra.mxu0 %v7293_v20  ;;  %v2789_v21 = vpop.f32.mrf.mxu1  ;;  %v7309_v20 = vld [vmem:[%s14171_s4 + $0x4f8] sm:$0xff]  ;;  %v7308_v19 = vld [vmem:[%s14171_s4 + $0x4f0] sm:$0xff] }
 0x361   : > { %v12028_v3 = vpop.f32.mrf.mxu0  ;;  %8708 = vmatprep.subr.mxu0 %v7292_v12  ;;  %7080 = vmatprep.mubr.msk.f32.mxu1 %vm1795_vm10, %v1624_v31 }
 0x362   : > { %8709 = vmatpush3.msra.mxu0 %v7292_v12  ;;  %v12031_v5 = vpop.f32.mrf.mxu1  ;;  %3031 = vmatmul.mubr.f32.gmra.mxu1 %v1623_v13  ;;  %v1640_v13 = vld [vmem:[%s14168_s1 + $0x7a8] sm:$0xff] }
 0x363   : > { %v8435_v63 = vpop.f32.mrf.mxu0  ;;  %8698 = vmatmul.mubr.f32.gmra.mxu0 %v11898_v25  ;;  %8710 = vmatprep.subr.mxu0 %v7291_v40  ;;  %v1628_v25 = vld [vmem:[%s14168_s1 + $0x748] sm:$0xff] }
 0x364   : > { %v12044_v6 = vadd.f32 %v8435_v63, %v11938_v42  ;;  %8700 = vmatprep.mubr.f32.mxu0 %v11917_v44  ;;  %8711 = vmatpush3.msra.mxu0 %v7291_v40  ;;  %v2794_v50 = vpop.f32.mrf.mxu1  ;;  %v7285_v42 = vld [vmem:[%s14171_s4 + $0x438] sm:$0xff]  ;;  %v1639_v40 = vld [vmem:[%s14168_s1 + $0x7a0] sm:$0xff]  ;;  %v7307_v63 = vld [vmem:[%s14171_s4 + $0x4e8] sm:$0xff] }
 0x365   : > { %v12050_v45 = vpop.f32.mrf.mxu0  ;;  %8712 = vmatprep.subr.mxu0 %v7290_v16  ;;  %7081 = vmatprep.mubr.msk.f32.mxu1 %vm1795_vm10, %v1626_v10 }
 0x366   : > { %8713 = vmatpush3.msra.mxu0 %v7290_v16  ;;  %v12053_v2 = vpop.f32.mrf.mxu1  ;;  %3036 = vmatmul.mubr.f32.gmra.mxu1 %v1625_v38 }
 0x367   : > { %v8438_v49 = vpop.f32.mrf.mxu0  ;;  %8701 = vmatmul.mubr.f32.gmra.mxu0 %v11941_v32  ;;  %8714 = vmatprep.subr.mxu0 %v7289_v53  ;;  %v1632_v32 = vld [vmem:[%s14168_s1 + $0x768] sm:$0xff] }
 0x368   : > { %v12066_v1 = vadd.f32 %v8438_v49, %v11964_v29  ;;  %8703 = vmatprep.mubr.f32.mxu0 %v11959_v35  ;;  %8715 = vmatpush3.msra.mxu0 %v7289_v53  ;;  %v2799_v24 = vpop.f32.mrf.mxu1  ;;  %v7283_v35 = vld [vmem:[%s14171_s4 + $0x428] sm:$0xff]  ;;  %v1641_v53 = vld [vmem:[%s14168_s1 + $0x7b0] sm:$0xff]  ;;  %v7305_v49 = vld [vmem:[%s14171_s4 + $0x4d8] sm:$0xff] }
 0x369   : > { %v12072_v15 = vpop.f32.mrf.mxu0  ;;  %8716 = vmatprep.subr.mxu0 %v7288_v39  ;;  %7082 = vmatprep.mubr.msk.f32.mxu1 %vm1795_vm10, %v1628_v25  ;;  %v1644_v24 = vld [vmem:[%s14168_s1 + $0x7c8] sm:$0xff] }
 0x36a   : > { %8717 = vmatpush3.msra.mxu0 %v7288_v39  ;;  %v12075_v44 = vpop.f32.mrf.mxu1  ;;  %3041 = vmatmul.mubr.f32.gmra.mxu1 %v1627_v14 }
 0x36b   : > { %v8441_v56 = vpop.f32.mrf.mxu0  ;;  %8704 = vmatmul.mubr.f32.gmra.mxu0 %v11976_v4  ;;  %8718 = vmatprep.subr.mxu0 %v7287_v17  ;;  %v1636_v4 = vld [vmem:[%s14168_s1 + $0x788] sm:$0xff] }
 0x36c   : > { %v12088_v61 = vadd.f32 %v8441_v56, %v11993_v43  ;;  %8719 = vmatpush3.msra.mxu0 %v7287_v17  ;;  %8738 = vmatprep.mubr.f32.mxu0 %v11995_v27  ;;  %v2804_v30 = vpop.f32.mrf.mxu1  ;;  %v1638_v43 = vld [vmem:[%s14168_s1 + $0x798] sm:$0xff]  ;;  %v7303_v56 = vld [vmem:[%s14171_s4 + $0x4c8] sm:$0xff] }
 0x36d   : > { %8720 = vmatprep.subr.mxu0 %v7286_v62  ;;  %7083 = vmatprep.mubr.msk.f32.mxu1 %vm1795_vm10, %v1630_v55  ;;  %v12158_v12 = vpop.f32.mrf.mxu0 }
 0x36e   : > { %8721 = vmatpush3.msra.mxu0 %v7286_v62  ;;  %v12098_v60 = vpop.f32.mrf.mxu1  ;;  %3046 = vmatmul.mubr.f32.gmra.mxu1 %v1629_v58 }
 0x36f   : > { %8722 = vmatprep.subr.mxu0 %v7285_v42  ;;  %7084 = vmatprep.mubr.msk.f32.mxu1 %vm1795_vm10, %v1632_v32 }
 0x370   : > { %8723 = vmatpush3.msra.mxu0 %v7285_v42  ;;  %v2809_v54 = vpop.f32.mrf.mxu1  ;;  %v1646_v42 = vld [vmem:[%s14168_s1 + $0x7d8] sm:$0xff] }
 0x371   : > { %8724 = vmatprep.subr.mxu0 %v7284_v59  ;;  %v1648_v54 = vld [vmem:[%s14168_s1 + $0x7e8] sm:$0xff] }
 0x372   : > { %8725 = vmatpush3.msra.mxu0 %v7284_v59  ;;  %v12116_v29 = vpop.f32.mrf.mxu1  ;;  %3051 = vmatmul.mubr.f32.gmra.mxu1 %v1631_v46  ;;  %v7301_v46 = vld [vmem:[%s14171_s4 + $0x4b8] sm:$0xff] }
 0x373   : > { %8726 = vmatprep.subr.mxu0 %v7283_v35  ;;  %7085 = vmatprep.mubr.msk.f32.mxu1 %vm1795_vm10, %v1634_v37  ;;  %v1647_v37 = vld [vmem:[%s14168_s1 + $0x7e0] sm:$0xff] }
 0x374   : > { %8727 = vmatpush3.msra.mxu0 %v7283_v35  ;;  %v2814_v28 = vpop.f32.mrf.mxu1 }
 0x375   : > { %8728 = vmatprep.subr.mxu0 %v7282_v23 }
 0x376   : > { %8729 = vmatpush3.msra.mxu0 %v7282_v23  ;;  %v12131_v0 = vpop.f32.mrf.mxu1  ;;  %3056 = vmatmul.mubr.f32.gmra.mxu1 %v1633_v8  ;;  %v7299_v23 = vld [vmem:[%s14171_s4 + $0x4a8] sm:$0xff]  ;;  %v1650_v8 = vld [vmem:[%s14168_s1 + $0x7f8] sm:$0xff] }
 0x377   : > { %8730 = vmatprep.subr.mxu0 %v7281_v47  ;;  %7086 = vmatprep.mubr.msk.f32.mxu1 %vm1795_vm10, %v1636_v4  ;;  %v1649_v4 = vld [vmem:[%s14168_s1 + $0x7f0] sm:$0xff] }
 0x378   : > { %8731 = vmatpush3.msra.mxu0 %v7281_v47  ;;  %v2819_v41 = vpop.f32.mrf.mxu1  ;;  %v7298_v47 = vld [vmem:[%s14171_s4 + $0x4a0] sm:$0xff] }
 0x379   : > { %8732 = vmatprep.subr.mxu0 %v7280_v48 }
 0x37a   : > { %8733 = vmatpush3.msra.mxu0 %v7280_v48  ;;  %v12146_v27 = vpop.f32.mrf.mxu1  ;;  %3061 = vmatmul.mubr.f32.gmra.mxu1 %v1635_v52  ;;  %v7297_v48 = vld [vmem:[%s14171_s4 + $0x498] sm:$0xff]  ;;  %v1652_v52 = vld [vmem:[%s14168_s1 + $0x808] sm:$0xff] }
 0x37b   : > { %8734 = vmatprep.subr.mxu0 %v7279_v11  ;;  %7087 = vmatprep.mubr.msk.f32.mxu1 %vm1795_vm10, %v1638_v43  ;;  %v1651_v43 = vld [vmem:[%s14168_s1 + $0x800] sm:$0xff] }
 0x37c   : > { %8735 = vmatpush3.msra.mxu0 %v7279_v11  ;;  %v2824_v51 = vpop.f32.mrf.mxu1  ;;  %v7296_v11 = vld [vmem:[%s14171_s4 + $0x490] sm:$0xff] }
 0x37d   : > { %8736 = vmatprep.subr.mxu0 %v7278_v26 }
 0x37e   : > { %8737 = vmatpush3.msra.mxu0 %v7278_v26  ;;  %v12160_v31 = vpop.f32.mrf.mxu1  ;;  %3066 = vmatmul.mubr.f32.gmra.mxu1 %v1637_v22  ;;  %v7295_v26 = vld [vmem:[%s14171_s4 + $0x488] sm:$0xff]  ;;  %v1654_v22 = vld [vmem:[%s14168_s1 + $0x818] sm:$0xff] }
 0x37f   : > { %v8476_v21 = vpop.f32.mrf.mxu0  ;;  %8739 = vmatmul.mubr.f32.vlgmr.msra.gmra.mxu0 %v12009_v33  ;;  %8750 = vmatprep.subr.mxu0 %v7309_v20 }
 0x380   : > { %v12173_v16 = vadd.f32 %v8476_v21, %v12022_v9  ;;  %8741 = vmatprep.mubr.f32.mxu0 %v12031_v5  ;;  %8751 = vmatpush3.msra.mxu0 %v7309_v20  ;;  %v2829_v10 = vpop.f32.mrf.mxu1  ;;  %v7306_v9 = vld [vmem:[%s14171_s4 + $0x4e0] sm:$0xff]  ;;  %v1642_v5 = vld [vmem:[%s14168_s1 + $0x7b8] sm:$0xff] }
 0x381   : > { %v12179_v38 = vpop.f32.mrf.mxu0  ;;  %8752 = vmatprep.subr.mxu0 %v7308_v19  ;;  %7088 = vmatprep.mubr.msk.f32.mxu1 %vm1795_vm10, %v1640_v13  ;;  %v7294_v20 = vld [vmem:[%s14171_s4 + $0x480] sm:$0xff]  ;;  %v7325_v21 = vld [vmem:[%s14171_s4 + $0x578] sm:$0xff] }
 0x382   : > { %8753 = vmatpush3.msra.mxu0 %v7308_v19  ;;  %v12182_v33 = vpop.f32.mrf.mxu1  ;;  %3071 = vmatmul.mubr.f32.gmra.mxu1 %v1639_v40  ;;  %v1653_v19 = vld [vmem:[%s14168_s1 + $0x810] sm:$0xff] }
 0x383   : > { %v8479_v50 = vpop.f32.mrf.mxu0  ;;  %8742 = vmatmul.mubr.f32.gmra.mxu0 %v12053_v2  ;;  %8754 = vmatprep.subr.mxu0 %v7307_v63 }
 0x384   : > { %v12195_v39 = vadd.f32 %v8479_v50, %v12044_v6  ;;  %8744 = vmatprep.mubr.f32.mxu0 %v12075_v44  ;;  %8755 = vmatpush3.msra.mxu0 %v7307_v63  ;;  %v2834_v25 = vpop.f32.mrf.mxu1  ;;  %v7304_v6 = vld [vmem:[%s14171_s4 + $0x4d0] sm:$0xff]  ;;  %v1643_v44 = vld [vmem:[%s14168_s1 + $0x7c0] sm:$0xff] }
 0x385   : > { %v12201_v14 = vpop.f32.mrf.mxu0  ;;  %8756 = vmatprep.subr.mxu0 %v7306_v9  ;;  %7089 = vmatprep.mubr.msk.f32.mxu1 %vm1795_vm10, %v1642_v5  ;;  %v7324_v63 = vld [vmem:[%s14171_s4 + $0x570] sm:$0xff]  ;;  %v1655_v50 = vld [vmem:[%s14168_s1 + $0x820] sm:$0xff] }
 0x386   : > { %8757 = vmatpush3.msra.mxu0 %v7306_v9  ;;  %v12204_v2 = vpop.f32.mrf.mxu1  ;;  %3076 = vmatmul.mubr.f32.gmra.mxu1 %v1641_v53  ;;  %v1656_v9 = vld [vmem:[%s14168_s1 + $0x828] sm:$0xff] }
 0x387   : > { %v8482_v17 = vpop.f32.mrf.mxu0  ;;  %8745 = vmatmul.mubr.f32.gmra.mxu0 %v12098_v60  ;;  %8758 = vmatprep.subr.mxu0 %v7305_v49  ;;  %v1645_v60 = vld [vmem:[%s14168_s1 + $0x7d0] sm:$0xff] }
 0x388   : > { %v12217_v62 = vadd.f32 %v8482_v17, %v12066_v1  ;;  %8747 = vmatprep.mubr.f32.mxu0 %v12116_v29  ;;  %8759 = vmatpush3.msra.mxu0 %v7305_v49  ;;  %v2839_v55 = vpop.f32.mrf.mxu1  ;;  %v7302_v1 = vld [vmem:[%s14171_s4 + $0x4c0] sm:$0xff]  ;;  %v7323_v49 = vld [vmem:[%s14171_s4 + $0x568] sm:$0xff]  ;;  %v1657_v17 = vld [vmem:[%s14168_s1 + $0x830] sm:$0xff] }
 0x389   : > { %v12223_v58 = vpop.f32.mrf.mxu0  ;;  %8760 = vmatprep.subr.mxu0 %v7304_v6  ;;  %7090 = vmatprep.mubr.msk.f32.mxu1 %vm1795_vm10, %v1644_v24 }
 0x38a   : > { %8761 = vmatpush3.msra.mxu0 %v7304_v6  ;;  %v12226_v30 = vpop.f32.mrf.mxu1  ;;  %3081 = vmatmul.mubr.f32.gmra.mxu1 %v1643_v44 }
 0x38b   : > { %v8485_v32 = vpop.f32.mrf.mxu0  ;;  %8748 = vmatmul.mubr.f32.gmra.mxu0 %v12131_v0  ;;  %8762 = vmatprep.subr.mxu0 %v7303_v56 }
 0x38c   : > { %v12239_v59 = vadd.f32 %v8485_v32, %v12088_v61  ;;  %8763 = vmatpush3.msra.mxu0 %v7303_v56  ;;  %8782 = vmatprep.mubr.f32.mxu0 %v12146_v27  ;;  %v2844_v57 = vpop.f32.mrf.mxu1  ;;  %v7300_v61 = vld [vmem:[%s14171_s4 + $0x4b0] sm:$0xff]  ;;  %v7321_v56 = vld [vmem:[%s14171_s4 + $0x558] sm:$0xff]  ;;  %v1659_v32 = vld [vmem:[%s14168_s1 + $0x840] sm:$0xff] }
 0x38d   : > { %8764 = vmatprep.subr.mxu0 %v7302_v1  ;;  %7091 = vmatprep.mubr.msk.f32.mxu1 %vm1795_vm10, %v1646_v42  ;;  %v12306_v40 = vpop.f32.mrf.mxu0 }
 0x38e   : > { %8765 = vmatpush3.msra.mxu0 %v7302_v1  ;;  %v12249_v35 = vpop.f32.mrf.mxu1  ;;  %3086 = vmatmul.mubr.f32.gmra.mxu1 %v1645_v60 }
 0x38f   : > { %8766 = vmatprep.subr.mxu0 %v7301_v46  ;;  %7092 = vmatprep.mubr.msk.f32.mxu1 %vm1795_vm10, %v1648_v54 }
 0x390   : > { %8767 = vmatpush3.msra.mxu0 %v7301_v46  ;;  %v2849_v29 = vpop.f32.mrf.mxu1  ;;  %v7319_v46 = vld [vmem:[%s14171_s4 + $0x548] sm:$0xff] }
 0x391   : > { %8768 = vmatprep.subr.mxu0 %v7300_v61  ;;  %v1661_v29 = vld [vmem:[%s14168_s1 + $0x850] sm:$0xff] }
 0x392   : > { %8769 = vmatpush3.msra.mxu0 %v7300_v61  ;;  %v12264_v28 = vpop.f32.mrf.mxu1  ;;  %3091 = vmatmul.mubr.f32.gmra.mxu1 %v1647_v37  ;;  %v1662_v61 = vld [vmem:[%s14168_s1 + $0x858] sm:$0xff] }
 0x393   : > { %8770 = vmatprep.subr.mxu0 %v7299_v23  ;;  %7093 = vmatprep.mubr.msk.f32.mxu1 %vm1795_vm10, %v1650_v8 }
 0x394   : > { %8771 = vmatpush3.msra.mxu0 %v7299_v23  ;;  %v2854_v0 = vpop.f32.mrf.mxu1 }
 0x395   : > { %8772 = vmatprep.subr.mxu0 %v7298_v47  ;;  %v7316_v0 = vld [vmem:[%s14171_s4 + $0x530] sm:$0xff] }
 0x396   : > { %8773 = vmatpush3.msra.mxu0 %v7298_v47  ;;  %v12279_v41 = vpop.f32.mrf.mxu1  ;;  %3096 = vmatmul.mubr.f32.gmra.mxu1 %v1649_v4  ;;  %v1664_v47 = vld [vmem:[%s14168_s1 + $0x868] sm:$0xff] }
 0x397   : > { %8774 = vmatprep.subr.mxu0 %v7297_v48  ;;  %7094 = vmatprep.mubr.msk.f32.mxu1 %vm1795_vm10, %v1652_v52 }
 0x398   : > { %8775 = vmatpush3.msra.mxu0 %v7297_v48  ;;  %v2859_v27 = vpop.f32.mrf.mxu1  ;;  %v1663_v48 = vld [vmem:[%s14168_s1 + $0x860] sm:$0xff] }
 0x399   : > { %8776 = vmatprep.subr.mxu0 %v7296_v11  ;;  %v7314_v27 = vld [vmem:[%s14171_s4 + $0x520] sm:$0xff] }
 0x39a   : > { %8777 = vmatpush3.msra.mxu0 %v7296_v11  ;;  %v12294_v51 = vpop.f32.mrf.mxu1  ;;  %3101 = vmatmul.mubr.f32.gmra.mxu1 %v1651_v43  ;;  %v1666_v11 = vld [vmem:[%s14168_s1 + $0x878] sm:$0xff] }
 0x39b   : > { %8778 = vmatprep.subr.mxu0 %v7295_v26  ;;  %7095 = vmatprep.mubr.msk.f32.mxu1 %vm1795_vm10, %v1654_v22 }
 0x39c   : > { %8779 = vmatpush3.msra.mxu0 %v7295_v26  ;;  %v2864_v13 = vpop.f32.mrf.mxu1  ;;  %v1665_v26 = vld [vmem:[%s14168_s1 + $0x870] sm:$0xff] }
 0x39d   : > { %8780 = vmatprep.subr.mxu0 %v7294_v20  ;;  %v7312_v13 = vld [vmem:[%s14171_s4 + $0x510] sm:$0xff] }
 0x39e   : > { %8781 = vmatpush3.msra.mxu0 %v7294_v20  ;;  %v12308_v10 = vpop.f32.mrf.mxu1  ;;  %3106 = vmatmul.mubr.f32.gmra.mxu1 %v1653_v19  ;;  %v1668_v20 = vld [vmem:[%s14168_s1 + $0x888] sm:$0xff] }
 0x39f   : > { %v8520_v5 = vpop.f32.mrf.mxu0  ;;  %8783 = vmatmul.mubr.f32.vlgmr.msra.gmra.mxu0 %v12160_v31  ;;  %8794 = vmatprep.subr.mxu0 %v7325_v21 }
 0x3a0   : > { %v12321_v53 = vadd.f32 %v8520_v5, %v12173_v16  ;;  %8785 = vmatprep.mubr.f32.mxu0 %v12182_v33  ;;  %8795 = vmatpush3.msra.mxu0 %v7325_v21  ;;  %v2869_v25 = vpop.f32.mrf.mxu1  ;;  %v7322_v16 = vld [vmem:[%s14171_s4 + $0x560] sm:$0xff]  ;;  %v1658_v33 = vld [vmem:[%s14168_s1 + $0x838] sm:$0xff] }
 0x3a1   : > { %v12327_v6 = vpop.f32.mrf.mxu0  ;;  %8796 = vmatprep.subr.mxu0 %v7324_v63  ;;  %7096 = vmatprep.mubr.msk.f32.mxu1 %vm1795_vm10, %v1656_v9  ;;  %v1667_v21 = vld [vmem:[%s14168_s1 + $0x880] sm:$0xff]  ;;  %v7311_v9 = vld [vmem:[%s14171_s4 + $0x508] sm:$0xff]  ;;  %v1670_v5 = vld [vmem:[%s14168_s1 + $0x898] sm:$0xff] }
 0x3a2   : > { %8797 = vmatpush3.msra.mxu0 %v7324_v63  ;;  %v12330_v31 = vpop.f32.mrf.mxu1  ;;  %3111 = vmatmul.mubr.f32.gmra.mxu1 %v1655_v50  ;;  %v7310_v25 = vld [vmem:[%s14171_s4 + $0x500] sm:$0xff] }
 0x3a3   : > { %v8523_v24 = vpop.f32.mrf.mxu0  ;;  %8786 = vmatmul.mubr.f32.gmra.mxu0 %v12204_v2  ;;  %8798 = vmatprep.subr.mxu0 %v7323_v49 }
 0x3a4   : > { %v12343_v44 = vadd.f32 %v8523_v24, %v12195_v39  ;;  %8788 = vmatprep.mubr.f32.mxu0 %v12226_v30  ;;  %8799 = vmatpush3.msra.mxu0 %v7323_v49  ;;  %v2874_v55 = vpop.f32.mrf.mxu1  ;;  %v7320_v39 = vld [vmem:[%s14171_s4 + $0x550] sm:$0xff]  ;;  %v1660_v30 = vld [vmem:[%s14168_s1 + $0x848] sm:$0xff] }
 0x3a5   : > { %v12349_v1 = vpop.f32.mrf.mxu0  ;;  %8800 = vmatprep.subr.mxu0 %v7322_v16  ;;  %7097 = vmatprep.mubr.msk.f32.mxu1 %vm1795_vm10, %v1658_v33  ;;  %v1669_v49 = vld [vmem:[%s14168_s1 + $0x890] sm:$0xff]  ;;  %v7341_v33 = vld [vmem:[%s14171_s4 + $0x5f8] sm:$0xff] }
 0x3a6   : > { %8801 = vmatpush3.msra.mxu0 %v7322_v16  ;;  %v12352_v2 = vpop.f32.mrf.mxu1  ;;  %3116 = vmatmul.mubr.f32.gmra.mxu1 %v1657_v17  ;;  %v7340_v55 = vld [vmem:[%s14171_s4 + $0x5f0] sm:$0xff] }
 0x3a7   : > { %v8526_v42 = vpop.f32.mrf.mxu0  ;;  %8789 = vmatmul.mubr.f32.gmra.mxu0 %v12249_v35  ;;  %8802 = vmatprep.subr.mxu0 %v7321_v56 }
 0x3a8   : > { %v12365_v60 = vadd.f32 %v8526_v42, %v12217_v62  ;;  %8791 = vmatprep.mubr.f32.mxu0 %v12264_v28  ;;  %8803 = vmatpush3.msra.mxu0 %v7321_v56  ;;  %v2879_v57 = vpop.f32.mrf.mxu1  ;;  %v7318_v62 = vld [vmem:[%s14171_s4 + $0x540] sm:$0xff]  ;;  %v7317_v28 = vld [vmem:[%s14171_s4 + $0x538] sm:$0xff]  ;;  %v1672_v56 = vld [vmem:[%s14168_s1 + $0x8a8] sm:$0xff] }
 0x3a9   : > { %v12371_v54 = vpop.f32.mrf.mxu0  ;;  %8804 = vmatprep.subr.mxu0 %v7320_v39  ;;  %7098 = vmatprep.mubr.msk.f32.mxu1 %vm1795_vm10, %v1660_v30  ;;  %v1671_v30 = vld [vmem:[%s14168_s1 + $0x8a0] sm:$0xff]  ;;  %v7339_v57 = vld [vmem:[%s14171_s4 + $0x5e8] sm:$0xff] }
 0x3aa   : > { %8805 = vmatpush3.msra.mxu0 %v7320_v39  ;;  %v12374_v35 = vpop.f32.mrf.mxu1  ;;  %3121 = vmatmul.mubr.f32.gmra.mxu1 %v1659_v32 }
 0x3ab   : > { %v8529_v37 = vpop.f32.mrf.mxu0  ;;  %8792 = vmatmul.mubr.f32.gmra.mxu0 %v12279_v41  ;;  %8806 = vmatprep.subr.mxu0 %v7319_v46  ;;  %v7315_v41 = vld [vmem:[%s14171_s4 + $0x528] sm:$0xff] }
 0x3ac   : > { %v12387_v23 = vadd.f32 %v8529_v37, %v12239_v59  ;;  %8807 = vmatpush3.msra.mxu0 %v7319_v46  ;;  %8826 = vmatprep.mubr.f32.mxu0 %v12294_v51  ;;  %v2884_v8 = vpop.f32.mrf.mxu1  ;;  %v7507_v59 = vld [vmem:[%s14171_s4 + $0xb28] sm:$0xff]  ;;  %v7313_v51 = vld [vmem:[%s14171_s4 + $0x518] sm:$0xff] }
 0x3ad   : > { %8808 = vmatprep.subr.mxu0 %v7318_v62  ;;  %7099 = vmatprep.mubr.msk.f32.mxu1 %vm1795_vm10, %v1662_v61  ;;  %v12457_v24 = vpop.f32.mrf.mxu0  ;;  %v1673_v61 = vld [vmem:[%s14168_s1 + $0x8b0] sm:$0xff]  ;;  %v7337_v8 = vld [vmem:[%s14171_s4 + $0x5d8] sm:$0xff] }
 0x3ae   : > { %8809 = vmatpush3.msra.mxu0 %v7318_v62  ;;  %v12400_v4 = vpop.f32.mrf.mxu1  ;;  %3126 = vmatmul.mubr.f32.gmra.mxu1 %v1661_v29 }
 0x3af   : > { %8810 = vmatprep.subr.mxu0 %v7317_v28  ;;  %7100 = vmatprep.mubr.msk.f32.mxu1 %vm1795_vm10, %v1664_v47 }
 0x3b0   : > { %8811 = vmatpush3.msra.mxu0 %v7317_v28  ;;  %v2889_v52 = vpop.f32.mrf.mxu1  ;;  %9342 = vmatprep.subr.mxu1 %v7507_v59 }
 0x3b1   : > { %8812 = vmatprep.subr.mxu0 %v7316_v0  ;;  %9343 = vmatpush3.msra.mxu1 %v7507_v59  ;;  %v1675_v59 = vld [vmem:[%s14168_s1 + $0x8c0] sm:$0xff]  ;;  %v7335_v52 = vld [vmem:[%s14171_s4 + $0x5c8] sm:$0xff] }
 0x3b2   : > { %8813 = vmatpush3.msra.mxu0 %v7316_v0  ;;  %v12415_v43 = vpop.f32.mrf.mxu1  ;;  %3131 = vmatmul.mubr.f32.gmra.mxu1 %v1663_v48 }
 0x3b3   : > { %8814 = vmatprep.subr.mxu0 %v7315_v41  ;;  %7101 = vmatprep.mubr.msk.f32.mxu1 %vm1795_vm10, %v1666_v11  ;;  %v1678_v11 = vld [vmem:[%s14168_s1 + $0x8d8] sm:$0xff] }
 0x3b4   : > { %8815 = vmatpush3.msra.mxu0 %v7315_v41  ;;  %v2894_v22 = vpop.f32.mrf.mxu1 }
 0x3b5   : > { %8816 = vmatprep.subr.mxu0 %v7314_v27 }
 0x3b6   : > { %8817 = vmatpush3.msra.mxu0 %v7314_v27  ;;  %v12430_v19 = vpop.f32.mrf.mxu1  ;;  %3136 = vmatmul.mubr.f32.gmra.mxu1 %v1665_v26  ;;  %v1677_v27 = vld [vmem:[%s14168_s1 + $0x8d0] sm:$0xff] }
 0x3b7   : > { %8818 = vmatprep.subr.mxu0 %v7313_v51  ;;  %7102 = vmatprep.mubr.msk.f32.mxu1 %vm1795_vm10, %v1668_v20  ;;  %v1680_v20 = vld [vmem:[%s14168_s1 + $0x8e8] sm:$0xff] }
 0x3b8   : > { %8819 = vmatpush3.msra.mxu0 %v7313_v51  ;;  %v2899_v63 = vpop.f32.mrf.mxu1  ;;  %v7333_v51 = vld [vmem:[%s14171_s4 + $0x5b8] sm:$0xff] }
 0x3b9   : > { %8820 = vmatprep.subr.mxu0 %v7312_v13  ;;  %v7331_v63 = vld [vmem:[%s14171_s4 + $0x5a8] sm:$0xff] }
 0x3ba   : > { %8821 = vmatpush3.msra.mxu0 %v7312_v13  ;;  %v12445_v50 = vpop.f32.mrf.mxu1  ;;  %3141 = vmatmul.mubr.f32.gmra.mxu1 %v1667_v21  ;;  %v1679_v13 = vld [vmem:[%s14168_s1 + $0x8e0] sm:$0xff] }
 0x3bb   : > { %8822 = vmatprep.subr.mxu0 %v7311_v9  ;;  %7103 = vmatprep.mubr.msk.f32.mxu1 %vm1795_vm10, %v1670_v5 }
 0x3bc   : > { %8823 = vmatpush3.msra.mxu0 %v7311_v9  ;;  %v2904_v16 = vpop.f32.mrf.mxu1  ;;  %v1682_v9 = vld [vmem:[%s14168_s1 + $0x8f8] sm:$0xff] }
 0x3bd   : > { %8824 = vmatprep.subr.mxu0 %v7310_v25 }
 0x3be   : > { %8825 = vmatpush3.msra.mxu0 %v7310_v25  ;;  %v12459_v17 = vpop.f32.mrf.mxu1  ;;  %3146 = vmatmul.mubr.f32.gmra.mxu1 %v1669_v49  ;;  %v7506_v25 = vld [vmem:[%s14171_s4 + $0xb20] sm:$0xff]  ;;  %v1681_v49 = vld [vmem:[%s14168_s1 + $0x8f0] sm:$0xff] }
 0x3bf   : > { %v8564_v39 = vpop.f32.mrf.mxu0  ;;  %8827 = vmatmul.mubr.f32.vlgmr.msra.gmra.mxu0 %v12308_v10  ;;  %8838 = vmatprep.subr.mxu0 %v7341_v33 }
 0x3c0   : > { %v12472_v42 = vadd.f32 %v8564_v39, %v12321_v53  ;;  %8829 = vmatprep.mubr.f32.mxu0 %v12330_v31  ;;  %8839 = vmatpush3.msra.mxu0 %v7341_v33  ;;  %v2909_v32 = vpop.f32.mrf.mxu1  ;;  %v7338_v53 = vld [vmem:[%s14171_s4 + $0x5e0] sm:$0xff]  ;;  %v1674_v31 = vld [vmem:[%s14168_s1 + $0x8b8] sm:$0xff]  ;;  %v7328_v39 = vld [vmem:[%s14171_s4 + $0x590] sm:$0xff] }
 0x3c1   : > { %v12478_v46 = vpop.f32.mrf.mxu0  ;;  %8840 = vmatprep.subr.mxu0 %v7340_v55  ;;  %7104 = vmatprep.mubr.msk.f32.mxu1 %vm1795_vm10, %v1672_v56  ;;  %v7329_v33 = vld [vmem:[%s14171_s4 + $0x598] sm:$0xff] }
 0x3c2   : > { %8841 = vmatpush3.msra.mxu0 %v7340_v55  ;;  %v12481_v10 = vpop.f32.mrf.mxu1  ;;  %3151 = vmatmul.mubr.f32.gmra.mxu1 %v1671_v30  ;;  %v1684_v55 = vld [vmem:[%s14168_s1 + $0x908] sm:$0xff]  ;;  %v1683_v30 = vld [vmem:[%s14168_s1 + $0x900] sm:$0xff] }
 0x3c3   : > { %v8567_v62 = vpop.f32.mrf.mxu0  ;;  %8830 = vmatmul.mubr.f32.gmra.mxu0 %v12352_v2  ;;  %8842 = vmatprep.subr.mxu0 %v7339_v57 }
 0x3c4   : > { %v12494_v37 = vadd.f32 %v8567_v62, %v12343_v44  ;;  %8832 = vmatprep.mubr.f32.mxu0 %v12374_v35  ;;  %8843 = vmatpush3.msra.mxu0 %v7339_v57  ;;  %v2914_v29 = vpop.f32.mrf.mxu1  ;;  %v7336_v44 = vld [vmem:[%s14171_s4 + $0x5d0] sm:$0xff]  ;;  %v1676_v35 = vld [vmem:[%s14168_s1 + $0x8c8] sm:$0xff]  ;;  %v7326_v62 = vld [vmem:[%s14171_s4 + $0x580] sm:$0xff] }
 0x3c5   : > { %v12500_v28 = vpop.f32.mrf.mxu0  ;;  %8844 = vmatprep.subr.mxu0 %v7338_v53  ;;  %7105 = vmatprep.mubr.msk.f32.mxu1 %vm1795_vm10, %v1674_v31  ;;  %v7327_v57 = vld [vmem:[%s14171_s4 + $0x588] sm:$0xff] }
 0x3c6   : > { %8845 = vmatpush3.msra.mxu0 %v7338_v53  ;;  %v12503_v2 = vpop.f32.mrf.mxu1  ;;  %3156 = vmatmul.mubr.f32.gmra.mxu1 %v1673_v61  ;;  %v1686_v53 = vld [vmem:[%s14168_s1 + $0x918] sm:$0xff]  ;;  %v1685_v61 = vld [vmem:[%s14168_s1 + $0x910] sm:$0xff] }
 0x3c7   : > { %v8570_v47 = vpop.f32.mrf.mxu0  ;;  %8833 = vmatmul.mubr.f32.gmra.mxu0 %v12400_v4  ;;  %8846 = vmatprep.subr.mxu0 %v7337_v8 }
 0x3c8   : > { %v12516_v0 = vadd.f32 %v8570_v47, %v12365_v60  ;;  %8835 = vmatprep.mubr.f32.mxu0 %v12415_v43  ;;  %8847 = vmatpush3.msra.mxu0 %v7337_v8  ;;  %v2919_v48 = vpop.f32.mrf.mxu1  ;;  %v7334_v60 = vld [vmem:[%s14171_s4 + $0x5c0] sm:$0xff]  ;;  %v7357_v8 = vld [vmem:[%s14171_s4 + $0x678] sm:$0xff]  ;;  %v7356_v47 = vld [vmem:[%s14171_s4 + $0x670] sm:$0xff] }
 0x3c9   : > { %v12522_v41 = vpop.f32.mrf.mxu0  ;;  %8848 = vmatprep.subr.mxu0 %v7336_v44  ;;  %7106 = vmatprep.mubr.msk.f32.mxu1 %vm1795_vm10, %v1676_v35 }
 0x3ca   : > { %8849 = vmatpush3.msra.mxu0 %v7336_v44  ;;  %v12525_v4 = vpop.f32.mrf.mxu1  ;;  %3161 = vmatmul.mubr.f32.gmra.mxu1 %v1675_v59  ;;  %v1688_v59 = vld [vmem:[%s14168_s1 + $0x928] sm:$0xff] }
 0x3cb   : > { %v8573_v43 = vpop.f32.mrf.mxu0  ;;  %8836 = vmatmul.mubr.f32.gmra.mxu0 %v12430_v19  ;;  %8850 = vmatprep.subr.mxu0 %v7335_v52 }
 0x3cc   : > { %v12538_v26 = vadd.f32 %v8573_v43, %v12387_v23  ;;  %8851 = vmatpush3.msra.mxu0 %v7335_v52  ;;  %8870 = vmatprep.mubr.f32.mxu0 %v12445_v50  ;;  %v2924_v22 = vpop.f32.mrf.mxu1  ;;  %v7332_v23 = vld [vmem:[%s14171_s4 + $0x5b0] sm:$0xff]  ;;  %v7330_v50 = vld [vmem:[%s14171_s4 + $0x5a0] sm:$0xff]  ;;  %v7355_v43 = vld [vmem:[%s14171_s4 + $0x668] sm:$0xff] }
 0x3cd   : > { %8852 = vmatprep.subr.mxu0 %v7334_v60  ;;  %7107 = vmatprep.mubr.msk.f32.mxu1 %vm1795_vm10, %v1678_v11  ;;  %v12608_v44 = vpop.f32.mrf.mxu0  ;;  %v1687_v52 = vld [vmem:[%s14168_s1 + $0x920] sm:$0xff] }
 0x3ce   : > { %8853 = vmatpush3.msra.mxu0 %v7334_v60  ;;  %v12548_v19 = vpop.f32.mrf.mxu1  ;;  %3166 = vmatmul.mubr.f32.gmra.mxu1 %v1677_v27 }
 0x3cf   : > { %8854 = vmatprep.subr.mxu0 %v7333_v51  ;;  %7108 = vmatprep.mubr.msk.f32.mxu1 %vm1795_vm10, %v1680_v20 }
 0x3d0   : > { %8855 = vmatpush3.msra.mxu0 %v7333_v51  ;;  %v2929_v21 = vpop.f32.mrf.mxu1  ;;  %9344 = vmatprep.subr.mxu1 %v7506_v25  ;;  %v1689_v51 = vld [vmem:[%s14168_s1 + $0x930] sm:$0xff] }
 0x3d1   : > { %8856 = vmatprep.subr.mxu0 %v7332_v23  ;;  %9345 = vmatpush3.msra.mxu1 %v7506_v25 }
 0x3d2   : > { %8857 = vmatpush3.msra.mxu0 %v7332_v23  ;;  %v12563_v5 = vpop.f32.mrf.mxu1  ;;  %3171 = vmatmul.mubr.f32.gmra.mxu1 %v1679_v13  ;;  %v7353_v13 = vld [vmem:[%s14171_s4 + $0x658] sm:$0xff] }
 0x3d3   : > { %8858 = vmatprep.subr.mxu0 %v7331_v63  ;;  %7109 = vmatprep.mubr.msk.f32.mxu1 %vm1795_vm10, %v1682_v9  ;;  %v1691_v9 = vld [vmem:[%s14168_s1 + $0x940] sm:$0xff] }
 0x3d4   : > { %8859 = vmatpush3.msra.mxu0 %v7331_v63  ;;  %v2934_v16 = vpop.f32.mrf.mxu1 }
 0x3d5   : > { %8860 = vmatprep.subr.mxu0 %v7330_v50 }
 0x3d6   : > { %8861 = vmatpush3.msra.mxu0 %v7330_v50  ;;  %v12581_v56 = vpop.f32.mrf.mxu1  ;;  %3176 = vmatmul.mubr.f32.gmra.mxu1 %v1681_v49  ;;  %v7351_v49 = vld [vmem:[%s14171_s4 + $0x648] sm:$0xff] }
 0x3d7   : > { %8862 = vmatprep.subr.mxu0 %v7329_v33  ;;  %7110 = vmatprep.mubr.msk.f32.mxu1 %vm1795_vm10, %v1684_v55  ;;  %v1693_v55 = vld [vmem:[%s14168_s1 + $0x950] sm:$0xff] }
 0x3d8   : > { %8863 = vmatpush3.msra.mxu0 %v7329_v33  ;;  %v2939_v32 = vpop.f32.mrf.mxu1 }
 0x3d9   : > { %8864 = vmatprep.subr.mxu0 %v7328_v39  ;;  %v7349_v32 = vld [vmem:[%s14171_s4 + $0x638] sm:$0xff] }
 0x3da   : > { %8865 = vmatpush3.msra.mxu0 %v7328_v39  ;;  %v12596_v31 = vpop.f32.mrf.mxu1  ;;  %3181 = vmatmul.mubr.f32.gmra.mxu1 %v1683_v30 }
 0x3db   : > { %8866 = vmatprep.subr.mxu0 %v7327_v57  ;;  %7111 = vmatprep.mubr.msk.f32.mxu1 %vm1795_vm10, %v1686_v53  ;;  %v1695_v53 = vld [vmem:[%s14168_s1 + $0x960] sm:$0xff] }
 0x3dc   : > { %8867 = vmatpush3.msra.mxu0 %v7327_v57  ;;  %v2944_v29 = vpop.f32.mrf.mxu1 }
 0x3dd   : > { %8868 = vmatprep.subr.mxu0 %v7326_v62 }
 0x3de   : > { %8869 = vmatpush3.msra.mxu0 %v7326_v62  ;;  %v12610_v35 = vpop.f32.mrf.mxu1  ;;  %3186 = vmatmul.mubr.f32.gmra.mxu1 %v1685_v61  ;;  %v7347_v62 = vld [vmem:[%s14171_s4 + $0x628] sm:$0xff]  ;;  %v1698_v61 = vld [vmem:[%s14168_s1 + $0x978] sm:$0xff] }
 0x3df   : > { %v8608_v48 = vpop.f32.mrf.mxu0  ;;  %8871 = vmatmul.mubr.f32.vlgmr.msra.gmra.mxu0 %v12459_v17  ;;  %8882 = vmatprep.subr.mxu0 %v7357_v8 }
 0x3e0   : > { %v12623_v60 = vadd.f32 %v8608_v48, %v12472_v42  ;;  %8873 = vmatprep.mubr.f32.mxu0 %v12481_v10  ;;  %8883 = vmatpush3.msra.mxu0 %v7357_v8  ;;  %v2949_v11 = vpop.f32.mrf.mxu1  ;;  %v7354_v42 = vld [vmem:[%s14171_s4 + $0x660] sm:$0xff]  ;;  %v1690_v10 = vld [vmem:[%s14168_s1 + $0x938] sm:$0xff] }
 0x3e1   : > { %v12629_v27 = vpop.f32.mrf.mxu0  ;;  %8884 = vmatprep.subr.mxu0 %v7356_v47  ;;  %7112 = vmatprep.mubr.msk.f32.mxu1 %vm1795_vm10, %v1688_v59  ;;  %v7346_v8 = vld [vmem:[%s14171_s4 + $0x620] sm:$0xff]  ;;  %v7345_v48 = vld [vmem:[%s14171_s4 + $0x618] sm:$0xff] }
 0x3e2   : > { %8885 = vmatpush3.msra.mxu0 %v7356_v47  ;;  %v12632_v17 = vpop.f32.mrf.mxu1  ;;  %3191 = vmatmul.mubr.f32.gmra.mxu1 %v1687_v52  ;;  %v1697_v47 = vld [vmem:[%s14168_s1 + $0x970] sm:$0xff]  ;;  %v1700_v52 = vld [vmem:[%s14168_s1 + $0x988] sm:$0xff] }
 0x3e3   : > { %v8611_v22 = vpop.f32.mrf.mxu0  ;;  %8874 = vmatmul.mubr.f32.gmra.mxu0 %v12503_v2  ;;  %8886 = vmatprep.subr.mxu0 %v7355_v43 }
 0x3e4   : > { %v12645_v20 = vadd.f32 %v8611_v22, %v12494_v37  ;;  %8876 = vmatprep.mubr.f32.mxu0 %v12525_v4  ;;  %8887 = vmatpush3.msra.mxu0 %v7355_v43  ;;  %v2954_v23 = vpop.f32.mrf.mxu1  ;;  %v7352_v37 = vld [vmem:[%s14171_s4 + $0x650] sm:$0xff]  ;;  %v1692_v4 = vld [vmem:[%s14168_s1 + $0x948] sm:$0xff] }
 0x3e5   : > { %v12651_v21 = vpop.f32.mrf.mxu0  ;;  %8888 = vmatprep.subr.mxu0 %v7354_v42  ;;  %7113 = vmatprep.mubr.msk.f32.mxu1 %vm1795_vm10, %v1690_v10  ;;  %v7344_v43 = vld [vmem:[%s14171_s4 + $0x610] sm:$0xff]  ;;  %v7343_v22 = vld [vmem:[%s14171_s4 + $0x608] sm:$0xff] }
 0x3e6   : > { %8889 = vmatpush3.msra.mxu0 %v7354_v42  ;;  %v12654_v2 = vpop.f32.mrf.mxu1  ;;  %3196 = vmatmul.mubr.f32.gmra.mxu1 %v1689_v51  ;;  %v1699_v42 = vld [vmem:[%s14168_s1 + $0x980] sm:$0xff]  ;;  %v1702_v51 = vld [vmem:[%s14168_s1 + $0x998] sm:$0xff] }
 0x3e7   : > { %v8614_v63 = vpop.f32.mrf.mxu0  ;;  %8877 = vmatmul.mubr.f32.gmra.mxu0 %v12548_v19  ;;  %8890 = vmatprep.subr.mxu0 %v7353_v13 }
 0x3e8   : > { %v12667_v50 = vadd.f32 %v8614_v63, %v12516_v0  ;;  %8879 = vmatprep.mubr.f32.mxu0 %v12563_v5  ;;  %8891 = vmatpush3.msra.mxu0 %v7353_v13  ;;  %v2959_v25 = vpop.f32.mrf.mxu1  ;;  %v7350_v0 = vld [vmem:[%s14171_s4 + $0x640] sm:$0xff]  ;;  %v1694_v5 = vld [vmem:[%s14168_s1 + $0x958] sm:$0xff] }
 0x3e9   : > { %v12673_v16 = vpop.f32.mrf.mxu0  ;;  %8892 = vmatprep.subr.mxu0 %v7352_v37  ;;  %7114 = vmatprep.mubr.msk.f32.mxu1 %vm1795_vm10, %v1692_v4  ;;  %v7342_v13 = vld [vmem:[%s14171_s4 + $0x600] sm:$0xff]  ;;  %v7373_v63 = vld [vmem:[%s14171_s4 + $0x6f8] sm:$0xff] }
 0x3ea   : > { %8893 = vmatpush3.msra.mxu0 %v7352_v37  ;;  %v12676_v19 = vpop.f32.mrf.mxu1  ;;  %3201 = vmatmul.mubr.f32.gmra.mxu1 %v1691_v9  ;;  %v1701_v37 = vld [vmem:[%s14168_s1 + $0x990] sm:$0xff] }
 0x3eb   : > { %v8617_v33 = vpop.f32.mrf.mxu0  ;;  %8880 = vmatmul.mubr.f32.gmra.mxu0 %v12581_v56  ;;  %8894 = vmatprep.subr.mxu0 %v7351_v49  ;;  %v1696_v56 = vld [vmem:[%s14168_s1 + $0x968] sm:$0xff] }
 0x3ec   : > { %v12689_v39 = vadd.f32 %v8617_v33, %v12538_v26  ;;  %8895 = vmatpush3.msra.mxu0 %v7351_v49  ;;  %8914 = vmatprep.mubr.f32.mxu0 %v12596_v31  ;;  %v2964_v30 = vpop.f32.mrf.mxu1  ;;  %v7348_v26 = vld [vmem:[%s14171_s4 + $0x630] sm:$0xff]  ;;  %v1703_v33 = vld [vmem:[%s14168_s1 + $0x9a0] sm:$0xff] }
 0x3ed   : > { %8896 = vmatprep.subr.mxu0 %v7350_v0  ;;  %7115 = vmatprep.mubr.msk.f32.mxu1 %vm1795_vm10, %v1694_v5  ;;  %v12756_v9 = vpop.f32.mrf.mxu0  ;;  %v7372_v49 = vld [vmem:[%s14171_s4 + $0x6f0] sm:$0xff] }
 0x3ee   : > { %8897 = vmatpush3.msra.mxu0 %v7350_v0  ;;  %v12699_v57 = vpop.f32.mrf.mxu1  ;;  %3206 = vmatmul.mubr.f32.gmra.mxu1 %v1693_v55  ;;  %v1704_v0 = vld [vmem:[%s14168_s1 + $0x9a8] sm:$0xff] }
 0x3ef   : > { %8898 = vmatprep.subr.mxu0 %v7349_v32  ;;  %7116 = vmatprep.mubr.msk.f32.mxu1 %vm1795_vm10, %v1696_v56 }
 0x3f0   : > { %8899 = vmatpush3.msra.mxu0 %v7349_v32  ;;  %v2969_v31 = vpop.f32.mrf.mxu1  ;;  %v7371_v32 = vld [vmem:[%s14171_s4 + $0x6e8] sm:$0xff] }
 0x3f1   : > { %8900 = vmatprep.subr.mxu0 %v7348_v26 }
 0x3f2   : > { %8901 = vmatpush3.msra.mxu0 %v7348_v26  ;;  %v12714_v29 = vpop.f32.mrf.mxu1  ;;  %3211 = vmatmul.mubr.f32.gmra.mxu1 %v1695_v53  ;;  %v1705_v53 = vld [vmem:[%s14168_s1 + $0x9b0] sm:$0xff] }
 0x3f3   : > { %8902 = vmatprep.subr.mxu0 %v7347_v62  ;;  %7117 = vmatprep.mubr.msk.f32.mxu1 %vm1795_vm10, %v1698_v61  ;;  %v7369_v61 = vld [vmem:[%s14171_s4 + $0x6d8] sm:$0xff] }
 0x3f4   : > { %8903 = vmatpush3.msra.mxu0 %v7347_v62  ;;  %v2974_v59 = vpop.f32.mrf.mxu1 }
 0x3f5   : > { %8904 = vmatprep.subr.mxu0 %v7346_v8  ;;  %v1707_v59 = vld [vmem:[%s14168_s1 + $0x9c0] sm:$0xff] }
 0x3f6   : > { %8905 = vmatpush3.msra.mxu0 %v7346_v8  ;;  %v12729_v11 = vpop.f32.mrf.mxu1  ;;  %3216 = vmatmul.mubr.f32.gmra.mxu1 %v1697_v47 }
 0x3f7   : > { %8906 = vmatprep.subr.mxu0 %v7345_v48  ;;  %7118 = vmatprep.mubr.msk.f32.mxu1 %vm1795_vm10, %v1700_v52 }
 0x3f8   : > { %8907 = vmatpush3.msra.mxu0 %v7345_v48  ;;  %v2979_v10 = vpop.f32.mrf.mxu1 }
 0x3f9   : > { %8908 = vmatprep.subr.mxu0 %v7344_v43 }
 0x3fa   : > { %8909 = vmatpush3.msra.mxu0 %v7344_v43  ;;  %v12744_v23 = vpop.f32.mrf.mxu1  ;;  %3221 = vmatmul.mubr.f32.gmra.mxu1 %v1699_v42  ;;  %v7367_v43 = vld [vmem:[%s14171_s4 + $0x6c8] sm:$0xff] }
 0x3fb   : > { %8910 = vmatprep.subr.mxu0 %v7343_v22  ;;  %7119 = vmatprep.mubr.msk.f32.mxu1 %vm1795_vm10, %v1702_v51 }
 0x3fc   : > { %8911 = vmatpush3.msra.mxu0 %v7343_v22  ;;  %v2984_v4 = vpop.f32.mrf.mxu1  ;;  %v1709_v22 = vld [vmem:[%s14168_s1 + $0x9d0] sm:$0xff] }
 0x3fd   : > { %8912 = vmatprep.subr.mxu0 %v7342_v13 }
 0x3fe   : > { %8913 = vmatpush3.msra.mxu0 %v7342_v13  ;;  %v12758_v25 = vpop.f32.mrf.mxu1  ;;  %3226 = vmatmul.mubr.f32.gmra.mxu1 %v1701_v37  ;;  %v7365_v37 = vld [vmem:[%s14171_s4 + $0x6b8] sm:$0xff] }
 0x3ff   : > { %v8652_v5 = vpop.f32.mrf.mxu0  ;;  %8915 = vmatmul.mubr.f32.vlgmr.msra.gmra.mxu0 %v12610_v35  ;;  %8926 = vmatprep.subr.mxu0 %v7373_v63 }
 0x400   : > { %v12771_v55 = vadd.f32 %v8652_v5, %v12623_v60  ;;  %8917 = vmatprep.mubr.f32.mxu0 %v12632_v17  ;;  %8927 = vmatpush3.msra.mxu0 %v7373_v63  ;;  %v2989_v30 = vpop.f32.mrf.mxu1  ;;  %v7370_v60 = vld [vmem:[%s14171_s4 + $0x6e0] sm:$0xff]  ;;  %v1706_v17 = vld [vmem:[%s14168_s1 + $0x9b8] sm:$0xff] }
 0x401   : > { %v12777_v56 = vpop.f32.mrf.mxu0  ;;  %8928 = vmatprep.subr.mxu0 %v7372_v49  ;;  %7120 = vmatprep.mubr.msk.f32.mxu1 %vm1795_vm10, %v1704_v0  ;;  %v1711_v63 = vld [vmem:[%s14168_s1 + $0x9e0] sm:$0xff]  ;;  %v7363_v0 = vld [vmem:[%s14171_s4 + $0x6a8] sm:$0xff]  ;;  %v1714_v5 = vld [vmem:[%s14168_s1 + $0x9f8] sm:$0xff] }
 0x402   : > { %8929 = vmatpush3.msra.mxu0 %v7372_v49  ;;  %v12780_v35 = vpop.f32.mrf.mxu1  ;;  %3231 = vmatmul.mubr.f32.gmra.mxu1 %v1703_v33  ;;  %v7362_v30 = vld [vmem:[%s14171_s4 + $0x6a0] sm:$0xff] }
 0x403   : > { %v8655_v26 = vpop.f32.mrf.mxu0  ;;  %8918 = vmatmul.mubr.f32.gmra.mxu0 %v12654_v2  ;;  %8930 = vmatprep.subr.mxu0 %v7371_v32 }
 0x404   : > { %v12793_v31 = vadd.f32 %v8655_v26, %v12645_v20  ;;  %8920 = vmatprep.mubr.f32.mxu0 %v12676_v19  ;;  %8931 = vmatpush3.msra.mxu0 %v7371_v32  ;;  %v2994_v62 = vpop.f32.mrf.mxu1  ;;  %v7368_v20 = vld [vmem:[%s14171_s4 + $0x6d0] sm:$0xff]  ;;  %v1708_v19 = vld [vmem:[%s14168_s1 + $0x9c8] sm:$0xff] }
 0x405   : > { %v12799_v8 = vpop.f32.mrf.mxu0  ;;  %8932 = vmatprep.subr.mxu0 %v7370_v60  ;;  %7121 = vmatprep.mubr.msk.f32.mxu1 %vm1795_vm10, %v1706_v17  ;;  %v1713_v32 = vld [vmem:[%s14168_s1 + $0x9f0] sm:$0xff]  ;;  %v7361_v17 = vld [vmem:[%s14171_s4 + $0x698] sm:$0xff]  ;;  %v1716_v26 = vld [vmem:[%s14168_s1 + $0xa08] sm:$0xff] }
 0x406   : > { %8933 = vmatpush3.msra.mxu0 %v7370_v60  ;;  %v12802_v2 = vpop.f32.mrf.mxu1  ;;  %3236 = vmatmul.mubr.f32.gmra.mxu1 %v1705_v53  ;;  %v7360_v62 = vld [vmem:[%s14171_s4 + $0x690] sm:$0xff] }
 0x407   : > { %v8658_v47 = vpop.f32.mrf.mxu0  ;;  %8921 = vmatmul.mubr.f32.gmra.mxu0 %v12699_v57  ;;  %8934 = vmatprep.subr.mxu0 %v7369_v61 }
 0x408   : > { %v12815_v48 = vadd.f32 %v8658_v47, %v12667_v50  ;;  %8923 = vmatprep.mubr.f32.mxu0 %v12714_v29  ;;  %8935 = vmatpush3.msra.mxu0 %v7369_v61  ;;  %v2999_v52 = vpop.f32.mrf.mxu1  ;;  %v7366_v50 = vld [vmem:[%s14171_s4 + $0x6c0] sm:$0xff]  ;;  %v1710_v29 = vld [vmem:[%s14168_s1 + $0x9d8] sm:$0xff] }
 0x409   : > { %v12821_v42 = vpop.f32.mrf.mxu0  ;;  %8936 = vmatprep.subr.mxu0 %v7368_v20  ;;  %7122 = vmatprep.mubr.msk.f32.mxu1 %vm1795_vm10, %v1708_v19  ;;  %v1715_v61 = vld [vmem:[%s14168_s1 + $0xa00] sm:$0xff]  ;;  %v7359_v19 = vld [vmem:[%s14171_s4 + $0x688] sm:$0xff]  ;;  %v1718_v47 = vld [vmem:[%s14168_s1 + $0xa18] sm:$0xff] }
 0x40a   : > { %8937 = vmatpush3.msra.mxu0 %v7368_v20  ;;  %v12824_v57 = vpop.f32.mrf.mxu1  ;;  %3241 = vmatmul.mubr.f32.gmra.mxu1 %v1707_v59  ;;  %v7358_v52 = vld [vmem:[%s14171_s4 + $0x680] sm:$0xff] }
 0x40b   : > { %v8661_v10 = vpop.f32.mrf.mxu0  ;;  %8924 = vmatmul.mubr.f32.gmra.mxu0 %v12729_v11  ;;  %8938 = vmatprep.subr.mxu0 %v7367_v43  ;;  %v1712_v11 = vld [vmem:[%s14168_s1 + $0x9e8] sm:$0xff] }
 0x40c   : > { %v12837_v51 = vadd.f32 %v8661_v10, %v12689_v39  ;;  %8939 = vmatpush3.msra.mxu0 %v7367_v43  ;;  %8958 = vmatprep.mubr.f32.mxu0 %v12744_v23  ;;  %v3004_v13 = vpop.f32.mrf.mxu1  ;;  %v7505_v39 = vld [vmem:[%s14171_s4 + $0xb18] sm:$0xff]  ;;  %v7364_v23 = vld [vmem:[%s14171_s4 + $0x6b0] sm:$0xff] }
 0x40d   : > { %8940 = vmatprep.subr.mxu0 %v7366_v50  ;;  %7123 = vmatprep.mubr.msk.f32.mxu1 %vm1795_vm10, %v1710_v29  ;;  %v1717_v43 = vld [vmem:[%s14168_s1 + $0xa10] sm:$0xff]  ;;  %v7389_v29 = vld [vmem:[%s14171_s4 + $0x778] sm:$0xff]  ;;  %v12907_v10 = vpop.f32.mrf.mxu0 }
 0x40e   : > { %8941 = vmatpush3.msra.mxu0 %v7366_v50  ;;  %v12850_v4 = vpop.f32.mrf.mxu1  ;;  %3246 = vmatmul.mubr.f32.gmra.mxu1 %v1709_v22  ;;  %v7388_v13 = vld [vmem:[%s14171_s4 + $0x770] sm:$0xff] }
 0x40f   : > { %8942 = vmatprep.subr.mxu0 %v7365_v37  ;;  %7124 = vmatprep.mubr.msk.f32.mxu1 %vm1795_vm10, %v1712_v11 }
 0x410   : > { %8943 = vmatpush3.msra.mxu0 %v7365_v37  ;;  %v3009_v49 = vpop.f32.mrf.mxu1  ;;  %9346 = vmatprep.subr.mxu1 %v7505_v39  ;;  %v1720_v37 = vld [vmem:[%s14168_s1 + $0xa28] sm:$0xff] }
 0x411   : > { %8944 = vmatprep.subr.mxu0 %v7364_v23  ;;  %9347 = vmatpush3.msra.mxu1 %v7505_v39  ;;  %v1719_v39 = vld [vmem:[%s14168_s1 + $0xa20] sm:$0xff]  ;;  %v7387_v49 = vld [vmem:[%s14171_s4 + $0x768] sm:$0xff] }
 0x412   : > { %8945 = vmatpush3.msra.mxu0 %v7364_v23  ;;  %v12865_v33 = vpop.f32.mrf.mxu1  ;;  %3251 = vmatmul.mubr.f32.gmra.mxu1 %v1711_v63 }
 0x413   : > { %8946 = vmatprep.subr.mxu0 %v7363_v0  ;;  %7125 = vmatprep.mubr.msk.f32.mxu1 %vm1795_vm10, %v1714_v5 }
 0x414   : > { %8947 = vmatpush3.msra.mxu0 %v7363_v0  ;;  %v3014_v60 = vpop.f32.mrf.mxu1 }
 0x415   : > { %8948 = vmatprep.subr.mxu0 %v7362_v30 }
 0x416   : > { %8949 = vmatpush3.msra.mxu0 %v7362_v30  ;;  %v12880_v53 = vpop.f32.mrf.mxu1  ;;  %3256 = vmatmul.mubr.f32.gmra.mxu1 %v1713_v32  ;;  %v1721_v30 = vld [vmem:[%s14168_s1 + $0xa30] sm:$0xff] }
 0x417   : > { %8950 = vmatprep.subr.mxu0 %v7361_v17  ;;  %7126 = vmatprep.mubr.msk.f32.mxu1 %vm1795_vm10, %v1716_v26 }
 0x418   : > { %8951 = vmatpush3.msra.mxu0 %v7361_v17  ;;  %v3019_v20 = vpop.f32.mrf.mxu1  ;;  %v7385_v17 = vld [vmem:[%s14171_s4 + $0x758] sm:$0xff] }
 0x419   : > { %8952 = vmatprep.subr.mxu0 %v7360_v62 }
 0x41a   : > { %8953 = vmatpush3.msra.mxu0 %v7360_v62  ;;  %v12895_v59 = vpop.f32.mrf.mxu1  ;;  %3261 = vmatmul.mubr.f32.gmra.mxu1 %v1715_v61  ;;  %v1723_v61 = vld [vmem:[%s14168_s1 + $0xa40] sm:$0xff] }
 0x41b   : > { %8954 = vmatprep.subr.mxu0 %v7359_v19  ;;  %7127 = vmatprep.mubr.msk.f32.mxu1 %vm1795_vm10, %v1718_v47  ;;  %v7383_v47 = vld [vmem:[%s14171_s4 + $0x748] sm:$0xff] }
 0x41c   : > { %8955 = vmatpush3.msra.mxu0 %v7359_v19  ;;  %v3024_v50 = vpop.f32.mrf.mxu1 }
 0x41d   : > { %8956 = vmatprep.subr.mxu0 %v7358_v52  ;;  %v1725_v50 = vld [vmem:[%s14168_s1 + $0xa50] sm:$0xff] }
 0x41e   : > { %8957 = vmatpush3.msra.mxu0 %v7358_v52  ;;  %v12909_v22 = vpop.f32.mrf.mxu1  ;;  %3266 = vmatmul.mubr.f32.gmra.mxu1 %v1717_v43 }
 0x41f   : > { %v8696_v11 = vpop.f32.mrf.mxu0  ;;  %8959 = vmatmul.mubr.f32.vlgmr.msra.gmra.mxu0 %v12758_v25  ;;  %8970 = vmatprep.subr.mxu0 %v7389_v29 }
 0x420   : > { %v12922_v23 = vadd.f32 %v8696_v11, %v12771_v55  ;;  %8961 = vmatprep.mubr.f32.mxu0 %v12780_v35  ;;  %8971 = vmatpush3.msra.mxu0 %v7389_v29  ;;  %v3029_v63 = vpop.f32.mrf.mxu1  ;;  %v7386_v55 = vld [vmem:[%s14171_s4 + $0x760] sm:$0xff]  ;;  %v1722_v35 = vld [vmem:[%s14168_s1 + $0xa38] sm:$0xff] }
 0x421   : > { %v12928_v0 = vpop.f32.mrf.mxu0  ;;  %8972 = vmatprep.subr.mxu0 %v7388_v13  ;;  %7128 = vmatprep.mubr.msk.f32.mxu1 %vm1795_vm10, %v1720_v37  ;;  %v7381_v37 = vld [vmem:[%s14171_s4 + $0x738] sm:$0xff]  ;;  %v7379_v63 = vld [vmem:[%s14171_s4 + $0x728] sm:$0xff] }
 0x422   : > { %8973 = vmatpush3.msra.mxu0 %v7388_v13  ;;  %v12931_v25 = vpop.f32.mrf.mxu1  ;;  %3271 = vmatmul.mubr.f32.gmra.mxu1 %v1719_v39 }
 0x423   : > { %v8699_v5 = vpop.f32.mrf.mxu0  ;;  %8962 = vmatmul.mubr.f32.gmra.mxu0 %v12802_v2  ;;  %8974 = vmatprep.subr.mxu0 %v7387_v49 }
 0x424   : > { %v12944_v32 = vadd.f32 %v8699_v5, %v12793_v31  ;;  %8964 = vmatprep.mubr.f32.mxu0 %v12824_v57  ;;  %8975 = vmatpush3.msra.mxu0 %v7387_v49  ;;  %v3034_v60 = vpop.f32.mrf.mxu1  ;;  %v7384_v31 = vld [vmem:[%s14171_s4 + $0x750] sm:$0xff]  ;;  %v1724_v57 = vld [vmem:[%s14168_s1 + $0xa48] sm:$0xff]  ;;  %v1730_v49 = vld [vmem:[%s14168_s1 + $0xa78] sm:$0xff] }
 0x425   : > { %v12950_v26 = vpop.f32.mrf.mxu0  ;;  %8976 = vmatprep.subr.mxu0 %v7386_v55  ;;  %7129 = vmatprep.mubr.msk.f32.mxu1 %vm1795_vm10, %v1722_v35  ;;  %v7378_v35 = vld [vmem:[%s14171_s4 + $0x720] sm:$0xff]  ;;  %v1729_v5 = vld [vmem:[%s14168_s1 + $0xa70] sm:$0xff]  ;;  %v7377_v60 = vld [vmem:[%s14171_s4 + $0x718] sm:$0xff] }
 0x426   : > { %8977 = vmatpush3.msra.mxu0 %v7386_v55  ;;  %v12953_v2 = vpop.f32.mrf.mxu1  ;;  %3276 = vmatmul.mubr.f32.gmra.mxu1 %v1721_v30 }
 0x427   : > { %v8702_v62 = vpop.f32.mrf.mxu0  ;;  %8965 = vmatmul.mubr.f32.gmra.mxu0 %v12850_v4  ;;  %8978 = vmatprep.subr.mxu0 %v7385_v17 }
 0x428   : > { %v12966_v20 = vadd.f32 %v8702_v62, %v12815_v48  ;;  %8967 = vmatprep.mubr.f32.mxu0 %v12865_v33  ;;  %8979 = vmatpush3.msra.mxu0 %v7385_v17  ;;  %v3039_v19 = vpop.f32.mrf.mxu1  ;;  %v7382_v48 = vld [vmem:[%s14171_s4 + $0x740] sm:$0xff]  ;;  %v1726_v33 = vld [vmem:[%s14168_s1 + $0xa58] sm:$0xff]  ;;  %v1732_v17 = vld [vmem:[%s14168_s1 + $0xa88] sm:$0xff] }
 0x429   : > { %v12972_v52 = vpop.f32.mrf.mxu0  ;;  %8980 = vmatprep.subr.mxu0 %v7384_v31  ;;  %7130 = vmatprep.mubr.msk.f32.mxu1 %vm1795_vm10, %v1724_v57  ;;  %v7376_v57 = vld [vmem:[%s14171_s4 + $0x710] sm:$0xff] }
 0x42a   : > { %8981 = vmatpush3.msra.mxu0 %v7384_v31  ;;  %v12975_v4 = vpop.f32.mrf.mxu1  ;;  %3281 = vmatmul.mubr.f32.gmra.mxu1 %v1723_v61  ;;  %v7504_v62 = vld [vmem:[%s14171_s4 + $0xb10] sm:$0xff]  ;;  %v1731_v61 = vld [vmem:[%s14168_s1 + $0xa80] sm:$0xff] }
 0x42b   : > { %v8705_v43 = vpop.f32.mrf.mxu0  ;;  %8968 = vmatmul.mubr.f32.gmra.mxu0 %v12880_v53  ;;  %8982 = vmatprep.subr.mxu0 %v7383_v47  ;;  %v1728_v53 = vld [vmem:[%s14168_s1 + $0xa68] sm:$0xff] }
 0x42c   : > { %v12988_v29 = vadd.f32 %v8705_v43, %v12837_v51  ;;  %8983 = vmatpush3.msra.mxu0 %v7383_v47  ;;  %9002 = vmatprep.mubr.f32.mxu0 %v12895_v59  ;;  %v3044_v13 = vpop.f32.mrf.mxu1  ;;  %v7380_v51 = vld [vmem:[%s14171_s4 + $0x730] sm:$0xff]  ;;  %v1727_v59 = vld [vmem:[%s14168_s1 + $0xa60] sm:$0xff]  ;;  %v7375_v47 = vld [vmem:[%s14171_s4 + $0x708] sm:$0xff] }
 0x42d   : > { %8984 = vmatprep.subr.mxu0 %v7382_v48  ;;  %7131 = vmatprep.mubr.msk.f32.mxu1 %vm1795_vm10, %v1726_v33  ;;  %v7374_v43 = vld [vmem:[%s14171_s4 + $0x700] sm:$0xff] }
 0x42e   : > { %8985 = vmatpush3.msra.mxu0 %v7382_v48  ;;  %v12998_v11 = vpop.f32.mrf.mxu1  ;;  %3286 = vmatmul.mubr.f32.gmra.mxu1 %v1725_v50  ;;  %v1734_v48 = vld [vmem:[%s14168_s1 + $0xa98] sm:$0xff]  ;;  %v1733_v50 = vld [vmem:[%s14168_s1 + $0xa90] sm:$0xff] }
 0x42f   : > { %8986 = vmatprep.subr.mxu0 %v7381_v37  ;;  %7132 = vmatprep.mubr.msk.f32.mxu1 %vm1795_vm10, %v1728_v53  ;;  %v13058_v53 = vpop.f32.mrf.mxu0 }
 0x430   : > { %8987 = vmatpush3.msra.mxu0 %v7381_v37  ;;  %v3049_v39 = vpop.f32.mrf.mxu1  ;;  %9348 = vmatprep.subr.mxu1 %v7504_v62  ;;  %v7405_v37 = vld [vmem:[%s14171_s4 + $0x7f8] sm:$0xff] }
 0x431   : > { %8988 = vmatprep.subr.mxu0 %v7380_v51  ;;  %9349 = vmatpush3.msra.mxu1 %v7504_v62  ;;  %v1736_v39 = vld [vmem:[%s14168_s1 + $0xaa8] sm:$0xff] }
 0x432   : > { %8989 = vmatpush3.msra.mxu0 %v7380_v51  ;;  %v13013_v55 = vpop.f32.mrf.mxu1  ;;  %3291 = vmatmul.mubr.f32.gmra.mxu1 %v1727_v59  ;;  %v7404_v59 = vld [vmem:[%s14171_s4 + $0x7f0] sm:$0xff] }
 0x433   : > { %8990 = vmatprep.subr.mxu0 %v7379_v63  ;;  %7133 = vmatprep.mubr.msk.f32.mxu1 %vm1795_vm10, %v1730_v49  ;;  %v1735_v49 = vld [vmem:[%s14168_s1 + $0xaa0] sm:$0xff] }
 0x434   : > { %8991 = vmatpush3.msra.mxu0 %v7379_v63  ;;  %v3054_v30 = vpop.f32.mrf.mxu1 }
 0x435   : > { %8992 = vmatprep.subr.mxu0 %v7378_v35  ;;  %v7403_v30 = vld [vmem:[%s14171_s4 + $0x7e8] sm:$0xff] }
 0x436   : > { %8993 = vmatpush3.msra.mxu0 %v7378_v35  ;;  %v13028_v31 = vpop.f32.mrf.mxu1  ;;  %3296 = vmatmul.mubr.f32.gmra.mxu1 %v1729_v5 }
 0x437   : > { %8994 = vmatprep.subr.mxu0 %v7377_v60  ;;  %7134 = vmatprep.mubr.msk.f32.mxu1 %vm1795_vm10, %v1732_v17 }
 0x438   : > { %8995 = vmatpush3.msra.mxu0 %v7377_v60  ;;  %v3059_v19 = vpop.f32.mrf.mxu1 }
 0x439   : > { %8996 = vmatprep.subr.mxu0 %v7376_v57  ;;  %v7401_v19 = vld [vmem:[%s14171_s4 + $0x7d8] sm:$0xff] }
 0x43a   : > { %8997 = vmatpush3.msra.mxu0 %v7376_v57  ;;  %v13046_v33 = vpop.f32.mrf.mxu1  ;;  %3301 = vmatmul.mubr.f32.gmra.mxu1 %v1731_v61  ;;  %v1737_v57 = vld [vmem:[%s14168_s1 + $0xab0] sm:$0xff] }
 0x43b   : > { %8998 = vmatprep.subr.mxu0 %v7375_v47  ;;  %7135 = vmatprep.mubr.msk.f32.mxu1 %vm1795_vm10, %v1734_v48 }
 0x43c   : > { %8999 = vmatpush3.msra.mxu0 %v7375_v47  ;;  %v3064_v13 = vpop.f32.mrf.mxu1 }
 0x43d   : > { %9000 = vmatprep.subr.mxu0 %v7374_v43 }
 0x43e   : > { %9001 = vmatpush3.msra.mxu0 %v7374_v43  ;;  %v13060_v51 = vpop.f32.mrf.mxu1  ;;  %3306 = vmatmul.mubr.f32.gmra.mxu1 %v1733_v50  ;;  %v1739_v43 = vld [vmem:[%s14168_s1 + $0xac0] sm:$0xff] }
 0x43f   : > { %v8740_v63 = vpop.f32.mrf.mxu0  ;;  %9003 = vmatmul.mubr.f32.vlgmr.msra.gmra.mxu0 %v12909_v22  ;;  %9014 = vmatprep.subr.mxu0 %v7405_v37 }
 0x440   : > { %v13073_v35 = vadd.f32 %v8740_v63, %v12922_v23  ;;  %9005 = vmatprep.mubr.f32.mxu0 %v12931_v25  ;;  %9015 = vmatpush3.msra.mxu0 %v7405_v37  ;;  %v3069_v5 = vpop.f32.mrf.mxu1  ;;  %v7402_v23 = vld [vmem:[%s14171_s4 + $0x7e0] sm:$0xff]  ;;  %v1738_v25 = vld [vmem:[%s14168_s1 + $0xab8] sm:$0xff]  ;;  %v7399_v37 = vld [vmem:[%s14171_s4 + $0x7c8] sm:$0xff] }
 0x441   : > { %v13079_v60 = vpop.f32.mrf.mxu0  ;;  %9016 = vmatprep.subr.mxu0 %v7404_v59  ;;  %7136 = vmatprep.mubr.msk.f32.mxu1 %vm1795_vm10, %v1736_v39  ;;  %v1741_v63 = vld [vmem:[%s14168_s1 + $0xad0] sm:$0xff] }
 0x442   : > { %9017 = vmatpush3.msra.mxu0 %v7404_v59  ;;  %v13082_v22 = vpop.f32.mrf.mxu1  ;;  %3311 = vmatmul.mubr.f32.gmra.mxu1 %v1735_v49 }
 0x443   : > { %v8743_v17 = vpop.f32.mrf.mxu0  ;;  %9006 = vmatmul.mubr.f32.gmra.mxu0 %v12953_v2  ;;  %9018 = vmatprep.subr.mxu0 %v7403_v30 }
 0x444   : > { %v13095_v62 = vadd.f32 %v8743_v17, %v12944_v32  ;;  %9008 = vmatprep.mubr.f32.mxu0 %v12975_v4  ;;  %9019 = vmatpush3.msra.mxu0 %v7403_v30  ;;  %v3074_v61 = vpop.f32.mrf.mxu1  ;;  %v7400_v32 = vld [vmem:[%s14171_s4 + $0x7d0] sm:$0xff]  ;;  %v1740_v4 = vld [vmem:[%s14168_s1 + $0xac8] sm:$0xff]  ;;  %v7397_v30 = vld [vmem:[%s14171_s4 + $0x7b8] sm:$0xff] }
 0x445   : > { %v13101_v47 = vpop.f32.mrf.mxu0  ;;  %9020 = vmatprep.subr.mxu0 %v7402_v23  ;;  %7137 = vmatprep.mubr.msk.f32.mxu1 %vm1795_vm10, %v1738_v25  ;;  %v7395_v17 = vld [vmem:[%s14171_s4 + $0x7a8] sm:$0xff] }
 0x446   : > { %9021 = vmatpush3.msra.mxu0 %v7402_v23  ;;  %v13104_v2 = vpop.f32.mrf.mxu1  ;;  %3316 = vmatmul.mubr.f32.gmra.mxu1 %v1737_v57  ;;  %v1746_v57 = vld [vmem:[%s14168_s1 + $0xaf8] sm:$0xff] }
 0x447   : > { %v8746_v48 = vpop.f32.mrf.mxu0  ;;  %9009 = vmatmul.mubr.f32.gmra.mxu0 %v12998_v11  ;;  %9022 = vmatprep.subr.mxu0 %v7401_v19 }
 0x448   : > { %v13117_v50 = vadd.f32 %v8746_v48, %v12966_v20  ;;  %9011 = vmatprep.mubr.f32.mxu0 %v13013_v55  ;;  %9023 = vmatpush3.msra.mxu0 %v7401_v19  ;;  %v3079_v13 = vpop.f32.mrf.mxu1  ;;  %v7398_v20 = vld [vmem:[%s14171_s4 + $0x7c0] sm:$0xff]  ;;  %v1742_v55 = vld [vmem:[%s14168_s1 + $0xad8] sm:$0xff] }
 0x449   : > { %v13123_v59 = vpop.f32.mrf.mxu0  ;;  %9024 = vmatprep.subr.mxu0 %v7400_v32  ;;  %7138 = vmatprep.mubr.msk.f32.mxu1 %vm1795_vm10, %v1740_v4  ;;  %v7394_v19 = vld [vmem:[%s14171_s4 + $0x7a0] sm:$0xff]  ;;  %v7393_v48 = vld [vmem:[%s14171_s4 + $0x798] sm:$0xff] }
 0x44a   : > { %9025 = vmatpush3.msra.mxu0 %v7400_v32  ;;  %v13126_v11 = vpop.f32.mrf.mxu1  ;;  %3321 = vmatmul.mubr.f32.gmra.mxu1 %v1739_v43  ;;  %v1745_v32 = vld [vmem:[%s14168_s1 + $0xaf0] sm:$0xff]  ;;  %v1748_v43 = vld [vmem:[%s14168_s1 + $0xb08] sm:$0xff] }
 0x44b   : > { %v8749_v39 = vpop.f32.mrf.mxu0  ;;  %9012 = vmatmul.mubr.f32.gmra.mxu0 %v13028_v31  ;;  %9026 = vmatprep.subr.mxu0 %v7399_v37  ;;  %v1744_v31 = vld [vmem:[%s14168_s1 + $0xae8] sm:$0xff] }
 0x44c   : > { %v13139_v49 = vadd.f32 %v8749_v39, %v12988_v29  ;;  %9027 = vmatpush3.msra.mxu0 %v7399_v37  ;;  %9046 = vmatprep.mubr.f32.mxu0 %v13046_v33  ;;  %v3084_v5 = vpop.f32.mrf.mxu1  ;;  %v7396_v29 = vld [vmem:[%s14171_s4 + $0x7b0] sm:$0xff]  ;;  %v1743_v33 = vld [vmem:[%s14168_s1 + $0xae0] sm:$0xff]  ;;  %v7391_v39 = vld [vmem:[%s14171_s4 + $0x788] sm:$0xff] }
 0x44d   : > { %9028 = vmatprep.subr.mxu0 %v7398_v20  ;;  %7139 = vmatprep.mubr.msk.f32.mxu1 %vm1795_vm10, %v1742_v55  ;;  %v7392_v37 = vld [vmem:[%s14171_s4 + $0x790] sm:$0xff] }
 0x44e   : > { %9029 = vmatpush3.msra.mxu0 %v7398_v20  ;;  %v13149_v23 = vpop.f32.mrf.mxu1  ;;  %3326 = vmatmul.mubr.f32.gmra.mxu1 %v1741_v63  ;;  %v1747_v20 = vld [vmem:[%s14168_s1 + $0xb00] sm:$0xff]  ;;  %v1750_v63 = vld [vmem:[%s14168_s1 + $0xb18] sm:$0xff] }
 0x44f   : > { %9030 = vmatprep.subr.mxu0 %v7397_v30  ;;  %7140 = vmatprep.mubr.msk.f32.mxu1 %vm1795_vm10, %v1744_v31  ;;  %v1749_v31 = vld [vmem:[%s14168_s1 + $0xb10] sm:$0xff] }
 0x450   : > { %9031 = vmatpush3.msra.mxu0 %v7397_v30  ;;  %v3089_v25 = vpop.f32.mrf.mxu1  ;;  %v7390_v30 = vld [vmem:[%s14171_s4 + $0x780] sm:$0xff] }
 0x451   : > { %9032 = vmatprep.subr.mxu0 %v7396_v29  ;;  %v13206_v25 = vpop.f32.mrf.mxu0 }
 0x452   : > { %9033 = vmatpush3.msra.mxu0 %v7396_v29  ;;  %v13164_v61 = vpop.f32.mrf.mxu1  ;;  %3331 = vmatmul.mubr.f32.gmra.mxu1 %v1743_v33  ;;  %v7421_v33 = vld [vmem:[%s14171_s4 + $0x878] sm:$0xff] }
 0x453   : > { %9034 = vmatprep.subr.mxu0 %v7395_v17  ;;  %7141 = vmatprep.mubr.msk.f32.mxu1 %vm1795_vm10, %v1746_v57  ;;  %v7420_v57 = vld [vmem:[%s14171_s4 + $0x870] sm:$0xff] }
 0x454   : > { %9035 = vmatpush3.msra.mxu0 %v7395_v17  ;;  %v3094_v4 = vpop.f32.mrf.mxu1 }
 0x455   : > { %9036 = vmatprep.subr.mxu0 %v7394_v19  ;;  %v1751_v4 = vld [vmem:[%s14168_s1 + $0xb20] sm:$0xff] }
 0x456   : > { %9037 = vmatpush3.msra.mxu0 %v7394_v19  ;;  %v13179_v13 = vpop.f32.mrf.mxu1  ;;  %3336 = vmatmul.mubr.f32.gmra.mxu1 %v1745_v32  ;;  %v1752_v19 = vld [vmem:[%s14168_s1 + $0xb28] sm:$0xff] }
 0x457   : > { %9038 = vmatprep.subr.mxu0 %v7393_v48  ;;  %7142 = vmatprep.mubr.msk.f32.mxu1 %vm1795_vm10, %v1748_v43 }
 0x458   : > { %9039 = vmatpush3.msra.mxu0 %v7393_v48  ;;  %v3099_v55 = vpop.f32.mrf.mxu1 }
 0x459   : > { %9040 = vmatprep.subr.mxu0 %v7392_v37 }
 0x45a   : > { %9041 = vmatpush3.msra.mxu0 %v7392_v37  ;;  %v13194_v5 = vpop.f32.mrf.mxu1  ;;  %3341 = vmatmul.mubr.f32.gmra.mxu1 %v1747_v20  ;;  %v7419_v37 = vld [vmem:[%s14171_s4 + $0x868] sm:$0xff] }
 0x45b   : > { %9042 = vmatprep.subr.mxu0 %v7391_v39  ;;  %7143 = vmatprep.mubr.msk.f32.mxu1 %vm1795_vm10, %v1750_v63 }
 0x45c   : > { %9043 = vmatpush3.msra.mxu0 %v7391_v39  ;;  %v3104_v29 = vpop.f32.mrf.mxu1  ;;  %v1753_v39 = vld [vmem:[%s14168_s1 + $0xb30] sm:$0xff] }
 0x45d   : > { %9044 = vmatprep.subr.mxu0 %v7390_v30 }
 0x45e   : > { %9045 = vmatpush3.msra.mxu0 %v7390_v30  ;;  %v13208_v17 = vpop.f32.mrf.mxu1  ;;  %3346 = vmatmul.mubr.f32.gmra.mxu1 %v1749_v31  ;;  %v7417_v31 = vld [vmem:[%s14171_s4 + $0x858] sm:$0xff] }
 0x45f   : > { %v8784_v32 = vpop.f32.mrf.mxu0  ;;  %9047 = vmatmul.mubr.f32.vlgmr.msra.gmra.mxu0 %v13060_v51  ;;  %9058 = vmatprep.subr.mxu0 %v7421_v33 }
 0x460   : > { %v13221_v48 = vadd.f32 %v8784_v32, %v13073_v35  ;;  %9049 = vmatprep.mubr.f32.mxu0 %v13082_v22  ;;  %9059 = vmatpush3.msra.mxu0 %v7421_v33  ;;  %v3109_v43 = vpop.f32.mrf.mxu1  ;;  %v7418_v35 = vld [vmem:[%s14171_s4 + $0x860] sm:$0xff]  ;;  %v1754_v22 = vld [vmem:[%s14168_s1 + $0xb38] sm:$0xff] }
 0x461   : > { %v13227_v20 = vpop.f32.mrf.mxu0  ;;  %9060 = vmatprep.subr.mxu0 %v7420_v57  ;;  %7144 = vmatprep.mubr.msk.f32.mxu1 %vm1795_vm10, %v1752_v19 }
 0x462   : > { %9061 = vmatpush3.msra.mxu0 %v7420_v57  ;;  %v13230_v51 = vpop.f32.mrf.mxu1  ;;  %3351 = vmatmul.mubr.f32.gmra.mxu1 %v1751_v4  ;;  %v1755_v57 = vld [vmem:[%s14168_s1 + $0xb40] sm:$0xff]  ;;  %v7415_v4 = vld [vmem:[%s14171_s4 + $0x848] sm:$0xff] }
 0x463   : > { %v8787_v55 = vpop.f32.mrf.mxu0  ;;  %9050 = vmatmul.mubr.f32.gmra.mxu0 %v13104_v2  ;;  %9062 = vmatprep.subr.mxu0 %v7419_v37 }
 0x464   : > { %v13243_v63 = vadd.f32 %v8787_v55, %v13095_v62  ;;  %9052 = vmatprep.mubr.f32.mxu0 %v13126_v11  ;;  %9063 = vmatpush3.msra.mxu0 %v7419_v37  ;;  %v3114_v30 = vpop.f32.mrf.mxu1  ;;  %v7416_v62 = vld [vmem:[%s14171_s4 + $0x850] sm:$0xff]  ;;  %v1756_v11 = vld [vmem:[%s14168_s1 + $0xb48] sm:$0xff] }
 0x465   : > { %v13249_v29 = vpop.f32.mrf.mxu0  ;;  %9064 = vmatprep.subr.mxu0 %v7418_v35  ;;  %7145 = vmatprep.mubr.msk.f32.mxu1 %vm1795_vm10, %v1754_v22 }
 0x466   : > { %9065 = vmatpush3.msra.mxu0 %v7418_v35  ;;  %v13252_v2 = vpop.f32.mrf.mxu1  ;;  %3356 = vmatmul.mubr.f32.gmra.mxu1 %v1753_v39  ;;  %v1757_v35 = vld [vmem:[%s14168_s1 + $0xb50] sm:$0xff]  ;;  %v7413_v39 = vld [vmem:[%s14171_s4 + $0x838] sm:$0xff] }
 0x467   : > { %v8790_v33 = vpop.f32.mrf.mxu0  ;;  %9053 = vmatmul.mubr.f32.gmra.mxu0 %v13149_v23  ;;  %9066 = vmatprep.subr.mxu0 %v7417_v31 }
 0x468   : > { %v13265_v19 = vadd.f32 %v8790_v33, %v13117_v50  ;;  %9055 = vmatprep.mubr.f32.mxu0 %v13164_v61  ;;  %9067 = vmatpush3.msra.mxu0 %v7417_v31  ;;  %v3119_v32 = vpop.f32.mrf.mxu1  ;;  %v7414_v50 = vld [vmem:[%s14171_s4 + $0x840] sm:$0xff]  ;;  %v1758_v61 = vld [vmem:[%s14168_s1 + $0xb58] sm:$0xff]  ;;  %v7411_v33 = vld [vmem:[%s14171_s4 + $0x828] sm:$0xff] }
 0x469   : > { %v13271_v43 = vpop.f32.mrf.mxu0  ;;  %9068 = vmatprep.subr.mxu0 %v7416_v62  ;;  %7146 = vmatprep.mubr.msk.f32.mxu1 %vm1795_vm10, %v1756_v11  ;;  %v1759_v31 = vld [vmem:[%s14168_s1 + $0xb60] sm:$0xff] }
 0x46a   : > { %9069 = vmatpush3.msra.mxu0 %v7416_v62  ;;  %v13274_v23 = vpop.f32.mrf.mxu1  ;;  %3361 = vmatmul.mubr.f32.gmra.mxu1 %v1755_v57  ;;  %v3666_v62 = vadd.f32 %v12028_v3, %v11925_v7  ;;  %v1762_v57 = vld [vmem:[%s14168_s1 + $0xb78] sm:$0xff]  ;;  %v7410_v7 = vld [vmem:[%s14171_s4 + $0x820] sm:$0xff]  ;;  %v1761_v3 = vld [vmem:[%s14168_s1 + $0xb70] sm:$0xff] }
 0x46b   : > { %v8793_v37 = vpop.f32.mrf.mxu0  ;;  %9056 = vmatmul.mubr.f32.gmra.mxu0 %v13179_v13  ;;  %9070 = vmatprep.subr.mxu0 %v7415_v4  ;;  %v1760_v13 = vld [vmem:[%s14168_s1 + $0xb68] sm:$0xff] }
 0x46c   : > { %v13287_v22 = vadd.f32 %v8793_v37, %v13139_v49  ;;  %9071 = vmatpush3.msra.mxu0 %v7415_v4  ;;  %9090 = vmatprep.mubr.f32.mxu0 %v13194_v5  ;;  %v3124_v55 = vpop.f32.mrf.mxu1  ;;  %v7503_v49 = vld [vmem:[%s14171_s4 + $0xb08] sm:$0xff]  ;;  %v7412_v5 = vld [vmem:[%s14171_s4 + $0x830] sm:$0xff]  ;;  %v3826_v32 = vadd.f32 %v12179_v38, %v3666_v62  ;;  %v7409_v37 = vld [vmem:[%s14171_s4 + $0x818] sm:$0xff] }
 0x46d   : > { %9072 = vmatprep.subr.mxu0 %v7414_v50  ;;  %7147 = vmatprep.mubr.msk.f32.mxu1 %vm1795_vm10, %v1758_v61 }
 0x46e   : > { %9073 = vmatpush3.msra.mxu0 %v7414_v50  ;;  %v13300_v30 = vpop.f32.mrf.mxu1  ;;  %3366 = vmatmul.mubr.f32.gmra.mxu1 %v1757_v35  ;;  %v3676_v50 = vadd.f32 %v12050_v45, %v11957_v36  ;;  %v3956_v38 = vadd.f32 %v12327_v6, %v3826_v32  ;;  %v1764_v35 = vld [vmem:[%s14168_s1 + $0xb88] sm:$0xff]  ;;  %v7408_v36 = vld [vmem:[%s14171_s4 + $0x810] sm:$0xff]  ;;  %v3686_v45 = vadd.f32 %v12072_v15, %v11981_v34  ;;  %v1766_v34 = vld [vmem:[%s14168_s1 + $0xb98] sm:$0xff] }
 0x46f   : > { %9074 = vmatprep.subr.mxu0 %v7413_v39  ;;  %7148 = vmatprep.mubr.msk.f32.mxu1 %vm1795_vm10, %v1760_v13  ;;  %v7437_v32 = vld [vmem:[%s14171_s4 + $0x8f8] sm:$0xff] }
 0x470   : > { %9075 = vmatpush3.msra.mxu0 %v7413_v39  ;;  %v3129_v11 = vpop.f32.mrf.mxu1  ;;  %9350 = vmatprep.subr.mxu1 %v7503_v49  ;;  %v3828_v55 = vadd.f32 %v12201_v14, %v3676_v50  ;;  %v4086_v39 = vadd.f32 %v12478_v46, %v3956_v38  ;;  %v1763_v14 = vld [vmem:[%s14168_s1 + $0xb80] sm:$0xff]  ;;  %v3830_v15 = vadd.f32 %v12223_v58, %v3686_v45  ;;  %v1765_v58 = vld [vmem:[%s14168_s1 + $0xb90] sm:$0xff] }
 0x471   : > { %9076 = vmatprep.subr.mxu0 %v7412_v5  ;;  %9351 = vmatpush3.msra.mxu1 %v7503_v49  ;;  %v3696_v11 = vadd.f32 %v12158_v12, %v12007_v18 }
 0x472   : > { %9077 = vmatpush3.msra.mxu0 %v7412_v5  ;;  %v13318_v4 = vpop.f32.mrf.mxu1  ;;  %3371 = vmatmul.mubr.f32.gmra.mxu1 %v1759_v31  ;;  %v3958_v6 = vadd.f32 %v12349_v1, %v3828_v55  ;;  %v4216_v46 = vadd.f32 %v12629_v27, %v4086_v39  ;;  %v7407_v5 = vld [vmem:[%s14171_s4 + $0x808] sm:$0xff]  ;;  %v7406_v27 = vld [vmem:[%s14171_s4 + $0x800] sm:$0xff] }
 0x473   : > { %9078 = vmatprep.subr.mxu0 %v7411_v33  ;;  %7149 = vmatprep.mubr.msk.f32.mxu1 %vm1795_vm10, %v1762_v57  ;;  %v3832_v18 = vadd.f32 %v12306_v40, %v3696_v11  ;;  %v1768_v40 = vld [vmem:[%s14168_s1 + $0xba8] sm:$0xff]  ;;  %v7434_v55 = vld [vmem:[%s14171_s4 + $0x8e0] sm:$0xff] }
 0x474   : > { %9079 = vmatpush3.msra.mxu0 %v7411_v33  ;;  %v3134_v61 = vpop.f32.mrf.mxu1  ;;  %v4088_v31 = vadd.f32 %v12500_v28, %v3958_v6  ;;  %v4346_v62 = vadd.f32 %v12777_v56, %v4216_v46  ;;  %v3960_v33 = vadd.f32 %v12371_v54, %v3830_v15  ;;  %v13379_v54 = vpop.f32.mrf.mxu0 }
 0x475   : > { %9080 = vmatprep.subr.mxu0 %v7410_v7 }
 0x476   : > { %9081 = vmatpush3.msra.mxu0 %v7410_v7  ;;  %v13338_v13 = vpop.f32.mrf.mxu1  ;;  %3376 = vmatmul.mubr.f32.gmra.mxu1 %v1761_v3  ;;  %v4218_v28 = vadd.f32 %v12651_v21, %v4088_v31  ;;  %v4476_v56 = vadd.f32 %v12928_v0, %v4346_v62  ;;  %v4090_v12 = vadd.f32 %v12522_v41, %v3960_v33  ;;  %v7436_v0 = vld [vmem:[%s14171_s4 + $0x8f0] sm:$0xff] }
 0x477   : > { %9082 = vmatprep.subr.mxu0 %v7409_v37  ;;  %7150 = vmatprep.mubr.msk.f32.mxu1 %vm1795_vm10, %v1764_v35  ;;  %v3962_v41 = vadd.f32 %v12457_v24, %v3832_v18  ;;  %v1775_v18 = vld [vmem:[%s14168_s1 + $0xbe0] sm:$0xff] }
 0x478   : > { %9083 = vmatpush3.msra.mxu0 %v7409_v37  ;;  %v3139_v49 = vpop.f32.mrf.mxu1  ;;  %v4348_v7 = vadd.f32 %v12799_v8, %v4218_v28  ;;  %v4606_v3 = vadd.f32 %v13079_v60, %v4476_v56  ;;  %v4220_v50 = vadd.f32 %v12673_v16, %v4090_v12  ;;  %v1767_v8 = vld [vmem:[%s14168_s1 + $0xba0] sm:$0xff]  ;;  %v7435_v16 = vld [vmem:[%s14171_s4 + $0x8e8] sm:$0xff]  ;;  %v7429_v56 = vld [vmem:[%s14171_s4 + $0x8b8] sm:$0xff] }
 0x479   : > { %9084 = vmatprep.subr.mxu0 %v7408_v36  ;;  %v1772_v49 = vld [vmem:[%s14168_s1 + $0xbc8] sm:$0xff] }
 0x47a   : > { %9085 = vmatpush3.msra.mxu0 %v7408_v36  ;;  %v13360_v1 = vpop.f32.mrf.mxu1  ;;  %3381 = vmatmul.mubr.f32.gmra.mxu1 %v1763_v14  ;;  %v4478_v60 = vadd.f32 %v12950_v26, %v4348_v7  ;;  %v4736_v61 = vadd.f32 %v13227_v20, %v4606_v3  ;;  %v4350_v26 = vadd.f32 %v12821_v42, %v4220_v50  ;;  %v1769_v42 = vld [vmem:[%s14168_s1 + $0xbb0] sm:$0xff]  ;;  %v1778_v7 = vld [vmem:[%s14168_s1 + $0xbf8] sm:$0xff] }
 0x47b   : > { %9086 = vmatprep.subr.mxu0 %v7407_v5  ;;  %7151 = vmatprep.mubr.msk.f32.mxu1 %vm1795_vm10, %v1766_v34  ;;  %v7425_v50 = vld [vmem:[%s14171_s4 + $0x898] sm:$0xff] }
 0x47c   : > { %9087 = vmatpush3.msra.mxu0 %v7407_v5  ;;  %v3144_v57 = vpop.f32.mrf.mxu1  ;;  %v4608_v20 = vadd.f32 %v13101_v47, %v4478_v60  ;;  %v4480_v47 = vadd.f32 %v12972_v52, %v4350_v26  ;;  %v7424_v60 = vld [vmem:[%s14171_s4 + $0x890] sm:$0xff]  ;;  %v7422_v26 = vld [vmem:[%s14171_s4 + $0x880] sm:$0xff] }
 0x47d   : > { %9088 = vmatprep.subr.mxu0 %v7406_v27 }
 0x47e   : > { %9089 = vmatpush3.msra.mxu0 %v7406_v27  ;;  %v13383_v21 = vpop.f32.mrf.mxu1  ;;  %3386 = vmatmul.mubr.f32.gmra.mxu1 %v1765_v58  ;;  %v4738_v45 = vadd.f32 %v13249_v29, %v4608_v20  ;;  %v4610_v52 = vadd.f32 %v13123_v59, %v4480_v47  ;;  %v7502_v20 = vld [vmem:[%s14171_s4 + $0xb00] sm:$0xff]  ;;  %v1784_v47 = vld [vmem:[%s14168_s1 + $0xc28] sm:$0xff] }
 0x47f   : > { %v8828_v38 = vpop.f32.mrf.mxu0  ;;  %9091 = vmatmul.mubr.f32.vlgmr.msra.gmra.mxu0 %v13208_v17  ;;  %9102 = vmatprep.subr.mxu0 %v7437_v32  ;;  %v4092_v17 = vadd.f32 %v12608_v44, %v3962_v41  ;;  %v1770_v44 = vld [vmem:[%s14168_s1 + $0xbb8] sm:$0xff] }
 0x480   : > { %v13400_v37 = vadd.f32 %v8828_v38, %v13221_v48  ;;  %9093 = vmatprep.mubr.f32.mxu0 %v13230_v51  ;;  %9103 = vmatpush3.msra.mxu0 %v7437_v32  ;;  %v3149_v24 = vpop.f32.mrf.mxu1  ;;  %v4740_v34 = vadd.f32 %v13271_v43, %v4610_v52  ;;  %v1780_v38 = vld [vmem:[%s14168_s1 + $0xc08] sm:$0xff] }
 0x481   : > { %v4827_v35 = vpop.f32.mrf.mxu0  ;;  %9104 = vmatprep.subr.mxu0 %v7436_v0  ;;  %7152 = vmatprep.mubr.msk.f32.mxu1 %vm1795_vm10, %v1768_v40  ;;  %v4222_v39 = vadd.f32 %v12756_v9, %v4092_v17  ;;  %v7433_v9 = vld [vmem:[%s14171_s4 + $0x8d8] sm:$0xff]  ;;  %v1777_v40 = vld [vmem:[%s14168_s1 + $0xbf0] sm:$0xff] }
 0x482   : > { %v13410_v48 = vadd.f32 %v4827_v35, %v4736_v61  ;;  %9105 = vmatpush3.msra.mxu0 %v7436_v0  ;;  %v13412_v51 = vpop.f32.mrf.mxu1  ;;  %3391 = vmatmul.mubr.f32.gmra.mxu1 %v1767_v8  ;;  %v7426_v0 = vld [vmem:[%s14171_s4 + $0x8a0] sm:$0xff]  ;;  %v1782_v17 = vld [vmem:[%s14168_s1 + $0xc18] sm:$0xff] }
 0x483   : > { %v8831_v36 = vpop.f32.mrf.mxu0  ;;  %9094 = vmatmul.mubr.f32.gmra.mxu0 %v13252_v2  ;;  %9106 = vmatprep.subr.mxu0 %v7435_v16  ;;  %v4352_v46 = vadd.f32 %v12907_v10, %v4222_v39  ;;  %v1771_v10 = vld [vmem:[%s14168_s1 + $0xbc0] sm:$0xff]  ;;  %v7453_v39 = vld [vmem:[%s14171_s4 + $0x978] sm:$0xff] }
 0x484   : > { %v13428_v14 = vadd.f32 %v8831_v36, %v13243_v63  ;;  %9096 = vmatprep.mubr.f32.mxu0 %v13274_v23  ;;  %9107 = vmatpush3.msra.mxu0 %v7435_v16  ;;  %v3154_v6 = vpop.f32.mrf.mxu1  ;;  %v7432_v23 = vld [vmem:[%s14171_s4 + $0x8d0] sm:$0xff]  ;;  %v1779_v61 = vld [vmem:[%s14168_s1 + $0xc00] sm:$0xff]  ;;  %v7423_v16 = vld [vmem:[%s14171_s4 + $0x888] sm:$0xff] }
 0x485   : > { %v4837_v2 = vpop.f32.mrf.mxu0  ;;  %9108 = vmatprep.subr.mxu0 %v7434_v55  ;;  %7153 = vmatprep.mubr.msk.f32.mxu1 %vm1795_vm10, %v1770_v44  ;;  %v4482_v59 = vadd.f32 %v13058_v53, %v4352_v46  ;;  %v1783_v6 = vld [vmem:[%s14168_s1 + $0xc20] sm:$0xff]  ;;  %v7451_v46 = vld [vmem:[%s14171_s4 + $0x968] sm:$0xff] }
 0x486   : > { %v13437_v29 = vadd.f32 %v4837_v2, %v4738_v45  ;;  %9109 = vmatpush3.msra.mxu0 %v7434_v55  ;;  %v13439_v63 = vpop.f32.mrf.mxu1  ;;  %3396 = vmatmul.mubr.f32.gmra.mxu1 %v1769_v42  ;;  %v1781_v55 = vld [vmem:[%s14168_s1 + $0xc10] sm:$0xff] }
 0x487   : > { %v8834_v5 = vpop.f32.mrf.mxu0  ;;  %9097 = vmatmul.mubr.f32.gmra.mxu0 %v13300_v30  ;;  %9110 = vmatprep.subr.mxu0 %v7433_v9  ;;  %v7431_v30 = vld [vmem:[%s14171_s4 + $0x8c8] sm:$0xff]  ;;  %v4612_v27 = vadd.f32 %v13206_v25, %v4482_v59  ;;  %v1773_v25 = vld [vmem:[%s14168_s1 + $0xbd0] sm:$0xff]  ;;  %v7449_v59 = vld [vmem:[%s14171_s4 + $0x958] sm:$0xff] }
 0x488   : > { %v13454_v15 = vadd.f32 %v8834_v5, %v13265_v19  ;;  %9099 = vmatprep.mubr.f32.mxu0 %v13318_v4  ;;  %9111 = vmatpush3.msra.mxu0 %v7433_v9  ;;  %v3159_v31 = vpop.f32.mrf.mxu1  ;;  %v7430_v19 = vld [vmem:[%s14171_s4 + $0x8c0] sm:$0xff]  ;;  %v1774_v4 = vld [vmem:[%s14168_s1 + $0xbd8] sm:$0xff]  ;;  %v7452_v42 = vld [vmem:[%s14171_s4 + $0x970] sm:$0xff] }
 0x489   : > { %v4847_v62 = vpop.f32.mrf.mxu0  ;;  %9112 = vmatprep.subr.mxu0 %v7432_v23  ;;  %7154 = vmatprep.mubr.msk.f32.mxu1 %vm1795_vm10, %v1772_v49  ;;  %v4742_v33 = vadd.f32 %v13379_v54, %v4612_v27  ;;  %v7427_v54 = vld [vmem:[%s14171_s4 + $0x8a8] sm:$0xff] }
 0x48a   : > { %v13462_v53 = vadd.f32 %v4847_v62, %v4740_v34  ;;  %9113 = vmatpush3.msra.mxu0 %v7432_v23  ;;  %v13464_v43 = vpop.f32.mrf.mxu1  ;;  %3401 = vmatmul.mubr.f32.gmra.mxu1 %v1771_v10 }
 0x48b   : > { %v8837_v11 = vpop.f32.mrf.mxu0  ;;  %9100 = vmatmul.mubr.f32.gmra.mxu0 %v13338_v13  ;;  %9114 = vmatprep.subr.mxu0 %v7431_v30  ;;  %v1776_v13 = vld [vmem:[%s14168_s1 + $0xbe8] sm:$0xff] }
 0x48c   : > { %v13478_v58 = vadd.f32 %v8837_v11, %v13287_v22  ;;  %9115 = vmatpush3.msra.mxu0 %v7431_v30  ;;  %9134 = vmatprep.mubr.f32.mxu0 %v13360_v1  ;;  %v3164_v28 = vpop.f32.mrf.mxu1  ;;  %v7428_v1 = vld [vmem:[%s14171_s4 + $0x8b0] sm:$0xff]  ;;  %v1788_v30 = vld [vmem:[%s14168_s1 + $0xc48] sm:$0xff] }
 0x48d   : > { %v4857_v57 = vpop.f32.mrf.mxu0  ;;  %9116 = vmatprep.subr.mxu0 %v7430_v19  ;;  %7155 = vmatprep.mubr.msk.f32.mxu1 %vm1795_vm10, %v1774_v4 }
 0x48e   : > { %v13488_v32 = vadd.f32 %v4857_v57, %v4742_v33  ;;  %9117 = vmatpush3.msra.mxu0 %v7430_v19  ;;  %v13490_v22 = vpop.f32.mrf.mxu1  ;;  %3406 = vmatmul.mubr.f32.gmra.mxu1 %v1773_v25  ;;  %v7447_v19 = vld [vmem:[%s14171_s4 + $0x948] sm:$0xff]  ;;  %v1790_v33 = vld [vmem:[%s14168_s1 + $0xc58] sm:$0xff] }
 0x48f   : > { %9118 = vmatprep.subr.mxu0 %v7429_v56  ;;  %7156 = vmatprep.mubr.msk.f32.mxu1 %vm1795_vm10, %v1776_v13  ;;  %v7445_v57 = vld [vmem:[%s14171_s4 + $0x938] sm:$0xff] }
 0x490   : > { %9119 = vmatpush3.msra.mxu0 %v7429_v56  ;;  %v3169_v12 = vpop.f32.mrf.mxu1  ;;  %9352 = vmatprep.subr.mxu1 %v7502_v20 }
 0x491   : > { %9120 = vmatprep.subr.mxu0 %v7428_v1  ;;  %9353 = vmatpush3.msra.mxu1 %v7502_v20  ;;  %v7444_v12 = vld [vmem:[%s14171_s4 + $0x930] sm:$0xff] }
 0x492   : > { %9121 = vmatpush3.msra.mxu0 %v7428_v1  ;;  %v13505_v3 = vpop.f32.mrf.mxu1  ;;  %3411 = vmatmul.mubr.f32.gmra.mxu1 %v1775_v18 }
 0x493   : > { %9122 = vmatprep.subr.mxu0 %v7427_v54  ;;  %7157 = vmatprep.mubr.msk.f32.mxu1 %vm1795_vm10, %v1778_v7 }
 0x494   : > { %9123 = vmatpush3.msra.mxu0 %v7427_v54  ;;  %v3174_v41 = vpop.f32.mrf.mxu1  ;;  %v1791_v54 = vld [vmem:[%s14168_s1 + $0xc60] sm:$0xff] }
 0x495   : > { %9124 = vmatprep.subr.mxu0 %v7426_v0  ;;  %v1793_v41 = vld [vmem:[%s14168_s1 + $0xc70] sm:$0xff] }
 0x496   : > { %9125 = vmatpush3.msra.mxu0 %v7426_v0  ;;  %v13520_v8 = vpop.f32.mrf.mxu1  ;;  %3416 = vmatmul.mubr.f32.gmra.mxu1 %v1777_v40  ;;  %v7442_v40 = vld [vmem:[%s14171_s4 + $0x920] sm:$0xff] }
 0x497   : > { %9126 = vmatprep.subr.mxu0 %v7425_v50  ;;  %7158 = vmatprep.mubr.msk.f32.mxu1 %vm1795_vm10, %v1780_v38  ;;  %v7441_v38 = vld [vmem:[%s14171_s4 + $0x918] sm:$0xff] }
 0x498   : > { %9127 = vmatpush3.msra.mxu0 %v7425_v50  ;;  %v3179_v24 = vpop.f32.mrf.mxu1 }
 0x499   : > { %9128 = vmatprep.subr.mxu0 %v7424_v60  ;;  %v7439_v24 = vld [vmem:[%s14171_s4 + $0x908] sm:$0xff] }
 0x49a   : > { %9129 = vmatpush3.msra.mxu0 %v7424_v60  ;;  %v13535_v35 = vpop.f32.mrf.mxu1  ;;  %3421 = vmatmul.mubr.f32.gmra.mxu1 %v1779_v61  ;;  %v7440_v60 = vld [vmem:[%s14171_s4 + $0x910] sm:$0xff] }
 0x49b   : > { %9130 = vmatprep.subr.mxu0 %v7423_v16  ;;  %7159 = vmatprep.mubr.msk.f32.mxu1 %vm1795_vm10, %v1782_v17  ;;  %v7438_v17 = vld [vmem:[%s14171_s4 + $0x900] sm:$0xff] }
 0x49c   : > { %9131 = vmatpush3.msra.mxu0 %v7423_v16  ;;  %v3184_v44 = vpop.f32.mrf.mxu1 }
 0x49d   : > { %9132 = vmatprep.subr.mxu0 %v7422_v26 }
 0x49e   : > { %9133 = vmatpush3.msra.mxu0 %v7422_v26  ;;  %v13550_v36 = vpop.f32.mrf.mxu1  ;;  %3426 = vmatmul.mubr.f32.gmra.mxu1 %v1781_v55  ;;  %v7469_v26 = vld [vmem:[%s14171_s4 + $0x9f8] sm:$0xff]  ;;  %v7468_v55 = vld [vmem:[%s14171_s4 + $0x9f0] sm:$0xff] }
 0x49f   : > { %v8872_v45 = vpop.f32.mrf.mxu0  ;;  %9135 = vmatmul.mubr.f32.vlgmr.msra.gmra.mxu0 %v13383_v21  ;;  %9146 = vmatprep.subr.mxu0 %v7453_v39 }
 0x4a0   : > { %v13563_v9 = vadd.f32 %v8872_v45, %v13400_v37  ;;  %9137 = vmatprep.mubr.f32.mxu0 %v13412_v51  ;;  %9147 = vmatpush3.msra.mxu0 %v7453_v39  ;;  %v3189_v2 = vpop.f32.mrf.mxu1  ;;  %v7450_v37 = vld [vmem:[%s14171_s4 + $0x960] sm:$0xff]  ;;  %v1786_v51 = vld [vmem:[%s14168_s1 + $0xc38] sm:$0xff] }
 0x4a1   : > { %v4957_v52 = vpop.f32.mrf.mxu0  ;;  %9148 = vmatprep.subr.mxu0 %v7452_v42  ;;  %7160 = vmatprep.mubr.msk.f32.mxu1 %vm1795_vm10, %v1784_v47  ;;  %v7467_v47 = vld [vmem:[%s14171_s4 + $0x9e8] sm:$0xff]  ;;  %v7466_v2 = vld [vmem:[%s14171_s4 + $0x9e0] sm:$0xff] }
 0x4a2   : > { %v13571_v21 = vadd.f32 %v4957_v52, %v13410_v48  ;;  %9149 = vmatpush3.msra.mxu0 %v7452_v42  ;;  %v13573_v23 = vpop.f32.mrf.mxu1  ;;  %3431 = vmatmul.mubr.f32.gmra.mxu1 %v1783_v6  ;;  %v1785_v48 = vld [vmem:[%s14168_s1 + $0xc30] sm:$0xff]  ;;  %v13702_v6 = vld [vmem:[%s14171_s4 + $0xc78] sm:$0xff] }
 0x4a3   : > { %v8875_v49 = vpop.f32.mrf.mxu0  ;;  %9138 = vmatmul.mubr.f32.gmra.mxu0 %v13439_v63  ;;  %9150 = vmatprep.subr.mxu0 %v7451_v46 }
 0x4a4   : > { %v13586_v5 = vadd.f32 %v8875_v49, %v13428_v14  ;;  %9140 = vmatprep.mubr.f32.mxu0 %v13464_v43  ;;  %9151 = vmatpush3.msra.mxu0 %v7451_v46  ;;  %v3194_v10 = vpop.f32.mrf.mxu1  ;;  %v7448_v14 = vld [vmem:[%s14171_s4 + $0x950] sm:$0xff] }
 0x4a5   : > { %v4967_v34 = vpop.f32.mrf.mxu0  ;;  %9152 = vmatprep.subr.mxu0 %v7450_v37  ;;  %7161 = vmatprep.mubr.msk.f32.mxu1 %vm1795_vm10, %v1786_v51 }
 0x4a6   : > { %v13594_v63 = vadd.f32 %v4967_v34, %v13437_v29  ;;  %9153 = vmatpush3.msra.mxu0 %v7450_v37  ;;  %v13596_v31 = vpop.f32.mrf.mxu1  ;;  %3436 = vmatmul.mubr.f32.gmra.mxu1 %v1785_v48  ;;  %v1787_v29 = vld [vmem:[%s14168_s1 + $0xc40] sm:$0xff]  ;;  %v7464_v48 = vld [vmem:[%s14171_s4 + $0x9d0] sm:$0xff]  ;;  %v7463_v34 = vld [vmem:[%s14171_s4 + $0x9c8] sm:$0xff] }
 0x4a7   : > { %v8878_v62 = vpop.f32.mrf.mxu0  ;;  %9141 = vmatmul.mubr.f32.gmra.mxu0 %v13490_v22  ;;  %9154 = vmatprep.subr.mxu0 %v7449_v59  ;;  %v1792_v22 = vld [vmem:[%s14168_s1 + $0xc68] sm:$0xff] }
 0x4a8   : > { %v13609_v27 = vadd.f32 %v8878_v62, %v13454_v15  ;;  %9143 = vmatprep.mubr.f32.mxu0 %v13505_v3  ;;  %9155 = vmatpush3.msra.mxu0 %v7449_v59  ;;  %v3199_v43 = vpop.f32.mrf.mxu1  ;;  %v7446_v15 = vld [vmem:[%s14171_s4 + $0x940] sm:$0xff]  ;;  %v1794_v3 = vld [vmem:[%s14168_s1 + $0xc78] sm:$0xff] }
 0x4a9   : > { %v4977_v4 = vpop.f32.mrf.mxu0  ;;  %9156 = vmatprep.subr.mxu0 %v7448_v14  ;;  %7162 = vmatprep.mubr.msk.f32.mxu1 %vm1795_vm10, %v1788_v30  ;;  %v7462_v30 = vld [vmem:[%s14171_s4 + $0x9c0] sm:$0xff]  ;;  %v7461_v43 = vld [vmem:[%s14171_s4 + $0x9b8] sm:$0xff] }
 0x4aa   : > { %v13617_v11 = vadd.f32 %v4977_v4, %v13462_v53  ;;  %9157 = vmatpush3.msra.mxu0 %v7448_v14  ;;  %v13619_v25 = vpop.f32.mrf.mxu1  ;;  %3441 = vmatmul.mubr.f32.gmra.mxu1 %v1787_v29  ;;  %v1789_v53 = vld [vmem:[%s14168_s1 + $0xc50] sm:$0xff] }
 0x4ab   : > { %v8881_v28 = vpop.f32.mrf.mxu0  ;;  %9144 = vmatmul.mubr.f32.gmra.mxu0 %v13520_v8  ;;  %9158 = vmatprep.subr.mxu0 %v7447_v19 }
 0x4ac   : > { %v13632_v56 = vadd.f32 %v8881_v28, %v13478_v58  ;;  %9159 = vmatpush3.msra.mxu0 %v7447_v19  ;;  %9178 = vmatprep.mubr.f32.mxu0 %v13535_v35  ;;  %v3204_v13 = vpop.f32.mrf.mxu1 }
 0x4ad   : > { %v4987_v1 = vpop.f32.mrf.mxu0  ;;  %9160 = vmatprep.subr.mxu0 %v7446_v15  ;;  %7163 = vmatprep.mubr.msk.f32.mxu1 %vm1795_vm10, %v1790_v33  ;;  %v7459_v33 = vld [vmem:[%s14171_s4 + $0x9a8] sm:$0xff]  ;;  %v7457_v13 = vld [vmem:[%s14171_s4 + $0x998] sm:$0xff] }
 0x4ae   : > { %v13643_v18 = vadd.f32 %v4987_v1, %v13488_v32  ;;  %9161 = vmatpush3.msra.mxu0 %v7446_v15  ;;  %v13645_v58 = vpop.f32.mrf.mxu1  ;;  %3446 = vmatmul.mubr.f32.gmra.mxu1 %v1789_v53  ;;  %v7443_v32 = vld [vmem:[%s14171_s4 + $0x928] sm:$0xff]  ;;  %v7458_v53 = vld [vmem:[%s14171_s4 + $0x9a0] sm:$0xff] }
 0x4af   : > { %9162 = vmatprep.subr.mxu0 %v7445_v57  ;;  %7164 = vmatprep.mubr.msk.f32.mxu1 %vm1795_vm10, %v1792_v22  ;;  %v7456_v22 = vld [vmem:[%s14171_s4 + $0x990] sm:$0xff] }
 0x4b0   : > { %9163 = vmatpush3.msra.mxu0 %v7445_v57  ;;  %v3209_v7 = vpop.f32.mrf.mxu1  ;;  %9410 = vmatprep.subr.mxu1 %v13702_v6 }
 0x4b1   : > { %9164 = vmatprep.subr.mxu0 %v7444_v12  ;;  %v7485_v7 = vld [vmem:[%s14171_s4 + $0xa78] sm:$0xff] }
 0x4b2   : > { %9165 = vmatpush3.msra.mxu0 %v7444_v12  ;;  %v13660_v0 = vpop.f32.mrf.mxu1  ;;  %3451 = vmatmul.mubr.f32.gmra.mxu1 %v1791_v54  ;;  %v7454_v12 = vld [vmem:[%s14171_s4 + $0x980] sm:$0xff] }
 0x4b3   : > { %9166 = vmatprep.subr.mxu0 %v7443_v32  ;;  %7165 = vmatprep.mubr.msk.f32.mxu1 %vm1795_vm10, %v1794_v3  ;;  %v7484_v3 = vld [vmem:[%s14171_s4 + $0xa70] sm:$0xff] }
 0x4b4   : > { %9167 = vmatpush3.msra.mxu0 %v7443_v32  ;;  %v3214_v50 = vpop.f32.mrf.mxu1 }
 0x4b5   : > { %9168 = vmatprep.subr.mxu0 %v7442_v40  ;;  %v7483_v50 = vld [vmem:[%s14171_s4 + $0xa68] sm:$0xff] }
 0x4b6   : > { %9169 = vmatpush3.msra.mxu0 %v7442_v40  ;;  %v13672_v8 = vpop.f32.mrf.mxu1  ;;  %3456 = vmatmul.mubr.f32.gmra.mxu1 %v1793_v41 }
 0x4b7   : > { %9170 = vmatprep.subr.mxu0 %v7441_v38 }
 0x4b8   : > { %9171 = vmatpush3.msra.mxu0 %v7441_v38  ;;  %v3219_v61 = vpop.f32.mrf.mxu1 }
 0x4b9   : > { %9172 = vmatprep.subr.mxu0 %v7440_v60  ;;  %v7482_v61 = vld [vmem:[%s14171_s4 + $0xa60] sm:$0xff] }
 0x4ba   : > { %9173 = vmatpush3.msra.mxu0 %v7440_v60  ;;  %v3222_v16 = vpop.f32.mrf.mxu1 }
 0x4bb   : > { %9174 = vmatprep.subr.mxu0 %v7439_v24 }
 0x4bc   : > { %9175 = vmatpush3.msra.mxu0 %v7439_v24  ;;  %v3224_v35 = vpop.f32.mrf.mxu1 }
 0x4bd   : > { %9176 = vmatprep.subr.mxu0 %v7438_v17  ;;  %v7481_v35 = vld [vmem:[%s14171_s4 + $0xa58] sm:$0xff] }
 0x4be   : > { %9177 = vmatpush3.msra.mxu0 %v7438_v17  ;;  %v13686_v20 = vpop.f32.mrf.mxu1 }
 0x4bf   : > { %v8916_v44 = vpop.f32.mrf.mxu0  ;;  %9179 = vmatmul.mubr.f32.vlgmr.msra.gmra.mxu0 %v13550_v36  ;;  %9190 = vmatprep.subr.mxu0 %v7469_v26 }
 0x4c0   : > { %v13693_v39 = vadd.f32 %v8916_v44, %v13563_v9  ;;  %9181 = vmatprep.mubr.f32.mxu0 %v13573_v23  ;;  %9191 = vmatpush3.msra.mxu0 %v7469_v26  ;;  %v3229_v42 = vpop.f32.mrf.mxu1  ;;  %v7465_v23 = vld [vmem:[%s14171_s4 + $0x9d8] sm:$0xff]  ;;  %v7480_v44 = vld [vmem:[%s14171_s4 + $0xa50] sm:$0xff] }
 0x4c1   : > { %v5087_v45 = vpop.f32.mrf.mxu0  ;;  %9192 = vmatprep.subr.mxu0 %v7468_v55 }
 0x4c2   : > { %v13705_v36 = vadd.f32 %v5087_v45, %v13571_v21  ;;  %9193 = vmatpush3.msra.mxu0 %v7468_v55  ;;  %v13707_v9 = vpop.f32.mrf.mxu1  ;;  %v7479_v45 = vld [vmem:[%s14171_s4 + $0xa48] sm:$0xff] }
 0x4c3   : > { %v8919_v46 = vpop.f32.mrf.mxu0  ;;  %9182 = vmatmul.mubr.f32.gmra.mxu0 %v13596_v31  ;;  %9194 = vmatprep.subr.mxu0 %v7467_v47 }
 0x4c4   : > { %v13715_v52 = vadd.f32 %v8919_v46, %v13586_v5  ;;  %9184 = vmatprep.mubr.f32.mxu0 %v13619_v25  ;;  %9195 = vmatpush3.msra.mxu0 %v7467_v47  ;;  %v3234_v21 = vpop.f32.mrf.mxu1  ;;  %v7460_v25 = vld [vmem:[%s14171_s4 + $0x9b0] sm:$0xff]  ;;  %v7478_v46 = vld [vmem:[%s14171_s4 + $0xa40] sm:$0xff] }
 0x4c5   : > { %v5097_v37 = vpop.f32.mrf.mxu0  ;;  %9196 = vmatprep.subr.mxu0 %v7466_v2 }
 0x4c6   : > { %v13722_v51 = vadd.f32 %v5097_v37, %v13594_v63  ;;  %9197 = vmatpush3.msra.mxu0 %v7466_v2  ;;  %v13724_v49 = vpop.f32.mrf.mxu1  ;;  %v7477_v37 = vld [vmem:[%s14171_s4 + $0xa38] sm:$0xff] }
 0x4c7   : > { %v8922_v5 = vpop.f32.mrf.mxu0  ;;  %9185 = vmatmul.mubr.f32.gmra.mxu0 %v13645_v58  ;;  %9198 = vmatprep.subr.mxu0 %v7465_v23 }
 0x4c8   : > { %v13731_v10 = vadd.f32 %v8922_v5, %v13609_v27  ;;  %9187 = vmatprep.mubr.f32.mxu0 %v13660_v0  ;;  %9199 = vmatpush3.msra.mxu0 %v7465_v23  ;;  %v3239_v59 = vpop.f32.mrf.mxu1  ;;  %v7476_v5 = vld [vmem:[%s14171_s4 + $0xa30] sm:$0xff] }
 0x4c9   : > { %v5107_v63 = vpop.f32.mrf.mxu0  ;;  %9200 = vmatprep.subr.mxu0 %v7464_v48  ;;  %v7475_v59 = vld [vmem:[%s14171_s4 + $0xa28] sm:$0xff] }
 0x4ca   : > { %v13738_v31 = vadd.f32 %v5107_v63, %v13617_v11  ;;  %9201 = vmatpush3.msra.mxu0 %v7464_v48  ;;  %v13740_v14 = vpop.f32.mrf.mxu1  ;;  %v7474_v63 = vld [vmem:[%s14171_s4 + $0xa20] sm:$0xff] }
 0x4cb   : > { %v8925_v62 = vpop.f32.mrf.mxu0  ;;  %9188 = vmatmul.mubr.f32.gmra.mxu0 %v13672_v8  ;;  %9202 = vmatprep.subr.mxu0 %v7463_v34 }
 0x4cc   : > { %v13747_v29 = vadd.f32 %v8925_v62, %v13632_v56  ;;  %9203 = vmatpush3.msra.mxu0 %v7463_v34  ;;  %9222 = vmatprep.mubr.f32.mxu0 %v3222_v16  ;;  %v3244_v27 = vpop.f32.mrf.mxu1  ;;  %v7472_v62 = vld [vmem:[%s14171_s4 + $0xa10] sm:$0xff] }
 0x4cd   : > { %v5117_v19 = vpop.f32.mrf.mxu0  ;;  %9204 = vmatprep.subr.mxu0 %v7462_v30  ;;  %v7471_v27 = vld [vmem:[%s14171_s4 + $0xa08] sm:$0xff] }
 0x4ce   : > { %v13753_v4 = vadd.f32 %v5117_v19, %v13643_v18  ;;  %9205 = vmatpush3.msra.mxu0 %v7462_v30  ;;  %v3247_v11 = vpop.f32.mrf.mxu1  ;;  %v7455_v18 = vld [vmem:[%s14171_s4 + $0x988] sm:$0xff]  ;;  %v7470_v19 = vld [vmem:[%s14171_s4 + $0xa00] sm:$0xff] }
 0x4cf   : > { %9206 = vmatprep.subr.mxu0 %v7461_v43 }
 0x4d0   : > { %9207 = vmatpush3.msra.mxu0 %v7461_v43  ;;  %v3249_v15 = vpop.f32.mrf.mxu1 }
 0x4d1   : > { %9208 = vmatprep.subr.mxu0 %v7460_v25  ;;  %v7500_v15 = vld [vmem:[%s14171_s4 + $0xaf0] sm:$0xff] }
 0x4d2   : > { %9209 = vmatpush3.msra.mxu0 %v7460_v25  ;;  %v3252_v28 = vpop.f32.mrf.mxu1 }
 0x4d3   : > { %9210 = vmatprep.subr.mxu0 %v7459_v33 }
 0x4d4   : > { %9211 = vmatpush3.msra.mxu0 %v7459_v33  ;;  %v3254_v56 = vpop.f32.mrf.mxu1 }
 0x4d5   : > { %9212 = vmatprep.subr.mxu0 %v7458_v53  ;;  %v7499_v56 = vld [vmem:[%s14171_s4 + $0xae8] sm:$0xff] }
 0x4d6   : > { %9213 = vmatpush3.msra.mxu0 %v7458_v53  ;;  %v3257_v57 = vpop.f32.mrf.mxu1 }
 0x4d7   : > { %9214 = vmatprep.subr.mxu0 %v7457_v13 }
 0x4d8   : > { %9215 = vmatpush3.msra.mxu0 %v7457_v13  ;;  %v3259_v1 = vpop.f32.mrf.mxu1 }
 0x4d9   : > { %9216 = vmatprep.subr.mxu0 %v7456_v22  ;;  %v7498_v1 = vld [vmem:[%s14171_s4 + $0xae0] sm:$0xff] }
 0x4da   : > { %9217 = vmatpush3.msra.mxu0 %v7456_v22  ;;  %v3262_v58 = vpop.f32.mrf.mxu1 }
 0x4db   : > { %9218 = vmatprep.subr.mxu0 %v7455_v18 }
 0x4dc   : > { %9219 = vmatpush3.msra.mxu0 %v7455_v18  ;;  %v3264_v54 = vpop.f32.mrf.mxu1 }
 0x4dd   : > { %9220 = vmatprep.subr.mxu0 %v7454_v12  ;;  %v7497_v54 = vld [vmem:[%s14171_s4 + $0xad8] sm:$0xff] }
 0x4de   : > { %9221 = vmatpush3.msra.mxu0 %v7454_v12  ;;  %v13779_v32 = vpop.f32.mrf.mxu1 }
 0x4df   : > { %v8960_v0 = vpop.f32.mrf.mxu0  ;;  %9223 = vmatmul.mubr.f32.vlgmr.msra.gmra.mxu0 %v13686_v20  ;;  %9234 = vmatprep.subr.mxu0 %v7485_v7 }
 0x4e0   : > { %v13786_v40 = vadd.f32 %v8960_v0, %v13693_v39  ;;  %9225 = vmatprep.mubr.f32.mxu0 %v13707_v9  ;;  %9235 = vmatpush3.msra.mxu0 %v7485_v7  ;;  %v3269_v41 = vpop.f32.mrf.mxu1  ;;  %v7496_v0 = vld [vmem:[%s14171_s4 + $0xad0] sm:$0xff] }
 0x4e1   : > { %v5217_v38 = vpop.f32.mrf.mxu0  ;;  %9236 = vmatprep.subr.mxu0 %v7484_v3 }
 0x4e2   : > { %v13793_v8 = vadd.f32 %v5217_v38, %v13705_v36  ;;  %9237 = vmatpush3.msra.mxu0 %v7484_v3  ;;  %v13795_v60 = vpop.f32.mrf.mxu1  ;;  %v7495_v38 = vld [vmem:[%s14171_s4 + $0xac8] sm:$0xff] }
 0x4e3   : > { %v8963_v24 = vpop.f32.mrf.mxu0  ;;  %9226 = vmatmul.mubr.f32.gmra.mxu0 %v13724_v49  ;;  %9238 = vmatprep.subr.mxu0 %v7483_v50 }
 0x4e4   : > { %v13802_v16 = vadd.f32 %v8963_v24, %v13715_v52  ;;  %9228 = vmatprep.mubr.f32.mxu0 %v13740_v14  ;;  %9239 = vmatpush3.msra.mxu0 %v7483_v50  ;;  %v3274_v17 = vpop.f32.mrf.mxu1  ;;  %v7473_v14 = vld [vmem:[%s14171_s4 + $0xa18] sm:$0xff]  ;;  %v7494_v24 = vld [vmem:[%s14171_s4 + $0xac0] sm:$0xff] }
 0x4e5   : > { %v5227_v26 = vpop.f32.mrf.mxu0  ;;  %9240 = vmatprep.subr.mxu0 %v7482_v61 }
 0x4e6   : > { %v13809_v20 = vadd.f32 %v5227_v26, %v13722_v51  ;;  %9241 = vmatpush3.msra.mxu0 %v7482_v61  ;;  %v13811_v55 = vpop.f32.mrf.mxu1  ;;  %v7493_v26 = vld [vmem:[%s14171_s4 + $0xab8] sm:$0xff] }
 0x4e7   : > { %v8966_v39 = vpop.f32.mrf.mxu0  ;;  %9229 = vmatmul.mubr.f32.gmra.mxu0 %v3247_v11  ;;  %9242 = vmatprep.subr.mxu0 %v7481_v35  ;;  %v7501_v11 = vld [vmem:[%s14171_s4 + $0xaf8] sm:$0xff] }
 0x4e8   : > { %v13817_v42 = vadd.f32 %v8966_v39, %v13731_v10  ;;  %9231 = vmatprep.mubr.f32.mxu0 %v3252_v28  ;;  %9243 = vmatpush3.msra.mxu0 %v7481_v35  ;;  %v3279_v47 = vpop.f32.mrf.mxu1  ;;  %v7492_v39 = vld [vmem:[%s14171_s4 + $0xab0] sm:$0xff] }
 0x4e9   : > { %v5237_v36 = vpop.f32.mrf.mxu0  ;;  %9244 = vmatprep.subr.mxu0 %v7480_v44  ;;  %v7491_v47 = vld [vmem:[%s14171_s4 + $0xaa8] sm:$0xff] }
 0x4ea   : > { %v13823_v9 = vadd.f32 %v5237_v36, %v13738_v31  ;;  %9245 = vmatpush3.msra.mxu0 %v7480_v44  ;;  %v13825_v2 = vpop.f32.mrf.mxu1  ;;  %v7490_v36 = vld [vmem:[%s14171_s4 + $0xaa0] sm:$0xff] }
 0x4eb   : > { %v8969_v52 = vpop.f32.mrf.mxu0  ;;  %9232 = vmatmul.mubr.f32.gmra.mxu0 %v3257_v57  ;;  %9246 = vmatprep.subr.mxu0 %v7479_v45 }
 0x4ec   : > { %v13831_v21 = vadd.f32 %v8969_v52, %v13747_v29  ;;  %9247 = vmatpush3.msra.mxu0 %v7479_v45  ;;  %9266 = vmatprep.mubr.f32.mxu0 %v3262_v58  ;;  %v3284_v23 = vpop.f32.mrf.mxu1  ;;  %v7488_v52 = vld [vmem:[%s14171_s4 + $0xa90] sm:$0xff] }
 0x4ed   : > { %v5247_v51 = vpop.f32.mrf.mxu0  ;;  %9248 = vmatprep.subr.mxu0 %v7478_v46  ;;  %v7487_v23 = vld [vmem:[%s14171_s4 + $0xa88] sm:$0xff] }
 0x4ee   : > { %v13837_v49 = vadd.f32 %v5247_v51, %v13753_v4  ;;  %9249 = vmatpush3.msra.mxu0 %v7478_v46  ;;  %v3287_v48 = vpop.f32.mrf.mxu1  ;;  %v7486_v51 = vld [vmem:[%s14171_s4 + $0xa80] sm:$0xff] }
 0x4ef   : > { %9250 = vmatprep.subr.mxu0 %v7477_v37 }
 0x4f0   : > { %9251 = vmatpush3.msra.mxu0 %v7477_v37  ;;  %v3289_v10 = vpop.f32.mrf.mxu1 }
 0x4f1   : > { %9252 = vmatprep.subr.mxu0 %v7476_v5 }
 0x4f2   : > { %9253 = vmatpush3.msra.mxu0 %v7476_v5  ;;  %v3292_v34 = vpop.f32.mrf.mxu1 }
 0x4f3   : > { %9254 = vmatprep.subr.mxu0 %v7475_v59 }
 0x4f4   : > { %9255 = vmatpush3.msra.mxu0 %v7475_v59  ;;  %v3294_v31 = vpop.f32.mrf.mxu1  ;;  %v7532_v59 = vld [vmem:[%s14171_s4 + $0xbf0] sm:$0xff] }
 0x4f5   : > { %9256 = vmatprep.subr.mxu0 %v7474_v63 }
 0x4f6   : > { %9257 = vmatpush3.msra.mxu0 %v7474_v63  ;;  %v3297_v30 = vpop.f32.mrf.mxu1 }
 0x4f7   : > { %9258 = vmatprep.subr.mxu0 %v7473_v14 }
 0x4f8   : > { %9259 = vmatpush3.msra.mxu0 %v7473_v14  ;;  %v3299_v29 = vpop.f32.mrf.mxu1 }
 0x4f9   : > { %9260 = vmatprep.subr.mxu0 %v7472_v62  ;;  %v7531_v29 = vld [vmem:[%s14171_s4 + $0xbe8] sm:$0xff] }
 0x4fa   : > { %9261 = vmatpush3.msra.mxu0 %v7472_v62  ;;  %v3302_v43 = vpop.f32.mrf.mxu1 }
 0x4fb   : > { %9262 = vmatprep.subr.mxu0 %v7471_v27 }
 0x4fc   : > { %9263 = vmatpush3.msra.mxu0 %v7471_v27  ;;  %v3304_v4 = vpop.f32.mrf.mxu1 }
 0x4fd   : > { %9264 = vmatprep.subr.mxu0 %v7470_v19  ;;  %v7530_v4 = vld [vmem:[%s14171_s4 + $0xbe0] sm:$0xff] }
 0x4fe   : > { %9265 = vmatpush3.msra.mxu0 %v7470_v19  ;;  %v13863_v25 = vpop.f32.mrf.mxu1 }
 0x4ff   : > { %v9004_v33 = vpop.f32.mrf.mxu0  ;;  %9267 = vmatmul.mubr.f32.vlgmr.msra.gmra.mxu0 %v13779_v32  ;;  %9278 = vmatprep.subr.mxu0 %v7501_v11 }
 0x500   : > { %v13870_v28 = vadd.f32 %v9004_v33, %v13786_v40  ;;  %9269 = vmatprep.mubr.f32.mxu0 %v13795_v60  ;;  %9279 = vmatpush3.msra.mxu0 %v7501_v11  ;;  %v3309_v53 = vpop.f32.mrf.mxu1  ;;  %v7529_v33 = vld [vmem:[%s14171_s4 + $0xbd8] sm:$0xff] }
 0x501   : > { %v5347_v13 = vpop.f32.mrf.mxu0  ;;  %9280 = vmatprep.subr.mxu0 %v7500_v15 }
 0x502   : > { %v13877_v57 = vadd.f32 %v5347_v13, %v13793_v8  ;;  %9281 = vmatpush3.msra.mxu0 %v7500_v15  ;;  %v13879_v22 = vpop.f32.mrf.mxu1  ;;  %v7528_v13 = vld [vmem:[%s14171_s4 + $0xbd0] sm:$0xff] }
 0x503   : > { %v9007_v18 = vpop.f32.mrf.mxu0  ;;  %9270 = vmatmul.mubr.f32.gmra.mxu0 %v13811_v55  ;;  %9282 = vmatprep.subr.mxu0 %v7499_v56 }
 0x504   : > { %v13886_v58 = vadd.f32 %v9007_v18, %v13802_v16  ;;  %9272 = vmatprep.mubr.f32.mxu0 %v13825_v2  ;;  %9283 = vmatpush3.msra.mxu0 %v7499_v56  ;;  %v3314_v12 = vpop.f32.mrf.mxu1  ;;  %v7489_v2 = vld [vmem:[%s14171_s4 + $0xa98] sm:$0xff]  ;;  %v7527_v18 = vld [vmem:[%s14171_s4 + $0xbc8] sm:$0xff] }
 0x505   : > { %v5357_v7 = vpop.f32.mrf.mxu0  ;;  %9284 = vmatprep.subr.mxu0 %v7498_v1 }
 0x506   : > { %v13893_v32 = vadd.f32 %v5357_v7, %v13809_v20  ;;  %9285 = vmatpush3.msra.mxu0 %v7498_v1  ;;  %v13895_v3 = vpop.f32.mrf.mxu1 }
 0x507   : > { %v9010_v40 = vpop.f32.mrf.mxu0  ;;  %9273 = vmatmul.mubr.f32.gmra.mxu0 %v3287_v48  ;;  %9286 = vmatprep.subr.mxu0 %v7497_v54  ;;  %v7533_v48 = vld [vmem:[%s14171_s4 + $0xbf8] sm:$0xff] }
 0x508   : > { %v13901_v41 = vadd.f32 %v9010_v40, %v13817_v42  ;;  %9275 = vmatprep.mubr.f32.mxu0 %v3292_v34  ;;  %9287 = vmatpush3.msra.mxu0 %v7497_v54  ;;  %v3319_v50 = vpop.f32.mrf.mxu1  ;;  %v7548_v34 = vld [vmem:[%s14171_s4 + $0xc70] sm:$0xff] }
 0x509   : > { %v5367_v8 = vpop.f32.mrf.mxu0  ;;  %9288 = vmatprep.subr.mxu0 %v7496_v0  ;;  %v7525_v50 = vld [vmem:[%s14171_s4 + $0xbb8] sm:$0xff] }
 0x50a   : > { %v13907_v60 = vadd.f32 %v5367_v8, %v13823_v9  ;;  %9289 = vmatpush3.msra.mxu0 %v7496_v0  ;;  %v13909_v61 = vpop.f32.mrf.mxu1  ;;  %v7545_v0 = vld [vmem:[%s14171_s4 + $0xc58] sm:$0xff] }
 0x50b   : > { %v9013_v16 = vpop.f32.mrf.mxu0  ;;  %9276 = vmatmul.mubr.f32.gmra.mxu0 %v3297_v30  ;;  %9290 = vmatprep.subr.mxu0 %v7495_v38 }
 0x50c   : > { %v13915_v17 = vadd.f32 %v9013_v16, %v13831_v21  ;;  %9291 = vmatpush3.msra.mxu0 %v7495_v38  ;;  %9310 = vmatprep.mubr.f32.mxu0 %v3302_v43  ;;  %v3324_v35 = vpop.f32.mrf.mxu1  ;;  %v7547_v43 = vld [vmem:[%s14171_s4 + $0xc68] sm:$0xff]  ;;  %v7544_v38 = vld [vmem:[%s14171_s4 + $0xc50] sm:$0xff] }
 0x50d   : > { %v5377_v20 = vpop.f32.mrf.mxu0  ;;  %9292 = vmatprep.subr.mxu0 %v7494_v24  ;;  %v7543_v16 = vld [vmem:[%s14171_s4 + $0xc48] sm:$0xff]  ;;  %v7522_v35 = vld [vmem:[%s14171_s4 + $0xba0] sm:$0xff] }
 0x50e   : > { %v13921_v55 = vadd.f32 %v5377_v20, %v13837_v49  ;;  %9293 = vmatpush3.msra.mxu0 %v7494_v24  ;;  %v13923_v44 = vpop.f32.mrf.mxu1  ;;  %v7523_v24 = vld [vmem:[%s14171_s4 + $0xba8] sm:$0xff] }
 0x50f   : > { %9294 = vmatprep.subr.mxu0 %v7493_v26 }
 0x510   : > { %9295 = vmatpush3.msra.mxu0 %v7493_v26  ;;  %v3329_v42 = vpop.f32.mrf.mxu1  ;;  %v7542_v26 = vld [vmem:[%s14171_s4 + $0xc40] sm:$0xff] }
 0x511   : > { %9296 = vmatprep.subr.mxu0 %v7492_v39  ;;  %v7520_v42 = vld [vmem:[%s14171_s4 + $0xb90] sm:$0xff] }
 0x512   : > { %9297 = vmatpush3.msra.mxu0 %v7492_v39  ;;  %v13931_v45 = vpop.f32.mrf.mxu1 }
 0x513   : > { %9298 = vmatprep.subr.mxu0 %v7491_v47 }
 0x514   : > { %9299 = vmatpush3.msra.mxu0 %v7491_v47  ;;  %v3334_v9 = vpop.f32.mrf.mxu1 }
 0x515   : > { %9300 = vmatprep.subr.mxu0 %v7490_v36 }
 0x516   : > { %9301 = vmatpush3.msra.mxu0 %v7490_v36  ;;  %v13939_v46 = vpop.f32.mrf.mxu1  ;;  %v7540_v36 = vld [vmem:[%s14171_s4 + $0xc30] sm:$0xff] }
 0x517   : > { %9302 = vmatprep.subr.mxu0 %v7489_v2 }
 0x518   : > { %9303 = vmatpush3.msra.mxu0 %v7489_v2  ;;  %v3339_v21 = vpop.f32.mrf.mxu1  ;;  %v7518_v2 = vld [vmem:[%s14171_s4 + $0xb80] sm:$0xff] }
 0x519   : > { %9304 = vmatprep.subr.mxu0 %v7488_v52  ;;  %v7538_v21 = vld [vmem:[%s14171_s4 + $0xc20] sm:$0xff] }
 0x51a   : > { %9305 = vmatpush3.msra.mxu0 %v7488_v52  ;;  %v3342_v37 = vpop.f32.mrf.mxu1 }
 0x51b   : > { %9306 = vmatprep.subr.mxu0 %v7487_v23  ;;  %9354 = vmatprep.mubr.f32.mxu1 %v3342_v37 }
 0x51c   : > { %9307 = vmatpush3.msra.mxu0 %v7487_v23  ;;  %v3344_v49 = vpop.f32.mrf.mxu1 }
 0x51d   : > { %9308 = vmatprep.subr.mxu0 %v7486_v51  ;;  %v7537_v49 = vld [vmem:[%s14171_s4 + $0xc18] sm:$0xff] }
 0x51e   : > { %9309 = vmatpush3.msra.mxu0 %v7486_v51  ;;  %v3347_v5 = vpop.f32.mrf.mxu1 }
 0x51f   : > { %v9048_v10 = vpop.f32.mrf.mxu0  ;;  %9311 = vmatmul.mubr.f32.vlgmr.msra.gmra.mxu0 %v13863_v25  ;;  %9355 = vmatmul.mubr.f32.vlgmr.msra.gmra.mxu1 %v3347_v5 }
 0x520   : > { %v13961_v63 = vadd.f32 %v9048_v10, %v13870_v28  ;;  %9313 = vmatprep.mubr.f32.mxu0 %v13879_v22  ;;  %9366 = vmatprep.subr.mxu0 %v7533_v48  ;;  %v3349_v31 = vpop.f32.mrf.mxu1 }
 0x521   : > { %v5477_v14 = vpop.f32.mrf.mxu0  ;;  %9367 = vmatpush3.msra.mxu0 %v7533_v48  ;;  %9411 = vmatpush3.msra.mxu1 %v13702_v6 }
 0x522   : > { %v13966_v30 = vadd.f32 %v5477_v14, %v13877_v57  ;;  %9368 = vmatprep.subr.mxu0 %v7532_v59  ;;  %v3352_v62 = vpop.f32.mrf.mxu1  ;;  %9412 = vmatprep.subr.mxu1 %v7548_v34  ;;  %v7535_v14 = vld [vmem:[%s14171_s4 + $0xc08] sm:$0xff] }
 0x523   : > { %v9051_v27 = vpop.f32.mrf.mxu0  ;;  %9314 = vmatmul.mubr.f32.gmra.mxu0 %v13895_v3  ;;  %9357 = vmatprep.mubr.f32.mxu1 %v3352_v62 }
 0x524   : > { %v13976_v6 = vadd.f32 %v9051_v27, %v13886_v58  ;;  %9369 = vmatpush3.msra.mxu0 %v7532_v59  ;;  %9316 = vmatprep.mubr.f32.mxu0 %v13909_v61  ;;  %v3354_v19 = vpop.f32.mrf.mxu1  ;;  %v7546_v58 = vld [vmem:[%s14171_s4 + $0xc60] sm:$0xff]  ;;  %v7536_v59 = vld [vmem:[%s14171_s4 + $0xc10] sm:$0xff] }
 0x525   : > { %9370 = vmatprep.subr.mxu0 %v7531_v29  ;;  %v5487_v11 = vpop.f32.mrf.mxu0  ;;  %9413 = vmatpush3.msra.mxu1 %v7548_v34  ;;  %v7534_v27 = vld [vmem:[%s14171_s4 + $0xc00] sm:$0xff] }
 0x526   : > { %v13983_v25 = vadd.f32 %v5487_v11, %v13893_v32  ;;  %9371 = vmatpush3.msra.mxu0 %v7531_v29  ;;  %v3357_v15 = vpop.f32.mrf.mxu1  ;;  %9414 = vmatprep.subr.mxu1 %v7547_v43  ;;  %v7526_v32 = vld [vmem:[%s14171_s4 + $0xbc0] sm:$0xff] }
 0x527   : > { %9372 = vmatprep.subr.mxu0 %v7530_v4  ;;  %v9054_v28 = vpop.f32.mrf.mxu0  ;;  %9317 = vmatmul.mubr.f32.gmra.mxu0 %v13923_v44  ;;  %v7541_v44 = vld [vmem:[%s14171_s4 + $0xc38] sm:$0xff] }
 0x528   : > { %v13990_v53 = vadd.f32 %v9054_v28, %v13901_v41  ;;  %9373 = vmatpush3.msra.mxu0 %v7530_v4  ;;  %9319 = vmatprep.mubr.f32.mxu0 %v13931_v45  ;;  %v3359_v56 = vpop.f32.mrf.mxu1  ;;  %v7519_v45 = vld [vmem:[%s14171_s4 + $0xb88] sm:$0xff] }
 0x529   : > { %9358 = vmatmul.mubr.f32.gmra.mxu1 %v3357_v15  ;;  %9374 = vmatprep.subr.mxu0 %v7529_v33  ;;  %v5497_v57 = vpop.f32.mrf.mxu0 }
 0x52a   : > { %v13997_v22 = vadd.f32 %v5497_v57, %v13907_v60  ;;  %9375 = vmatpush3.msra.mxu0 %v7529_v33  ;;  %v3362_v1 = vpop.f32.mrf.mxu1  ;;  %9415 = vmatpush3.msra.mxu1 %v7547_v43  ;;  %v7524_v60 = vld [vmem:[%s14171_s4 + $0xbb0] sm:$0xff] }
 0x52b   : > { %9376 = vmatprep.subr.mxu0 %v7528_v13  ;;  %v9057_v12 = vpop.f32.mrf.mxu0  ;;  %9320 = vmatmul.mubr.f32.gmra.mxu0 %v13939_v46  ;;  %v7539_v46 = vld [vmem:[%s14171_s4 + $0xc28] sm:$0xff] }
 0x52c   : > { %v14007_v54 = vadd.f32 %v9057_v12, %v13915_v17  ;;  %9377 = vmatpush3.msra.mxu0 %v7528_v13  ;;  %9360 = vmatprep.mubr.f32.mxu1 %v3362_v1  ;;  %v3364_v7 = vpop.f32.mrf.mxu1 }
 0x52d   : > { %9378 = vmatprep.subr.mxu0 %v7527_v18  ;;  %v5507_v3 = vpop.f32.mrf.mxu0  ;;  %9416 = vmatprep.subr.mxu1 %v7546_v58 }
 0x52e   : > { %v14016_v40 = vadd.f32 %v5507_v3, %v13921_v55  ;;  %9379 = vmatpush3.msra.mxu0 %v7527_v18  ;;  %v3367_v41 = vpop.f32.mrf.mxu1  ;;  %9417 = vmatpush3.msra.mxu1 %v7546_v58  ;;  %v7521_v55 = vld [vmem:[%s14171_s4 + $0xb98] sm:$0xff] }
 0x52f   : > { %9380 = vmatprep.subr.mxu0 %v7526_v32  ;;  %9361 = vmatmul.mubr.f32.gmra.mxu1 %v3367_v41 }
 0x530   : > { %9381 = vmatpush3.msra.mxu0 %v7526_v32  ;;  %v3369_v8 = vpop.f32.mrf.mxu1  ;;  %9418 = vmatprep.subr.mxu1 %v7545_v0 }
 0x531   : > { %9382 = vmatprep.subr.mxu0 %v7525_v50  ;;  %9419 = vmatpush3.msra.mxu1 %v7545_v0 }
 0x532   : > { %9383 = vmatpush3.msra.mxu0 %v7525_v50  ;;  %v3372_v61 = vpop.f32.mrf.mxu1  ;;  %9420 = vmatprep.subr.mxu1 %v7544_v38 }
 0x533   : > { %9384 = vmatprep.subr.mxu0 %v7524_v60  ;;  %9363 = vmatprep.mubr.f32.mxu1 %v3372_v61 }
 0x534   : > { %9385 = vmatpush3.msra.mxu0 %v7524_v60  ;;  %v3374_v17 = vpop.f32.mrf.mxu1  ;;  %9421 = vmatpush3.msra.mxu1 %v7544_v38 }
 0x535   : > { %9386 = vmatprep.subr.mxu0 %v7523_v24  ;;  %9422 = vmatprep.subr.mxu1 %v7543_v16 }
 0x536   : > { %9387 = vmatpush3.msra.mxu0 %v7523_v24  ;;  %v3377_v20 = vpop.f32.mrf.mxu1  ;;  %9423 = vmatpush3.msra.mxu1 %v7543_v16 }
 0x537   : > { %9388 = vmatprep.subr.mxu0 %v7522_v35  ;;  %9364 = vmatmul.mubr.f32.gmra.mxu1 %v3377_v20 }
 0x538   : > { %9389 = vmatpush3.msra.mxu0 %v7522_v35  ;;  %v3379_v39 = vpop.f32.mrf.mxu1  ;;  %9424 = vmatprep.subr.mxu1 %v7542_v26 }
 0x539   : > { %9390 = vmatprep.subr.mxu0 %v7521_v55  ;;  %9425 = vmatpush3.msra.mxu1 %v7542_v26 }
 0x53a   : > { %9391 = vmatpush3.msra.mxu0 %v7521_v55  ;;  %v3382_v47 = vpop.f32.mrf.mxu1  ;;  %9426 = vmatprep.subr.mxu1 %v7541_v44 }
 0x53b   : > { %9392 = vmatprep.subr.mxu0 %v7520_v42  ;;  %9398 = vmatprep.mubr.f32.mxu0 %v3382_v47 }
 0x53c   : > { %9393 = vmatpush3.msra.mxu0 %v7520_v42  ;;  %v3384_v9 = vpop.f32.mrf.mxu1  ;;  %9427 = vmatpush3.msra.mxu1 %v7541_v44 }
 0x53d   : > { %9394 = vmatprep.subr.mxu0 %v7519_v45  ;;  %9428 = vmatprep.subr.mxu1 %v7540_v36 }
 0x53e   : > { %9395 = vmatpush3.msra.mxu0 %v7519_v45  ;;  %v3387_v52 = vpop.f32.mrf.mxu1  ;;  %9429 = vmatpush3.msra.mxu1 %v7540_v36 }
 0x53f   : > { %9396 = vmatprep.subr.mxu0 %v7518_v2  ;;  %v9092_v23 = vpop.f32.mrf.mxu0  ;;  %9430 = vmatprep.subr.mxu1 %v7539_v46 }
 0x540   : > { %v5647_v37 = vadd.f32 %v9092_v23, %v13961_v63  ;;  %9397 = vmatpush3.msra.mxu0 %v7518_v2  ;;  %v3389_v51 = vpop.f32.mrf.mxu1  ;;  %9431 = vmatpush3.msra.mxu1 %v7539_v46 }
 0x541   : > { %9399 = vmatmul.mubr.f32.vlgmr.msra.gmra.mxu0 %v3387_v52  ;;  %v5607_v48 = vpop.f32.mrf.mxu0  ;;  %9432 = vmatprep.subr.mxu1 %v7538_v21 }
 0x542   : > { %v5646_v5 = vadd.f32 %v5607_v48, %v13966_v30  ;;  %v3392_v10 = vpop.f32.mrf.mxu1  ;;  %9433 = vmatpush3.msra.mxu1 %v7538_v21 }
 0x543   : > { %v9095_v34 = vpop.f32.mrf.mxu0  ;;  %9401 = vmatprep.mubr.f32.mxu0 %v3392_v10  ;;  %9434 = vmatprep.subr.mxu1 %v7537_v49 }
 0x544   : > { %v5649_v63 = vadd.f32 %v9095_v34, %v13976_v6  ;;  %v3394_v31 = vpop.f32.mrf.mxu1  ;;  %9435 = vmatpush3.msra.mxu1 %v7537_v49 }
 0x545   : > { %v5617_v62 = vpop.f32.mrf.mxu0  ;;  %9436 = vmatprep.subr.mxu1 %v7536_v59 }
 0x546   : > { %v5648_v30 = vadd.f32 %v5617_v62, %v13983_v25  ;;  %v3397_v29 = vpop.f32.mrf.mxu1  ;;  %9437 = vmatpush3.msra.mxu1 %v7536_v59 }
 0x547   : > { %v9098_v43 = vpop.f32.mrf.mxu0  ;;  %9402 = vmatmul.mubr.f32.gmra.mxu0 %v3397_v29  ;;  %9438 = vmatprep.subr.mxu1 %v7535_v14 }
 0x548   : > { %v5651_v6 = vadd.f32 %v9098_v43, %v13990_v53  ;;  %v3399_v19 = vpop.f32.mrf.mxu1  ;;  %9439 = vmatpush3.msra.mxu1 %v7535_v14 }
 0x549   : > { %v5627_v4 = vpop.f32.mrf.mxu0  ;;  %9440 = vmatprep.subr.mxu1 %v7534_v27 }
 0x54a   : > { %v5650_v11 = vadd.f32 %v5627_v4, %v13997_v22  ;;  %v3402_v15 = vpop.f32.mrf.mxu1  ;;  %9441 = vmatpush3.msra.mxu1 %v7534_v27 }
 0x54b   : > { %v9101_v25 = vpop.f32.mrf.mxu0  ;;  %9404 = vmatprep.mubr.f32.mxu0 %v3402_v15 }
 0x54c   : > { %v5653_v33 = vadd.f32 %v9101_v25, %v14007_v54  ;;  %v3404_v28 = vpop.f32.mrf.mxu1 }
 0x54d   : > { %v5637_v56 = vpop.f32.mrf.mxu0 }
 0x54e   : > { %v5652_v13 = vadd.f32 %v5637_v56, %v14016_v40  ;;  %v3407_v57 = vpop.f32.mrf.mxu1 }
 0x54f   : > { %9405 = vmatmul.mubr.f32.gmra.mxu0 %v3407_v57 }
 0x550   : > { %v3409_v1 = vpop.f32.mrf.mxu1 }
 0x552   : > { %v3412_v53 = vpop.f32.mrf.mxu1 }
 0x553   : > { %9407 = vmatprep.mubr.f32.mxu0 %v3412_v53 }
 0x554   : > { %v3414_v18 = vpop.f32.mrf.mxu1 }
 0x556   : > { %v3417_v58 = vpop.f32.mrf.mxu1 }
 0x557   : > { %9408 = vmatmul.mubr.f32.gmra.mxu0 %v3417_v58 }
 0x558   : > { %v3419_v12 = vpop.f32.mrf.mxu1 }
 0x55a   : > { %v3422_v22 = vpop.f32.mrf.mxu1 }
 0x55b   : > { %9442 = vmatprep.mubr.f32.mxu1 %v3422_v22 }
 0x55c   : > { %v3424_v7 = vpop.f32.mrf.mxu1 }
 0x55e   : > { %v3427_v32 = vpop.f32.mrf.mxu1 }
 0x55f   : > { %v9136_v3 = vpop.f32.mrf.mxu0  ;;  %9443 = vmatmul.mubr.f32.vlgmr.msra.gmra.mxu1 %v3427_v32 }
 0x560   : > { %v5777_v54 = vadd.f32 %v9136_v3, %v5647_v37  ;;  %v3429_v0 = vpop.f32.mrf.mxu1 }
 0x561   : > { %v5737_v41 = vpop.f32.mrf.mxu0 }
 0x562   : > { %v5776_v50 = vadd.f32 %v5737_v41, %v5646_v5  ;;  %v3432_v40 = vpop.f32.mrf.mxu1 }
 0x563   : > { %v9139_v38 = vpop.f32.mrf.mxu0  ;;  %9445 = vmatprep.mubr.f32.mxu1 %v3432_v40 }
 0x564   : > { %v14083_v8 = vadd.f32 %v9139_v38, %v5649_v63  ;;  %v3434_v60 = vpop.f32.mrf.mxu1 }
 0x565   : > { %v5747_v61 = vpop.f32.mrf.mxu0 }
 0x566   : > { %v14085_v24 = vadd.f32 %v5747_v61, %v5648_v30  ;;  %v3437_v16 = vpop.f32.mrf.mxu1 }
 0x567   : > { %v9142_v17 = vpop.f32.mrf.mxu0  ;;  %9446 = vmatmul.mubr.f32.gmra.mxu1 %v3437_v16 }
 0x568   : > { %v14087_v35 = vadd.f32 %v9142_v17, %v5651_v6  ;;  %v3439_v26 = vpop.f32.mrf.mxu1 }
 0x569   : > { %v5757_v20 = vpop.f32.mrf.mxu0 }
 0x56a   : > { %v14089_v55 = vadd.f32 %v5757_v20, %v5650_v11  ;;  %v3442_v44 = vpop.f32.mrf.mxu1 }
 0x56b   : > { %v9145_v39 = vpop.f32.mrf.mxu0  ;;  %9448 = vmatprep.mubr.f32.mxu1 %v3442_v44 }
 0x56c   : > { %v14091_v42 = vadd.f32 %v9145_v39, %v5653_v33  ;;  %v3444_v47 = vpop.f32.mrf.mxu1 }
 0x56d   : > { %v5767_v45 = vpop.f32.mrf.mxu0 }
 0x56e   : > { %v14093_v36 = vadd.f32 %v5767_v45, %v5652_v13  ;;  %v3447_v9 = vpop.f32.mrf.mxu1 }
 0x56f   : > { %9449 = vmatmul.mubr.f32.gmra.mxu1 %v3447_v9 }
 0x570   : > { %v3449_v2 = vpop.f32.mrf.mxu1 }
 0x572   : > { %v3452_v46 = vpop.f32.mrf.mxu1 }
 0x573   : > { %9451 = vmatprep.mubr.f32.mxu1 %v3452_v46 }
 0x574   : > { %v3454_v52 = vpop.f32.mrf.mxu1 }
 0x576   : > { %v3457_v21 = vpop.f32.mrf.mxu1 }
 0x577   : > { %9452 = vmatmul.mubr.f32.gmra.mxu1 %v3457_v21 }
 0x578   : > { %v3459_v23 = vpop.f32.mrf.mxu1 }
 0x579   : > { %v14124_v23 = vld [vmem:[%s14172_s5] ss:$0 sm:$0xff] }
 0x57f   : > { %v9180_v37 = vpop.f32.mrf.mxu0 }
 0x580   : > { %v5907_v51 = vadd.f32 %v9180_v37, %v5777_v54 }
 0x581   : > { %v5867_v49 = vpop.f32.mrf.mxu0 }
 0x582   : > { %v5906_v48 = vadd.f32 %v5867_v49, %v5776_v50 }
 0x583   : > { %v9183_v5 = vpop.f32.mrf.mxu0 }
 0x584   : > { %v5909_v44 = vadd.f32 %v9183_v5, %v14083_v8 }
 0x585   : > { %v5877_v10 = vpop.f32.mrf.mxu0 }
 0x586   : > { %v5908_v9 = vadd.f32 %v5877_v10, %v14085_v24 }
 0x587   : > { %v9186_v59 = vpop.f32.mrf.mxu0 }
 0x588   : > { %v5911_v10 = vadd.f32 %v9186_v59, %v14087_v35 }
 0x589   : > { %v14095_v34 = vpop.f32.mrf.mxu0 }
 0x58b   : > { %v14097_v63 = vpop.f32.mrf.mxu0 }
 0x58d   : > { %v14099_v31 = vpop.f32.mrf.mxu0 }
 0x59f   : > { %v9224_v14 = vpop.f32.mrf.mxu0 }
 0x5a0   : > { %v6037_v41 = vadd.f32 %v9224_v14, %v5907_v51 }
 0x5a1   : > { %v5997_v62 = vpop.f32.mrf.mxu0 }
 0x5a2   : > { %v6036_v50 = vadd.f32 %v5997_v62, %v5906_v48 }
 0x5a3   : > { %v9227_v30 = vpop.f32.mrf.mxu0 }
 0x5a4   : > { %v6039_v2 = vadd.f32 %v9227_v30, %v5909_v44 }
 0x5a5   : > { %v6007_v29 = vpop.f32.mrf.mxu0 }
 0x5a6   : > { %v6038_v37 = vadd.f32 %v6007_v29, %v5908_v9  ;;  %v5910_v29 = vadd.f32 %v14095_v34, %v14089_v55 }
 0x5a7   : > { %v9230_v27 = vpop.f32.mrf.mxu0 }
 0x5a9   : > { %v14101_v43 = vpop.f32.mrf.mxu0 }
 0x5ab   : > { %v14103_v6 = vpop.f32.mrf.mxu0 }
 0x5ad   : > { %v14105_v19 = vpop.f32.mrf.mxu0 }
 0x5bf   : > { %v9268_v4 = vpop.f32.mrf.mxu0 }
 0x5c0   : > { %v6167_v40 = vadd.f32 %v9268_v4, %v6037_v41 }
 0x5c1   : > { %v6127_v11 = vpop.f32.mrf.mxu0 }
 0x5c2   : > { %v6166_v61 = vadd.f32 %v6127_v11, %v6036_v50 }
 0x5c3   : > { %v9271_v15 = vpop.f32.mrf.mxu0 }
 0x5c4   : > { %v6169_v51 = vadd.f32 %v9271_v15, %v6039_v2 }
 0x5c5   : > { %v6137_v25 = vpop.f32.mrf.mxu0 }
 0x5c6   : > { %v6168_v14 = vadd.f32 %v6137_v25, %v6038_v37 }
 0x5c7   : > { %v9274_v33 = vpop.f32.mrf.mxu0 }
 0x5c9   : > { %v6147_v28 = vpop.f32.mrf.mxu0 }
 0x5cb   : > { %v14107_v56 = vpop.f32.mrf.mxu0 }
 0x5cd   : > { %v14109_v13 = vpop.f32.mrf.mxu0 }
 0x5df   : > { %v9312_v57 = vpop.f32.mrf.mxu0  ;;  %v9356_v18 = vpop.f32.mrf.mxu1 }
 0x5e0   : > { %v6297_v16 = vadd.f32 %v9312_v57, %v6167_v40 }
 0x5e1   : > { %v6257_v1 = vpop.f32.mrf.mxu0  ;;  %v6387_v12 = vpop.f32.mrf.mxu1 }
 0x5e2   : > { %v6296_v20 = vadd.f32 %v6257_v1, %v6166_v61  ;;  %v6427_v39 = vadd.f32 %v9356_v18, %v6297_v16  ;;  %v6041_v1 = vadd.f32 %v9230_v27, %v5911_v10  ;;  %v5913_v27 = vadd.f32 %v14097_v63, %v14091_v42 }
 0x5e3   : > { %v9315_v53 = vpop.f32.mrf.mxu0 }
 0x5e4   : > { %v6426_v46 = vadd.f32 %v6387_v12, %v6296_v20  ;;  %v6299_v62 = vadd.f32 %v9315_v53, %v6169_v51  ;;  %v6040_v53 = vadd.f32 %v14101_v43, %v5910_v29  ;;  %v6171_v50 = vadd.f32 %v9274_v33, %v6041_v1 }
 0x5e5   : > { %v6267_v58 = vpop.f32.mrf.mxu0  ;;  %v5912_v20 = vadd.f32 %v14099_v31, %v14093_v36 }
 0x5e6   : > { %v6298_v30 = vadd.f32 %v6267_v58, %v6168_v14  ;;  %v6170_v58 = vadd.f32 %v6147_v28, %v6040_v53  ;;  %v6043_v28 = vadd.f32 %v14103_v6, %v5913_v27 }
 0x5e7   : > { %v9318_v22 = vpop.f32.mrf.mxu0  ;;  %v6042_v9 = vadd.f32 %v14105_v19, %v5912_v20 }
 0x5e8   : > { %v6301_v16 = vadd.f32 %v9318_v22, %v6171_v50  ;;  %v6173_v42 = vadd.f32 %v14107_v56, %v6043_v28 }
 0x5e9   : > { %v9359_v7 = vpop.f32.mrf.mxu1  ;;  %v6277_v32 = vpop.f32.mrf.mxu0 }
 0x5ea   : > { %v6429_v11 = vadd.f32 %v9359_v7, %v6299_v62 }
 0x5eb   : > { %v6397_v3 = vpop.f32.mrf.mxu1  ;;  %v14111_v54 = vpop.f32.mrf.mxu0 }
 0x5ec   : > { %v6428_v18 = vadd.f32 %v6397_v3, %v6298_v30  ;;  %v6300_v3 = vadd.f32 %v6277_v32, %v6170_v58  ;;  %v6303_v36 = vadd.f32 %v14111_v54, %v6173_v42 }
 0x5ed   : > { %v14113_v38 = vpop.f32.mrf.mxu0 }
 0x5ef   : > { %v9362_v0 = vpop.f32.mrf.mxu1 }
 0x5f1   : > { %v6407_v60 = vpop.f32.mrf.mxu1 }
 0x5f2   : > { %v6430_v22 = vadd.f32 %v6407_v60, %v6300_v3 }
 0x5f7   : > { %v14115_v17 = vpop.f32.mrf.mxu1 }
 0x5f9   : > { %v14118_v47 = vpop.f32.mrf.mxu1 }
 0x601   : > { %v9400_v26 = vpop.f32.mrf.mxu0 }
 0x602   : > { %v6557_v52 = vadd.f32 %v9400_v26, %v6427_v39  ;;  %v6431_v26 = vadd.f32 %v9362_v0, %v6301_v16 }
 0x603   : > { %v6517_v45 = vpop.f32.mrf.mxu0 }
 0x604   : > { %v6556_v49 = vadd.f32 %v6517_v45, %v6426_v46 }
 0x607   : > { %v9403_v8 = vpop.f32.mrf.mxu0 }
 0x608   : > { %v6559_v12 = vadd.f32 %v9403_v8, %v6429_v11 }
 0x609   : > { %v6527_v15 = vpop.f32.mrf.mxu0 }
 0x60a   : > { %v6558_v40 = vadd.f32 %v6527_v15, %v6428_v18 }
 0x60f   : > { %v9406_v7 = vpop.f32.mrf.mxu0 }
 0x610   : > { %v6561_v39 = vadd.f32 %v9406_v7, %v6431_v26 }
 0x611   : > { %v6537_v44 = vpop.f32.mrf.mxu0 }
 0x612   : > { %v6560_v63 = vadd.f32 %v6537_v44, %v6430_v22 }
 0x617   : > { %v9409_v0 = vpop.f32.mrf.mxu0 }
 0x619   : > { %v6547_v19 = vpop.f32.mrf.mxu0 }
 0x61f   : > { %v9444_v21 = vpop.f32.mrf.mxu1 }
 0x620   : > { %v6687_v48 = vadd.f32 %v9444_v21, %v6557_v52  ;;  %v6172_v52 = vadd.f32 %v14109_v13, %v6042_v9  ;;  %v6433_v21 = vadd.f32 %v14115_v17, %v6303_v36 }
 0x621   : > { %v6647_v5 = vpop.f32.mrf.mxu1 }
 0x622   : > { %v14127_v4 = vadd.f32 %v14124_v23, %v6687_v48  ;;  %v6686_v24 = vadd.f32 %v6647_v5, %v6556_v49  ;;  %v6302_v60 = vadd.f32 %v14113_v38, %v6172_v52  ;;  %v6563_v51 = vadd.f32 %v9409_v0, %v6433_v21 }
 0x624   : > { %v14131_v57 = vadd.f32 %v14124_v23, %v6686_v24  ;;  %v6719_v25 = vmul.f32 1.442695, %v14127_v4  ;;  %v6432_v56 = vadd.f32 %v14118_v47, %v6302_v60  ;;  %vm6710_vm10 = vcmp.gt.f32.partialorder %v14127_v4, 0.0 }
 0x626   : > { %v6717_v35 = vmul.f32 1.442695, %v14131_v57  ;;  %9608 = vpow2.f32 %v6719_v25  ;;  %v6562_v5 = vadd.f32 %v6547_v19, %v6432_v56  ;;  %vm6709_vm0 = vcmp.gt.f32.partialorder %v14131_v57, 0.0 }
 0x627   : > { %v9447_v41 = vpop.f32.mrf.mxu1 }
 0x628   : > { %v6689_v59 = vadd.f32 %v9447_v41, %v6559_v12  ;;  %9610 = vpow2.f32 %v6717_v35 }
 0x629   : > { %v6657_v61 = vpop.f32.mrf.mxu1 }
 0x62a   : > { %v6704_v55 = vadd.f32 %v14124_v23, %v6689_v59  ;;  %v6688_v34 = vadd.f32 %v6657_v61, %v6558_v40 }
 0x62c   : > { %v6723_v43 = vmul.f32 1.442695, %v6704_v55  ;;  %v6703_v33 = vadd.f32 %v14124_v23, %v6688_v34  ;;  %vm6712_vm15 = vcmp.gt.f32.partialorder %v6704_v55, 0.0 }
 0x62e   : > { %9612 = vpow2.f32 %v6723_v43  ;;  %v6721_v45 = vmul.f32 1.442695, %v6703_v33  ;;  %vm6711_vm1 = vcmp.gt.f32.partialorder %v6703_v33, 0.0 }
 0x62f   : > { %v9450_v2 = vpop.f32.mrf.mxu1 }
 0x630   : > { %9614 = vpow2.f32 %v6721_v45  ;;  %v6691_v32 = vadd.f32 %v9450_v2, %v6561_v39 }
 0x631   : > { %v6667_v46 = vpop.f32.mrf.mxu1 }
 0x632   : > { %v6706_v31 = vadd.f32 %v14124_v23, %v6691_v32  ;;  %v6690_v6 = vadd.f32 %v6667_v46, %v6560_v63 }
 0x633   : > { %v9609_v48 = vpop.eup %9608 }
 0x634   : > { %v6705_v37 = vadd.f32 %v14124_v23, %v6690_v6  ;;  %v6727_v49 = vmul.f32 1.442695, %v6706_v31  ;;  %v7552_v24 = vadd.f32 -1.0, %v9609_v48  ;;  %vm6714_vm2 = vcmp.gt.f32.partialorder %v6706_v31, 0.0 }
 0x635   : > { %v9611_v14 = vpop.eup %9610 }
 0x636   : > { %v6725_v54 = vmul.f32 1.442695, %v6705_v37  ;;  %9616 = vpow2.f32 %v6727_v49  ;;  %v7551_v30 = vadd.f32 -1.0, %v9611_v14  ;;  %v6742_v1 = vsel %vm6710_vm10, %v14127_v4, %v7552_v24 }
 0x637   : > { %v9453_v8 = vpop.f32.mrf.mxu1  ;;  %vm6713_vm4 = vcmp.gt.f32.partialorder %v6705_v37, 0.0 }
 0x638   : > { %v6693_v13 = vadd.f32 %v9453_v8, %v6563_v51  ;;  %9618 = vpow2.f32 %v6725_v54  ;;  %v6741_v41 = vsel %vm6709_vm0, %v14131_v57, %v7551_v30 }
 0x639   : > { %v6677_v62 = vpop.f32.mrf.mxu1 }
 0x63a   : > { %v6708_v38 = vadd.f32 %v14124_v23, %v6693_v13  ;;  %v6692_v10 = vadd.f32 %v6677_v62, %v6562_v5 }
 0x63b   : > { %v9613_v17 = vpop.eup %9612 }
 0x63c   : > { %v7554_v11 = vadd.f32 -1.0, %v9613_v17  ;;  %v6731_v29 = vmul.f32 1.442695, %v6708_v38  ;;  %v6707_v47 = vadd.f32 %v14124_v23, %v6692_v10  ;;  %vm6716_vm3 = vcmp.gt.f32.partialorder %v6708_v38, 0.0 }
 0x63d   : > { %v9615_v15 = vpop.eup %9614 }
 0x63e   : > { %v6744_v18 = vsel %vm6712_vm15, %v6704_v55, %v7554_v11  ;;  %v7553_v12 = vadd.f32 -1.0, %v9615_v15  ;;  %9620 = vpow2.f32 %v6731_v29  ;;  %v6729_v53 = vmul.f32 1.442695, %v6707_v47 }
 0x63f   : > { %v6750_v25 = vmax.f32 %v6742_v1, %v6744_v18  ;;  %vm6715_vm5 = vcmp.gt.f32.partialorder %v6707_v47, 0.0 }
 0x640   : > { %v6743_v50 = vsel %vm6711_vm1, %v6703_v33, %v7553_v12  ;;  %9622 = vpow2.f32 %v6729_v53 }
 0x641   : > { %v6749_v23 = vmax.f32 %v6741_v41, %v6743_v50 }
 0x643   : > { %v9617_v40 = vpop.eup %9616 }
 0x644   : > { %v7556_v59 = vadd.f32 -1.0, %v9617_v40 }
 0x645   : > { %v9619_v35 = vpop.eup %9618 }
 0x646   : > { %v7555_v4 = vadd.f32 -1.0, %v9619_v35  ;;  %v6746_v16 = vsel %vm6714_vm2, %v6706_v31, %v7556_v59 }
 0x648   : > { %v6745_v57 = vsel %vm6713_vm4, %v6705_v37, %v7555_v4 }
 0x64b   : > { %v9621_v58 = vpop.eup %9620 }
 0x64c   : > { %v7558_v7 = vadd.f32 -1.0, %v9621_v58 }
 0x64d   : > { %v9623_v61 = vpop.eup %9622 }
 0x64e   : > { %v6748_v55 = vsel %vm6716_vm3, %v6708_v38, %v7558_v7  ;;  %v7557_v27 = vadd.f32 -1.0, %v9623_v61 }
 0x64f   : > { %v6752_v34 = vmax.f32 %v6746_v16, %v6748_v55 }
 0x650   : > { %v6747_v26 = vsel %vm6715_vm5, %v6707_v47, %v7557_v27 }
 0x651   : > { %v6754_v3 = vmax.f32 %v6750_v25, %v6752_v34  ;;  %v6751_v43 = vmax.f32 %v6745_v57, %v6747_v26 }
 0x653   : > { %6756 = vst [vmem:[%s251_s12 + $0x8] sm:$0xff] %v6754_v3  ;;  %v6753_v33 = vmax.f32 %v6749_v23, %v6751_v43 }
 0x655   : > { %6755 = vst [vmem:[%s251_s12] sm:$0xff] %v6753_v33 }
 0x656 PF: > { %s16_s21 = sadd.s32 1, %s9630_s21  }
 0x657   : > { %p13_p4 = scmp.ge.s32.totalorder %s16_s21, 4  }
 0x659   :  { %15 = sbr.rel (!%p13_p4) target bundleno = 1 (0x1), region = 98 }

</bundles_post_ra>
